<compile_context>
chip_gen: v6e
topology: v6e:2x2x1
jax: 0.10.0
libtpu: 0.0.40
codegen_flags: <defaults>
</compile_context>

<pallas_src>
import functools

import jax
import jax.numpy as jnp
from jax import lax
from jax.experimental import pallas as pl
from jax.experimental.pallas import tpu as pltpu

EPS = 1e-5


# ----------------------------------------------------------------------------
# Fused decoder-block kernel.  All arrays are flattened to (N, C, H2*W2) with
# the spatial axis on lanes; channels live on sublanes.
# ----------------------------------------------------------------------------
def _decoder_block_kernel(H2, W2, xf_ref, skip_ref, pos_ref, wup_ref,
                          w1u_ref, w1s_ref, w2_ref, vec_ref, out_ref):
    f32 = jnp.float32
    N = out_ref.shape[0]
    S2 = H2 * W2
    inv_cnt = 1.0 / (N * S2)

    yv = pos_ref[0:1, :]            # (1, S2) int32 row index of each lane
    xv = pos_ref[1:2, :]            # (1, S2) int32 col index of each lane

    # Per-channel parameter vectors, each (Cout, 1).
    bup, b1, b2 = vec_ref[0], vec_ref[1], vec_ref[2]
    g1, be1, g2, be2 = vec_ref[3], vec_ref[4], vec_ref[5], vec_ref[6]

    # ---- masks: built once in-kernel, reused by both convs (centre tap skipped) ----
    offsets = [(dh, dw) for dh in (-1, 0, 1) for dw in (-1, 0, 1)]

    def border_mask(dh, dw):
        conds = []
        if dh < 0:
            conds.append(yv >= -dh)
        if dh > 0:
            conds.append(yv < H2 - dh)
        if dw < 0:
            conds.append(xv >= -dw)
        if dw > 0:
            conds.append(xv < W2 - dw)
        if not conds:
            return None                                  # centre tap: always valid
        m = conds[0]
        for c in conds[1:]:
            m = m & c
        return m.astype(f32)

    border = {od: border_mask(*od) for od in offsets}
    parity = [(((yv & 1) == kh) & ((xv & 1) == kw)).astype(f32)
              for kh in (0, 1) for kw in (0, 1)]

    def conv3x3(pairs, bias):
        """3x3 'same' conv: accumulating MXU dots on rolled + masked taps."""
        acc = None
        for t, (dh, dw) in enumerate(offsets):
            shift = (-(dh * W2 + dw)) % S2
            m = border[(dh, dw)]
            for w_ref, xin in pairs:
                tap = pltpu.roll(xin, shift, 1) if shift else xin
                if m is not None:
                    tap = tap * m
                d = jnp.dot(w_ref[t], tap, preferred_element_type=f32)
                acc = d if acc is None else acc + d
        return acc + bias

    # ---- deconv (parity-fused, stays in VMEM) + conv1 + BN1 batch stats ----
    c1 = []
    s1 = None
    for n in range(N):
        xf = xf_ref[n]                                   # (Cin, S2) NN-upsampled x
        up = None
        for p in range(4):                               # 2x2 parity decomposition
            d = jnp.dot(wup_ref[p], xf, preferred_element_type=f32) * parity[p]
            up = d if up is None else up + d
        up = up + bup
        # torch.cat([up, skip], dim=1) fused via split conv1 weights.
        c1_n = conv3x3([(w1u_ref, up), (w1s_ref, skip_ref[n])], b1)
        c1.append(c1_n)
        ssum = jnp.sum(c1_n, axis=1, keepdims=True)
        s1 = ssum if s1 is None else s1 + ssum

    mean1 = s1 * inv_cnt
    v1 = None
    for n in range(N):                                   # two-pass (stable) variance
        d = c1[n] - mean1
        ssum = jnp.sum(d * d, axis=1, keepdims=True)
        v1 = ssum if v1 is None else v1 + ssum
    scale1 = g1 * lax.rsqrt(v1 * inv_cnt + EPS)
    shift1 = be1 - mean1 * scale1

    # ---- bn1 + ReLU + conv2 + BN2 batch stats ----
    c2 = []
    s2 = None
    for n in range(N):
        h1 = jnp.maximum(c1[n] * scale1 + shift1, 0.0)
        c2_n = conv3x3([(w2_ref, h1)], b2)
        c2.append(c2_n)
        ssum = jnp.sum(c2_n, axis=1, keepdims=True)
        s2 = ssum if s2 is None else s2 + ssum

    mean2 = s2 * inv_cnt
    v2 = None
    for n in range(N):
        d = c2[n] - mean2
        ssum = jnp.sum(d * d, axis=1, keepdims=True)
        v2 = ssum if v2 is None else v2 + ssum
    scale2 = g2 * lax.rsqrt(v2 * inv_cnt + EPS)
    shift2 = be2 - mean2 * scale2

    # ---- bn2 + ReLU written straight to the output (no extra pass) ----
    for n in range(N):
        out_ref[n] = jnp.maximum(c2[n] * scale2 + shift2, 0.0)


# ----------------------------------------------------------------------------
# Wrapper
# ----------------------------------------------------------------------------
def decoder_block_forward(x_nchw, skip_nchw, p):
    """DecoderBlock forward.  x: (N, Cin, H, W), skip: (N, Cout, 2H, 2W); NCHW in/out."""
    N, Cin, H, W = x_nchw.shape
    Cout = p["up_b"].shape[0]
    H2, W2 = 2 * H, 2 * W
    S2 = H2 * W2
    f32 = jnp.float32

    # Nearest-neighbour 2x upsample of x (cheap XLA broadcast); the per-parity
    # deconv weights applied in-kernel make it the exact ConvTranspose2d(k=2,s=2).
    x_fine = jnp.broadcast_to(
        x_nchw[:, :, :, None, :, None], (N, Cin, H, 2, W, 2)
    ).reshape(N, Cin, S2).astype(f32)
    skip_f = skip_nchw.reshape(N, Cout, S2).astype(f32)

    # (y, x) lane indices -> border & parity masks are generated in-kernel.
    s_idx = jnp.arange(S2, dtype=jnp.int32)
    pos = jnp.stack([s_idx // W2, s_idx % W2], axis=0)           # (2, S2) int32

    # Tiny XLA-side weight re-layouts.
    wup = jnp.transpose(p["up_w"], (2, 3, 1, 0)).reshape(4, Cout, Cin)   # (kh*2+kw, co, ci)
    w1t = jnp.transpose(p["w1"], (2, 3, 0, 1)).reshape(9, Cout, 2 * Cout)
    w1u = w1t[:, :, :Cout]            # conv1 taps hitting the upsampled half of the concat
    w1s = w1t[:, :, Cout:]            # conv1 taps hitting the skip half of the concat
    w2t = jnp.transpose(p["w2"], (2, 3, 0, 1)).reshape(9, Cout, Cout)
    vec = jnp.stack([p["up_b"], p["b1"], p["b2"],
                     p["g1"], p["be1"], p["g2"], p["be2"]]).reshape(7, Cout, 1)

    bytes_accessed = 4 * (x_fine.size + skip_f.size + pos.size + wup.size
                          + w1u.size + w1s.size + w2t.size + vec.size
                          + N * Cout * S2)
    cost = pl.CostEstimate(
        flops=2 * N * S2 * (4 * Cout * Cin + 27 * Cout * Cout) + 40 * N * S2 * Cout,
        transcendentals=2 * Cout,
        bytes_accessed=int(bytes_accessed),
    )

    out_flat = pl.pallas_call(
        functools.partial(_decoder_block_kernel, H2, W2),
        out_shape=jax.ShapeDtypeStruct((N, Cout, S2), f32),
        grid=(1,),
        in_specs=[
            pl.BlockSpec((N, Cin, S2), lambda i: (0, 0, 0)),
            pl.BlockSpec((N, Cout, S2), lambda i: (0, 0, 0)),
            pl.BlockSpec((2, S2), lambda i: (0, 0)),
            pl.BlockSpec((4, Cout, Cin), lambda i: (0, 0, 0)),
            pl.BlockSpec((9, Cout, Cout), lambda i: (0, 0, 0)),
            pl.BlockSpec((9, Cout, Cout), lambda i: (0, 0, 0)),
            pl.BlockSpec((9, Cout, Cout), lambda i: (0, 0, 0)),
            pl.BlockSpec((7, Cout, 1), lambda i: (0, 0, 0)),
        ],
        out_specs=pl.BlockSpec((N, Cout, S2), lambda i: (0, 0, 0)),
        compiler_params=pltpu.CompilerParams(dimension_semantics=("arbitrary",)),
        cost_estimate=cost,
    )(x_fine, skip_f, pos, wup, w1u, w1s, w2t, vec)

    return out_flat.reshape(N, Cout, H2, W2)


# ----------------------------------------------------------------------------
# Pure-JAX reference (NCHW, PyTorch training-mode BN) for a correctness check.
# ----------------------------------------------------------------------------
def reference_forward(x, skip, p):
    N, Cin, H, W = x.shape
    Cout = p["up_b"].shape[0]
    hi = lax.Precision.HIGHEST

    up = jnp.einsum("nihw,iokl->nohkwl", x, p["up_w"], precision=hi)
    up = up.reshape(N, Cout, 2 * H, 2 * W) + p["up_b"][None, :, None, None]
    cat = jnp.concatenate([up, skip], axis=1)

    def conv(z, w, b):
        return lax.conv_general_dilated(
            z, w, window_strides=(1, 1), padding="SAME",
            dimension_numbers=("NCHW", "OIHW", "NCHW"), precision=hi,
        ) + b[None, :, None, None]

    def bn_relu(z, g, be):
        m = jnp.mean(z, axis=(0, 2, 3), keepdims=True)
        v = jnp.mean((z - m) ** 2, axis=(0, 2, 3), keepdims=True)
        zn = (z - m) / jnp.sqrt(v + EPS)
        return jnp.maximum(zn * g[None, :, None, None] + be[None, :, None, None], 0.0)

    r1 = bn_relu(conv(cat, p["w1"], p["b1"]), p["g1"], p["be1"])
    r2 = bn_relu(conv(r1, p["w2"], p["b2"]), p["g2"], p["be2"])
    return r2


if __name__ == "__main__":
    in_channels, out_channels = 8, 4
    N, H, W = 2, 16, 16                       # x spatial; skip is (2H, 2W) = (32, 32)

    key = jax.random.PRNGKey(0)
    ks = jax.random.split(key, 12)

    params = dict(
        # PyTorch layouts: ConvTranspose2d weight (Cin, Cout, 2, 2); Conv2d weight OIHW.
        up_w=0.1 * jax.random.normal(ks[0], (in_channels, out_channels, 2, 2), jnp.float32),
        up_b=0.05 * jax.random.normal(ks[1], (out_channels,), jnp.float32),
        w1=0.1 * jax.random.normal(ks[2], (out_channels, 2 * out_channels, 3, 3), jnp.float32),
        b1=0.05 * jax.random.normal(ks[3], (out_channels,), jnp.float32),
        w2=0.1 * jax.random.normal(ks[4], (out_channels, out_channels, 3, 3), jnp.float32),
        b2=0.05 * jax.random.normal(ks[5], (out_channels,), jnp.float32),
        g1=1.0 + 0.1 * jax.random.normal(ks[6], (out_channels,), jnp.float32),
        be1=0.1 * jax.random.normal(ks[7], (out_channels,), jnp.float32),
        g2=1.0 + 0.1 * jax.random.normal(ks[8], (out_channels,), jnp.float32),
        be2=0.1 * jax.random.normal(ks[9], (out_channels,), jnp.float32),
    )

    x = jax.random.normal(ks[10], (N, in_channels, H, W), jnp.float32)          # NCHW
    skip = jax.random.normal(ks[11], (N, out_channels, 2 * H, 2 * W), jnp.float32)

    out = jax.block_until_ready(jax.jit(decoder_block_forward)(x, skip, params))
    assert out.shape == (N, out_channels, 2 * H, 2 * W)

    ref = jax.block_until_ready(reference_forward(x, skip, params))
    max_err = float(jnp.max(jnp.abs(out - ref)))
    # Tolerance leaves headroom for MXU rounding modes; structural bugs would be O(1).
    assert jnp.allclose(out, ref, atol=2e-2, rtol=2e-2), max_err

    print("KERNEL_OK")
</pallas_src>

<mosaic_0001>
module attributes {stable_mosaic.version = 11 : i64} {
  func.func @_decoder_block_kernel(%arg0: i32, %arg1: memref<2x8x1024xf32, #tpu.memory_space<vmem>>, %arg2: memref<2x4x1024xf32, #tpu.memory_space<vmem>>, %arg3: memref<2x1024xi32, #tpu.memory_space<vmem>>, %arg4: memref<4x4x8xf32, #tpu.memory_space<vmem>>, %arg5: memref<9x4x4xf32, #tpu.memory_space<vmem>>, %arg6: memref<9x4x4xf32, #tpu.memory_space<vmem>>, %arg7: memref<9x4x4xf32, #tpu.memory_space<vmem>>, %arg8: memref<7x4x1xf32, #tpu.memory_space<vmem>>, %arg9: memref<2x4x1024xf32, #tpu.memory_space<vmem>>) attributes {dimension_semantics = [#tpu.dimension_semantics<arbitrary>], iteration_bounds = array<i64: 1>, scalar_prefetch = 0 : i64, scratch_operands = 0 : i64, tpu.core_type = #tpu.core_type<tc>, window_params = [{pipeline_mode = #tpu.pipeline_mode<synchronous>, transform_indices = @transform_0, window_bounds = array<i64: 2, 8, 1024>}, {pipeline_mode = #tpu.pipeline_mode<synchronous>, transform_indices = @transform_1, window_bounds = array<i64: 2, 4, 1024>}, {pipeline_mode = #tpu.pipeline_mode<synchronous>, transform_indices = @transform_2, window_bounds = array<i64: 2, 1024>}, {pipeline_mode = #tpu.pipeline_mode<synchronous>, transform_indices = @transform_3, window_bounds = array<i64: 4, 4, 8>}, {pipeline_mode = #tpu.pipeline_mode<synchronous>, transform_indices = @transform_4, window_bounds = array<i64: 9, 4, 4>}, {pipeline_mode = #tpu.pipeline_mode<synchronous>, transform_indices = @transform_5, window_bounds = array<i64: 9, 4, 4>}, {pipeline_mode = #tpu.pipeline_mode<synchronous>, transform_indices = @transform_6, window_bounds = array<i64: 9, 4, 4>}, {pipeline_mode = #tpu.pipeline_mode<synchronous>, transform_indices = @transform_7, window_bounds = array<i64: 7, 4, 1>}, {pipeline_mode = #tpu.pipeline_mode<synchronous>, transform_indices = @transform_8, window_bounds = array<i64: 2, 4, 1024>}]} {
    %c0 = arith.constant 0 : index
    %c0_0 = arith.constant 0 : index
    %0 = vector.load %arg3[%c0, %c0_0] : memref<2x1024xi32, #tpu.memory_space<vmem>>, vector<1x1024xi32>
    %c1 = arith.constant 1 : index
    %c0_1 = arith.constant 0 : index
    %1 = vector.load %arg3[%c1, %c0_1] : memref<2x1024xi32, #tpu.memory_space<vmem>>, vector<1x1024xi32>
    %c0_2 = arith.constant 0 : index
    %c0_3 = arith.constant 0 : index
    %c0_4 = arith.constant 0 : index
    %2 = vector.load %arg8[%c0_2, %c0_3, %c0_4] : memref<7x4x1xf32, #tpu.memory_space<vmem>>, vector<1x4x1xf32>
    %3 = vector.shape_cast %2 : vector<1x4x1xf32> to vector<4x1xf32>
    %c1_5 = arith.constant 1 : index
    %c0_6 = arith.constant 0 : index
    %c0_7 = arith.constant 0 : index
    %4 = vector.load %arg8[%c1_5, %c0_6, %c0_7] : memref<7x4x1xf32, #tpu.memory_space<vmem>>, vector<1x4x1xf32>
    %5 = vector.shape_cast %4 : vector<1x4x1xf32> to vector<4x1xf32>
    %c2 = arith.constant 2 : index
    %c0_8 = arith.constant 0 : index
    %c0_9 = arith.constant 0 : index
    %6 = vector.load %arg8[%c2, %c0_8, %c0_9] : memref<7x4x1xf32, #tpu.memory_space<vmem>>, vector<1x4x1xf32>
    %7 = vector.shape_cast %6 : vector<1x4x1xf32> to vector<4x1xf32>
    %c3 = arith.constant 3 : index
    %c0_10 = arith.constant 0 : index
    %c0_11 = arith.constant 0 : index
    %8 = vector.load %arg8[%c3, %c0_10, %c0_11] : memref<7x4x1xf32, #tpu.memory_space<vmem>>, vector<1x4x1xf32>
    %9 = vector.shape_cast %8 : vector<1x4x1xf32> to vector<4x1xf32>
    %c4 = arith.constant 4 : index
    %c0_12 = arith.constant 0 : index
    %c0_13 = arith.constant 0 : index
    %10 = vector.load %arg8[%c4, %c0_12, %c0_13] : memref<7x4x1xf32, #tpu.memory_space<vmem>>, vector<1x4x1xf32>
    %11 = vector.shape_cast %10 : vector<1x4x1xf32> to vector<4x1xf32>
    %c5 = arith.constant 5 : index
    %c0_14 = arith.constant 0 : index
    %c0_15 = arith.constant 0 : index
    %12 = vector.load %arg8[%c5, %c0_14, %c0_15] : memref<7x4x1xf32, #tpu.memory_space<vmem>>, vector<1x4x1xf32>
    %13 = vector.shape_cast %12 : vector<1x4x1xf32> to vector<4x1xf32>
    %c6 = arith.constant 6 : index
    %c0_16 = arith.constant 0 : index
    %c0_17 = arith.constant 0 : index
    %14 = vector.load %arg8[%c6, %c0_16, %c0_17] : memref<7x4x1xf32, #tpu.memory_space<vmem>>, vector<1x4x1xf32>
    %15 = vector.shape_cast %14 : vector<1x4x1xf32> to vector<4x1xf32>
    %c1_i32 = arith.constant 1 : i32
    %16 = vector.broadcast %c1_i32 : i32 to vector<1x1024xi32>
    %17 = arith.cmpi sge, %0, %16 : vector<1x1024xi32>
    %c1_i32_18 = arith.constant 1 : i32
    %18 = vector.broadcast %c1_i32_18 : i32 to vector<1x1024xi32>
    %19 = arith.cmpi sge, %1, %18 : vector<1x1024xi32>
    %20 = arith.andi %17, %19 : vector<1x1024xi1>
    %21 = arith.extui %20 : vector<1x1024xi1> to vector<1x1024xi32>
    %22 = arith.sitofp %21 : vector<1x1024xi32> to vector<1x1024xf32>
    %c1_i32_19 = arith.constant 1 : i32
    %23 = vector.broadcast %c1_i32_19 : i32 to vector<1x1024xi32>
    %24 = arith.cmpi sge, %0, %23 : vector<1x1024xi32>
    %25 = arith.extui %24 : vector<1x1024xi1> to vector<1x1024xi32>
    %26 = arith.sitofp %25 : vector<1x1024xi32> to vector<1x1024xf32>
    %c1_i32_20 = arith.constant 1 : i32
    %27 = vector.broadcast %c1_i32_20 : i32 to vector<1x1024xi32>
    %28 = arith.cmpi sge, %0, %27 : vector<1x1024xi32>
    %c31_i32 = arith.constant 31 : i32
    %29 = vector.broadcast %c31_i32 : i32 to vector<1x1024xi32>
    %30 = arith.cmpi slt, %1, %29 : vector<1x1024xi32>
    %31 = arith.andi %28, %30 : vector<1x1024xi1>
    %32 = arith.extui %31 : vector<1x1024xi1> to vector<1x1024xi32>
    %33 = arith.sitofp %32 : vector<1x1024xi32> to vector<1x1024xf32>
    %c1_i32_21 = arith.constant 1 : i32
    %34 = vector.broadcast %c1_i32_21 : i32 to vector<1x1024xi32>
    %35 = arith.cmpi sge, %1, %34 : vector<1x1024xi32>
    %36 = arith.extui %35 : vector<1x1024xi1> to vector<1x1024xi32>
    %37 = arith.sitofp %36 : vector<1x1024xi32> to vector<1x1024xf32>
    %c31_i32_22 = arith.constant 31 : i32
    %38 = vector.broadcast %c31_i32_22 : i32 to vector<1x1024xi32>
    %39 = arith.cmpi slt, %1, %38 : vector<1x1024xi32>
    %40 = arith.extui %39 : vector<1x1024xi1> to vector<1x1024xi32>
    %41 = arith.sitofp %40 : vector<1x1024xi32> to vector<1x1024xf32>
    %c31_i32_23 = arith.constant 31 : i32
    %42 = vector.broadcast %c31_i32_23 : i32 to vector<1x1024xi32>
    %43 = arith.cmpi slt, %0, %42 : vector<1x1024xi32>
    %c1_i32_24 = arith.constant 1 : i32
    %44 = vector.broadcast %c1_i32_24 : i32 to vector<1x1024xi32>
    %45 = arith.cmpi sge, %1, %44 : vector<1x1024xi32>
    %46 = arith.andi %43, %45 : vector<1x1024xi1>
    %47 = arith.extui %46 : vector<1x1024xi1> to vector<1x1024xi32>
    %48 = arith.sitofp %47 : vector<1x1024xi32> to vector<1x1024xf32>
    %c31_i32_25 = arith.constant 31 : i32
    %49 = vector.broadcast %c31_i32_25 : i32 to vector<1x1024xi32>
    %50 = arith.cmpi slt, %0, %49 : vector<1x1024xi32>
    %51 = arith.extui %50 : vector<1x1024xi1> to vector<1x1024xi32>
    %52 = arith.sitofp %51 : vector<1x1024xi32> to vector<1x1024xf32>
    %c31_i32_26 = arith.constant 31 : i32
    %53 = vector.broadcast %c31_i32_26 : i32 to vector<1x1024xi32>
    %54 = arith.cmpi slt, %0, %53 : vector<1x1024xi32>
    %c31_i32_27 = arith.constant 31 : i32
    %55 = vector.broadcast %c31_i32_27 : i32 to vector<1x1024xi32>
    %56 = arith.cmpi slt, %1, %55 : vector<1x1024xi32>
    %57 = arith.andi %54, %56 : vector<1x1024xi1>
    %58 = arith.extui %57 : vector<1x1024xi1> to vector<1x1024xi32>
    %59 = arith.sitofp %58 : vector<1x1024xi32> to vector<1x1024xf32>
    %c1_i32_28 = arith.constant 1 : i32
    %60 = vector.broadcast %c1_i32_28 : i32 to vector<1x1024xi32>
    %61 = arith.andi %0, %60 : vector<1x1024xi32>
    %c0_i32 = arith.constant 0 : i32
    %62 = vector.broadcast %c0_i32 : i32 to vector<1x1024xi32>
    %63 = arith.cmpi eq, %61, %62 : vector<1x1024xi32>
    %c1_i32_29 = arith.constant 1 : i32
    %64 = vector.broadcast %c1_i32_29 : i32 to vector<1x1024xi32>
    %65 = arith.andi %1, %64 : vector<1x1024xi32>
    %c0_i32_30 = arith.constant 0 : i32
    %66 = vector.broadcast %c0_i32_30 : i32 to vector<1x1024xi32>
    %67 = arith.cmpi eq, %65, %66 : vector<1x1024xi32>
    %68 = arith.andi %63, %67 : vector<1x1024xi1>
    %69 = arith.extui %68 : vector<1x1024xi1> to vector<1x1024xi32>
    %70 = arith.sitofp %69 : vector<1x1024xi32> to vector<1x1024xf32>
    %c1_i32_31 = arith.constant 1 : i32
    %71 = vector.broadcast %c1_i32_31 : i32 to vector<1x1024xi32>
    %72 = arith.andi %0, %71 : vector<1x1024xi32>
    %c0_i32_32 = arith.constant 0 : i32
    %73 = vector.broadcast %c0_i32_32 : i32 to vector<1x1024xi32>
    %74 = arith.cmpi eq, %72, %73 : vector<1x1024xi32>
    %c1_i32_33 = arith.constant 1 : i32
    %75 = vector.broadcast %c1_i32_33 : i32 to vector<1x1024xi32>
    %76 = arith.andi %1, %75 : vector<1x1024xi32>
    %c1_i32_34 = arith.constant 1 : i32
    %77 = vector.broadcast %c1_i32_34 : i32 to vector<1x1024xi32>
    %78 = arith.cmpi eq, %76, %77 : vector<1x1024xi32>
    %79 = arith.andi %74, %78 : vector<1x1024xi1>
    %80 = arith.extui %79 : vector<1x1024xi1> to vector<1x1024xi32>
    %81 = arith.sitofp %80 : vector<1x1024xi32> to vector<1x1024xf32>
    %c1_i32_35 = arith.constant 1 : i32
    %82 = vector.broadcast %c1_i32_35 : i32 to vector<1x1024xi32>
    %83 = arith.andi %0, %82 : vector<1x1024xi32>
    %c1_i32_36 = arith.constant 1 : i32
    %84 = vector.broadcast %c1_i32_36 : i32 to vector<1x1024xi32>
    %85 = arith.cmpi eq, %83, %84 : vector<1x1024xi32>
    %c1_i32_37 = arith.constant 1 : i32
    %86 = vector.broadcast %c1_i32_37 : i32 to vector<1x1024xi32>
    %87 = arith.andi %1, %86 : vector<1x1024xi32>
    %c0_i32_38 = arith.constant 0 : i32
    %88 = vector.broadcast %c0_i32_38 : i32 to vector<1x1024xi32>
    %89 = arith.cmpi eq, %87, %88 : vector<1x1024xi32>
    %90 = arith.andi %85, %89 : vector<1x1024xi1>
    %91 = arith.extui %90 : vector<1x1024xi1> to vector<1x1024xi32>
    %92 = arith.sitofp %91 : vector<1x1024xi32> to vector<1x1024xf32>
    %c1_i32_39 = arith.constant 1 : i32
    %93 = vector.broadcast %c1_i32_39 : i32 to vector<1x1024xi32>
    %94 = arith.andi %0, %93 : vector<1x1024xi32>
    %c1_i32_40 = arith.constant 1 : i32
    %95 = vector.broadcast %c1_i32_40 : i32 to vector<1x1024xi32>
    %96 = arith.cmpi eq, %94, %95 : vector<1x1024xi32>
    %c1_i32_41 = arith.constant 1 : i32
    %97 = vector.broadcast %c1_i32_41 : i32 to vector<1x1024xi32>
    %98 = arith.andi %1, %97 : vector<1x1024xi32>
    %c1_i32_42 = arith.constant 1 : i32
    %99 = vector.broadcast %c1_i32_42 : i32 to vector<1x1024xi32>
    %100 = arith.cmpi eq, %98, %99 : vector<1x1024xi32>
    %101 = arith.andi %96, %100 : vector<1x1024xi1>
    %102 = arith.extui %101 : vector<1x1024xi1> to vector<1x1024xi32>
    %103 = arith.sitofp %102 : vector<1x1024xi32> to vector<1x1024xf32>
    %c0_43 = arith.constant 0 : index
    %c0_44 = arith.constant 0 : index
    %c0_45 = arith.constant 0 : index
    %104 = vector.load %arg1[%c0_43, %c0_44, %c0_45] : memref<2x8x1024xf32, #tpu.memory_space<vmem>>, vector<1x8x1024xf32>
    %105 = vector.shape_cast %104 : vector<1x8x1024xf32> to vector<8x1024xf32>
    %c0_46 = arith.constant 0 : index
    %c0_47 = arith.constant 0 : index
    %c0_48 = arith.constant 0 : index
    %106 = vector.load %arg4[%c0_46, %c0_47, %c0_48] : memref<4x4x8xf32, #tpu.memory_space<vmem>>, vector<1x4x8xf32>
    %107 = vector.shape_cast %106 : vector<1x4x8xf32> to vector<4x8xf32>
    %cst = arith.constant dense<0.000000e+00> : vector<4x1024xf32>
    %108 = tpu.matmul %107, %105, %cst {dimension_numbers = #tpu.dot_dimension_numbers<[1], [0], [0], [1], [0, 0, 1, 1], [], []>} : vector<4x8xf32>, vector<8x1024xf32>, vector<4x1024xf32> -> vector<4x1024xf32>
    %109 = vector.broadcast %70 : vector<1x1024xf32> to vector<4x1024xf32>
    %110 = arith.mulf %108, %109 : vector<4x1024xf32>
    %c1_49 = arith.constant 1 : index
    %c0_50 = arith.constant 0 : index
    %c0_51 = arith.constant 0 : index
    %111 = vector.load %arg4[%c1_49, %c0_50, %c0_51] : memref<4x4x8xf32, #tpu.memory_space<vmem>>, vector<1x4x8xf32>
    %112 = vector.shape_cast %111 : vector<1x4x8xf32> to vector<4x8xf32>
    %cst_52 = arith.constant dense<0.000000e+00> : vector<4x1024xf32>
    %113 = tpu.matmul %112, %105, %cst_52 {dimension_numbers = #tpu.dot_dimension_numbers<[1], [0], [0], [1], [0, 0, 1, 1], [], []>} : vector<4x8xf32>, vector<8x1024xf32>, vector<4x1024xf32> -> vector<4x1024xf32>
    %114 = vector.broadcast %81 : vector<1x1024xf32> to vector<4x1024xf32>
    %115 = arith.mulf %113, %114 : vector<4x1024xf32>
    %116 = arith.addf %110, %115 : vector<4x1024xf32>
    %c2_53 = arith.constant 2 : index
    %c0_54 = arith.constant 0 : index
    %c0_55 = arith.constant 0 : index
    %117 = vector.load %arg4[%c2_53, %c0_54, %c0_55] : memref<4x4x8xf32, #tpu.memory_space<vmem>>, vector<1x4x8xf32>
    %118 = vector.shape_cast %117 : vector<1x4x8xf32> to vector<4x8xf32>
    %cst_56 = arith.constant dense<0.000000e+00> : vector<4x1024xf32>
    %119 = tpu.matmul %118, %105, %cst_56 {dimension_numbers = #tpu.dot_dimension_numbers<[1], [0], [0], [1], [0, 0, 1, 1], [], []>} : vector<4x8xf32>, vector<8x1024xf32>, vector<4x1024xf32> -> vector<4x1024xf32>
    %120 = vector.broadcast %92 : vector<1x1024xf32> to vector<4x1024xf32>
    %121 = arith.mulf %119, %120 : vector<4x1024xf32>
    %122 = arith.addf %116, %121 : vector<4x1024xf32>
    %c3_57 = arith.constant 3 : index
    %c0_58 = arith.constant 0 : index
    %c0_59 = arith.constant 0 : index
    %123 = vector.load %arg4[%c3_57, %c0_58, %c0_59] : memref<4x4x8xf32, #tpu.memory_space<vmem>>, vector<1x4x8xf32>
    %124 = vector.shape_cast %123 : vector<1x4x8xf32> to vector<4x8xf32>
    %cst_60 = arith.constant dense<0.000000e+00> : vector<4x1024xf32>
    %125 = tpu.matmul %124, %105, %cst_60 {dimension_numbers = #tpu.dot_dimension_numbers<[1], [0], [0], [1], [0, 0, 1, 1], [], []>} : vector<4x8xf32>, vector<8x1024xf32>, vector<4x1024xf32> -> vector<4x1024xf32>
    %126 = vector.broadcast %103 : vector<1x1024xf32> to vector<4x1024xf32>
    %127 = arith.mulf %125, %126 : vector<4x1024xf32>
    %128 = arith.addf %122, %127 : vector<4x1024xf32>
    %129 = vector.broadcast %3 : vector<4x1xf32> to vector<4x1024xf32>
    %130 = arith.addf %128, %129 : vector<4x1024xf32>
    %c0_61 = arith.constant 0 : index
    %c0_62 = arith.constant 0 : index
    %c0_63 = arith.constant 0 : index
    %131 = vector.load %arg2[%c0_61, %c0_62, %c0_63] : memref<2x4x1024xf32, #tpu.memory_space<vmem>>, vector<1x4x1024xf32>
    %132 = vector.shape_cast %131 : vector<1x4x1024xf32> to vector<4x1024xf32>
    %c33_i32 = arith.constant 33 : i32
    %133 = tpu.dynamic_rotate %130 by %c33_i32 dim 1 : vector<4x1024xf32>, i32 -> vector<4x1024xf32>
    %134 = vector.broadcast %22 : vector<1x1024xf32> to vector<4x1024xf32>
    %135 = arith.mulf %133, %134 : vector<4x1024xf32>
    %c0_64 = arith.constant 0 : index
    %c0_65 = arith.constant 0 : index
    %c0_66 = arith.constant 0 : index
    %136 = vector.load %arg5[%c0_64, %c0_65, %c0_66] : memref<9x4x4xf32, #tpu.memory_space<vmem>>, vector<1x4x4xf32>
    %137 = vector.shape_cast %136 : vector<1x4x4xf32> to vector<4x4xf32>
    %cst_67 = arith.constant dense<0.000000e+00> : vector<4x1024xf32>
    %138 = tpu.matmul %137, %135, %cst_67 {dimension_numbers = #tpu.dot_dimension_numbers<[1], [0], [0], [1], [0, 0, 1, 1], [], []>} : vector<4x4xf32>, vector<4x1024xf32>, vector<4x1024xf32> -> vector<4x1024xf32>
    %c33_i32_68 = arith.constant 33 : i32
    %139 = tpu.dynamic_rotate %132 by %c33_i32_68 dim 1 : vector<4x1024xf32>, i32 -> vector<4x1024xf32>
    %140 = vector.broadcast %22 : vector<1x1024xf32> to vector<4x1024xf32>
    %141 = arith.mulf %139, %140 : vector<4x1024xf32>
    %c0_69 = arith.constant 0 : index
    %c0_70 = arith.constant 0 : index
    %c0_71 = arith.constant 0 : index
    %142 = vector.load %arg6[%c0_69, %c0_70, %c0_71] : memref<9x4x4xf32, #tpu.memory_space<vmem>>, vector<1x4x4xf32>
    %143 = vector.shape_cast %142 : vector<1x4x4xf32> to vector<4x4xf32>
    %cst_72 = arith.constant dense<0.000000e+00> : vector<4x1024xf32>
    %144 = tpu.matmul %143, %141, %cst_72 {dimension_numbers = #tpu.dot_dimension_numbers<[1], [0], [0], [1], [0, 0, 1, 1], [], []>} : vector<4x4xf32>, vector<4x1024xf32>, vector<4x1024xf32> -> vector<4x1024xf32>
    %145 = arith.addf %138, %144 : vector<4x1024xf32>
    %c32_i32 = arith.constant 32 : i32
    %146 = tpu.dynamic_rotate %130 by %c32_i32 dim 1 : vector<4x1024xf32>, i32 -> vector<4x1024xf32>
    %147 = vector.broadcast %26 : vector<1x1024xf32> to vector<4x1024xf32>
    %148 = arith.mulf %146, %147 : vector<4x1024xf32>
    %c1_73 = arith.constant 1 : index
    %c0_74 = arith.constant 0 : index
    %c0_75 = arith.constant 0 : index
    %149 = vector.load %arg5[%c1_73, %c0_74, %c0_75] : memref<9x4x4xf32, #tpu.memory_space<vmem>>, vector<1x4x4xf32>
    %150 = vector.shape_cast %149 : vector<1x4x4xf32> to vector<4x4xf32>
    %cst_76 = arith.constant dense<0.000000e+00> : vector<4x1024xf32>
    %151 = tpu.matmul %150, %148, %cst_76 {dimension_numbers = #tpu.dot_dimension_numbers<[1], [0], [0], [1], [0, 0, 1, 1], [], []>} : vector<4x4xf32>, vector<4x1024xf32>, vector<4x1024xf32> -> vector<4x1024xf32>
    %152 = arith.addf %145, %151 : vector<4x1024xf32>
    %c32_i32_77 = arith.constant 32 : i32
    %153 = tpu.dynamic_rotate %132 by %c32_i32_77 dim 1 : vector<4x1024xf32>, i32 -> vector<4x1024xf32>
    %154 = vector.broadcast %26 : vector<1x1024xf32> to vector<4x1024xf32>
    %155 = arith.mulf %153, %154 : vector<4x1024xf32>
    %c1_78 = arith.constant 1 : index
    %c0_79 = arith.constant 0 : index
    %c0_80 = arith.constant 0 : index
    %156 = vector.load %arg6[%c1_78, %c0_79, %c0_80] : memref<9x4x4xf32, #tpu.memory_space<vmem>>, vector<1x4x4xf32>
    %157 = vector.shape_cast %156 : vector<1x4x4xf32> to vector<4x4xf32>
    %cst_81 = arith.constant dense<0.000000e+00> : vector<4x1024xf32>
    %158 = tpu.matmul %157, %155, %cst_81 {dimension_numbers = #tpu.dot_dimension_numbers<[1], [0], [0], [1], [0, 0, 1, 1], [], []>} : vector<4x4xf32>, vector<4x1024xf32>, vector<4x1024xf32> -> vector<4x1024xf32>
    %159 = arith.addf %152, %158 : vector<4x1024xf32>
    %c31_i32_82 = arith.constant 31 : i32
    %160 = tpu.dynamic_rotate %130 by %c31_i32_82 dim 1 : vector<4x1024xf32>, i32 -> vector<4x1024xf32>
    %161 = vector.broadcast %33 : vector<1x1024xf32> to vector<4x1024xf32>
    %162 = arith.mulf %160, %161 : vector<4x1024xf32>
    %c2_83 = arith.constant 2 : index
    %c0_84 = arith.constant 0 : index
    %c0_85 = arith.constant 0 : index
    %163 = vector.load %arg5[%c2_83, %c0_84, %c0_85] : memref<9x4x4xf32, #tpu.memory_space<vmem>>, vector<1x4x4xf32>
    %164 = vector.shape_cast %163 : vector<1x4x4xf32> to vector<4x4xf32>
    %cst_86 = arith.constant dense<0.000000e+00> : vector<4x1024xf32>
    %165 = tpu.matmul %164, %162, %cst_86 {dimension_numbers = #tpu.dot_dimension_numbers<[1], [0], [0], [1], [0, 0, 1, 1], [], []>} : vector<4x4xf32>, vector<4x1024xf32>, vector<4x1024xf32> -> vector<4x1024xf32>
    %166 = arith.addf %159, %165 : vector<4x1024xf32>
    %c31_i32_87 = arith.constant 31 : i32
    %167 = tpu.dynamic_rotate %132 by %c31_i32_87 dim 1 : vector<4x1024xf32>, i32 -> vector<4x1024xf32>
    %168 = vector.broadcast %33 : vector<1x1024xf32> to vector<4x1024xf32>
    %169 = arith.mulf %167, %168 : vector<4x1024xf32>
    %c2_88 = arith.constant 2 : index
    %c0_89 = arith.constant 0 : index
    %c0_90 = arith.constant 0 : index
    %170 = vector.load %arg6[%c2_88, %c0_89, %c0_90] : memref<9x4x4xf32, #tpu.memory_space<vmem>>, vector<1x4x4xf32>
    %171 = vector.shape_cast %170 : vector<1x4x4xf32> to vector<4x4xf32>
    %cst_91 = arith.constant dense<0.000000e+00> : vector<4x1024xf32>
    %172 = tpu.matmul %171, %169, %cst_91 {dimension_numbers = #tpu.dot_dimension_numbers<[1], [0], [0], [1], [0, 0, 1, 1], [], []>} : vector<4x4xf32>, vector<4x1024xf32>, vector<4x1024xf32> -> vector<4x1024xf32>
    %173 = arith.addf %166, %172 : vector<4x1024xf32>
    %c1_i32_92 = arith.constant 1 : i32
    %174 = tpu.dynamic_rotate %130 by %c1_i32_92 dim 1 : vector<4x1024xf32>, i32 -> vector<4x1024xf32>
    %175 = vector.broadcast %37 : vector<1x1024xf32> to vector<4x1024xf32>
    %176 = arith.mulf %174, %175 : vector<4x1024xf32>
    %c3_93 = arith.constant 3 : index
    %c0_94 = arith.constant 0 : index
    %c0_95 = arith.constant 0 : index
    %177 = vector.load %arg5[%c3_93, %c0_94, %c0_95] : memref<9x4x4xf32, #tpu.memory_space<vmem>>, vector<1x4x4xf32>
    %178 = vector.shape_cast %177 : vector<1x4x4xf32> to vector<4x4xf32>
    %cst_96 = arith.constant dense<0.000000e+00> : vector<4x1024xf32>
    %179 = tpu.matmul %178, %176, %cst_96 {dimension_numbers = #tpu.dot_dimension_numbers<[1], [0], [0], [1], [0, 0, 1, 1], [], []>} : vector<4x4xf32>, vector<4x1024xf32>, vector<4x1024xf32> -> vector<4x1024xf32>
    %180 = arith.addf %173, %179 : vector<4x1024xf32>
    %c1_i32_97 = arith.constant 1 : i32
    %181 = tpu.dynamic_rotate %132 by %c1_i32_97 dim 1 : vector<4x1024xf32>, i32 -> vector<4x1024xf32>
    %182 = vector.broadcast %37 : vector<1x1024xf32> to vector<4x1024xf32>
    %183 = arith.mulf %181, %182 : vector<4x1024xf32>
    %c3_98 = arith.constant 3 : index
    %c0_99 = arith.constant 0 : index
    %c0_100 = arith.constant 0 : index
    %184 = vector.load %arg6[%c3_98, %c0_99, %c0_100] : memref<9x4x4xf32, #tpu.memory_space<vmem>>, vector<1x4x4xf32>
    %185 = vector.shape_cast %184 : vector<1x4x4xf32> to vector<4x4xf32>
    %cst_101 = arith.constant dense<0.000000e+00> : vector<4x1024xf32>
    %186 = tpu.matmul %185, %183, %cst_101 {dimension_numbers = #tpu.dot_dimension_numbers<[1], [0], [0], [1], [0, 0, 1, 1], [], []>} : vector<4x4xf32>, vector<4x1024xf32>, vector<4x1024xf32> -> vector<4x1024xf32>
    %187 = arith.addf %180, %186 : vector<4x1024xf32>
    %c4_102 = arith.constant 4 : index
    %c0_103 = arith.constant 0 : index
    %c0_104 = arith.constant 0 : index
    %188 = vector.load %arg5[%c4_102, %c0_103, %c0_104] : memref<9x4x4xf32, #tpu.memory_space<vmem>>, vector<1x4x4xf32>
    %189 = vector.shape_cast %188 : vector<1x4x4xf32> to vector<4x4xf32>
    %cst_105 = arith.constant dense<0.000000e+00> : vector<4x1024xf32>
    %190 = tpu.matmul %189, %130, %cst_105 {dimension_numbers = #tpu.dot_dimension_numbers<[1], [0], [0], [1], [0, 0, 1, 1], [], []>} : vector<4x4xf32>, vector<4x1024xf32>, vector<4x1024xf32> -> vector<4x1024xf32>
    %191 = arith.addf %187, %190 : vector<4x1024xf32>
    %c4_106 = arith.constant 4 : index
    %c0_107 = arith.constant 0 : index
    %c0_108 = arith.constant 0 : index
    %192 = vector.load %arg6[%c4_106, %c0_107, %c0_108] : memref<9x4x4xf32, #tpu.memory_space<vmem>>, vector<1x4x4xf32>
    %193 = vector.shape_cast %192 : vector<1x4x4xf32> to vector<4x4xf32>
    %cst_109 = arith.constant dense<0.000000e+00> : vector<4x1024xf32>
    %194 = tpu.matmul %193, %132, %cst_109 {dimension_numbers = #tpu.dot_dimension_numbers<[1], [0], [0], [1], [0, 0, 1, 1], [], []>} : vector<4x4xf32>, vector<4x1024xf32>, vector<4x1024xf32> -> vector<4x1024xf32>
    %195 = arith.addf %191, %194 : vector<4x1024xf32>
    %c1023_i32 = arith.constant 1023 : i32
    %196 = tpu.dynamic_rotate %130 by %c1023_i32 dim 1 : vector<4x1024xf32>, i32 -> vector<4x1024xf32>
    %197 = vector.broadcast %41 : vector<1x1024xf32> to vector<4x1024xf32>
    %198 = arith.mulf %196, %197 : vector<4x1024xf32>
    %c5_110 = arith.constant 5 : index
    %c0_111 = arith.constant 0 : index
    %c0_112 = arith.constant 0 : index
    %199 = vector.load %arg5[%c5_110, %c0_111, %c0_112] : memref<9x4x4xf32, #tpu.memory_space<vmem>>, vector<1x4x4xf32>
    %200 = vector.shape_cast %199 : vector<1x4x4xf32> to vector<4x4xf32>
    %cst_113 = arith.constant dense<0.000000e+00> : vector<4x1024xf32>
    %201 = tpu.matmul %200, %198, %cst_113 {dimension_numbers = #tpu.dot_dimension_numbers<[1], [0], [0], [1], [0, 0, 1, 1], [], []>} : vector<4x4xf32>, vector<4x1024xf32>, vector<4x1024xf32> -> vector<4x1024xf32>
    %202 = arith.addf %195, %201 : vector<4x1024xf32>
    %c1023_i32_114 = arith.constant 1023 : i32
    %203 = tpu.dynamic_rotate %132 by %c1023_i32_114 dim 1 : vector<4x1024xf32>, i32 -> vector<4x1024xf32>
    %204 = vector.broadcast %41 : vector<1x1024xf32> to vector<4x1024xf32>
    %205 = arith.mulf %203, %204 : vector<4x1024xf32>
    %c5_115 = arith.constant 5 : index
    %c0_116 = arith.constant 0 : index
    %c0_117 = arith.constant 0 : index
    %206 = vector.load %arg6[%c5_115, %c0_116, %c0_117] : memref<9x4x4xf32, #tpu.memory_space<vmem>>, vector<1x4x4xf32>
    %207 = vector.shape_cast %206 : vector<1x4x4xf32> to vector<4x4xf32>
    %cst_118 = arith.constant dense<0.000000e+00> : vector<4x1024xf32>
    %208 = tpu.matmul %207, %205, %cst_118 {dimension_numbers = #tpu.dot_dimension_numbers<[1], [0], [0], [1], [0, 0, 1, 1], [], []>} : vector<4x4xf32>, vector<4x1024xf32>, vector<4x1024xf32> -> vector<4x1024xf32>
    %209 = arith.addf %202, %208 : vector<4x1024xf32>
    %c993_i32 = arith.constant 993 : i32
    %210 = tpu.dynamic_rotate %130 by %c993_i32 dim 1 : vector<4x1024xf32>, i32 -> vector<4x1024xf32>
    %211 = vector.broadcast %48 : vector<1x1024xf32> to vector<4x1024xf32>
    %212 = arith.mulf %210, %211 : vector<4x1024xf32>
    %c6_119 = arith.constant 6 : index
    %c0_120 = arith.constant 0 : index
    %c0_121 = arith.constant 0 : index
    %213 = vector.load %arg5[%c6_119, %c0_120, %c0_121] : memref<9x4x4xf32, #tpu.memory_space<vmem>>, vector<1x4x4xf32>
    %214 = vector.shape_cast %213 : vector<1x4x4xf32> to vector<4x4xf32>
    %cst_122 = arith.constant dense<0.000000e+00> : vector<4x1024xf32>
    %215 = tpu.matmul %214, %212, %cst_122 {dimension_numbers = #tpu.dot_dimension_numbers<[1], [0], [0], [1], [0, 0, 1, 1], [], []>} : vector<4x4xf32>, vector<4x1024xf32>, vector<4x1024xf32> -> vector<4x1024xf32>
    %216 = arith.addf %209, %215 : vector<4x1024xf32>
    %c993_i32_123 = arith.constant 993 : i32
    %217 = tpu.dynamic_rotate %132 by %c993_i32_123 dim 1 : vector<4x1024xf32>, i32 -> vector<4x1024xf32>
    %218 = vector.broadcast %48 : vector<1x1024xf32> to vector<4x1024xf32>
    %219 = arith.mulf %217, %218 : vector<4x1024xf32>
    %c6_124 = arith.constant 6 : index
    %c0_125 = arith.constant 0 : index
    %c0_126 = arith.constant 0 : index
    %220 = vector.load %arg6[%c6_124, %c0_125, %c0_126] : memref<9x4x4xf32, #tpu.memory_space<vmem>>, vector<1x4x4xf32>
    %221 = vector.shape_cast %220 : vector<1x4x4xf32> to vector<4x4xf32>
    %cst_127 = arith.constant dense<0.000000e+00> : vector<4x1024xf32>
    %222 = tpu.matmul %221, %219, %cst_127 {dimension_numbers = #tpu.dot_dimension_numbers<[1], [0], [0], [1], [0, 0, 1, 1], [], []>} : vector<4x4xf32>, vector<4x1024xf32>, vector<4x1024xf32> -> vector<4x1024xf32>
    %223 = arith.addf %216, %222 : vector<4x1024xf32>
    %c992_i32 = arith.constant 992 : i32
    %224 = tpu.dynamic_rotate %130 by %c992_i32 dim 1 : vector<4x1024xf32>, i32 -> vector<4x1024xf32>
    %225 = vector.broadcast %52 : vector<1x1024xf32> to vector<4x1024xf32>
    %226 = arith.mulf %224, %225 : vector<4x1024xf32>
    %c7 = arith.constant 7 : index
    %c0_128 = arith.constant 0 : index
    %c0_129 = arith.constant 0 : index
    %227 = vector.load %arg5[%c7, %c0_128, %c0_129] : memref<9x4x4xf32, #tpu.memory_space<vmem>>, vector<1x4x4xf32>
    %228 = vector.shape_cast %227 : vector<1x4x4xf32> to vector<4x4xf32>
    %cst_130 = arith.constant dense<0.000000e+00> : vector<4x1024xf32>
    %229 = tpu.matmul %228, %226, %cst_130 {dimension_numbers = #tpu.dot_dimension_numbers<[1], [0], [0], [1], [0, 0, 1, 1], [], []>} : vector<4x4xf32>, vector<4x1024xf32>, vector<4x1024xf32> -> vector<4x1024xf32>
    %230 = arith.addf %223, %229 : vector<4x1024xf32>
    %c992_i32_131 = arith.constant 992 : i32
    %231 = tpu.dynamic_rotate %132 by %c992_i32_131 dim 1 : vector<4x1024xf32>, i32 -> vector<4x1024xf32>
    %232 = vector.broadcast %52 : vector<1x1024xf32> to vector<4x1024xf32>
    %233 = arith.mulf %231, %232 : vector<4x1024xf32>
    %c7_132 = arith.constant 7 : index
    %c0_133 = arith.constant 0 : index
    %c0_134 = arith.constant 0 : index
    %234 = vector.load %arg6[%c7_132, %c0_133, %c0_134] : memref<9x4x4xf32, #tpu.memory_space<vmem>>, vector<1x4x4xf32>
    %235 = vector.shape_cast %234 : vector<1x4x4xf32> to vector<4x4xf32>
    %cst_135 = arith.constant dense<0.000000e+00> : vector<4x1024xf32>
    %236 = tpu.matmul %235, %233, %cst_135 {dimension_numbers = #tpu.dot_dimension_numbers<[1], [0], [0], [1], [0, 0, 1, 1], [], []>} : vector<4x4xf32>, vector<4x1024xf32>, vector<4x1024xf32> -> vector<4x1024xf32>
    %237 = arith.addf %230, %236 : vector<4x1024xf32>
    %c991_i32 = arith.constant 991 : i32
    %238 = tpu.dynamic_rotate %130 by %c991_i32 dim 1 : vector<4x1024xf32>, i32 -> vector<4x1024xf32>
    %239 = vector.broadcast %59 : vector<1x1024xf32> to vector<4x1024xf32>
    %240 = arith.mulf %238, %239 : vector<4x1024xf32>
    %c8 = arith.constant 8 : index
    %c0_136 = arith.constant 0 : index
    %c0_137 = arith.constant 0 : index
    %241 = vector.load %arg5[%c8, %c0_136, %c0_137] : memref<9x4x4xf32, #tpu.memory_space<vmem>>, vector<1x4x4xf32>
    %242 = vector.shape_cast %241 : vector<1x4x4xf32> to vector<4x4xf32>
    %cst_138 = arith.constant dense<0.000000e+00> : vector<4x1024xf32>
    %243 = tpu.matmul %242, %240, %cst_138 {dimension_numbers = #tpu.dot_dimension_numbers<[1], [0], [0], [1], [0, 0, 1, 1], [], []>} : vector<4x4xf32>, vector<4x1024xf32>, vector<4x1024xf32> -> vector<4x1024xf32>
    %244 = arith.addf %237, %243 : vector<4x1024xf32>
    %c991_i32_139 = arith.constant 991 : i32
    %245 = tpu.dynamic_rotate %132 by %c991_i32_139 dim 1 : vector<4x1024xf32>, i32 -> vector<4x1024xf32>
    %246 = vector.broadcast %59 : vector<1x1024xf32> to vector<4x1024xf32>
    %247 = arith.mulf %245, %246 : vector<4x1024xf32>
    %c8_140 = arith.constant 8 : index
    %c0_141 = arith.constant 0 : index
    %c0_142 = arith.constant 0 : index
    %248 = vector.load %arg6[%c8_140, %c0_141, %c0_142] : memref<9x4x4xf32, #tpu.memory_space<vmem>>, vector<1x4x4xf32>
    %249 = vector.shape_cast %248 : vector<1x4x4xf32> to vector<4x4xf32>
    %cst_143 = arith.constant dense<0.000000e+00> : vector<4x1024xf32>
    %250 = tpu.matmul %249, %247, %cst_143 {dimension_numbers = #tpu.dot_dimension_numbers<[1], [0], [0], [1], [0, 0, 1, 1], [], []>} : vector<4x4xf32>, vector<4x1024xf32>, vector<4x1024xf32> -> vector<4x1024xf32>
    %251 = arith.addf %244, %250 : vector<4x1024xf32>
    %252 = vector.broadcast %5 : vector<4x1xf32> to vector<4x1024xf32>
    %253 = arith.addf %251, %252 : vector<4x1024xf32>
    %cst_144 = arith.constant dense<0.000000e+00> : vector<4xf32>
    %254 = vector.multi_reduction <add>, %253, %cst_144 [1] : vector<4x1024xf32> to vector<4xf32>
    %255 = vector.shape_cast %254 : vector<4xf32> to vector<4x1xf32>
    %c1_145 = arith.constant 1 : index
    %c0_146 = arith.constant 0 : index
    %c0_147 = arith.constant 0 : index
    %256 = vector.load %arg1[%c1_145, %c0_146, %c0_147] : memref<2x8x1024xf32, #tpu.memory_space<vmem>>, vector<1x8x1024xf32>
    %257 = vector.shape_cast %256 : vector<1x8x1024xf32> to vector<8x1024xf32>
    %c0_148 = arith.constant 0 : index
    %c0_149 = arith.constant 0 : index
    %c0_150 = arith.constant 0 : index
    %258 = vector.load %arg4[%c0_148, %c0_149, %c0_150] : memref<4x4x8xf32, #tpu.memory_space<vmem>>, vector<1x4x8xf32>
    %259 = vector.shape_cast %258 : vector<1x4x8xf32> to vector<4x8xf32>
    %cst_151 = arith.constant dense<0.000000e+00> : vector<4x1024xf32>
    %260 = tpu.matmul %259, %257, %cst_151 {dimension_numbers = #tpu.dot_dimension_numbers<[1], [0], [0], [1], [0, 0, 1, 1], [], []>} : vector<4x8xf32>, vector<8x1024xf32>, vector<4x1024xf32> -> vector<4x1024xf32>
    %261 = vector.broadcast %70 : vector<1x1024xf32> to vector<4x1024xf32>
    %262 = arith.mulf %260, %261 : vector<4x1024xf32>
    %c1_152 = arith.constant 1 : index
    %c0_153 = arith.constant 0 : index
    %c0_154 = arith.constant 0 : index
    %263 = vector.load %arg4[%c1_152, %c0_153, %c0_154] : memref<4x4x8xf32, #tpu.memory_space<vmem>>, vector<1x4x8xf32>
    %264 = vector.shape_cast %263 : vector<1x4x8xf32> to vector<4x8xf32>
    %cst_155 = arith.constant dense<0.000000e+00> : vector<4x1024xf32>
    %265 = tpu.matmul %264, %257, %cst_155 {dimension_numbers = #tpu.dot_dimension_numbers<[1], [0], [0], [1], [0, 0, 1, 1], [], []>} : vector<4x8xf32>, vector<8x1024xf32>, vector<4x1024xf32> -> vector<4x1024xf32>
    %266 = vector.broadcast %81 : vector<1x1024xf32> to vector<4x1024xf32>
    %267 = arith.mulf %265, %266 : vector<4x1024xf32>
    %268 = arith.addf %262, %267 : vector<4x1024xf32>
    %c2_156 = arith.constant 2 : index
    %c0_157 = arith.constant 0 : index
    %c0_158 = arith.constant 0 : index
    %269 = vector.load %arg4[%c2_156, %c0_157, %c0_158] : memref<4x4x8xf32, #tpu.memory_space<vmem>>, vector<1x4x8xf32>
    %270 = vector.shape_cast %269 : vector<1x4x8xf32> to vector<4x8xf32>
    %cst_159 = arith.constant dense<0.000000e+00> : vector<4x1024xf32>
    %271 = tpu.matmul %270, %257, %cst_159 {dimension_numbers = #tpu.dot_dimension_numbers<[1], [0], [0], [1], [0, 0, 1, 1], [], []>} : vector<4x8xf32>, vector<8x1024xf32>, vector<4x1024xf32> -> vector<4x1024xf32>
    %272 = vector.broadcast %92 : vector<1x1024xf32> to vector<4x1024xf32>
    %273 = arith.mulf %271, %272 : vector<4x1024xf32>
    %274 = arith.addf %268, %273 : vector<4x1024xf32>
    %c3_160 = arith.constant 3 : index
    %c0_161 = arith.constant 0 : index
    %c0_162 = arith.constant 0 : index
    %275 = vector.load %arg4[%c3_160, %c0_161, %c0_162] : memref<4x4x8xf32, #tpu.memory_space<vmem>>, vector<1x4x8xf32>
    %276 = vector.shape_cast %275 : vector<1x4x8xf32> to vector<4x8xf32>
    %cst_163 = arith.constant dense<0.000000e+00> : vector<4x1024xf32>
    %277 = tpu.matmul %276, %257, %cst_163 {dimension_numbers = #tpu.dot_dimension_numbers<[1], [0], [0], [1], [0, 0, 1, 1], [], []>} : vector<4x8xf32>, vector<8x1024xf32>, vector<4x1024xf32> -> vector<4x1024xf32>
    %278 = vector.broadcast %103 : vector<1x1024xf32> to vector<4x1024xf32>
    %279 = arith.mulf %277, %278 : vector<4x1024xf32>
    %280 = arith.addf %274, %279 : vector<4x1024xf32>
    %281 = vector.broadcast %3 : vector<4x1xf32> to vector<4x1024xf32>
    %282 = arith.addf %280, %281 : vector<4x1024xf32>
    %c1_164 = arith.constant 1 : index
    %c0_165 = arith.constant 0 : index
    %c0_166 = arith.constant 0 : index
    %283 = vector.load %arg2[%c1_164, %c0_165, %c0_166] : memref<2x4x1024xf32, #tpu.memory_space<vmem>>, vector<1x4x1024xf32>
    %284 = vector.shape_cast %283 : vector<1x4x1024xf32> to vector<4x1024xf32>
    %c33_i32_167 = arith.constant 33 : i32
    %285 = tpu.dynamic_rotate %282 by %c33_i32_167 dim 1 : vector<4x1024xf32>, i32 -> vector<4x1024xf32>
    %286 = vector.broadcast %22 : vector<1x1024xf32> to vector<4x1024xf32>
    %287 = arith.mulf %285, %286 : vector<4x1024xf32>
    %c0_168 = arith.constant 0 : index
    %c0_169 = arith.constant 0 : index
    %c0_170 = arith.constant 0 : index
    %288 = vector.load %arg5[%c0_168, %c0_169, %c0_170] : memref<9x4x4xf32, #tpu.memory_space<vmem>>, vector<1x4x4xf32>
    %289 = vector.shape_cast %288 : vector<1x4x4xf32> to vector<4x4xf32>
    %cst_171 = arith.constant dense<0.000000e+00> : vector<4x1024xf32>
    %290 = tpu.matmul %289, %287, %cst_171 {dimension_numbers = #tpu.dot_dimension_numbers<[1], [0], [0], [1], [0, 0, 1, 1], [], []>} : vector<4x4xf32>, vector<4x1024xf32>, vector<4x1024xf32> -> vector<4x1024xf32>
    %c33_i32_172 = arith.constant 33 : i32
    %291 = tpu.dynamic_rotate %284 by %c33_i32_172 dim 1 : vector<4x1024xf32>, i32 -> vector<4x1024xf32>
    %292 = vector.broadcast %22 : vector<1x1024xf32> to vector<4x1024xf32>
    %293 = arith.mulf %291, %292 : vector<4x1024xf32>
    %c0_173 = arith.constant 0 : index
    %c0_174 = arith.constant 0 : index
    %c0_175 = arith.constant 0 : index
    %294 = vector.load %arg6[%c0_173, %c0_174, %c0_175] : memref<9x4x4xf32, #tpu.memory_space<vmem>>, vector<1x4x4xf32>
    %295 = vector.shape_cast %294 : vector<1x4x4xf32> to vector<4x4xf32>
    %cst_176 = arith.constant dense<0.000000e+00> : vector<4x1024xf32>
    %296 = tpu.matmul %295, %293, %cst_176 {dimension_numbers = #tpu.dot_dimension_numbers<[1], [0], [0], [1], [0, 0, 1, 1], [], []>} : vector<4x4xf32>, vector<4x1024xf32>, vector<4x1024xf32> -> vector<4x1024xf32>
    %297 = arith.addf %290, %296 : vector<4x1024xf32>
    %c32_i32_177 = arith.constant 32 : i32
    %298 = tpu.dynamic_rotate %282 by %c32_i32_177 dim 1 : vector<4x1024xf32>, i32 -> vector<4x1024xf32>
    %299 = vector.broadcast %26 : vector<1x1024xf32> to vector<4x1024xf32>
    %300 = arith.mulf %298, %299 : vector<4x1024xf32>
    %c1_178 = arith.constant 1 : index
    %c0_179 = arith.constant 0 : index
    %c0_180 = arith.constant 0 : index
    %301 = vector.load %arg5[%c1_178, %c0_179, %c0_180] : memref<9x4x4xf32, #tpu.memory_space<vmem>>, vector<1x4x4xf32>
    %302 = vector.shape_cast %301 : vector<1x4x4xf32> to vector<4x4xf32>
    %cst_181 = arith.constant dense<0.000000e+00> : vector<4x1024xf32>
    %303 = tpu.matmul %302, %300, %cst_181 {dimension_numbers = #tpu.dot_dimension_numbers<[1], [0], [0], [1], [0, 0, 1, 1], [], []>} : vector<4x4xf32>, vector<4x1024xf32>, vector<4x1024xf32> -> vector<4x1024xf32>
    %304 = arith.addf %297, %303 : vector<4x1024xf32>
    %c32_i32_182 = arith.constant 32 : i32
    %305 = tpu.dynamic_rotate %284 by %c32_i32_182 dim 1 : vector<4x1024xf32>, i32 -> vector<4x1024xf32>
    %306 = vector.broadcast %26 : vector<1x1024xf32> to vector<4x1024xf32>
    %307 = arith.mulf %305, %306 : vector<4x1024xf32>
    %c1_183 = arith.constant 1 : index
    %c0_184 = arith.constant 0 : index
    %c0_185 = arith.constant 0 : index
    %308 = vector.load %arg6[%c1_183, %c0_184, %c0_185] : memref<9x4x4xf32, #tpu.memory_space<vmem>>, vector<1x4x4xf32>
    %309 = vector.shape_cast %308 : vector<1x4x4xf32> to vector<4x4xf32>
    %cst_186 = arith.constant dense<0.000000e+00> : vector<4x1024xf32>
    %310 = tpu.matmul %309, %307, %cst_186 {dimension_numbers = #tpu.dot_dimension_numbers<[1], [0], [0], [1], [0, 0, 1, 1], [], []>} : vector<4x4xf32>, vector<4x1024xf32>, vector<4x1024xf32> -> vector<4x1024xf32>
    %311 = arith.addf %304, %310 : vector<4x1024xf32>
    %c31_i32_187 = arith.constant 31 : i32
    %312 = tpu.dynamic_rotate %282 by %c31_i32_187 dim 1 : vector<4x1024xf32>, i32 -> vector<4x1024xf32>
    %313 = vector.broadcast %33 : vector<1x1024xf32> to vector<4x1024xf32>
    %314 = arith.mulf %312, %313 : vector<4x1024xf32>
    %c2_188 = arith.constant 2 : index
    %c0_189 = arith.constant 0 : index
    %c0_190 = arith.constant 0 : index
    %315 = vector.load %arg5[%c2_188, %c0_189, %c0_190] : memref<9x4x4xf32, #tpu.memory_space<vmem>>, vector<1x4x4xf32>
    %316 = vector.shape_cast %315 : vector<1x4x4xf32> to vector<4x4xf32>
    %cst_191 = arith.constant dense<0.000000e+00> : vector<4x1024xf32>
    %317 = tpu.matmul %316, %314, %cst_191 {dimension_numbers = #tpu.dot_dimension_numbers<[1], [0], [0], [1], [0, 0, 1, 1], [], []>} : vector<4x4xf32>, vector<4x1024xf32>, vector<4x1024xf32> -> vector<4x1024xf32>
    %318 = arith.addf %311, %317 : vector<4x1024xf32>
    %c31_i32_192 = arith.constant 31 : i32
    %319 = tpu.dynamic_rotate %284 by %c31_i32_192 dim 1 : vector<4x1024xf32>, i32 -> vector<4x1024xf32>
    %320 = vector.broadcast %33 : vector<1x1024xf32> to vector<4x1024xf32>
    %321 = arith.mulf %319, %320 : vector<4x1024xf32>
    %c2_193 = arith.constant 2 : index
    %c0_194 = arith.constant 0 : index
    %c0_195 = arith.constant 0 : index
    %322 = vector.load %arg6[%c2_193, %c0_194, %c0_195] : memref<9x4x4xf32, #tpu.memory_space<vmem>>, vector<1x4x4xf32>
    %323 = vector.shape_cast %322 : vector<1x4x4xf32> to vector<4x4xf32>
    %cst_196 = arith.constant dense<0.000000e+00> : vector<4x1024xf32>
    %324 = tpu.matmul %323, %321, %cst_196 {dimension_numbers = #tpu.dot_dimension_numbers<[1], [0], [0], [1], [0, 0, 1, 1], [], []>} : vector<4x4xf32>, vector<4x1024xf32>, vector<4x1024xf32> -> vector<4x1024xf32>
    %325 = arith.addf %318, %324 : vector<4x1024xf32>
    %c1_i32_197 = arith.constant 1 : i32
    %326 = tpu.dynamic_rotate %282 by %c1_i32_197 dim 1 : vector<4x1024xf32>, i32 -> vector<4x1024xf32>
    %327 = vector.broadcast %37 : vector<1x1024xf32> to vector<4x1024xf32>
    %328 = arith.mulf %326, %327 : vector<4x1024xf32>
    %c3_198 = arith.constant 3 : index
    %c0_199 = arith.constant 0 : index
    %c0_200 = arith.constant 0 : index
    %329 = vector.load %arg5[%c3_198, %c0_199, %c0_200] : memref<9x4x4xf32, #tpu.memory_space<vmem>>, vector<1x4x4xf32>
    %330 = vector.shape_cast %329 : vector<1x4x4xf32> to vector<4x4xf32>
    %cst_201 = arith.constant dense<0.000000e+00> : vector<4x1024xf32>
    %331 = tpu.matmul %330, %328, %cst_201 {dimension_numbers = #tpu.dot_dimension_numbers<[1], [0], [0], [1], [0, 0, 1, 1], [], []>} : vector<4x4xf32>, vector<4x1024xf32>, vector<4x1024xf32> -> vector<4x1024xf32>
    %332 = arith.addf %325, %331 : vector<4x1024xf32>
    %c1_i32_202 = arith.constant 1 : i32
    %333 = tpu.dynamic_rotate %284 by %c1_i32_202 dim 1 : vector<4x1024xf32>, i32 -> vector<4x1024xf32>
    %334 = vector.broadcast %37 : vector<1x1024xf32> to vector<4x1024xf32>
    %335 = arith.mulf %333, %334 : vector<4x1024xf32>
    %c3_203 = arith.constant 3 : index
    %c0_204 = arith.constant 0 : index
    %c0_205 = arith.constant 0 : index
    %336 = vector.load %arg6[%c3_203, %c0_204, %c0_205] : memref<9x4x4xf32, #tpu.memory_space<vmem>>, vector<1x4x4xf32>
    %337 = vector.shape_cast %336 : vector<1x4x4xf32> to vector<4x4xf32>
    %cst_206 = arith.constant dense<0.000000e+00> : vector<4x1024xf32>
    %338 = tpu.matmul %337, %335, %cst_206 {dimension_numbers = #tpu.dot_dimension_numbers<[1], [0], [0], [1], [0, 0, 1, 1], [], []>} : vector<4x4xf32>, vector<4x1024xf32>, vector<4x1024xf32> -> vector<4x1024xf32>
    %339 = arith.addf %332, %338 : vector<4x1024xf32>
    %c4_207 = arith.constant 4 : index
    %c0_208 = arith.constant 0 : index
    %c0_209 = arith.constant 0 : index
    %340 = vector.load %arg5[%c4_207, %c0_208, %c0_209] : memref<9x4x4xf32, #tpu.memory_space<vmem>>, vector<1x4x4xf32>
    %341 = vector.shape_cast %340 : vector<1x4x4xf32> to vector<4x4xf32>
    %cst_210 = arith.constant dense<0.000000e+00> : vector<4x1024xf32>
    %342 = tpu.matmul %341, %282, %cst_210 {dimension_numbers = #tpu.dot_dimension_numbers<[1], [0], [0], [1], [0, 0, 1, 1], [], []>} : vector<4x4xf32>, vector<4x1024xf32>, vector<4x1024xf32> -> vector<4x1024xf32>
    %343 = arith.addf %339, %342 : vector<4x1024xf32>
    %c4_211 = arith.constant 4 : index
    %c0_212 = arith.constant 0 : index
    %c0_213 = arith.constant 0 : index
    %344 = vector.load %arg6[%c4_211, %c0_212, %c0_213] : memref<9x4x4xf32, #tpu.memory_space<vmem>>, vector<1x4x4xf32>
    %345 = vector.shape_cast %344 : vector<1x4x4xf32> to vector<4x4xf32>
    %cst_214 = arith.constant dense<0.000000e+00> : vector<4x1024xf32>
    %346 = tpu.matmul %345, %284, %cst_214 {dimension_numbers = #tpu.dot_dimension_numbers<[1], [0], [0], [1], [0, 0, 1, 1], [], []>} : vector<4x4xf32>, vector<4x1024xf32>, vector<4x1024xf32> -> vector<4x1024xf32>
    %347 = arith.addf %343, %346 : vector<4x1024xf32>
    %c1023_i32_215 = arith.constant 1023 : i32
    %348 = tpu.dynamic_rotate %282 by %c1023_i32_215 dim 1 : vector<4x1024xf32>, i32 -> vector<4x1024xf32>
    %349 = vector.broadcast %41 : vector<1x1024xf32> to vector<4x1024xf32>
    %350 = arith.mulf %348, %349 : vector<4x1024xf32>
    %c5_216 = arith.constant 5 : index
    %c0_217 = arith.constant 0 : index
    %c0_218 = arith.constant 0 : index
    %351 = vector.load %arg5[%c5_216, %c0_217, %c0_218] : memref<9x4x4xf32, #tpu.memory_space<vmem>>, vector<1x4x4xf32>
    %352 = vector.shape_cast %351 : vector<1x4x4xf32> to vector<4x4xf32>
    %cst_219 = arith.constant dense<0.000000e+00> : vector<4x1024xf32>
    %353 = tpu.matmul %352, %350, %cst_219 {dimension_numbers = #tpu.dot_dimension_numbers<[1], [0], [0], [1], [0, 0, 1, 1], [], []>} : vector<4x4xf32>, vector<4x1024xf32>, vector<4x1024xf32> -> vector<4x1024xf32>
    %354 = arith.addf %347, %353 : vector<4x1024xf32>
    %c1023_i32_220 = arith.constant 1023 : i32
    %355 = tpu.dynamic_rotate %284 by %c1023_i32_220 dim 1 : vector<4x1024xf32>, i32 -> vector<4x1024xf32>
    %356 = vector.broadcast %41 : vector<1x1024xf32> to vector<4x1024xf32>
    %357 = arith.mulf %355, %356 : vector<4x1024xf32>
    %c5_221 = arith.constant 5 : index
    %c0_222 = arith.constant 0 : index
    %c0_223 = arith.constant 0 : index
    %358 = vector.load %arg6[%c5_221, %c0_222, %c0_223] : memref<9x4x4xf32, #tpu.memory_space<vmem>>, vector<1x4x4xf32>
    %359 = vector.shape_cast %358 : vector<1x4x4xf32> to vector<4x4xf32>
    %cst_224 = arith.constant dense<0.000000e+00> : vector<4x1024xf32>
    %360 = tpu.matmul %359, %357, %cst_224 {dimension_numbers = #tpu.dot_dimension_numbers<[1], [0], [0], [1], [0, 0, 1, 1], [], []>} : vector<4x4xf32>, vector<4x1024xf32>, vector<4x1024xf32> -> vector<4x1024xf32>
    %361 = arith.addf %354, %360 : vector<4x1024xf32>
    %c993_i32_225 = arith.constant 993 : i32
    %362 = tpu.dynamic_rotate %282 by %c993_i32_225 dim 1 : vector<4x1024xf32>, i32 -> vector<4x1024xf32>
    %363 = vector.broadcast %48 : vector<1x1024xf32> to vector<4x1024xf32>
    %364 = arith.mulf %362, %363 : vector<4x1024xf32>
    %c6_226 = arith.constant 6 : index
    %c0_227 = arith.constant 0 : index
    %c0_228 = arith.constant 0 : index
    %365 = vector.load %arg5[%c6_226, %c0_227, %c0_228] : memref<9x4x4xf32, #tpu.memory_space<vmem>>, vector<1x4x4xf32>
    %366 = vector.shape_cast %365 : vector<1x4x4xf32> to vector<4x4xf32>
    %cst_229 = arith.constant dense<0.000000e+00> : vector<4x1024xf32>
    %367 = tpu.matmul %366, %364, %cst_229 {dimension_numbers = #tpu.dot_dimension_numbers<[1], [0], [0], [1], [0, 0, 1, 1], [], []>} : vector<4x4xf32>, vector<4x1024xf32>, vector<4x1024xf32> -> vector<4x1024xf32>
    %368 = arith.addf %361, %367 : vector<4x1024xf32>
    %c993_i32_230 = arith.constant 993 : i32
    %369 = tpu.dynamic_rotate %284 by %c993_i32_230 dim 1 : vector<4x1024xf32>, i32 -> vector<4x1024xf32>
    %370 = vector.broadcast %48 : vector<1x1024xf32> to vector<4x1024xf32>
    %371 = arith.mulf %369, %370 : vector<4x1024xf32>
    %c6_231 = arith.constant 6 : index
    %c0_232 = arith.constant 0 : index
    %c0_233 = arith.constant 0 : index
    %372 = vector.load %arg6[%c6_231, %c0_232, %c0_233] : memref<9x4x4xf32, #tpu.memory_space<vmem>>, vector<1x4x4xf32>
    %373 = vector.shape_cast %372 : vector<1x4x4xf32> to vector<4x4xf32>
    %cst_234 = arith.constant dense<0.000000e+00> : vector<4x1024xf32>
    %374 = tpu.matmul %373, %371, %cst_234 {dimension_numbers = #tpu.dot_dimension_numbers<[1], [0], [0], [1], [0, 0, 1, 1], [], []>} : vector<4x4xf32>, vector<4x1024xf32>, vector<4x1024xf32> -> vector<4x1024xf32>
    %375 = arith.addf %368, %374 : vector<4x1024xf32>
    %c992_i32_235 = arith.constant 992 : i32
    %376 = tpu.dynamic_rotate %282 by %c992_i32_235 dim 1 : vector<4x1024xf32>, i32 -> vector<4x1024xf32>
    %377 = vector.broadcast %52 : vector<1x1024xf32> to vector<4x1024xf32>
    %378 = arith.mulf %376, %377 : vector<4x1024xf32>
    %c7_236 = arith.constant 7 : index
    %c0_237 = arith.constant 0 : index
    %c0_238 = arith.constant 0 : index
    %379 = vector.load %arg5[%c7_236, %c0_237, %c0_238] : memref<9x4x4xf32, #tpu.memory_space<vmem>>, vector<1x4x4xf32>
    %380 = vector.shape_cast %379 : vector<1x4x4xf32> to vector<4x4xf32>
    %cst_239 = arith.constant dense<0.000000e+00> : vector<4x1024xf32>
    %381 = tpu.matmul %380, %378, %cst_239 {dimension_numbers = #tpu.dot_dimension_numbers<[1], [0], [0], [1], [0, 0, 1, 1], [], []>} : vector<4x4xf32>, vector<4x1024xf32>, vector<4x1024xf32> -> vector<4x1024xf32>
    %382 = arith.addf %375, %381 : vector<4x1024xf32>
    %c992_i32_240 = arith.constant 992 : i32
    %383 = tpu.dynamic_rotate %284 by %c992_i32_240 dim 1 : vector<4x1024xf32>, i32 -> vector<4x1024xf32>
    %384 = vector.broadcast %52 : vector<1x1024xf32> to vector<4x1024xf32>
    %385 = arith.mulf %383, %384 : vector<4x1024xf32>
    %c7_241 = arith.constant 7 : index
    %c0_242 = arith.constant 0 : index
    %c0_243 = arith.constant 0 : index
    %386 = vector.load %arg6[%c7_241, %c0_242, %c0_243] : memref<9x4x4xf32, #tpu.memory_space<vmem>>, vector<1x4x4xf32>
    %387 = vector.shape_cast %386 : vector<1x4x4xf32> to vector<4x4xf32>
    %cst_244 = arith.constant dense<0.000000e+00> : vector<4x1024xf32>
    %388 = tpu.matmul %387, %385, %cst_244 {dimension_numbers = #tpu.dot_dimension_numbers<[1], [0], [0], [1], [0, 0, 1, 1], [], []>} : vector<4x4xf32>, vector<4x1024xf32>, vector<4x1024xf32> -> vector<4x1024xf32>
    %389 = arith.addf %382, %388 : vector<4x1024xf32>
    %c991_i32_245 = arith.constant 991 : i32
    %390 = tpu.dynamic_rotate %282 by %c991_i32_245 dim 1 : vector<4x1024xf32>, i32 -> vector<4x1024xf32>
    %391 = vector.broadcast %59 : vector<1x1024xf32> to vector<4x1024xf32>
    %392 = arith.mulf %390, %391 : vector<4x1024xf32>
    %c8_246 = arith.constant 8 : index
    %c0_247 = arith.constant 0 : index
    %c0_248 = arith.constant 0 : index
    %393 = vector.load %arg5[%c8_246, %c0_247, %c0_248] : memref<9x4x4xf32, #tpu.memory_space<vmem>>, vector<1x4x4xf32>
    %394 = vector.shape_cast %393 : vector<1x4x4xf32> to vector<4x4xf32>
    %cst_249 = arith.constant dense<0.000000e+00> : vector<4x1024xf32>
    %395 = tpu.matmul %394, %392, %cst_249 {dimension_numbers = #tpu.dot_dimension_numbers<[1], [0], [0], [1], [0, 0, 1, 1], [], []>} : vector<4x4xf32>, vector<4x1024xf32>, vector<4x1024xf32> -> vector<4x1024xf32>
    %396 = arith.addf %389, %395 : vector<4x1024xf32>
    %c991_i32_250 = arith.constant 991 : i32
    %397 = tpu.dynamic_rotate %284 by %c991_i32_250 dim 1 : vector<4x1024xf32>, i32 -> vector<4x1024xf32>
    %398 = vector.broadcast %59 : vector<1x1024xf32> to vector<4x1024xf32>
    %399 = arith.mulf %397, %398 : vector<4x1024xf32>
    %c8_251 = arith.constant 8 : index
    %c0_252 = arith.constant 0 : index
    %c0_253 = arith.constant 0 : index
    %400 = vector.load %arg6[%c8_251, %c0_252, %c0_253] : memref<9x4x4xf32, #tpu.memory_space<vmem>>, vector<1x4x4xf32>
    %401 = vector.shape_cast %400 : vector<1x4x4xf32> to vector<4x4xf32>
    %cst_254 = arith.constant dense<0.000000e+00> : vector<4x1024xf32>
    %402 = tpu.matmul %401, %399, %cst_254 {dimension_numbers = #tpu.dot_dimension_numbers<[1], [0], [0], [1], [0, 0, 1, 1], [], []>} : vector<4x4xf32>, vector<4x1024xf32>, vector<4x1024xf32> -> vector<4x1024xf32>
    %403 = arith.addf %396, %402 : vector<4x1024xf32>
    %404 = vector.broadcast %5 : vector<4x1xf32> to vector<4x1024xf32>
    %405 = arith.addf %403, %404 : vector<4x1024xf32>
    %cst_255 = arith.constant dense<0.000000e+00> : vector<4xf32>
    %406 = vector.multi_reduction <add>, %405, %cst_255 [1] : vector<4x1024xf32> to vector<4xf32>
    %407 = vector.shape_cast %406 : vector<4xf32> to vector<4x1xf32>
    %408 = arith.addf %255, %407 : vector<4x1xf32>
    %cst_256 = arith.constant 4.8828125E-4 : f32
    %409 = vector.broadcast %cst_256 : f32 to vector<4x1xf32>
    %410 = arith.mulf %408, %409 : vector<4x1xf32>
    %411 = vector.broadcast %410 : vector<4x1xf32> to vector<4x1024xf32>
    %412 = arith.subf %253, %411 : vector<4x1024xf32>
    %413 = arith.mulf %412, %412 : vector<4x1024xf32>
    %cst_257 = arith.constant dense<0.000000e+00> : vector<4xf32>
    %414 = vector.multi_reduction <add>, %413, %cst_257 [1] : vector<4x1024xf32> to vector<4xf32>
    %415 = vector.shape_cast %414 : vector<4xf32> to vector<4x1xf32>
    %416 = vector.broadcast %410 : vector<4x1xf32> to vector<4x1024xf32>
    %417 = arith.subf %405, %416 : vector<4x1024xf32>
    %418 = arith.mulf %417, %417 : vector<4x1024xf32>
    %cst_258 = arith.constant dense<0.000000e+00> : vector<4xf32>
    %419 = vector.multi_reduction <add>, %418, %cst_258 [1] : vector<4x1024xf32> to vector<4xf32>
    %420 = vector.shape_cast %419 : vector<4xf32> to vector<4x1xf32>
    %421 = arith.addf %415, %420 : vector<4x1xf32>
    %cst_259 = arith.constant 4.8828125E-4 : f32
    %422 = vector.broadcast %cst_259 : f32 to vector<4x1xf32>
    %423 = arith.mulf %421, %422 : vector<4x1xf32>
    %cst_260 = arith.constant 9.99999974E-6 : f32
    %424 = vector.broadcast %cst_260 : f32 to vector<4x1xf32>
    %425 = arith.addf %423, %424 : vector<4x1xf32>
    %426 = math.rsqrt %425 : vector<4x1xf32>
    %427 = arith.mulf %9, %426 : vector<4x1xf32>
    %428 = arith.mulf %410, %427 : vector<4x1xf32>
    %429 = arith.subf %11, %428 : vector<4x1xf32>
    %430 = vector.broadcast %427 : vector<4x1xf32> to vector<4x1024xf32>
    %431 = arith.mulf %253, %430 : vector<4x1024xf32>
    %432 = vector.broadcast %429 : vector<4x1xf32> to vector<4x1024xf32>
    %433 = arith.addf %431, %432 : vector<4x1024xf32>
    %cst_261 = arith.constant 0.000000e+00 : f32
    %434 = vector.broadcast %cst_261 : f32 to vector<4x1024xf32>
    %435 = arith.maximumf %433, %434 : vector<4x1024xf32>
    %c33_i32_262 = arith.constant 33 : i32
    %436 = tpu.dynamic_rotate %435 by %c33_i32_262 dim 1 : vector<4x1024xf32>, i32 -> vector<4x1024xf32>
    %437 = vector.broadcast %22 : vector<1x1024xf32> to vector<4x1024xf32>
    %438 = arith.mulf %436, %437 : vector<4x1024xf32>
    %c0_263 = arith.constant 0 : index
    %c0_264 = arith.constant 0 : index
    %c0_265 = arith.constant 0 : index
    %439 = vector.load %arg7[%c0_263, %c0_264, %c0_265] : memref<9x4x4xf32, #tpu.memory_space<vmem>>, vector<1x4x4xf32>
    %440 = vector.shape_cast %439 : vector<1x4x4xf32> to vector<4x4xf32>
    %cst_266 = arith.constant dense<0.000000e+00> : vector<4x1024xf32>
    %441 = tpu.matmul %440, %438, %cst_266 {dimension_numbers = #tpu.dot_dimension_numbers<[1], [0], [0], [1], [0, 0, 1, 1], [], []>} : vector<4x4xf32>, vector<4x1024xf32>, vector<4x1024xf32> -> vector<4x1024xf32>
    %c32_i32_267 = arith.constant 32 : i32
    %442 = tpu.dynamic_rotate %435 by %c32_i32_267 dim 1 : vector<4x1024xf32>, i32 -> vector<4x1024xf32>
    %443 = vector.broadcast %26 : vector<1x1024xf32> to vector<4x1024xf32>
    %444 = arith.mulf %442, %443 : vector<4x1024xf32>
    %c1_268 = arith.constant 1 : index
    %c0_269 = arith.constant 0 : index
    %c0_270 = arith.constant 0 : index
    %445 = vector.load %arg7[%c1_268, %c0_269, %c0_270] : memref<9x4x4xf32, #tpu.memory_space<vmem>>, vector<1x4x4xf32>
    %446 = vector.shape_cast %445 : vector<1x4x4xf32> to vector<4x4xf32>
    %cst_271 = arith.constant dense<0.000000e+00> : vector<4x1024xf32>
    %447 = tpu.matmul %446, %444, %cst_271 {dimension_numbers = #tpu.dot_dimension_numbers<[1], [0], [0], [1], [0, 0, 1, 1], [], []>} : vector<4x4xf32>, vector<4x1024xf32>, vector<4x1024xf32> -> vector<4x1024xf32>
    %448 = arith.addf %441, %447 : vector<4x1024xf32>
    %c31_i32_272 = arith.constant 31 : i32
    %449 = tpu.dynamic_rotate %435 by %c31_i32_272 dim 1 : vector<4x1024xf32>, i32 -> vector<4x1024xf32>
    %450 = vector.broadcast %33 : vector<1x1024xf32> to vector<4x1024xf32>
    %451 = arith.mulf %449, %450 : vector<4x1024xf32>
    %c2_273 = arith.constant 2 : index
    %c0_274 = arith.constant 0 : index
    %c0_275 = arith.constant 0 : index
    %452 = vector.load %arg7[%c2_273, %c0_274, %c0_275] : memref<9x4x4xf32, #tpu.memory_space<vmem>>, vector<1x4x4xf32>
    %453 = vector.shape_cast %452 : vector<1x4x4xf32> to vector<4x4xf32>
    %cst_276 = arith.constant dense<0.000000e+00> : vector<4x1024xf32>
    %454 = tpu.matmul %453, %451, %cst_276 {dimension_numbers = #tpu.dot_dimension_numbers<[1], [0], [0], [1], [0, 0, 1, 1], [], []>} : vector<4x4xf32>, vector<4x1024xf32>, vector<4x1024xf32> -> vector<4x1024xf32>
    %455 = arith.addf %448, %454 : vector<4x1024xf32>
    %c1_i32_277 = arith.constant 1 : i32
    %456 = tpu.dynamic_rotate %435 by %c1_i32_277 dim 1 : vector<4x1024xf32>, i32 -> vector<4x1024xf32>
    %457 = vector.broadcast %37 : vector<1x1024xf32> to vector<4x1024xf32>
    %458 = arith.mulf %456, %457 : vector<4x1024xf32>
    %c3_278 = arith.constant 3 : index
    %c0_279 = arith.constant 0 : index
    %c0_280 = arith.constant 0 : index
    %459 = vector.load %arg7[%c3_278, %c0_279, %c0_280] : memref<9x4x4xf32, #tpu.memory_space<vmem>>, vector<1x4x4xf32>
    %460 = vector.shape_cast %459 : vector<1x4x4xf32> to vector<4x4xf32>
    %cst_281 = arith.constant dense<0.000000e+00> : vector<4x1024xf32>
    %461 = tpu.matmul %460, %458, %cst_281 {dimension_numbers = #tpu.dot_dimension_numbers<[1], [0], [0], [1], [0, 0, 1, 1], [], []>} : vector<4x4xf32>, vector<4x1024xf32>, vector<4x1024xf32> -> vector<4x1024xf32>
    %462 = arith.addf %455, %461 : vector<4x1024xf32>
    %c4_282 = arith.constant 4 : index
    %c0_283 = arith.constant 0 : index
    %c0_284 = arith.constant 0 : index
    %463 = vector.load %arg7[%c4_282, %c0_283, %c0_284] : memref<9x4x4xf32, #tpu.memory_space<vmem>>, vector<1x4x4xf32>
    %464 = vector.shape_cast %463 : vector<1x4x4xf32> to vector<4x4xf32>
    %cst_285 = arith.constant dense<0.000000e+00> : vector<4x1024xf32>
    %465 = tpu.matmul %464, %435, %cst_285 {dimension_numbers = #tpu.dot_dimension_numbers<[1], [0], [0], [1], [0, 0, 1, 1], [], []>} : vector<4x4xf32>, vector<4x1024xf32>, vector<4x1024xf32> -> vector<4x1024xf32>
    %466 = arith.addf %462, %465 : vector<4x1024xf32>
    %c1023_i32_286 = arith.constant 1023 : i32
    %467 = tpu.dynamic_rotate %435 by %c1023_i32_286 dim 1 : vector<4x1024xf32>, i32 -> vector<4x1024xf32>
    %468 = vector.broadcast %41 : vector<1x1024xf32> to vector<4x1024xf32>
    %469 = arith.mulf %467, %468 : vector<4x1024xf32>
    %c5_287 = arith.constant 5 : index
    %c0_288 = arith.constant 0 : index
    %c0_289 = arith.constant 0 : index
    %470 = vector.load %arg7[%c5_287, %c0_288, %c0_289] : memref<9x4x4xf32, #tpu.memory_space<vmem>>, vector<1x4x4xf32>
    %471 = vector.shape_cast %470 : vector<1x4x4xf32> to vector<4x4xf32>
    %cst_290 = arith.constant dense<0.000000e+00> : vector<4x1024xf32>
    %472 = tpu.matmul %471, %469, %cst_290 {dimension_numbers = #tpu.dot_dimension_numbers<[1], [0], [0], [1], [0, 0, 1, 1], [], []>} : vector<4x4xf32>, vector<4x1024xf32>, vector<4x1024xf32> -> vector<4x1024xf32>
    %473 = arith.addf %466, %472 : vector<4x1024xf32>
    %c993_i32_291 = arith.constant 993 : i32
    %474 = tpu.dynamic_rotate %435 by %c993_i32_291 dim 1 : vector<4x1024xf32>, i32 -> vector<4x1024xf32>
    %475 = vector.broadcast %48 : vector<1x1024xf32> to vector<4x1024xf32>
    %476 = arith.mulf %474, %475 : vector<4x1024xf32>
    %c6_292 = arith.constant 6 : index
    %c0_293 = arith.constant 0 : index
    %c0_294 = arith.constant 0 : index
    %477 = vector.load %arg7[%c6_292, %c0_293, %c0_294] : memref<9x4x4xf32, #tpu.memory_space<vmem>>, vector<1x4x4xf32>
    %478 = vector.shape_cast %477 : vector<1x4x4xf32> to vector<4x4xf32>
    %cst_295 = arith.constant dense<0.000000e+00> : vector<4x1024xf32>
    %479 = tpu.matmul %478, %476, %cst_295 {dimension_numbers = #tpu.dot_dimension_numbers<[1], [0], [0], [1], [0, 0, 1, 1], [], []>} : vector<4x4xf32>, vector<4x1024xf32>, vector<4x1024xf32> -> vector<4x1024xf32>
    %480 = arith.addf %473, %479 : vector<4x1024xf32>
    %c992_i32_296 = arith.constant 992 : i32
    %481 = tpu.dynamic_rotate %435 by %c992_i32_296 dim 1 : vector<4x1024xf32>, i32 -> vector<4x1024xf32>
    %482 = vector.broadcast %52 : vector<1x1024xf32> to vector<4x1024xf32>
    %483 = arith.mulf %481, %482 : vector<4x1024xf32>
    %c7_297 = arith.constant 7 : index
    %c0_298 = arith.constant 0 : index
    %c0_299 = arith.constant 0 : index
    %484 = vector.load %arg7[%c7_297, %c0_298, %c0_299] : memref<9x4x4xf32, #tpu.memory_space<vmem>>, vector<1x4x4xf32>
    %485 = vector.shape_cast %484 : vector<1x4x4xf32> to vector<4x4xf32>
    %cst_300 = arith.constant dense<0.000000e+00> : vector<4x1024xf32>
    %486 = tpu.matmul %485, %483, %cst_300 {dimension_numbers = #tpu.dot_dimension_numbers<[1], [0], [0], [1], [0, 0, 1, 1], [], []>} : vector<4x4xf32>, vector<4x1024xf32>, vector<4x1024xf32> -> vector<4x1024xf32>
    %487 = arith.addf %480, %486 : vector<4x1024xf32>
    %c991_i32_301 = arith.constant 991 : i32
    %488 = tpu.dynamic_rotate %435 by %c991_i32_301 dim 1 : vector<4x1024xf32>, i32 -> vector<4x1024xf32>
    %489 = vector.broadcast %59 : vector<1x1024xf32> to vector<4x1024xf32>
    %490 = arith.mulf %488, %489 : vector<4x1024xf32>
    %c8_302 = arith.constant 8 : index
    %c0_303 = arith.constant 0 : index
    %c0_304 = arith.constant 0 : index
    %491 = vector.load %arg7[%c8_302, %c0_303, %c0_304] : memref<9x4x4xf32, #tpu.memory_space<vmem>>, vector<1x4x4xf32>
    %492 = vector.shape_cast %491 : vector<1x4x4xf32> to vector<4x4xf32>
    %cst_305 = arith.constant dense<0.000000e+00> : vector<4x1024xf32>
    %493 = tpu.matmul %492, %490, %cst_305 {dimension_numbers = #tpu.dot_dimension_numbers<[1], [0], [0], [1], [0, 0, 1, 1], [], []>} : vector<4x4xf32>, vector<4x1024xf32>, vector<4x1024xf32> -> vector<4x1024xf32>
    %494 = arith.addf %487, %493 : vector<4x1024xf32>
    %495 = vector.broadcast %7 : vector<4x1xf32> to vector<4x1024xf32>
    %496 = arith.addf %494, %495 : vector<4x1024xf32>
    %cst_306 = arith.constant dense<0.000000e+00> : vector<4xf32>
    %497 = vector.multi_reduction <add>, %496, %cst_306 [1] : vector<4x1024xf32> to vector<4xf32>
    %498 = vector.shape_cast %497 : vector<4xf32> to vector<4x1xf32>
    %499 = vector.broadcast %427 : vector<4x1xf32> to vector<4x1024xf32>
    %500 = arith.mulf %405, %499 : vector<4x1024xf32>
    %501 = vector.broadcast %429 : vector<4x1xf32> to vector<4x1024xf32>
    %502 = arith.addf %500, %501 : vector<4x1024xf32>
    %cst_307 = arith.constant 0.000000e+00 : f32
    %503 = vector.broadcast %cst_307 : f32 to vector<4x1024xf32>
    %504 = arith.maximumf %502, %503 : vector<4x1024xf32>
    %c33_i32_308 = arith.constant 33 : i32
    %505 = tpu.dynamic_rotate %504 by %c33_i32_308 dim 1 : vector<4x1024xf32>, i32 -> vector<4x1024xf32>
    %506 = vector.broadcast %22 : vector<1x1024xf32> to vector<4x1024xf32>
    %507 = arith.mulf %505, %506 : vector<4x1024xf32>
    %c0_309 = arith.constant 0 : index
    %c0_310 = arith.constant 0 : index
    %c0_311 = arith.constant 0 : index
    %508 = vector.load %arg7[%c0_309, %c0_310, %c0_311] : memref<9x4x4xf32, #tpu.memory_space<vmem>>, vector<1x4x4xf32>
    %509 = vector.shape_cast %508 : vector<1x4x4xf32> to vector<4x4xf32>
    %cst_312 = arith.constant dense<0.000000e+00> : vector<4x1024xf32>
    %510 = tpu.matmul %509, %507, %cst_312 {dimension_numbers = #tpu.dot_dimension_numbers<[1], [0], [0], [1], [0, 0, 1, 1], [], []>} : vector<4x4xf32>, vector<4x1024xf32>, vector<4x1024xf32> -> vector<4x1024xf32>
    %c32_i32_313 = arith.constant 32 : i32
    %511 = tpu.dynamic_rotate %504 by %c32_i32_313 dim 1 : vector<4x1024xf32>, i32 -> vector<4x1024xf32>
    %512 = vector.broadcast %26 : vector<1x1024xf32> to vector<4x1024xf32>
    %513 = arith.mulf %511, %512 : vector<4x1024xf32>
    %c1_314 = arith.constant 1 : index
    %c0_315 = arith.constant 0 : index
    %c0_316 = arith.constant 0 : index
    %514 = vector.load %arg7[%c1_314, %c0_315, %c0_316] : memref<9x4x4xf32, #tpu.memory_space<vmem>>, vector<1x4x4xf32>
    %515 = vector.shape_cast %514 : vector<1x4x4xf32> to vector<4x4xf32>
    %cst_317 = arith.constant dense<0.000000e+00> : vector<4x1024xf32>
    %516 = tpu.matmul %515, %513, %cst_317 {dimension_numbers = #tpu.dot_dimension_numbers<[1], [0], [0], [1], [0, 0, 1, 1], [], []>} : vector<4x4xf32>, vector<4x1024xf32>, vector<4x1024xf32> -> vector<4x1024xf32>
    %517 = arith.addf %510, %516 : vector<4x1024xf32>
    %c31_i32_318 = arith.constant 31 : i32
    %518 = tpu.dynamic_rotate %504 by %c31_i32_318 dim 1 : vector<4x1024xf32>, i32 -> vector<4x1024xf32>
    %519 = vector.broadcast %33 : vector<1x1024xf32> to vector<4x1024xf32>
    %520 = arith.mulf %518, %519 : vector<4x1024xf32>
    %c2_319 = arith.constant 2 : index
    %c0_320 = arith.constant 0 : index
    %c0_321 = arith.constant 0 : index
    %521 = vector.load %arg7[%c2_319, %c0_320, %c0_321] : memref<9x4x4xf32, #tpu.memory_space<vmem>>, vector<1x4x4xf32>
    %522 = vector.shape_cast %521 : vector<1x4x4xf32> to vector<4x4xf32>
    %cst_322 = arith.constant dense<0.000000e+00> : vector<4x1024xf32>
    %523 = tpu.matmul %522, %520, %cst_322 {dimension_numbers = #tpu.dot_dimension_numbers<[1], [0], [0], [1], [0, 0, 1, 1], [], []>} : vector<4x4xf32>, vector<4x1024xf32>, vector<4x1024xf32> -> vector<4x1024xf32>
    %524 = arith.addf %517, %523 : vector<4x1024xf32>
    %c1_i32_323 = arith.constant 1 : i32
    %525 = tpu.dynamic_rotate %504 by %c1_i32_323 dim 1 : vector<4x1024xf32>, i32 -> vector<4x1024xf32>
    %526 = vector.broadcast %37 : vector<1x1024xf32> to vector<4x1024xf32>
    %527 = arith.mulf %525, %526 : vector<4x1024xf32>
    %c3_324 = arith.constant 3 : index
    %c0_325 = arith.constant 0 : index
    %c0_326 = arith.constant 0 : index
    %528 = vector.load %arg7[%c3_324, %c0_325, %c0_326] : memref<9x4x4xf32, #tpu.memory_space<vmem>>, vector<1x4x4xf32>
    %529 = vector.shape_cast %528 : vector<1x4x4xf32> to vector<4x4xf32>
    %cst_327 = arith.constant dense<0.000000e+00> : vector<4x1024xf32>
    %530 = tpu.matmul %529, %527, %cst_327 {dimension_numbers = #tpu.dot_dimension_numbers<[1], [0], [0], [1], [0, 0, 1, 1], [], []>} : vector<4x4xf32>, vector<4x1024xf32>, vector<4x1024xf32> -> vector<4x1024xf32>
    %531 = arith.addf %524, %530 : vector<4x1024xf32>
    %c4_328 = arith.constant 4 : index
    %c0_329 = arith.constant 0 : index
    %c0_330 = arith.constant 0 : index
    %532 = vector.load %arg7[%c4_328, %c0_329, %c0_330] : memref<9x4x4xf32, #tpu.memory_space<vmem>>, vector<1x4x4xf32>
    %533 = vector.shape_cast %532 : vector<1x4x4xf32> to vector<4x4xf32>
    %cst_331 = arith.constant dense<0.000000e+00> : vector<4x1024xf32>
    %534 = tpu.matmul %533, %504, %cst_331 {dimension_numbers = #tpu.dot_dimension_numbers<[1], [0], [0], [1], [0, 0, 1, 1], [], []>} : vector<4x4xf32>, vector<4x1024xf32>, vector<4x1024xf32> -> vector<4x1024xf32>
    %535 = arith.addf %531, %534 : vector<4x1024xf32>
    %c1023_i32_332 = arith.constant 1023 : i32
    %536 = tpu.dynamic_rotate %504 by %c1023_i32_332 dim 1 : vector<4x1024xf32>, i32 -> vector<4x1024xf32>
    %537 = vector.broadcast %41 : vector<1x1024xf32> to vector<4x1024xf32>
    %538 = arith.mulf %536, %537 : vector<4x1024xf32>
    %c5_333 = arith.constant 5 : index
    %c0_334 = arith.constant 0 : index
    %c0_335 = arith.constant 0 : index
    %539 = vector.load %arg7[%c5_333, %c0_334, %c0_335] : memref<9x4x4xf32, #tpu.memory_space<vmem>>, vector<1x4x4xf32>
    %540 = vector.shape_cast %539 : vector<1x4x4xf32> to vector<4x4xf32>
    %cst_336 = arith.constant dense<0.000000e+00> : vector<4x1024xf32>
    %541 = tpu.matmul %540, %538, %cst_336 {dimension_numbers = #tpu.dot_dimension_numbers<[1], [0], [0], [1], [0, 0, 1, 1], [], []>} : vector<4x4xf32>, vector<4x1024xf32>, vector<4x1024xf32> -> vector<4x1024xf32>
    %542 = arith.addf %535, %541 : vector<4x1024xf32>
    %c993_i32_337 = arith.constant 993 : i32
    %543 = tpu.dynamic_rotate %504 by %c993_i32_337 dim 1 : vector<4x1024xf32>, i32 -> vector<4x1024xf32>
    %544 = vector.broadcast %48 : vector<1x1024xf32> to vector<4x1024xf32>
    %545 = arith.mulf %543, %544 : vector<4x1024xf32>
    %c6_338 = arith.constant 6 : index
    %c0_339 = arith.constant 0 : index
    %c0_340 = arith.constant 0 : index
    %546 = vector.load %arg7[%c6_338, %c0_339, %c0_340] : memref<9x4x4xf32, #tpu.memory_space<vmem>>, vector<1x4x4xf32>
    %547 = vector.shape_cast %546 : vector<1x4x4xf32> to vector<4x4xf32>
    %cst_341 = arith.constant dense<0.000000e+00> : vector<4x1024xf32>
    %548 = tpu.matmul %547, %545, %cst_341 {dimension_numbers = #tpu.dot_dimension_numbers<[1], [0], [0], [1], [0, 0, 1, 1], [], []>} : vector<4x4xf32>, vector<4x1024xf32>, vector<4x1024xf32> -> vector<4x1024xf32>
    %549 = arith.addf %542, %548 : vector<4x1024xf32>
    %c992_i32_342 = arith.constant 992 : i32
    %550 = tpu.dynamic_rotate %504 by %c992_i32_342 dim 1 : vector<4x1024xf32>, i32 -> vector<4x1024xf32>
    %551 = vector.broadcast %52 : vector<1x1024xf32> to vector<4x1024xf32>
    %552 = arith.mulf %550, %551 : vector<4x1024xf32>
    %c7_343 = arith.constant 7 : index
    %c0_344 = arith.constant 0 : index
    %c0_345 = arith.constant 0 : index
    %553 = vector.load %arg7[%c7_343, %c0_344, %c0_345] : memref<9x4x4xf32, #tpu.memory_space<vmem>>, vector<1x4x4xf32>
    %554 = vector.shape_cast %553 : vector<1x4x4xf32> to vector<4x4xf32>
    %cst_346 = arith.constant dense<0.000000e+00> : vector<4x1024xf32>
    %555 = tpu.matmul %554, %552, %cst_346 {dimension_numbers = #tpu.dot_dimension_numbers<[1], [0], [0], [1], [0, 0, 1, 1], [], []>} : vector<4x4xf32>, vector<4x1024xf32>, vector<4x1024xf32> -> vector<4x1024xf32>
    %556 = arith.addf %549, %555 : vector<4x1024xf32>
    %c991_i32_347 = arith.constant 991 : i32
    %557 = tpu.dynamic_rotate %504 by %c991_i32_347 dim 1 : vector<4x1024xf32>, i32 -> vector<4x1024xf32>
    %558 = vector.broadcast %59 : vector<1x1024xf32> to vector<4x1024xf32>
    %559 = arith.mulf %557, %558 : vector<4x1024xf32>
    %c8_348 = arith.constant 8 : index
    %c0_349 = arith.constant 0 : index
    %c0_350 = arith.constant 0 : index
    %560 = vector.load %arg7[%c8_348, %c0_349, %c0_350] : memref<9x4x4xf32, #tpu.memory_space<vmem>>, vector<1x4x4xf32>
    %561 = vector.shape_cast %560 : vector<1x4x4xf32> to vector<4x4xf32>
    %cst_351 = arith.constant dense<0.000000e+00> : vector<4x1024xf32>
    %562 = tpu.matmul %561, %559, %cst_351 {dimension_numbers = #tpu.dot_dimension_numbers<[1], [0], [0], [1], [0, 0, 1, 1], [], []>} : vector<4x4xf32>, vector<4x1024xf32>, vector<4x1024xf32> -> vector<4x1024xf32>
    %563 = arith.addf %556, %562 : vector<4x1024xf32>
    %564 = vector.broadcast %7 : vector<4x1xf32> to vector<4x1024xf32>
    %565 = arith.addf %563, %564 : vector<4x1024xf32>
    %cst_352 = arith.constant dense<0.000000e+00> : vector<4xf32>
    %566 = vector.multi_reduction <add>, %565, %cst_352 [1] : vector<4x1024xf32> to vector<4xf32>
    %567 = vector.shape_cast %566 : vector<4xf32> to vector<4x1xf32>
    %568 = arith.addf %498, %567 : vector<4x1xf32>
    %cst_353 = arith.constant 4.8828125E-4 : f32
    %569 = vector.broadcast %cst_353 : f32 to vector<4x1xf32>
    %570 = arith.mulf %568, %569 : vector<4x1xf32>
    %571 = vector.broadcast %570 : vector<4x1xf32> to vector<4x1024xf32>
    %572 = arith.subf %496, %571 : vector<4x1024xf32>
    %573 = arith.mulf %572, %572 : vector<4x1024xf32>
    %cst_354 = arith.constant dense<0.000000e+00> : vector<4xf32>
    %574 = vector.multi_reduction <add>, %573, %cst_354 [1] : vector<4x1024xf32> to vector<4xf32>
    %575 = vector.shape_cast %574 : vector<4xf32> to vector<4x1xf32>
    %576 = vector.broadcast %570 : vector<4x1xf32> to vector<4x1024xf32>
    %577 = arith.subf %565, %576 : vector<4x1024xf32>
    %578 = arith.mulf %577, %577 : vector<4x1024xf32>
    %cst_355 = arith.constant dense<0.000000e+00> : vector<4xf32>
    %579 = vector.multi_reduction <add>, %578, %cst_355 [1] : vector<4x1024xf32> to vector<4xf32>
    %580 = vector.shape_cast %579 : vector<4xf32> to vector<4x1xf32>
    %581 = arith.addf %575, %580 : vector<4x1xf32>
    %cst_356 = arith.constant 4.8828125E-4 : f32
    %582 = vector.broadcast %cst_356 : f32 to vector<4x1xf32>
    %583 = arith.mulf %581, %582 : vector<4x1xf32>
    %cst_357 = arith.constant 9.99999974E-6 : f32
    %584 = vector.broadcast %cst_357 : f32 to vector<4x1xf32>
    %585 = arith.addf %583, %584 : vector<4x1xf32>
    %586 = math.rsqrt %585 : vector<4x1xf32>
    %587 = arith.mulf %13, %586 : vector<4x1xf32>
    %588 = arith.mulf %570, %587 : vector<4x1xf32>
    %589 = arith.subf %15, %588 : vector<4x1xf32>
    %590 = vector.broadcast %587 : vector<4x1xf32> to vector<4x1024xf32>
    %591 = arith.mulf %496, %590 : vector<4x1024xf32>
    %592 = vector.broadcast %589 : vector<4x1xf32> to vector<4x1024xf32>
    %593 = arith.addf %591, %592 : vector<4x1024xf32>
    %cst_358 = arith.constant 0.000000e+00 : f32
    %594 = vector.broadcast %cst_358 : f32 to vector<4x1024xf32>
    %595 = arith.maximumf %593, %594 : vector<4x1024xf32>
    %c0_359 = arith.constant 0 : index
    %c0_360 = arith.constant 0 : index
    %c0_361 = arith.constant 0 : index
    %596 = vector.load %arg9[%c0_359, %c0_360, %c0_361] : memref<2x4x1024xf32, #tpu.memory_space<vmem>>, vector<1x4x1024xf32>
    %597 = vector.shape_cast %596 : vector<1x4x1024xf32> to vector<4x1024xf32>
    %598 = vector.shape_cast %595 : vector<4x1024xf32> to vector<1x4x1024xf32>
    tpu.vector_store %arg9[%c0_359, %c0_360, %c0_361], %598 {strides = array<i32>} : memref<2x4x1024xf32, #tpu.memory_space<vmem>>, vector<1x4x1024xf32>,
    %599 = vector.broadcast %587 : vector<4x1xf32> to vector<4x1024xf32>
    %600 = arith.mulf %565, %599 : vector<4x1024xf32>
    %601 = vector.broadcast %589 : vector<4x1xf32> to vector<4x1024xf32>
    %602 = arith.addf %600, %601 : vector<4x1024xf32>
    %cst_362 = arith.constant 0.000000e+00 : f32
    %603 = vector.broadcast %cst_362 : f32 to vector<4x1024xf32>
    %604 = arith.maximumf %602, %603 : vector<4x1024xf32>
    %c1_363 = arith.constant 1 : index
    %c0_364 = arith.constant 0 : index
    %c0_365 = arith.constant 0 : index
    %605 = vector.load %arg9[%c1_363, %c0_364, %c0_365] : memref<2x4x1024xf32, #tpu.memory_space<vmem>>, vector<1x4x1024xf32>
    %606 = vector.shape_cast %605 : vector<1x4x1024xf32> to vector<4x1024xf32>
    %607 = vector.shape_cast %604 : vector<4x1024xf32> to vector<1x4x1024xf32>
    tpu.vector_store %arg9[%c1_363, %c0_364, %c0_365], %607 {strides = array<i32>} : memref<2x4x1024xf32, #tpu.memory_space<vmem>>, vector<1x4x1024xf32>,
    return
  }
  func.func @transform_0(%arg0: i32) -> (i32, i32, i32) {
    %c0_i32 = arith.constant 0 : i32
    %c0_i32_0 = arith.constant 0 : i32
    %c0_i32_1 = arith.constant 0 : i32
    %c0_i32_2 = arith.constant 0 : i32
    return %c0_i32, %c0_i32_0, %c0_i32_1 : i32, i32, i32
  }
  func.func @transform_1(%arg0: i32) -> (i32, i32, i32) {
    %c0_i32 = arith.constant 0 : i32
    %c0_i32_0 = arith.constant 0 : i32
    %c0_i32_1 = arith.constant 0 : i32
    %c0_i32_2 = arith.constant 0 : i32
    return %c0_i32, %c0_i32_0, %c0_i32_1 : i32, i32, i32
  }
  func.func @transform_2(%arg0: i32) -> (i32, i32) {
    %c0_i32 = arith.constant 0 : i32
    %c0_i32_0 = arith.constant 0 : i32
    %c0_i32_1 = arith.constant 0 : i32
    return %c0_i32, %c0_i32_0 : i32, i32
  }
  func.func @transform_3(%arg0: i32) -> (i32, i32, i32) {
    %c0_i32 = arith.constant 0 : i32
    %c0_i32_0 = arith.constant 0 : i32
    %c0_i32_1 = arith.constant 0 : i32
    %c0_i32_2 = arith.constant 0 : i32
    return %c0_i32, %c0_i32_0, %c0_i32_1 : i32, i32, i32
  }
  func.func @transform_4(%arg0: i32) -> (i32, i32, i32) {
    %c0_i32 = arith.constant 0 : i32
    %c0_i32_0 = arith.constant 0 : i32
    %c0_i32_1 = arith.constant 0 : i32
    %c0_i32_2 = arith.constant 0 : i32
    return %c0_i32, %c0_i32_0, %c0_i32_1 : i32, i32, i32
  }
  func.func @transform_5(%arg0: i32) -> (i32, i32, i32) {
    %c0_i32 = arith.constant 0 : i32
    %c0_i32_0 = arith.constant 0 : i32
    %c0_i32_1 = arith.constant 0 : i32
    %c0_i32_2 = arith.constant 0 : i32
    return %c0_i32, %c0_i32_0, %c0_i32_1 : i32, i32, i32
  }
  func.func @transform_6(%arg0: i32) -> (i32, i32, i32) {
    %c0_i32 = arith.constant 0 : i32
    %c0_i32_0 = arith.constant 0 : i32
    %c0_i32_1 = arith.constant 0 : i32
    %c0_i32_2 = arith.constant 0 : i32
    return %c0_i32, %c0_i32_0, %c0_i32_1 : i32, i32, i32
  }
  func.func @transform_7(%arg0: i32) -> (i32, i32, i32) {
    %c0_i32 = arith.constant 0 : i32
    %c0_i32_0 = arith.constant 0 : i32
    %c0_i32_1 = arith.constant 0 : i32
    %c0_i32_2 = arith.constant 0 : i32
    return %c0_i32, %c0_i32_0, %c0_i32_1 : i32, i32, i32
  }
  func.func @transform_8(%arg0: i32) -> (i32, i32, i32) {
    %c0_i32 = arith.constant 0 : i32
    %c0_i32_0 = arith.constant 0 : i32
    %c0_i32_1 = arith.constant 0 : i32
    %c0_i32_2 = arith.constant 0 : i32
    return %c0_i32, %c0_i32_0, %c0_i32_1 : i32, i32, i32
  }
}

</mosaic_0001>

<bundles_post_ra>
// kernel: decoder_block_forward.1
= control target key start
LH: loop header
LB: loop body
LE: loop exit
PB: predicated region body
PF: predicated region fallthrough
CT: control target
= control target key end

     0   :  { %v28866_v3 = vmov 0.0   ;;  %vm28859_vm0 = vcmask 64512   ;;  %v29185_v13 = vmov 0  ;;  %v29188_v14 = vmov 0  ;;  %s22937_s16 = smov 33   ;;  %s22938_s21 = smov 32   ;;  %s28850_s0 = inlined_call_operand.vmem [shape: f32[2,8,1024], index: 0, kind: input, shape index: {}]   ;;  %s28851_s3 = inlined_call_operand.vmem [shape: f32[4,4,8], index: 3, kind: input, shape index: {}]   ;;  %s28852_s2 = inlined_call_operand.vmem [shape: s32[2,1024], index: 2, kind: input, shape index: {}]   ;;  %s28853_s1 = inlined_call_operand.vmem [shape: f32[2,4,1024], index: 1, kind: input, shape index: {}]   ;;  %s28854_s7 = inlined_call_operand.vmem [shape: f32[7,4,1], index: 7, kind: input, shape index: {}]   ;;  %s28855_s5 = inlined_call_operand.vmem [shape: f32[9,4,4], index: 5, kind: input, shape index: {}]   ;;  %s28856_s4 = inlined_call_operand.vmem [shape: f32[9,4,4], index: 4, kind: input, shape index: {}]   ;;  %s28857_s6 = inlined_call_operand.vmem [shape: f32[9,4,4], index: 6, kind: input, shape index: {}]   ;;  %s28858_s8 = inlined_call_operand.vmem [shape: f32[2,4,1024], index: 8, kind: output, shape index: {}]  }
   0x1   :  { %v22993_v0 = vld [vmem:[%s28850_s0 + $0x8] sm:$0xff]  ;;  %v22998_v1 = vld [vmem:[%s28850_s0 + $0x18] sm:$0xff]  ;;  %v23003_v2 = vld [vmem:[%s28850_s0] sm:$0xff]  ;;  %164 = vmatprep.mubr.f32.mxu0 %v28866_v3  ;;  %235 = vmatprep.mubr.f32.mxu1 %v28866_v3  ;;  %v29191_v15 = vmov 0  ;;  %v22936_v22 = vmov 0   ;;  %s22939_s22 = smov 31   ;;  %v385_v29 = vlaneseq }
   0x2   :  { %130 = vmatprep.subr.mxu0 %v22993_v0  ;;  %201 = vmatprep.subr.mxu1 %v22998_v1  ;;  %v23012_v4 = vld [vmem:[%s28850_s0 + $0x10] sm:$0xff]  ;;  %v95_v5 = vld [vmem:[%s28851_s3] sm:$0xf]  ;;  %v23020_v6 = vld [vmem:[%s28850_s0 + $0x28] sm:$0xff]  ;;  %s22940_s23 = smov 1   ;;  %vm1614_vm10 = vcmask 1043456  }
   0x3   :  { %131 = vmatpush1.msra.mxu0 %v23003_v2  ;;  %202 = vmatpush1.msra.mxu1 %v23012_v4  ;;  %v23027_v7 = vld [vmem:[%s28850_s0 + $0x38] sm:$0xff]  ;;  %v23032_v8 = vld [vmem:[%s28850_s0 + $0x20] sm:$0xff]  ;;  %v23039_v9 = vld [vmem:[%s28850_s0 + $0x30] sm:$0xff]  ;;  %v386_v30 = vshrl.u32 %v385_v29, 7  ;;  %v23253_v32 = vand.u32 127, %v385_v29  ;;  %vm1610_vm11 = vcmask 31744  }
   0x4   :  { %22158 = vmatmul.mubr.msk.f32.vlgmr.msra.gmra.mxu0 %vm28859_vm0, %v95_v5  ;;  %22159 = vmatmul.mubr.msk.f32.vlgmr.msra.gmra.mxu1 %vm28859_vm0, %v95_v5  ;;  %v23050_v10 = vld [vmem:[%s28852_s2 + $0x1] ss:$2 sm:$0xff]  ;;  %v23057_v11 = vld [vmem:[%s28852_s2] ss:$2 sm:$0xff]  ;;  %v23176_v24 = vld [vmem:[%s28853_s1 + $0x10] sm:$0xff]  ;;  %s22941_s26 = smov 127  }
   0x5   :  { %272 = vmatprep.subr.mxu0 %v23020_v6  ;;  %343 = vmatprep.subr.mxu1 %v23027_v7  ;;  %29183 = vst [vmem:[#allocation2_spill] sm:$0xff] %v23050_v10  ;;  %29184 = vst [vmem:[#allocation3_spill] sm:$0xff] %v23057_v11  ;;  %vm52_vm1 = vcmp.lt.s32.totalorder %v23050_v10, 31  ;;  %v22162_v12 = vld [vmem:[%s28851_s3 + $0x4] sm:$0xf]  ;;  %vm45_vm2 = vcmp.ge.s32.totalorder %v23057_v11, 1  ;;  %v23187_v26 = vcombine.high %v23176_v24, %v23176_v24 }
   0x6   :  { %273 = vmatpush1.msra.mxu0 %v23032_v8  ;;  %306 = vmatprep.mubr.f32.mxu0 %v28866_v3  ;;  %vm28860_vm3 = vcmp.lt.s32.totalorder %v23057_v11, 31  ;;  %vm46_vm4 = vcmp.ge.s32.totalorder %v23050_v10, 1  ;;  %vm23074_vm5 = vmand %vm45_vm2, %vm52_vm1  ;;  %v22167_v16 = vld [vmem:[%s28851_s3 + $0x8] sm:$0xf]  ;;  %v22172_v17 = vld [vmem:[%s28851_s3 + $0xc] sm:$0xf] }
   0x7   :  { %344 = vmatpush1.msra.mxu1 %v23039_v9  ;;  %377 = vmatprep.mubr.f32.mxu1 %v28866_v3  ;;  %v29186_v13 = vsel %vm23074_vm5, 4294967295, %v29185_v13  ;;  %vm23084_vm6 = vmand %vm28860_vm3, %vm46_vm4  ;;  %v23135_v18 = vld [vmem:[%s28853_s1 + $0x8] sm:$0xff]  ;;  %v23152_v20 = vld [vmem:[%s28853_s1] sm:$0xff]  ;;  %29194 = vst [vmem:[#allocation7_spill] sm:$0xff] %v23253_v32  ;;  %v23255_v33 = vsub.s32 2, %v386_v30  ;;  %v23257_v34 = vsub.s32 3, %v386_v30 }
   0x8   :  { %22160 = vmatmul.mubr.msk.f32.vlgmr.msra.gmra.mxu0 %vm28859_vm0, %v95_v5  ;;  %22161 = vmatmul.mubr.msk.f32.vlgmr.msra.gmra.mxu1 %vm28859_vm0, %v95_v5  ;;  %29187 = vst [vmem:[#allocation4_spill] sm:$0xff] %v29186_v13  ;;  %v29189_v14 = vsel %vm23084_vm6, 4294967295, %v29188_v14  ;;  %vm23094_vm7 = vmand %vm28860_vm3, %vm52_vm1  ;;  %v23145_v19 = vcombine.high %v23135_v18, %v23135_v18  ;;  %v32_v21 = vld [vmem:[%s28854_s7] sm:$0xf]  ;;  %v23165_v23 = vcombine.high %v23152_v20, %v23152_v20  ;;  %v23181_v25 = vld [vmem:[%s28853_s1 + $0x18] sm:$0xff]  ;;  %vm1506_vm9 = vcmp.lt.s32.totalorder %v23253_v32, 33 }
   0x9   :  { %468 = vmatprep.subr.mxu0 %v22993_v0  ;;  %539 = vmatprep.subr.mxu1 %v22998_v1  ;;  %29190 = vst [vmem:[#allocation5_spill] sm:$0xff] %v29189_v14  ;;  %v29192_v15 = vsel %vm23094_vm7, 4294967295, %v29191_v15  ;;  %v23193_v27 = vcombine.high %v23181_v25, %v23181_v25  ;;  %vm47_vm8 = vmand %vm45_vm2, %vm46_vm4  ;;  %v23269_v40 = vsub.s32 1, %v386_v30  ;;  %v23280_v47 = vsub.s32 6, %v386_v30  ;;  %v1609_v54 = vld [vmem:[%s28855_s5] sm:$0xf] }
   0xa   :  { %469 = vmatpush1.msra.mxu0 %v23003_v2  ;;  %502 = vmatprep.mubr.f32.mxu0 %v28866_v3  ;;  %29193 = vst [vmem:[#allocation6_spill] sm:$0xff] %v29192_v15  ;;  %29195 = vst [vmem:[#allocation8_spill] sm:$0xff] %v23255_v33  ;;  %v22146_v36 = vsel %vm47_vm8, 1.0, %v28866_v3  ;;  %v23282_v48 = vsub.s32 0, %v386_v30  ;;  %v23284_v49 = vsub.s32 7, %v386_v30  ;;  %v23307_v59 = vsub.s32 4, %v386_v30 }
   0xb   :  { %540 = vmatpush1.msra.mxu1 %v23012_v4  ;;  %573 = vmatprep.mubr.f32.mxu1 %v28866_v3  ;;  %v23263_v37 = vrot.slane %v22146_v36, %v23257_v34  ;;  %v23266_v38 = vrot.slane %v22146_v36, %v23255_v33  ;;  %v23277_v45 = vrot.slane %v22146_v36, %v23269_v40  ;;  %v23309_v60 = vsub.s32 5, %v386_v30  ;;  %s22942_s27 = smov 97   ;;  %s22943_s28 = smov 96  }
   0xc   :  { %22163 = vmatmul.mubr.msk.f32.vlgmr.msra.gmra.mxu0 %vm28859_vm0, %v22162_v12  ;;  %22164 = vmatmul.mubr.msk.f32.vlgmr.msra.gmra.mxu1 %vm28859_vm0, %v22162_v12  ;;  %29200 = vst [vmem:[#allocation13_spill] sm:$0xff] %v23282_v48  ;;  %v23290_v52 = vrot.slane %v22146_v36, %v23280_v47  ;;  %v23298_v56 = vrot.slane %v22146_v36, %v23282_v48  ;;  %v71_v29 = vand.u32 1, %v23050_v10  ;;  %s22944_s30 = smov 95  }
   0xd   :  { %610 = vmatprep.subr.mxu0 %v23020_v6  ;;  %681 = vmatprep.subr.mxu1 %v23027_v7  ;;  %29197 = vst [vmem:[#allocation10_spill] sm:$0xff] %v23263_v37  ;;  %29198 = vst [vmem:[#allocation11_spill] sm:$0xff] %v23266_v38  ;;  %v23301_v57 = vrot.slane %v22146_v36, %v23284_v49  ;;  %v23323_v5 = vrot.slane %v22146_v36, %v23309_v60 }
   0xe   :  { %611 = vmatpush1.msra.mxu0 %v23032_v8  ;;  %644 = vmatprep.mubr.f32.mxu0 %v28866_v3  ;;  %29199 = vst [vmem:[#allocation12_spill] sm:$0xff] %v23277_v45  ;;  %29201 = vst [vmem:[#allocation14_spill] sm:$0xff] %v23290_v52  ;;  %vm23356_vm12 = vcmp.eq.s32.totalorder %v71_v29, 1  ;;  %vm23360_vm14 = vcmp.eq.s32.totalorder %v71_v29, 0 }
   0xf   :  { %682 = vmatpush1.msra.mxu1 %v23039_v9  ;;  %715 = vmatprep.mubr.f32.mxu1 %v28866_v3  ;;  %29202 = vst [vmem:[#allocation15_spill] sm:$0xff] %v23298_v56  ;;  %29203 = vst [vmem:[#allocation16_spill] sm:$0xff] %v23301_v57 }
  0x10   :  { %22165 = vmatmul.mubr.msk.f32.vlgmr.msra.gmra.mxu0 %vm28859_vm0, %v22162_v12  ;;  %22166 = vmatmul.mubr.msk.f32.vlgmr.msra.gmra.mxu1 %vm28859_vm0, %v22162_v12  ;;  %29205 = vst [vmem:[#allocation18_spill] sm:$0xff] %v23323_v5 }
  0x11   :  { %814 = vmatprep.subr.mxu0 %v22993_v0  ;;  %885 = vmatprep.subr.mxu1 %v22998_v1 }
  0x12   :  { %815 = vmatpush1.msra.mxu0 %v23003_v2  ;;  %848 = vmatprep.mubr.f32.mxu0 %v28866_v3 }
  0x13   :  { %886 = vmatpush1.msra.mxu1 %v23012_v4  ;;  %919 = vmatprep.mubr.f32.mxu1 %v28866_v3 }
  0x14   :  { %22168 = vmatmul.mubr.msk.f32.vlgmr.msra.gmra.mxu0 %vm28859_vm0, %v22167_v16  ;;  %22169 = vmatmul.mubr.msk.f32.vlgmr.msra.gmra.mxu1 %vm28859_vm0, %v22167_v16 }
  0x15   :  { %956 = vmatprep.subr.mxu0 %v23020_v6  ;;  %1027 = vmatprep.subr.mxu1 %v23027_v7 }
  0x16   :  { %957 = vmatpush1.msra.mxu0 %v23032_v8  ;;  %990 = vmatprep.mubr.f32.mxu0 %v28866_v3 }
  0x17   :  { %1028 = vmatpush1.msra.mxu1 %v23039_v9  ;;  %1061 = vmatprep.mubr.f32.mxu1 %v28866_v3 }
  0x18   :  { %22170 = vmatmul.mubr.msk.f32.vlgmr.msra.gmra.mxu0 %vm28859_vm0, %v22167_v16  ;;  %22171 = vmatmul.mubr.msk.f32.vlgmr.msra.gmra.mxu1 %vm28859_vm0, %v22167_v16 }
  0x19   :  { %1160 = vmatprep.subr.mxu0 %v22993_v0  ;;  %1231 = vmatprep.subr.mxu1 %v22998_v1 }
  0x1a   :  { %1161 = vmatpush1.msra.mxu0 %v23003_v2  ;;  %1194 = vmatprep.mubr.f32.mxu0 %v28866_v3 }
  0x1b   :  { %1232 = vmatpush1.msra.mxu1 %v23012_v4  ;;  %1265 = vmatprep.mubr.f32.mxu1 %v28866_v3  ;;  %v23320_v4 = vrot.slane %v22146_v36, %v23307_v59 }
  0x1c   :  { %22173 = vmatmul.mubr.msk.f32.vlgmr.msra.gmra.mxu0 %vm28859_vm0, %v22172_v17  ;;  %22174 = vmatmul.mubr.msk.f32.vlgmr.msra.gmra.mxu1 %vm28859_vm0, %v22172_v17 }
  0x1d   :  { %1302 = vmatprep.subr.mxu0 %v23020_v6  ;;  %1373 = vmatprep.subr.mxu1 %v23027_v7  ;;  %29204 = vst [vmem:[#allocation17_spill] sm:$0xff] %v23320_v4 }
  0x1e   :  { %1303 = vmatpush1.msra.mxu0 %v23032_v8  ;;  %1336 = vmatprep.mubr.f32.mxu0 %v28866_v3 }
  0x1f   :  { %1374 = vmatpush1.msra.mxu1 %v23039_v9  ;;  %1407 = vmatprep.mubr.f32.mxu1 %v28866_v3 }
  0x20   :  { %22175 = vmatmul.mubr.msk.f32.vlgmr.msra.gmra.mxu0 %vm28859_vm0, %v22172_v17  ;;  %22176 = vmatmul.mubr.msk.f32.vlgmr.msra.gmra.mxu1 %vm28859_vm0, %v22172_v17 }
  0x21   :  { %22891 = vset.pattern.permute.xlu0 %v22936_v22  ;;  %1583 = vrot.lane.b32.xlu1 %v23145_v19, %s22937_s16 }
  0x22   :  { %1473 = vperm.xlu0 %22891, %v32_v21   ;;  %1703 = vmatprep.mubr.f32.mxu0 %v28866_v3 }
  0x23   :  { %1774 = vmatprep.mubr.f32.mxu1 %v28866_v3  ;;  %22892 = vset.pattern.permute.xlu1 %v22936_v22 }
  0x25   :  { %1579 = vrot.lane.b32.xlu1 %v23165_v23, %s22937_s16 }
  0x26   :  { %1581 = vrot.lane.b32.xlu0 %v23135_v18, %s22937_s16 }
  0x29   :  { %1589 = vrot.lane.b32.xlu1 %v23181_v25, %s22937_s16 }
  0x2a   :  { %1577 = vrot.lane.b32.xlu0 %v23152_v20, %s22937_s16 }
  0x2d   :  { %1587 = vrot.lane.b32.xlu1 %v23187_v26, %s22937_s16 }
  0x2e   :  { %1591 = vrot.lane.b32.xlu0 %v23193_v27, %s22937_s16 }
  0x31   :  { %2633 = vrot.lane.b32.xlu1 %v23135_v18, %s22938_s21 }
  0x32   :  { %1585 = vrot.lane.b32.xlu0 %v23176_v24, %s22937_s16 }
  0x35   :  { %2631 = vrot.lane.b32.xlu1 %v23165_v23, %s22938_s21 }
  0x36   :  { %2635 = vrot.lane.b32.xlu0 %v23145_v19, %s22938_s21 }
  0x39   :  { %2641 = vrot.lane.b32.xlu1 %v23181_v25, %s22938_s21 }
  0x3a   :  { %2629 = vrot.lane.b32.xlu0 %v23152_v20, %s22938_s21 }
  0x3d   :  { %2639 = vrot.lane.b32.xlu1 %v23187_v26, %s22938_s21 }
  0x3e   :  { %2643 = vrot.lane.b32.xlu0 %v23193_v27, %s22938_s21 }
  0x41   :  { %3381 = vrot.lane.b32.xlu1 %v23135_v18, %s22939_s22 }
  0x42   :  { %2637 = vrot.lane.b32.xlu0 %v23176_v24, %s22938_s21 }
  0x45   :  { %3379 = vrot.lane.b32.xlu1 %v23165_v23, %s22939_s22 }
  0x46   :  { %3383 = vrot.lane.b32.xlu0 %v23145_v19, %s22939_s22 }
  0x49   :  { %3389 = vrot.lane.b32.xlu1 %v23181_v25, %s22939_s22 }
  0x4a   :  { %3377 = vrot.lane.b32.xlu0 %v23152_v20, %s22939_s22 }
  0x4d   :  { %3387 = vrot.lane.b32.xlu1 %v23187_v26, %s22939_s22 }
  0x4e   :  { %3391 = vrot.lane.b32.xlu0 %v23193_v27, %s22939_s22 }
  0x51   :  { %4129 = vrot.lane.b32.xlu1 %v23135_v18, %s22940_s23 }
  0x52   :  { %3385 = vrot.lane.b32.xlu0 %v23176_v24, %s22939_s22 }
  0x55   :  { %4127 = vrot.lane.b32.xlu1 %v23165_v23, %s22940_s23 }
  0x56   :  { %4131 = vrot.lane.b32.xlu0 %v23145_v19, %s22940_s23 }
  0x59   :  { %4137 = vrot.lane.b32.xlu1 %v23181_v25, %s22940_s23 }
  0x5a   :  { %4125 = vrot.lane.b32.xlu0 %v23152_v20, %s22940_s23 }
  0x5d   :  { %4135 = vrot.lane.b32.xlu1 %v23187_v26, %s22940_s23 }
  0x5e   :  { %4139 = vrot.lane.b32.xlu0 %v23193_v27, %s22940_s23 }
  0x62   :  { %4133 = vrot.lane.b32.xlu0 %v23176_v24, %s22940_s23 }
  0x93   :  { %v1584_v28 = vpop.permute.xlu1 %1583 }
  0x97   :  { %v1580_v31 = vpop.permute.xlu1 %1579 }
  0x9b   :  { %v1590_v39 = vpop.permute.xlu1 %1589 }
  0x9d   :  { %v23259_v35 = vpop.permute.xlu0 %1473 }
  0x9e   :  { %29196 = vst [vmem:[#allocation9_spill] sm:$0xff] %v23259_v35 }
  0x9f   :  { %v1588_v53 = vpop.permute.xlu1 %1587 }
  0xa0   :  { %v1594_v58 = vsel %vm1506_vm9, %v1588_v53, %v1590_v39 }
  0xa1   :  { %v1582_v41 = vpop.permute.xlu0 %1581  ;;  %v1607_v0 = vmul.f32 %v1594_v58, %v23290_v52 }
  0xa2   :  { %v1597_v42 = vsel %vm1506_vm9, %v1582_v41, %v1584_v28  ;;  %v1598_v43 = vsel %vm1506_vm9, %v1580_v31, %v1582_v41 }
  0xa3   :  { %v1604_v44 = vmul.f32 %v1597_v42, %v23263_v37  ;;  %v1603_v46 = vmul.f32 %v1598_v43, %v23266_v38 }
  0xa5   :  { %v1578_v50 = vpop.permute.xlu0 %1577  ;;  %22180 = vmatprep.subr.msk.mxu1 %vm1614_vm10, %v1604_v44 }
  0xa6   :  { %v1599_v51 = vsel %vm1506_vm9, %v1578_v50, %v1580_v31  ;;  %22181 = vmatpush1.msk.msra.mxu1 %vm1614_vm10, %v1603_v46 }
  0xa7   :  { %v1602_v55 = vmul.f32 %v1599_v51, %v23277_v45  ;;  %22182 = vmatmul.mubr.msk.f32.vlgmr.msra.gmra.mxu1 %vm1610_vm11, %v1609_v54 }
  0xa8   :  { %1916 = vmatprep.mubr.f32.mxu1 %v28866_v3 }
  0xa9   :  { %v1592_v61 = vpop.permute.xlu0 %1591  ;;  %22177 = vmatprep.subr.msk.mxu0 %vm1614_vm10, %v1602_v55 }
  0xaa   :  { %v1600_v62 = vsel %vm1506_vm9, %v1592_v61, %v1578_v50  ;;  %v1593_v63 = vsel %vm1506_vm9, %v1590_v39, %v1592_v61 }
  0xab   :  { %v1601_v1 = vmul.f32 %v1600_v62, %v23298_v56  ;;  %v1608_v2 = vmul.f32 %v1593_v63, %v23301_v57 }
  0xad   :  { %v1586_v6 = vpop.permute.xlu0 %1585  ;;  %22178 = vmatpush1.msk.msra.mxu0 %vm1614_vm10, %v1601_v1  ;;  %22186 = vmatprep.subr.msk.mxu1 %vm1614_vm10, %v1608_v2 }
  0xae   :  { %v1596_v7 = vsel %vm1506_vm9, %v1584_v28, %v1586_v6  ;;  %v1595_v8 = vsel %vm1506_vm9, %v1586_v6, %v1588_v53  ;;  %22179 = vmatmul.mubr.msk.f32.vlgmr.msra.gmra.mxu0 %vm1610_vm11, %v1609_v54  ;;  %22187 = vmatpush1.msk.msra.mxu1 %vm1614_vm10, %v1607_v0  ;;  %v69_v28 = vand.u32 1, %v23057_v11 }
  0xaf   :  { %v1605_v9 = vmul.f32 %v1596_v7, %v23320_v4  ;;  %v1606_v12 = vmul.f32 %v1595_v8, %v23323_v5  ;;  %22188 = vmatmul.mubr.msk.f32.vlgmr.msra.gmra.mxu1 %vm1610_vm11, %v1609_v54  ;;  %1845 = vmatprep.mubr.f32.mxu0 %v28866_v3 }
  0xb0   :  { %2085 = vmatprep.mubr.f32.mxu1 %v28866_v3  ;;  %vm70_vm13 = vcmp.eq.s32.totalorder %v69_v28, 0  ;;  %vm23364_vm15 = vcmp.eq.s32.totalorder %v69_v28, 1 }
  0xb1   :  { %22183 = vmatprep.subr.msk.mxu0 %vm1614_vm10, %v1606_v12  ;;  %vm77_vm8 = vmand %vm70_vm13, %vm23356_vm12 }
  0xb2   :  { %22184 = vmatpush1.msk.msra.mxu0 %vm1614_vm10, %v1605_v9  ;;  %vm73_vm0 = vmand %vm70_vm13, %vm23360_vm14  ;;  %v23379_v53 = vsel %vm77_vm8, 1.0, %v28866_v3 }
  0xb3   :  { %22185 = vmatmul.mubr.msk.f32.vlgmr.msra.gmra.mxu0 %vm1610_vm11, %v1609_v54  ;;  %vm81_vm3 = vmand %vm23364_vm15, %vm23360_vm14  ;;  %v23386_v58 = vsel %vm73_vm0, 1.0, %v28866_v3  ;;  %v23401_v0 = vrot.slane %v23379_v53, %v23282_v48  ;;  %v23405_v1 = vrot.slane %v23379_v53, %v23255_v33  ;;  %vm2250_vm0 = vcmp.lt.s32.totalorder %v23253_v32, 32 }
  0xb4   :  { %2014 = vmatprep.mubr.f32.mxu0 %v28866_v3  ;;  %v23393_v63 = vsel %vm81_vm3, 1.0, %v28866_v3  ;;  %vm84_vm13 = vmand %vm23364_vm15, %vm23356_vm12  ;;  %v23409_v2 = vrot.slane %v23386_v58, %v23255_v33  ;;  %v23413_v8 = vrot.slane %v23386_v58, %v23282_v48  ;;  %vm3746_vm3 = vcmp.lt.s32.totalorder %v23253_v32, 1 }
  0xb5   :  { %29212 = vst [vmem:[#allocation19_spill] sm:$0xff] %v23401_v0  ;;  %29213 = vst [vmem:[#allocation20_spill] sm:$0xff] %v23405_v1  ;;  %v23417_v9 = vrot.slane %v23393_v63, %v23282_v48  ;;  %v23421_v12 = vrot.slane %v23393_v63, %v23255_v33  ;;  %v23424_v28 = vsel %vm84_vm13, 1.0, %v28866_v3  ;;  %vm29367_vm12 = vcmask 64512  }
  0xb6   :  { %29214 = vst [vmem:[#allocation21_spill] sm:$0xff] %v23409_v2  ;;  %29215 = vst [vmem:[#allocation22_spill] sm:$0xff] %v23413_v8  ;;  %v23434_v10 = vrot.slane %v23424_v28, %v23282_v48  ;;  %v23438_v13 = vrot.slane %v23424_v28, %v23255_v33 }
  0xb7   :  { %29216 = vst [vmem:[#allocation23_spill] sm:$0xff] %v23417_v9  ;;  %29217 = vst [vmem:[#allocation24_spill] sm:$0xff] %v23421_v12 }
  0xb8   :  { %29218 = vst [vmem:[#allocation25_spill] sm:$0xff] %v23434_v10  ;;  %29219 = vst [vmem:[#allocation26_spill] sm:$0xff] %v23438_v13 }
  0xb9   :  { %vm29368_vm14 = vmmov %vm29367_vm12 }
  0xba   :  { %vm29369_vm15 = vmmov %vm29367_vm12 }
  0xbb   :  { %vm29370_vm8 = vmmov %vm29367_vm12 }
  0xbc   :  { %vm29371_vm13 = vmmov %vm29370_vm8 }
  0xc4   :  { %v166_v16 = vpop.f32.mrf.mxu0  ;;  %v237_v17 = vpop.f32.mrf.mxu1 }
  0xc5   :  { %v425_v3 = vmul.f32 %v23413_v8, %v166_v16  ;;  %v427_v4 = vmul.f32 %v23409_v2, %v237_v17 }
  0xc6   :  { %v23342_v21 = vpop.f32.mrf.mxu0  ;;  %v23344_v22 = vpop.f32.mrf.mxu1 }
  0xc8   :  { %v23348_v30 = vpop.f32.mrf.mxu0  ;;  %v23350_v31 = vpop.f32.mrf.mxu1 }
  0xca   :  { %v23352_v36 = vpop.f32.mrf.mxu0  ;;  %v23354_v39 = vpop.f32.mrf.mxu1 }
  0xcc   :  { %v504_v43 = vpop.f32.mrf.mxu0  ;;  %v575_v44 = vpop.f32.mrf.mxu1 }
  0xcd   :  { %v763_v42 = vmul.f32 %v23401_v0, %v504_v43  ;;  %v765_v46 = vmul.f32 %v23405_v1, %v575_v44 }
  0xce   :  { %v23372_v50 = vpop.f32.mrf.mxu0  ;;  %v577_v51 = vpop.f32.mrf.mxu1 }
  0xcf   :  { %v771_v52 = vadd.f32 %v763_v42, %v425_v3  ;;  %v773_v5 = vadd.f32 %v765_v46, %v427_v4  ;;  %v23491_v42 = vrot.slane %v23386_v58, %v23269_v40 }
  0xd0   :  { %v23381_v54 = vpop.f32.mrf.mxu0  ;;  %v23383_v55 = vpop.f32.mrf.mxu1 }
  0xd1   :  { %29227 = vst [vmem:[#allocation34_spill] sm:$0xff] %v23491_v42 }
  0xd2   :  { %v23388_v61 = vpop.f32.mrf.mxu0  ;;  %v23390_v62 = vpop.f32.mrf.mxu1 }
  0xd4   :  { %v850_v6 = vpop.f32.mrf.mxu0  ;;  %v921_v7 = vpop.f32.mrf.mxu1 }
  0xd5   :  { %v1109_v43 = vmul.f32 %v23417_v9, %v850_v6  ;;  %v1111_v44 = vmul.f32 %v23421_v12, %v921_v7  ;;  %v23452_v6 = vrot.slane %v23379_v53, %v23257_v34 }
  0xd6   :  { %v852_v29 = vpop.f32.mrf.mxu0  ;;  %v923_v41 = vpop.f32.mrf.mxu1 }
  0xd7   :  { %v1117_v56 = vadd.f32 %v1109_v43, %v771_v52  ;;  %v1119_v11 = vadd.f32 %v1111_v44, %v773_v5  ;;  %29220 = vst [vmem:[#allocation27_spill] sm:$0xff] %v23452_v6  ;;  %v23462_v52 = vrot.slane %v23386_v58, %v23257_v34  ;;  %v23486_v5 = vrot.slane %v23379_v53, %v23269_v40 }
  0xd8   :  { %v23428_v15 = vpop.f32.mrf.mxu0  ;;  %v23430_v14 = vpop.f32.mrf.mxu1  ;;  %v23505_v43 = vrot.slane %v23424_v28, %v23269_v40 }
  0xd9   :  { %29223 = vst [vmem:[#allocation30_spill] sm:$0xff] %v23462_v52  ;;  %29226 = vst [vmem:[#allocation33_spill] sm:$0xff] %v23486_v5  ;;  %v764_v46 = vmul.f32 %v23486_v5, %v23372_v50 }
  0xda   :  { %v23444_v0 = vpop.f32.mrf.mxu0  ;;  %v23446_v1 = vpop.f32.mrf.mxu1  ;;  %29229 = vst [vmem:[#allocation36_spill] sm:$0xff] %v23505_v43 }
  0xdc   :  { %v1196_v48 = vpop.f32.mrf.mxu0  ;;  %v1267_v57 = vpop.f32.mrf.mxu1 }
  0xdd   :  { %v1455_v33 = vmul.f32 %v23434_v10, %v1196_v48  ;;  %v1457_v16 = vmul.f32 %v23438_v13, %v1267_v57  ;;  %v23466_v48 = vrot.slane %v23393_v63, %v23257_v34  ;;  %v428_v57 = vmul.f32 %v23462_v52, %v23344_v22 }
  0xde   :  { %v23495_v22 = vrot.slane %v23393_v63, %v23269_v40 }
  0xdf   :  { %v1463_v8 = vadd.f32 %v1455_v33, %v1117_v56  ;;  %v1465_v17 = vadd.f32 %v1457_v16, %v1119_v11  ;;  %29224 = vst [vmem:[#allocation31_spill] sm:$0xff] %v23466_v48  ;;  %v766_v11 = vmul.f32 %v23452_v6, %v577_v51  ;;  %v23475_v33 = vrot.slane %v23424_v28, %v23257_v34  ;;  %v1269_v56 = vpop.f32.mrf.mxu1  ;;  %v1198_v16 = vpop.f32.mrf.mxu0 }
  0xe0   :  { %v1112_v4 = vmul.f32 %v23466_v48, %v923_v41  ;;  %29228 = vst [vmem:[#allocation35_spill] sm:$0xff] %v23495_v22  ;;  %v1456_v50 = vmul.f32 %v23505_v43, %v1198_v16 }
  0xe1   :  { %v23455_v7 = vadd.f32 %v23259_v35, %v1465_v17  ;;  %v23458_v3 = vadd.f32 %v23259_v35, %v1463_v8  ;;  %29225 = vst [vmem:[#allocation32_spill] sm:$0xff] %v23475_v33  ;;  %v774_v51 = vadd.f32 %v766_v11, %v428_v57  ;;  %v1458_v8 = vmul.f32 %v23475_v33, %v1269_v56  ;;  %v1338_v16 = vpop.f32.mrf.mxu0 }
  0xe2   :  { %v426_v17 = vmul.f32 %v23491_v42, %v23342_v21  ;;  %v1110_v11 = vmul.f32 %v23495_v22, %v852_v29  ;;  %v23524_v21 = vrot.slane %v23379_v53, %v23307_v59 }
  0xe3   :  { %29221 = vst [vmem:[#allocation28_spill] sm:$0xff] %v23455_v7  ;;  %29222 = vst [vmem:[#allocation29_spill] sm:$0xff] %v23458_v3  ;;  %1492 = vrot.lane.b32.xlu1 %v23455_v7, %s22937_s16  ;;  %1488 = vrot.lane.b32.xlu0 %v23458_v3, %s22937_s16  ;;  %v1120_v41 = vadd.f32 %v1112_v4, %v774_v51  ;;  %v23528_v51 = vrot.slane %v23386_v58, %v23307_v59 }
  0xe4   :  { %v772_v56 = vadd.f32 %v764_v46, %v426_v17  ;;  %29231 = vst [vmem:[#allocation38_spill] sm:$0xff] %v23524_v21  ;;  %v23542_v46 = vrot.slane %v23424_v28, %v23307_v59 }
  0xe5   :  { %v1466_v44 = vadd.f32 %v1458_v8, %v1120_v41  ;;  %29232 = vst [vmem:[#allocation39_spill] sm:$0xff] %v23528_v51  ;;  %v23532_v8 = vrot.slane %v23393_v63, %v23307_v59  ;;  %v767_v41 = vmul.f32 %v23524_v21, %v23381_v54  ;;  %v429_v17 = vmul.f32 %v23528_v51, %v23348_v30  ;;  %v1340_v51 = vpop.f32.mrf.mxu0 }
  0xe6   :  { %v1118_v4 = vadd.f32 %v1110_v11, %v772_v56  ;;  %29234 = vst [vmem:[#allocation41_spill] sm:$0xff] %v23542_v46  ;;  %v23557_v56 = vrot.slane %v23379_v53, %v23280_v47 }
  0xe7   :  { %2238 = vrot.lane.b32.xlu1 %v23455_v7, %s22938_s21  ;;  %2234 = vrot.lane.b32.xlu0 %v23458_v3, %s22938_s21  ;;  %v23516_v57 = vadd.f32 %v23259_v35, %v1466_v44  ;;  %29233 = vst [vmem:[#allocation40_spill] sm:$0xff] %v23532_v8  ;;  %v1113_v11 = vmul.f32 %v23532_v8, %v23428_v15 }
  0xe8   :  { %v1464_v29 = vadd.f32 %v1456_v50, %v1118_v4  ;;  %v775_v54 = vadd.f32 %v767_v41, %v429_v17  ;;  %29236 = vst [vmem:[#allocation43_spill] sm:$0xff] %v23557_v56  ;;  %v1459_v50 = vmul.f32 %v23542_v46, %v1338_v16  ;;  %v23562_v4 = vrot.slane %v23386_v58, %v23280_v47  ;;  %v1409_v17 = vpop.f32.mrf.mxu1 }
  0xe9   :  { %29230 = vst [vmem:[#allocation37_spill] sm:$0xff] %v23516_v57  ;;  %v23566_v15 = vrot.slane %v23393_v63, %v23280_v47  ;;  %v23576_v16 = vrot.slane %v23424_v28, %v23280_v47 }
  0xea   :  { %v23545_v44 = vadd.f32 %v23259_v35, %v1464_v29  ;;  %29237 = vst [vmem:[#allocation44_spill] sm:$0xff] %v23562_v4  ;;  %v1121_v30 = vadd.f32 %v1113_v11, %v775_v54  ;;  %v769_v29 = vmul.f32 %v23557_v56, %v23383_v55  ;;  %v431_v11 = vmul.f32 %v23562_v4, %v23350_v31 }
  0xeb   :  { %2986 = vrot.lane.b32.xlu1 %v23455_v7, %s22939_s22  ;;  %2982 = vrot.lane.b32.xlu0 %v23458_v3, %s22939_s22  ;;  %29238 = vst [vmem:[#allocation45_spill] sm:$0xff] %v23566_v15  ;;  %29239 = vst [vmem:[#allocation46_spill] sm:$0xff] %v23576_v16  ;;  %v1115_v54 = vmul.f32 %v23566_v15, %v23430_v14  ;;  %v23596_v14 = vrot.slane %v23379_v53, %v23284_v49 }
  0xec   :  { %29235 = vst [vmem:[#allocation42_spill] sm:$0xff] %v23545_v44  ;;  %v1467_v41 = vadd.f32 %v1459_v50, %v1121_v30  ;;  %v777_v46 = vadd.f32 %v769_v29, %v431_v11  ;;  %v1461_v50 = vmul.f32 %v23576_v16, %v1409_v17  ;;  %v23600_v29 = vrot.slane %v23386_v58, %v23284_v49 }
  0xed   :  { %29241 = vst [vmem:[#allocation48_spill] sm:$0xff] %v23596_v14  ;;  %v770_v17 = vmul.f32 %v23596_v14, %v23390_v62 }
  0xee   :  { %v23587_v55 = vadd.f32 %v23259_v35, %v1467_v41  ;;  %v1123_v30 = vadd.f32 %v1115_v54, %v777_v46  ;;  %29242 = vst [vmem:[#allocation49_spill] sm:$0xff] %v23600_v29  ;;  %v23604_v41 = vrot.slane %v23393_v63, %v23284_v49  ;;  %v23612_v46 = vrot.slane %v23379_v53, %v23309_v60 }
  0xef   :  { %3734 = vrot.lane.b32.xlu1 %v23455_v7, %s22940_s23  ;;  %3730 = vrot.lane.b32.xlu0 %v23458_v3, %s22940_s23  ;;  %v23621_v54 = vrot.slane %v23424_v28, %v23284_v49  ;;  %v432_v8 = vmul.f32 %v23600_v29, %v23354_v39  ;;  %v23631_v53 = vrot.slane %v23393_v63, %v23309_v60 }
  0xf0   :  { %29240 = vst [vmem:[#allocation47_spill] sm:$0xff] %v23587_v55  ;;  %v1469_v31 = vadd.f32 %v1461_v50, %v1123_v30  ;;  %29243 = vst [vmem:[#allocation50_spill] sm:$0xff] %v23604_v41  ;;  %v23625_v50 = vrot.slane %v23386_v58, %v23309_v60  ;;  %v1411_v30 = vpop.f32.mrf.mxu1  ;;  %v1116_v62 = vmul.f32 %v23604_v41, %v23446_v1  ;;  %v23641_v58 = vpop.permute.xlu1 %2633 }
  0xf1   :  { %29244 = vst [vmem:[#allocation51_spill] sm:$0xff] %v23612_v46  ;;  %29246 = vst [vmem:[#allocation53_spill] sm:$0xff] %v23621_v54  ;;  %v768_v39 = vmul.f32 %v23612_v46, %v23388_v61  ;;  %v778_v21 = vadd.f32 %v770_v17, %v432_v8  ;;  %v23647_v63 = vrot.slane %v23424_v28, %v23309_v60 }
  0xf2   :  { %v23617_v11 = vadd.f32 %v23259_v35, %v1469_v31  ;;  %29247 = vst [vmem:[#allocation54_spill] sm:$0xff] %v23625_v50  ;;  %29248 = vst [vmem:[#allocation55_spill] sm:$0xff] %v23631_v53  ;;  %v23639_v31 = vpop.permute.xlu0 %2635  ;;  %v1462_v1 = vmul.f32 %v23621_v54, %v1411_v30  ;;  %v430_v41 = vmul.f32 %v23625_v50, %v23352_v36 }
  0xf3   :  { %5116 = vrot.lane.b32.xlu1 %v23455_v7, %s22941_s26  ;;  %1494 = vrot.lane.b32.xlu0 %v23516_v57, %s22937_s16  ;;  %29249 = vst [vmem:[#allocation56_spill] sm:$0xff] %v23647_v63  ;;  %v1114_v29 = vmul.f32 %v23631_v53, %v23444_v0  ;;  %v1124_v14 = vadd.f32 %v1116_v62, %v778_v21 }
  0xf4   :  { %29245 = vst [vmem:[#allocation52_spill] sm:$0xff] %v23617_v11  ;;  %v776_v61 = vadd.f32 %v768_v39, %v430_v41  ;;  %v1460_v28 = vmul.f32 %v23647_v63, %v1340_v51  ;;  %v23661_v30 = vpop.permute.xlu1 %2631 }
  0xf5   :  { %v1470_v8 = vadd.f32 %v1462_v1, %v1124_v14 }
  0xf6   :  { %v23659_v17 = vpop.permute.xlu0 %2629  ;;  %v1122_v46 = vadd.f32 %v1114_v29, %v776_v61 }
  0xf7   :  { %5112 = vrot.lane.b32.xlu1 %v23458_v3, %s22941_s26  ;;  %2240 = vrot.lane.b32.xlu0 %v23516_v57, %s22938_s21  ;;  %v23668_v0 = vadd.f32 %v23259_v35, %v1470_v8 }
  0xf8   :  { %v1468_v36 = vadd.f32 %v1460_v28, %v1122_v46  ;;  %v23676_v51 = vpop.permute.xlu1 %2641 }
  0xf9   :  { %29250 = vst [vmem:[#allocation57_spill] sm:$0xff] %v23668_v0 }
  0xfa   :  { %v23674_v21 = vpop.permute.xlu0 %2643  ;;  %v23679_v14 = vadd.f32 %v23259_v35, %v1468_v36 }
  0xfb   :  { %2988 = vrot.lane.b32.xlu0 %v23516_v57, %s22939_s22  ;;  %1490 = vrot.lane.b32.xlu1 %v23545_v44, %s22937_s16 }
  0xfc   :  { %29251 = vst [vmem:[#allocation58_spill] sm:$0xff] %v23679_v14  ;;  %v23687_v41 = vpop.permute.xlu1 %2639 }
  0xfe   :  { %v23685_v29 = vpop.permute.xlu0 %2637 }
  0xff   :  { %3736 = vrot.lane.b32.xlu0 %v23516_v57, %s22940_s23  ;;  %2236 = vrot.lane.b32.xlu1 %v23545_v44, %s22938_s21 }
 0x100   :  { %v23699_v62 = vpop.permute.xlu1 %3381 }
 0x102   :  { %v23697_v46 = vpop.permute.xlu0 %3383 }
 0x103   :  { %5114 = vrot.lane.b32.xlu0 %v23545_v44, %s22941_s26  ;;  %2984 = vrot.lane.b32.xlu1 %v23545_v44, %s22939_s22 }
 0x104   :  { %v23707_v1 = vpop.permute.xlu1 %3379 }
 0x106   :  { %v23705_v39 = vpop.permute.xlu0 %3377 }
 0x107   :  { %3732 = vrot.lane.b32.xlu1 %v23545_v44, %s22940_s23  ;;  %1496 = vrot.lane.b32.xlu0 %v23587_v55, %s22937_s16 }
 0x108   :  { %v23719_v28 = vpop.permute.xlu1 %3389 }
 0x10a   :  { %v23717_v61 = vpop.permute.xlu0 %3391 }
 0x10b   :  { %5118 = vrot.lane.b32.xlu1 %v23516_v57, %s22941_s26  ;;  %2242 = vrot.lane.b32.xlu0 %v23587_v55, %s22938_s21 }
 0x10c   :  { %v23727_v36 = vpop.permute.xlu1 %3387 }
 0x10e   :  { %v23725_v8 = vpop.permute.xlu0 %3385 }
 0x10f   :  { %1500 = vrot.lane.b32.xlu1 %v23617_v11, %s22937_s16  ;;  %2990 = vrot.lane.b32.xlu0 %v23587_v55, %s22939_s22 }
 0x110   :  { %v23739_v53 = vpop.permute.xlu1 %4129 }
 0x111   :  { %29253 = vst [vmem:[#allocation60_spill] sm:$0xff] %v23739_v53 }
 0x112   :  { %v23733_v63 = vpop.permute.xlu0 %4131 }
 0x113   :  { %2246 = vrot.lane.b32.xlu1 %v23617_v11, %s22938_s21  ;;  %3738 = vrot.lane.b32.xlu0 %v23587_v55, %s22940_s23  ;;  %29252 = vst [vmem:[#allocation59_spill] sm:$0xff] %v23733_v63 }
 0x114   :  { %v23747_v54 = vpop.permute.xlu1 %4127 }
 0x115   :  { %29255 = vst [vmem:[#allocation62_spill] sm:$0xff] %v23747_v54 }
 0x116   :  { %v23745_v50 = vpop.permute.xlu0 %4125 }
 0x117   :  { %2994 = vrot.lane.b32.xlu1 %v23617_v11, %s22939_s22  ;;  %5120 = vrot.lane.b32.xlu0 %v23587_v55, %s22941_s26  ;;  %29254 = vst [vmem:[#allocation61_spill] sm:$0xff] %v23745_v50 }
 0x118   :  { %v23755_v22 = vpop.permute.xlu1 %4137 }
 0x119   :  { %29257 = vst [vmem:[#allocation64_spill] sm:$0xff] %v23755_v22 }
 0x11a   :  { %v23753_v43 = vpop.permute.xlu0 %4139 }
 0x11b   :  { %3742 = vrot.lane.b32.xlu1 %v23617_v11, %s22940_s23  ;;  %1502 = vrot.lane.b32.xlu0 %v23668_v0, %s22937_s16  ;;  %29256 = vst [vmem:[#allocation63_spill] sm:$0xff] %v23753_v43 }
 0x11c   :  { %v23767_v42 = vpop.permute.xlu1 %4135 }
 0x11d   :  { %29259 = vst [vmem:[#allocation66_spill] sm:$0xff] %v23767_v42  ;;  %v23840_v42 = vld [vmem:[%s28856_s4] sm:$0xf] }
 0x11e   :  { %v23765_v5 = vpop.permute.xlu0 %4133 }
 0x11f   :  { %2248 = vrot.lane.b32.xlu0 %v23668_v0, %s22938_s21  ;;  %1498 = vrot.lane.b32.xlu1 %v23679_v14, %s22937_s16  ;;  %29258 = vst [vmem:[#allocation65_spill] sm:$0xff] %v23765_v5 }
 0x123   :  { %5515 = vrot.lane.b32.xlu0 %v23176_v24, %s22941_s26  ;;  %5124 = vrot.lane.b32.xlu1 %v23617_v11, %s22941_s26 }
 0x127   :  { %5509 = vrot.lane.b32.xlu0 %v23165_v23, %s22941_s26  ;;  %2244 = vrot.lane.b32.xlu1 %v23679_v14, %s22938_s21 }
 0x12b   :  { %5521 = vrot.lane.b32.xlu0 %v23193_v27, %s22941_s26  ;;  %5513 = vrot.lane.b32.xlu1 %v23145_v19, %s22941_s26 }
 0x12f   :  { %2996 = vrot.lane.b32.xlu0 %v23668_v0, %s22939_s22  ;;  %5511 = vrot.lane.b32.xlu1 %v23135_v18, %s22941_s26 }
 0x133   :  { %5517 = vrot.lane.b32.xlu0 %v23187_v26, %s22941_s26  ;;  %5507 = vrot.lane.b32.xlu1 %v23152_v20, %s22941_s26 }
 0x137   :  { %5868 = vrot.lane.b32.xlu0 %v23587_v55, %s22942_s27  ;;  %2992 = vrot.lane.b32.xlu1 %v23679_v14, %s22939_s22 }
 0x13b   :  { %5862 = vrot.lane.b32.xlu0 %v23545_v44, %s22942_s27  ;;  %5519 = vrot.lane.b32.xlu1 %v23181_v25, %s22941_s26 }
 0x13f   :  { %3744 = vrot.lane.b32.xlu0 %v23668_v0, %s22940_s23  ;;  %5866 = vrot.lane.b32.xlu1 %v23516_v57, %s22942_s27 }
 0x143   :  { %6263 = vrot.lane.b32.xlu0 %v23176_v24, %s22942_s27  ;;  %5864 = vrot.lane.b32.xlu1 %v23455_v7, %s22942_s27 }
 0x147   :  { %6257 = vrot.lane.b32.xlu0 %v23165_v23, %s22942_s27  ;;  %3740 = vrot.lane.b32.xlu1 %v23679_v14, %s22940_s23 }
 0x14b   :  { %6269 = vrot.lane.b32.xlu0 %v23193_v27, %s22942_s27  ;;  %5860 = vrot.lane.b32.xlu1 %v23458_v3, %s22942_s27 }
 0x14f   :  { %6265 = vrot.lane.b32.xlu0 %v23187_v26, %s22942_s27  ;;  %5872 = vrot.lane.b32.xlu1 %v23617_v11, %s22942_s27 }
 0x153   :  { %6616 = vrot.lane.b32.xlu0 %v23587_v55, %s22943_s28  ;;  %6261 = vrot.lane.b32.xlu1 %v23145_v19, %s22942_s27 }
 0x155   :  { %v1493_v16 = vpop.permute.xlu1 %1492  ;;  %v23773_v15 = vpop.permute.xlu0 %1488 }
 0x157   :  { %6610 = vrot.lane.b32.xlu0 %v23545_v44, %s22943_s28  ;;  %6259 = vrot.lane.b32.xlu1 %v23135_v18, %s22942_s27 }
 0x159   :  { %v23779_v4 = vpop.permute.xlu1 %2238  ;;  %v23781_v56 = vpop.permute.xlu0 %2234 }
 0x15b   :  { %7011 = vrot.lane.b32.xlu0 %v23176_v24, %s22943_s28  ;;  %6255 = vrot.lane.b32.xlu1 %v23152_v20, %s22942_s27 }
 0x15d   :  { %v23787_v10 = vpop.permute.xlu1 %2986  ;;  %v23789_v9 = vpop.permute.xlu0 %2982 }
 0x15f   :  { %7005 = vrot.lane.b32.xlu0 %v23165_v23, %s22943_s28  ;;  %6267 = vrot.lane.b32.xlu1 %v23181_v25, %s22942_s27 }
 0x161   :  { %v23795_v35 = vpop.permute.xlu1 %3734  ;;  %v23797_v33 = vpop.permute.xlu0 %3730 }
 0x162   :  { %29260 = vst [vmem:[#allocation67_spill] sm:$0xff] %v23795_v35  ;;  %29261 = vst [vmem:[#allocation68_spill] sm:$0xff] %v23797_v33 }
 0x163   :  { %5126 = vrot.lane.b32.xlu0 %v23668_v0, %s22941_s26  ;;  %6614 = vrot.lane.b32.xlu1 %v23516_v57, %s22943_s28 }
 0x165   :  { %v23803_v13 = vpop.permute.xlu1 %5116  ;;  %v23805_v48 = vpop.permute.xlu0 %1494 }
 0x166   :  { %29262 = vst [vmem:[#allocation69_spill] sm:$0xff] %v23803_v13  ;;  %v1511_v52 = vsel %vm1506_vm9, %v1493_v16, %v23805_v48 }
 0x167   :  { %v1559_v12 = vmul.f32 %v23263_v37, %v1511_v52  ;;  %5122 = vrot.lane.b32.xlu0 %v23679_v14, %s22941_s26  ;;  %6612 = vrot.lane.b32.xlu1 %v23455_v7, %s22943_s28 }
 0x169   :  { %v23815_v6 = vpop.permute.xlu1 %5112  ;;  %22192 = vmatprep.subr.msk.mxu1 %vm1614_vm10, %v1559_v12  ;;  %v23818_v2 = vpop.permute.xlu0 %2240 }
 0x16a   :  { %29263 = vst [vmem:[#allocation70_spill] sm:$0xff] %v23815_v6 }
 0x16b   :  { %7017 = vrot.lane.b32.xlu0 %v23193_v27, %s22943_s28  ;;  %6608 = vrot.lane.b32.xlu1 %v23458_v3, %s22943_s28 }
 0x16d   :  { %v23824_v13 = vpop.permute.xlu0 %2988  ;;  %v1491_v52 = vpop.permute.xlu1 %1490 }
 0x16e   :  { %v1512_v37 = vsel %vm1506_vm9, %v1491_v52, %v1493_v16  ;;  %v1513_v6 = vsel %vm1506_vm9, %v23773_v15, %v1491_v52 }
 0x16f   :  { %v1557_v12 = vmul.f32 %v23277_v45, %v1513_v6  ;;  %v1558_v5 = vmul.f32 %v23266_v38, %v1512_v37  ;;  %7013 = vrot.lane.b32.xlu0 %v23187_v26, %s22943_s28  ;;  %6620 = vrot.lane.b32.xlu1 %v23617_v11, %s22943_s28  ;;  %v29264_v37 = vmov 0.0  }
 0x171   :  { %v23842_v16 = vpop.permute.xlu0 %3736  ;;  %22189 = vmatprep.subr.msk.mxu0 %vm1614_vm10, %v1557_v12  ;;  %22193 = vmatpush1.msk.msra.mxu1 %vm1614_vm10, %v1558_v5  ;;  %v2237_v6 = vpop.permute.xlu1 %2236 }
 0x172   :  { %22194 = vmatmul.mubr.msk.f32.vlgmr.msra.gmra.mxu1 %vm1610_vm11, %v23840_v42 }
 0x173   :  { %5874 = vrot.lane.b32.xlu0 %v23668_v0, %s22942_s27  ;;  %7009 = vrot.lane.b32.xlu1 %v23145_v19, %s22943_s28 }
 0x174   :  { %2227 = vmatprep.mubr.f32.mxu1 %v29264_v37 }
 0x175   :  { %v23853_v52 = vpop.permute.xlu0 %5114  ;;  %v23855_v38 = vpop.permute.xlu1 %2984 }
 0x176   :  { %29265 = vst [vmem:[#allocation71_spill] sm:$0xff] %v23853_v52 }
 0x177   :  { %5870 = vrot.lane.b32.xlu0 %v23679_v14, %s22942_s27  ;;  %7007 = vrot.lane.b32.xlu1 %v23135_v18, %s22943_s28 }
 0x179   :  { %v23861_v5 = vpop.permute.xlu1 %3732  ;;  %v1497_v12 = vpop.permute.xlu0 %1496 }
 0x17a   :  { %29266 = vst [vmem:[#allocation72_spill] sm:$0xff] %v23861_v5 }
 0x17b   :  { %7364 = vrot.lane.b32.xlu0 %v23587_v55, %s22944_s30  ;;  %7003 = vrot.lane.b32.xlu1 %v23152_v20, %s22943_s28 }
 0x17d   :  { %v23867_v45 = vpop.permute.xlu1 %5118  ;;  %v23869_v52 = vpop.permute.xlu0 %2242 }
 0x17e   :  { %29267 = vst [vmem:[#allocation73_spill] sm:$0xff] %v23867_v45 }
 0x17f   :  { %7358 = vrot.lane.b32.xlu0 %v23545_v44, %s22944_s30  ;;  %7015 = vrot.lane.b32.xlu1 %v23181_v25, %s22943_s28 }
 0x181   :  { %v1501_v22 = vpop.permute.xlu1 %1500  ;;  %v23875_v43 = vpop.permute.xlu0 %2990 }
 0x183   :  { %6622 = vrot.lane.b32.xlu0 %v23668_v0, %s22943_s28  ;;  %7362 = vrot.lane.b32.xlu1 %v23516_v57, %s22944_s30 }
 0x185   :  { %v23881_v55 = vpop.permute.xlu1 %2246  ;;  %v23883_v45 = vpop.permute.xlu0 %3738 }
 0x186   :  { %29268 = vst [vmem:[#allocation74_spill] sm:$0xff] %v23883_v45  ;;  %v29272_v45 = vld [vmem:[#allocation15_spill] sm:$0xff] }
 0x187   :  { %6618 = vrot.lane.b32.xlu0 %v23679_v14, %s22943_s28  ;;  %7360 = vrot.lane.b32.xlu1 %v23455_v7, %s22944_s30 }
 0x189   :  { %v23889_v44 = vpop.permute.xlu1 %2994  ;;  %v23891_v50 = vpop.permute.xlu0 %5120 }
 0x18a   :  { %29269 = vst [vmem:[#allocation75_spill] sm:$0xff] %v23891_v50  ;;  %v22147_v50 = vsel %vm45_vm2, 1.0, %v29264_v37  ;;  %vm2998_vm2 = vcmp.lt.s32.totalorder %v23253_v32, 31 }
 0x18b   :  { %7370 = vrot.lane.b32.xlu0 %v23668_v0, %s22944_s30  ;;  %7356 = vrot.lane.b32.xlu1 %v23458_v3, %s22944_s30  ;;  %v29273_v0 = vld [vmem:[#allocation16_spill] sm:$0xff]  ;;  %v29279_v3 = vld [vmem:[#allocation14_spill] sm:$0xff] }
 0x18d   :  { %v23897_v57 = vpop.permute.xlu1 %3742  ;;  %v1503_v54 = vpop.permute.xlu0 %1502 }
 0x18e   :  { %29270 = vst [vmem:[#allocation76_spill] sm:$0xff] %v23897_v57  ;;  %v1507_v53 = vsel %vm1506_vm9, %v1501_v22, %v1503_v54  ;;  %v1514_v7 = vsel %vm1506_vm9, %v1503_v54, %v23773_v15  ;;  %v1510_v15 = vsel %vm1506_vm9, %v23805_v48, %v1497_v12 }
 0x18f   :  { %v1556_v33 = vmul.f32 %v29272_v45, %v1514_v7  ;;  %v1563_v5 = vmul.f32 %v29273_v0, %v1507_v53  ;;  %7366 = vrot.lane.b32.xlu0 %v23679_v14, %s22944_s30  ;;  %7368 = vrot.lane.b32.xlu1 %v23617_v11, %s22944_s30  ;;  %v23920_v53 = vrot.slane %v22147_v50, %v23257_v34  ;;  %v29278_v11 = vld [vmem:[#allocation18_spill] sm:$0xff] }
 0x190   :  { %v2255_v0 = vsel %vm2250_vm0, %v23779_v4, %v23818_v2 }
 0x191   :  { %22190 = vmatpush1.msk.msra.mxu0 %vm1614_vm10, %v1556_v33  ;;  %22198 = vmatprep.subr.msk.mxu1 %vm1614_vm10, %v1563_v5  ;;  %v2249_v54 = vpop.permute.xlu0 %2248  ;;  %v1499_v7 = vpop.permute.xlu1 %1498  ;;  %29274 = vst [vmem:[#allocation77_spill] sm:$0xff] %v23920_v53  ;;  %v23933_v33 = vrot.slane %v22147_v50, %v23269_v40  ;;  %v29276_v5 = vld [vmem:[#allocation8_spill] sm:$0xff] }
 0x192   :  { %v1508_v45 = vsel %vm1506_vm9, %v1499_v7, %v1501_v22  ;;  %v1509_v48 = vsel %vm1506_vm9, %v1497_v12, %v1499_v7  ;;  %22191 = vmatmul.mubr.msk.f32.vlgmr.msra.gmra.mxu0 %vm1610_vm11, %v23840_v42  ;;  %v23936_v63 = vrot.slane %v22147_v50, %v29276_v5  ;;  %v2256_v22 = vsel %vm2250_vm0, %v2237_v6, %v23779_v4  ;;  %v29280_v7 = vld [vmem:[#allocation17_spill] sm:$0xff] }
 0x193   :  { %29275 = vst [vmem:[#allocation78_spill] sm:$0xff] %v23933_v33  ;;  %v1561_v14 = vmul.f32 %v29278_v11, %v1509_v48  ;;  %v1562_v57 = vmul.f32 %v29279_v3, %v1508_v45  ;;  %7759 = vrot.lane.b32.xlu0 %v23176_v24, %s22944_s30  ;;  %v2257_v12 = vsel %vm2250_vm0, %v23781_v56, %v2237_v6 }
 0x194   :  { %29277 = vst [vmem:[#allocation8_spill] sm:$0xff] %v23936_v63  ;;  %v1560_v35 = vmul.f32 %v29280_v7, %v1510_v15  ;;  %7757 = vrot.lane.b32.xlu1 %v23145_v19, %s22944_s30  ;;  %2156 = vmatprep.mubr.f32.mxu0 %v29264_v37  ;;  %v2303_v45 = vmul.f32 %v23920_v53, %v2255_v0  ;;  %v29281_v15 = vld [vmem:[#allocation13_spill] sm:$0xff] }
 0x195   :  { %v2251_v24 = vsel %vm2250_vm0, %v23881_v55, %v2249_v54  ;;  %v2258_v4 = vsel %vm2250_vm0, %v2249_v54, %v23781_v56  ;;  %v23959_v48 = vpop.permute.xlu0 %5515  ;;  %22195 = vmatprep.subr.msk.mxu0 %vm1614_vm10, %v1561_v14  ;;  %22199 = vmatpush1.msk.msra.mxu1 %vm1614_vm10, %v1562_v57  ;;  %v23963_v6 = vpop.permute.xlu1 %5124  ;;  %v23966_v3 = vrot.slane %v22147_v50, %v29281_v15 }
 0x196   :  { %v23969_v0 = vrot.slane %v22147_v50, %v23284_v49  ;;  %22196 = vmatpush1.msk.msra.mxu0 %vm1614_vm10, %v1560_v35  ;;  %22200 = vmatmul.mubr.msk.f32.vlgmr.msra.gmra.mxu1 %vm1610_vm11, %v23840_v42  ;;  %v2301_v56 = vmul.f32 %v23933_v33, %v2257_v12  ;;  %v2302_v54 = vmul.f32 %v23936_v63, %v2256_v22 }
 0x197   :  { %29282 = vst [vmem:[#allocation13_spill] sm:$0xff] %v23966_v3  ;;  %22205 = vmatprep.subr.msk.mxu1 %vm1614_vm10, %v2303_v45  ;;  %7753 = vrot.lane.b32.xlu0 %v23165_v23, %s22944_s30  ;;  %v2300_v57 = vmul.f32 %v23966_v3, %v2258_v4  ;;  %v23986_v35 = vrot.slane %v22147_v50, %v23309_v60 }
 0x198   :  { %29283 = vst [vmem:[#allocation79_spill] sm:$0xff] %v23969_v0  ;;  %v2307_v14 = vmul.f32 %v23969_v0, %v2251_v24  ;;  %7755 = vrot.lane.b32.xlu1 %v23135_v18, %s22944_s30  ;;  %22197 = vmatmul.mubr.msk.f32.vlgmr.msra.gmra.mxu0 %vm1610_vm11, %v23840_v42  ;;  %v23989_v22 = vrot.slane %v22147_v50, %v23280_v47  ;;  %v22201_v18 = vld [vmem:[%s28856_s4 + $0x4] sm:$0xf] }
 0x199   :  { %29284 = vst [vmem:[#allocation80_spill] sm:$0xff] %v23986_v35  ;;  %22202 = vmatprep.subr.msk.mxu0 %vm1614_vm10, %v2301_v56  ;;  %22206 = vmatpush1.msk.msra.mxu1 %vm1614_vm10, %v2302_v54  ;;  %v23993_v12 = vpop.permute.xlu0 %5509  ;;  %v2245_v45 = vpop.permute.xlu1 %2244  ;;  %v2254_v42 = vsel %vm2250_vm0, %v23818_v2, %v23869_v52  ;;  %v24011_v56 = vrot.slane %v22147_v50, %v23307_v59 }
 0x19a   :  { %29285 = vst [vmem:[#allocation81_spill] sm:$0xff] %v23989_v22  ;;  %22203 = vmatpush1.msk.msra.mxu0 %vm1614_vm10, %v2300_v57  ;;  %22211 = vmatprep.subr.msk.mxu1 %vm1614_vm10, %v2307_v14  ;;  %v2252_v24 = vsel %vm2250_vm0, %v2245_v45, %v23881_v55  ;;  %v2253_v4 = vsel %vm2250_vm0, %v23869_v52, %v2245_v45 }
 0x19b   :  { %29286 = vst [vmem:[#allocation82_spill] sm:$0xff] %v24011_v56  ;;  %2472 = vmatprep.mubr.f32.mxu1 %v29264_v37  ;;  %v2305_v54 = vmul.f32 %v23986_v35, %v2253_v4  ;;  %v2306_v2 = vmul.f32 %v23989_v22, %v2252_v24  ;;  %2401 = vmatprep.mubr.f32.mxu0 %v29264_v37  ;;  %v24062_v24 = vsel %vm23074_vm5, 1.0, %v29264_v37 }
 0x19c   :  { %v2649_v55 = vsel %vm2250_vm0, %v23641_v58, %v23639_v31  ;;  %22207 = vmatmul.mubr.msk.f32.vlgmr.msra.gmra.mxu1 %vm1610_vm11, %v22201_v18  ;;  %7765 = vrot.lane.b32.xlu0 %v23193_v27, %s22944_s30  ;;  %v2304_v50 = vmul.f32 %v24011_v56, %v2254_v42  ;;  %v2650_v14 = vsel %vm2250_vm0, %v23661_v30, %v23641_v58 }
 0x19d   :  { %7751 = vrot.lane.b32.xlu1 %v23152_v20, %s22944_s30  ;;  %22204 = vmatmul.mubr.msk.f32.vlgmr.msra.gmra.mxu0 %vm1610_vm11, %v22201_v18  ;;  %v24028_v52 = vpop.permute.xlu0 %5521  ;;  %v24030_v57 = vpop.permute.xlu1 %5513  ;;  %v2651_v45 = vsel %vm2250_vm0, %v23659_v17, %v23661_v30  ;;  %v2656_v20 = vmul.f32 %v2649_v55, %v23920_v53  ;;  %v2652_v42 = vsel %vm2250_vm0, %v23674_v21, %v23659_v17 }
 0x19e   :  { %22208 = vmatprep.subr.msk.mxu0 %vm1614_vm10, %v2305_v54  ;;  %22212 = vmatpush1.msk.msra.mxu1 %vm1614_vm10, %v2306_v2  ;;  %v2645_v58 = vsel %vm2250_vm0, %v23676_v51, %v23674_v21  ;;  %v2647_v30 = vsel %vm2250_vm0, %v23685_v29, %v23687_v41  ;;  %v2654_v21 = vmul.f32 %v2651_v45, %v23933_v33 }
 0x19f   :  { %2614 = vmatprep.mubr.f32.mxu1 %v29264_v37  ;;  %22209 = vmatpush1.msk.msra.mxu0 %vm1614_vm10, %v2304_v50  ;;  %v2655_v4 = vmul.f32 %v2650_v14, %v23936_v63  ;;  %v2646_v54 = vsel %vm2250_vm0, %v23687_v41, %v23676_v51  ;;  %v2653_v50 = vmul.f32 %v2652_v42, %v23966_v3 }
 0x1a0   :  { %2543 = vmatprep.mubr.f32.mxu0 %v29264_v37  ;;  %22213 = vmatmul.mubr.msk.f32.vlgmr.msra.gmra.mxu1 %vm1610_vm11, %v22201_v18  ;;  %v2648_v14 = vsel %vm2250_vm0, %v23639_v31, %v23685_v29  ;;  %v2660_v45 = vmul.f32 %v2645_v58, %v23969_v0  ;;  %v2658_v51 = vmul.f32 %v2647_v30, %v23986_v35  ;;  %v22214_v31 = vld [vmem:[%s28855_s5 + $0x4] sm:$0xf] }
 0x1a1   :  { %22218 = vmatprep.subr.msk.mxu1 %vm1614_vm10, %v2656_v20  ;;  %7761 = vrot.lane.b32.xlu0 %v23187_v26, %s22944_s30  ;;  %v2997_v2 = vpop.permute.xlu0 %2996  ;;  %v24073_v55 = vpop.permute.xlu1 %5511  ;;  %v3003_v41 = vsel %vm2998_vm2, %v23787_v10, %v23824_v13  ;;  %v2659_v29 = vmul.f32 %v2646_v54, %v23989_v22  ;;  %v2657_v20 = vmul.f32 %v2648_v14, %v24011_v56  ;;  %v29315_v22 = vld [vmem:[#allocation64_spill] sm:$0xff] }
 0x1a2   :  { %7763 = vrot.lane.b32.xlu1 %v23181_v25, %s22944_s30  ;;  %22210 = vmatmul.mubr.msk.f32.vlgmr.msra.gmra.mxu0 %vm1610_vm11, %v22201_v18  ;;  %v24098_v25 = vrot.slane %v24062_v24, %v23257_v34  ;;  %v3005_v18 = vsel %vm2998_vm2, %v23789_v9, %v23855_v38  ;;  %v24109_v42 = vrot.slane %v24062_v24, %v29281_v15 }
 0x1a3   :  { %22215 = vmatprep.subr.msk.mxu0 %vm1614_vm10, %v2654_v21  ;;  %22219 = vmatpush1.msk.msra.mxu1 %vm1614_vm10, %v2655_v4  ;;  %v24113_v58 = vrot.slane %v24062_v24, %v23269_v40  ;;  %v3004_v4 = vsel %vm2998_vm2, %v23855_v38, %v23787_v10  ;;  %v3006_v54 = vsel %vm2998_vm2, %v2997_v2, %v23789_v9 }
 0x1a4   :  { %29288 = vst [vmem:[#allocation4_spill] sm:$0xff] %v24098_v25  ;;  %22216 = vmatpush1.msk.msra.mxu0 %vm1614_vm10, %v2653_v50  ;;  %22224 = vmatprep.subr.msk.mxu1 %vm1614_vm10, %v2660_v45  ;;  %29289 = vst [vmem:[#allocation83_spill] sm:$0xff] %v24109_v42  ;;  %v3051_v21 = vmul.f32 %v24098_v25, %v3003_v41  ;;  %v24133_v50 = vrot.slane %v24062_v24, %v29276_v5 }
 0x1a5   :  { %29290 = vst [vmem:[#allocation84_spill] sm:$0xff] %v24113_v58  ;;  %2825 = vmatprep.mubr.f32.mxu1 %v29264_v37  ;;  %22221 = vmatprep.subr.msk.mxu0 %vm1614_vm10, %v2658_v51  ;;  %v24117_v30 = vpop.permute.xlu0 %5517  ;;  %v24119_v17 = vpop.permute.xlu1 %5507  ;;  %v3049_v14 = vmul.f32 %v24113_v58, %v3005_v18  ;;  %v2999_v45 = vsel %vm2998_vm2, %v23889_v44, %v2997_v2 }
 0x1a6   :  { %2754 = vmatprep.mubr.f32.mxu0 %v29264_v37  ;;  %22220 = vmatmul.mubr.msk.f32.vlgmr.msra.gmra.mxu1 %vm1610_vm11, %v22214_v31  ;;  %29291 = vst [vmem:[#allocation85_spill] sm:$0xff] %v24133_v50  ;;  %v24143_v10 = vrot.slane %v24062_v24, %v23284_v49  ;;  %v24147_v38 = vrot.slane %v24062_v24, %v23309_v60 }
 0x1a7   :  { %22225 = vmatpush1.msk.msra.mxu1 %vm1614_vm10, %v2659_v29  ;;  %22217 = vmatmul.mubr.msk.f32.vlgmr.msra.gmra.mxu0 %vm1610_vm11, %v22214_v31  ;;  %v24153_v9 = vrot.slane %v24062_v24, %v23280_v47  ;;  %v3050_v2 = vmul.f32 %v24133_v50, %v3004_v4  ;;  %v3048_v51 = vmul.f32 %v24109_v42, %v3006_v54 }
 0x1a8   :  { %29292 = vst [vmem:[#allocation86_spill] sm:$0xff] %v24143_v10  ;;  %29293 = vst [vmem:[#allocation87_spill] sm:$0xff] %v24147_v38  ;;  %22222 = vmatpush1.msk.msra.mxu0 %vm1614_vm10, %v2657_v20  ;;  %22231 = vmatprep.subr.msk.mxu1 %vm1614_vm10, %v3051_v21  ;;  %v3055_v18 = vmul.f32 %v24143_v10, %v2999_v45  ;;  %v3002_v4 = vsel %vm2998_vm2, %v23824_v13, %v23875_v43 }
 0x1a9   :  { %29294 = vst [vmem:[#allocation88_spill] sm:$0xff] %v24153_v9  ;;  %22228 = vmatprep.subr.msk.mxu0 %vm1614_vm10, %v3049_v14  ;;  %2967 = vmatprep.mubr.f32.mxu1 %v29264_v37  ;;  %v24159_v41 = vpop.permute.xlu0 %5868  ;;  %v2993_v29 = vpop.permute.xlu1 %2992  ;;  %v3397_v45 = vsel %vm2998_vm2, %v23699_v62, %v23697_v46  ;;  %v24187_v13 = vrot.slane %v24062_v24, %v23307_v59 }
 0x1aa   :  { %2896 = vmatprep.mubr.f32.mxu0 %v29264_v37  ;;  %22226 = vmatmul.mubr.msk.f32.vlgmr.msra.gmra.mxu1 %vm1610_vm11, %v22214_v31  ;;  %v3000_v20 = vsel %vm2998_vm2, %v2993_v29, %v23889_v44  ;;  %v3001_v21 = vsel %vm2998_vm2, %v23875_v43, %v2993_v29  ;;  %v22227_v44 = vld [vmem:[%s28856_s4 + $0x8] sm:$0xf]  ;;  %v3399_v43 = vsel %vm2998_vm2, %v23705_v39, %v23707_v1 }
 0x1ab   :  { %22232 = vmatpush1.msk.msra.mxu1 %vm1614_vm10, %v3050_v2  ;;  %22223 = vmatmul.mubr.msk.f32.vlgmr.msra.gmra.mxu0 %vm1610_vm11, %v22214_v31  ;;  %v3053_v54 = vmul.f32 %v24147_v38, %v3001_v21  ;;  %v3054_v14 = vmul.f32 %v24153_v9, %v3000_v20  ;;  %29295 = vst [vmem:[#allocation89_spill] sm:$0xff] %v24187_v13  ;;  %v24229_v21 = vsel %vm46_vm4, 1.0, %v29264_v37  ;;  %vm5128_vm4 = vcmp.lt.s32.totalorder %v23253_v32, 127 }
 0x1ac   :  { %22229 = vmatpush1.msk.msra.mxu0 %vm1614_vm10, %v3048_v51  ;;  %22237 = vmatprep.subr.msk.mxu1 %vm1614_vm10, %v3055_v18  ;;  %v3398_v24 = vsel %vm2998_vm2, %v23707_v1, %v23699_v62  ;;  %v3052_v51 = vmul.f32 %v24187_v13, %v3002_v4  ;;  %v3404_v29 = vmul.f32 %v3397_v45, %v24098_v25  ;;  %v29314_v25 = vld [vmem:[#allocation63_spill] sm:$0xff] }
 0x1ad   :  { %3220 = vmatprep.mubr.f32.mxu1 %v29264_v37  ;;  %3149 = vmatprep.mubr.f32.mxu0 %v29264_v37  ;;  %v24197_v31 = vpop.permute.xlu0 %5862  ;;  %v24199_v2 = vpop.permute.xlu1 %5519  ;;  %v3400_v18 = vsel %vm2998_vm2, %v23717_v61, %v23705_v39  ;;  %v3393_v20 = vsel %vm2998_vm2, %v23719_v28, %v23717_v61  ;;  %v3402_v62 = vmul.f32 %v3399_v43, %v24113_v58  ;;  %v29310_v58 = vld [vmem:[#allocation60_spill] sm:$0xff] }
 0x1ae   :  { %22233 = vmatmul.mubr.msk.f32.vlgmr.msra.gmra.mxu1 %vm1610_vm11, %v22227_v44  ;;  %22234 = vmatprep.subr.msk.mxu0 %vm1614_vm10, %v3053_v54  ;;  %v3395_v1 = vsel %vm2998_vm2, %v23725_v8, %v23727_v36  ;;  %v3403_v61 = vmul.f32 %v3398_v24, %v24133_v50  ;;  %v3394_v4 = vsel %vm2998_vm2, %v23727_v36, %v23719_v28  ;;  %v29297_v36 = vld [vmem:[#allocation67_spill] sm:$0xff] }
 0x1af   :  { %22230 = vmatmul.mubr.msk.f32.vlgmr.msra.gmra.mxu0 %vm1610_vm11, %v22227_v44  ;;  %22238 = vmatpush1.msk.msra.mxu1 %vm1614_vm10, %v3054_v14  ;;  %v3401_v45 = vmul.f32 %v3400_v18, %v24109_v42  ;;  %v3396_v43 = vsel %vm2998_vm2, %v23697_v46, %v23725_v8  ;;  %v3408_v24 = vmul.f32 %v3393_v20, %v24143_v10  ;;  %v22240_v46 = vld [vmem:[%s28855_s5 + $0x8] sm:$0xf]  ;;  %v29299_v18 = vld [vmem:[#allocation72_spill] sm:$0xff] }
 0x1b0   :  { %3362 = vmatprep.mubr.f32.mxu1 %v29264_v37  ;;  %22235 = vmatpush1.msk.msra.mxu0 %vm1614_vm10, %v3052_v51  ;;  %v3406_v28 = vmul.f32 %v3395_v1, %v24147_v38  ;;  %v3751_v51 = vsel %vm3746_vm3, %v29297_v36, %v23842_v16  ;;  %v3407_v8 = vmul.f32 %v3394_v4, %v24153_v9  ;;  %v29300_v20 = vld [vmem:[#allocation68_spill] sm:$0xff]  ;;  %v29309_v50 = vld [vmem:[#allocation59_spill] sm:$0xff] }
 0x1b1   :  { %3291 = vmatprep.mubr.f32.mxu0 %v29264_v37  ;;  %22244 = vmatprep.subr.msk.mxu1 %vm1614_vm10, %v3404_v29  ;;  %v3745_v54 = vpop.permute.xlu0 %3744  ;;  %v24238_v14 = vpop.permute.xlu1 %5866  ;;  %v24262_v29 = vrot.slane %v24229_v21, %v23257_v34  ;;  %v24273_v1 = vrot.slane %v24229_v21, %v29281_v15  ;;  %v4141_v35 = vsel %vm3746_vm3, %v29315_v22, %v29314_v25 }
 0x1b2   :  { %22239 = vmatmul.mubr.msk.f32.vlgmr.msra.gmra.mxu1 %vm1610_vm11, %v22227_v44  ;;  %22241 = vmatprep.subr.msk.mxu0 %vm1614_vm10, %v3402_v62  ;;  %v3753_v62 = vsel %vm3746_vm3, %v29300_v20, %v29299_v18 }
 0x1b3   :  { %22236 = vmatmul.mubr.msk.f32.vlgmr.msra.gmra.mxu0 %vm1610_vm11, %v22227_v44  ;;  %22245 = vmatpush1.msk.msra.mxu1 %vm1614_vm10, %v3403_v61  ;;  %29298 = vst [vmem:[#allocation2_spill] sm:$0xff] %v24262_v29  ;;  %v3405_v44 = vmul.f32 %v3396_v43, %v24187_v13  ;;  %29301 = vst [vmem:[#allocation67_spill] sm:$0xff] %v24273_v1  ;;  %v24277_v61 = vrot.slane %v24229_v21, %v23269_v40 }
 0x1b4   :  { %22242 = vmatpush1.msk.msra.mxu0 %vm1614_vm10, %v3401_v45  ;;  %22250 = vmatprep.subr.msk.mxu1 %vm1614_vm10, %v3408_v24  ;;  %v3799_v45 = vmul.f32 %v24262_v29, %v3751_v51  ;;  %v3752_v43 = vsel %vm3746_vm3, %v29299_v18, %v29297_v36  ;;  %v3754_v24 = vsel %vm3746_vm3, %v3745_v54, %v29300_v20  ;;  %v29304_v51 = vld [vmem:[#allocation76_spill] sm:$0xff] }
 0x1b5   :  { %29302 = vst [vmem:[#allocation72_spill] sm:$0xff] %v24277_v61  ;;  %3573 = vmatprep.mubr.f32.mxu1 %v29264_v37  ;;  %22247 = vmatprep.subr.msk.mxu0 %vm1614_vm10, %v3406_v28  ;;  %v24281_v4 = vpop.permute.xlu0 %6263  ;;  %v24283_v9 = vpop.permute.xlu1 %5864  ;;  %v24297_v28 = vrot.slane %v24229_v21, %v29276_v5  ;;  %v3797_v13 = vmul.f32 %v24277_v61, %v3753_v62 }
 0x1b6   :  { %3502 = vmatprep.mubr.f32.mxu0 %v29264_v37  ;;  %22246 = vmatmul.mubr.msk.f32.vlgmr.msra.gmra.mxu1 %vm1610_vm11, %v22240_v46  ;;  %v3747_v38 = vsel %vm3746_vm3, %v29304_v51, %v3745_v54  ;;  %v24307_v36 = vrot.slane %v24229_v21, %v23284_v49  ;;  %v24311_v18 = vrot.slane %v24229_v21, %v23309_v60 }
 0x1b7   :  { %29303 = vst [vmem:[#allocation68_spill] sm:$0xff] %v24297_v28  ;;  %22251 = vmatpush1.msk.msra.mxu1 %vm1614_vm10, %v3407_v8  ;;  %22243 = vmatmul.mubr.msk.f32.vlgmr.msra.gmra.mxu0 %vm1610_vm11, %v22240_v46  ;;  %v24317_v20 = vrot.slane %v24229_v21, %v23280_v47  ;;  %v3798_v54 = vmul.f32 %v24297_v28, %v3752_v43 }
 0x1b8   :  { %29305 = vst [vmem:[#allocation76_spill] sm:$0xff] %v24307_v36  ;;  %29306 = vst [vmem:[#allocation90_spill] sm:$0xff] %v24311_v18  ;;  %22248 = vmatpush1.msk.msra.mxu0 %vm1614_vm10, %v3405_v44  ;;  %22257 = vmatprep.subr.msk.mxu1 %vm1614_vm10, %v3799_v45  ;;  %v3796_v8 = vmul.f32 %v24273_v1, %v3754_v24  ;;  %v3803_v10 = vmul.f32 %v24307_v36, %v3747_v38  ;;  %v29308_v45 = vld [vmem:[#allocation74_spill] sm:$0xff] }
 0x1b9   :  { %29307 = vst [vmem:[#allocation91_spill] sm:$0xff] %v24317_v20  ;;  %22254 = vmatprep.subr.msk.mxu0 %vm1614_vm10, %v3797_v13  ;;  %3715 = vmatprep.mubr.f32.mxu1 %v29264_v37  ;;  %v24323_v62 = vpop.permute.xlu0 %6257  ;;  %v3741_v42 = vpop.permute.xlu1 %3740  ;;  %v3750_v13 = vsel %vm3746_vm3, %v23842_v16, %v29308_v45  ;;  %v24351_v16 = vrot.slane %v24229_v21, %v23307_v59 }
 0x1ba   :  { %3644 = vmatprep.mubr.f32.mxu0 %v29264_v37  ;;  %22252 = vmatmul.mubr.msk.f32.vlgmr.msra.gmra.mxu1 %vm1610_vm11, %v22240_v46  ;;  %v3748_v44 = vsel %vm3746_vm3, %v3741_v42, %v29304_v51  ;;  %v3749_v43 = vsel %vm3746_vm3, %v29308_v45, %v3741_v42  ;;  %v22253_v51 = vld [vmem:[%s28856_s4 + $0xc] sm:$0xf]  ;;  %v4145_v42 = vsel %vm3746_vm3, %v29310_v58, %v29309_v50 }
 0x1bb   :  { %22258 = vmatpush1.msk.msra.mxu1 %vm1614_vm10, %v3798_v54  ;;  %22249 = vmatmul.mubr.msk.f32.vlgmr.msra.gmra.mxu0 %vm1610_vm11, %v22240_v46  ;;  %v3801_v38 = vmul.f32 %v24311_v18, %v3749_v43  ;;  %v3802_v24 = vmul.f32 %v24317_v20, %v3748_v44  ;;  %29311 = vst [vmem:[#allocation74_spill] sm:$0xff] %v24351_v16  ;;  %v29312_v46 = vld [vmem:[#allocation62_spill] sm:$0xff]  ;;  %v29313_v54 = vld [vmem:[#allocation61_spill] sm:$0xff] }
 0x1bc   :  { %22255 = vmatpush1.msk.msra.mxu0 %vm1614_vm10, %v3796_v8  ;;  %22263 = vmatprep.subr.msk.mxu1 %vm1614_vm10, %v3803_v10  ;;  %v4147_v44 = vsel %vm3746_vm3, %v29313_v54, %v29312_v46  ;;  %v4146_v21 = vsel %vm3746_vm3, %v29312_v46, %v29310_v58  ;;  %v3800_v10 = vmul.f32 %v24351_v16, %v3750_v13  ;;  %v29316_v13 = vld [vmem:[#allocation66_spill] sm:$0xff] }
 0x1bd   :  { %3968 = vmatprep.mubr.f32.mxu1 %v29264_v37  ;;  %3897 = vmatprep.mubr.f32.mxu0 %v29264_v37  ;;  %v24361_v45 = vpop.permute.xlu0 %6269  ;;  %v24363_v43 = vpop.permute.xlu1 %5860  ;;  %v4152_v8 = vmul.f32 %v4145_v42, %v24262_v29  ;;  %v4148_v56 = vsel %vm3746_vm3, %v29314_v25, %v29313_v54  ;;  %v4150_v58 = vmul.f32 %v4147_v44, %v24277_v61 }
 0x1be   :  { %22259 = vmatmul.mubr.msk.f32.vlgmr.msra.gmra.mxu1 %vm1610_vm11, %v22253_v51  ;;  %22260 = vmatprep.subr.msk.mxu0 %vm1614_vm10, %v3801_v38  ;;  %v29317_v38 = vld [vmem:[#allocation65_spill] sm:$0xff]  ;;  %v4151_v46 = vmul.f32 %v4146_v21, %v24297_v28  ;;  %v4149_v54 = vmul.f32 %v4148_v56, %v24273_v1  ;;  %v4156_v44 = vmul.f32 %v4141_v35, %v24307_v36  ;;  %v22266_v35 = vld [vmem:[%s28855_s5 + $0xc] sm:$0xf]  ;;  %v29334_v28 = vld [vmem:[#allocation70_spill] sm:$0xff] }
 0x1bf   :  { %22256 = vmatmul.mubr.msk.f32.vlgmr.msra.gmra.mxu0 %vm1610_vm11, %v22253_v51  ;;  %22264 = vmatpush1.msk.msra.mxu1 %vm1614_vm10, %v3802_v24  ;;  %v4143_v42 = vsel %vm3746_vm3, %v29317_v38, %v29316_v13  ;;  %v4142_v61 = vsel %vm3746_vm3, %v29316_v13, %v29315_v22  ;;  %v4144_v21 = vsel %vm3746_vm3, %v29309_v50, %v29317_v38  ;;  %v29320_v38 = vld [vmem:[#allocation28_spill] sm:$0xff] }
 0x1c0   :  { %4110 = vmatprep.mubr.f32.mxu1 %v29264_v37  ;;  %22261 = vmatpush1.msk.msra.mxu0 %vm1614_vm10, %v3800_v10  ;;  %v4154_v10 = vmul.f32 %v4143_v42, %v24311_v18  ;;  %v4155_v22 = vmul.f32 %v4142_v61, %v24317_v20  ;;  %v29318_v61 = vld [vmem:[#allocation37_spill] sm:$0xff]  ;;  %v22279_v42 = vld [vmem:[%s28856_s4 + $0x10] sm:$0xf]  ;;  %v22906_v20 = vld [vmem:[%s28853_s1] sm:$0xff] }
 0x1c1   :  { %4039 = vmatprep.mubr.f32.mxu0 %v29264_v37  ;;  %22270 = vmatprep.subr.msk.mxu1 %vm1614_vm10, %v4152_v8  ;;  %v24393_v25 = vpop.permute.xlu0 %6265  ;;  %v24395_v24 = vpop.permute.xlu1 %5872  ;;  %v29319_v8 = vld [vmem:[#allocation42_spill] sm:$0xff] }
 0x1c2   :  { %22265 = vmatmul.mubr.msk.f32.vlgmr.msra.gmra.mxu1 %vm1610_vm11, %v22253_v51  ;;  %22267 = vmatprep.subr.msk.mxu0 %vm1614_vm10, %v4150_v58 }
 0x1c3   :  { %22262 = vmatmul.mubr.msk.f32.vlgmr.msra.gmra.mxu0 %vm1610_vm11, %v22253_v51  ;;  %22271 = vmatpush1.msk.msra.mxu1 %vm1614_vm10, %v4151_v46  ;;  %v4153_v51 = vmul.f32 %v4144_v21, %v24351_v16  ;;  %v29321_v46 = vld [vmem:[#allocation29_spill] sm:$0xff] }
 0x1c4   :  { %22268 = vmatpush1.msk.msra.mxu0 %vm1614_vm10, %v4149_v54  ;;  %22276 = vmatprep.subr.msk.mxu1 %vm1614_vm10, %v4156_v44  ;;  %v29322_v54 = vld [vmem:[#allocation57_spill] sm:$0xff]  ;;  %v29323_v44 = vld [vmem:[#allocation58_spill] sm:$0xff] }
 0x1c5   :  { %4321 = vmatprep.mubr.f32.mxu1 %v29264_v37  ;;  %22273 = vmatprep.subr.msk.mxu0 %vm1614_vm10, %v4154_v10  ;;  %v24420_v56 = vpop.permute.xlu0 %6616  ;;  %v24422_v50 = vpop.permute.xlu1 %6261 }
 0x1c6   :  { %4250 = vmatprep.mubr.f32.mxu0 %v29264_v37  ;;  %22272 = vmatmul.mubr.msk.f32.vlgmr.msra.gmra.mxu1 %vm1610_vm11, %v22266_v35 }
 0x1c7   :  { %22277 = vmatpush1.msk.msra.mxu1 %vm1614_vm10, %v4155_v22  ;;  %22269 = vmatmul.mubr.msk.f32.vlgmr.msra.gmra.mxu0 %vm1610_vm11, %v22266_v35  ;;  %v22150_v22 = vsel %vm52_vm1, 1.0, %v29264_v37  ;;  %vm5876_vm1 = vcmp.lt.s32.totalorder %v23253_v32, 97 }
 0x1c8   :  { %22274 = vmatpush1.msk.msra.mxu0 %vm1614_vm10, %v4153_v51  ;;  %22283 = vmatprep.subr.msk.mxu1 %vm1614_vm10, %v29318_v61  ;;  %v29325_v51 = vld [vmem:[#allocation47_spill] sm:$0xff]  ;;  %v24484_v39 = vrot.slane %v22150_v22, %v23269_v40 }
 0x1c9   :  { %22280 = vmatprep.subr.msk.mxu0 %vm1614_vm10, %v29319_v8  ;;  %4463 = vmatprep.mubr.f32.mxu1 %v29264_v37  ;;  %v24435_v58 = vpop.permute.xlu0 %6610  ;;  %v24437_v13 = vpop.permute.xlu1 %6259 }
 0x1ca   :  { %4392 = vmatprep.mubr.f32.mxu0 %v29264_v37  ;;  %22278 = vmatmul.mubr.msk.f32.vlgmr.msra.gmra.mxu1 %vm1610_vm11, %v22266_v35  ;;  %29327 = vst [vmem:[#allocation60_spill] sm:$0xff] %v24484_v39 }
 0x1cb   :  { %22284 = vmatpush1.msk.msra.mxu1 %vm1614_vm10, %v29320_v38  ;;  %22275 = vmatmul.mubr.msk.f32.vlgmr.msra.gmra.mxu0 %vm1610_vm11, %v22266_v35  ;;  %v29324_v35 = vld [vmem:[#allocation52_spill] sm:$0xff]  ;;  %v24478_v38 = vrot.slane %v22150_v22, %v23257_v34 }
 0x1cc   :  { %22281 = vmatpush1.msk.msra.mxu0 %vm1614_vm10, %v29321_v46  ;;  %22289 = vmatprep.subr.msk.mxu1 %vm1614_vm10, %v29322_v54  ;;  %v29328_v46 = vld [vmem:[#allocation75_spill] sm:$0xff]  ;;  %v29329_v54 = vld [vmem:[#allocation73_spill] sm:$0xff] }
 0x1cd   :  { %22286 = vmatprep.subr.msk.mxu0 %vm1614_vm10, %v29323_v44  ;;  %4642 = vmatprep.mubr.f32.mxu1 %v29264_v37  ;;  %v24454_v21 = vpop.permute.xlu0 %7011  ;;  %v24456_v10 = vpop.permute.xlu1 %6255  ;;  %29326 = vst [vmem:[#allocation59_spill] sm:$0xff] %v24478_v38  ;;  %v22905_v44 = vld [vmem:[%s28853_s1 + $0x8] sm:$0xff] }
 0x1ce   :  { %4571 = vmatprep.mubr.f32.mxu0 %v29264_v37  ;;  %22285 = vmatmul.mubr.msk.f32.vlgmr.msra.gmra.mxu1 %vm1610_vm11, %v22279_v42 }
 0x1cf   :  { %22290 = vmatpush1.msk.msra.mxu1 %vm1614_vm10, %v29324_v35  ;;  %22282 = vmatmul.mubr.msk.f32.vlgmr.msra.gmra.mxu0 %vm1610_vm11, %v22279_v42  ;;  %v29330_v35 = vld [vmem:[#allocation69_spill] sm:$0xff] }
 0x1d0   :  { %22287 = vmatpush1.msk.msra.mxu0 %vm1614_vm10, %v29325_v51  ;;  %4784 = vmatprep.mubr.f32.mxu1 %v29264_v37  ;;  %v29331_v51 = vld [vmem:[#allocation71_spill] sm:$0xff] }
 0x1d1   :  { %4713 = vmatprep.mubr.f32.mxu0 %v29264_v37  ;;  %22296 = vmatprep.subr.msk.mxu1 %vm1614_vm10, %v23145_v19  ;;  %v24473_v61 = vpop.permute.xlu0 %7005  ;;  %v24475_v8 = vpop.permute.xlu1 %6267  ;;  %v5132_v19 = vsel %vm5128_vm4, %v29329_v54, %v29328_v46  ;;  %v5134_v16 = vsel %vm5128_vm4, %v29331_v51, %v29330_v35  ;;  %v5135_v29 = vsel %vm5128_vm4, %v29334_v28, %v29331_v51 }
 0x1d2   :  { %22291 = vmatmul.mubr.msk.f32.vlgmr.msra.gmra.mxu1 %vm1610_vm11, %v22279_v42  ;;  %22293 = vmatprep.subr.msk.mxu0 %vm1614_vm10, %v23165_v23  ;;  %v22292_v23 = vld [vmem:[%s28855_s5 + $0x10] sm:$0xf]  ;;  %v5181_v1 = vmul.f32 %v24478_v38, %v5132_v19  ;;  %v5179_v0 = vmul.f32 %v24484_v39, %v5134_v16  ;;  %v22907_v19 = vld [vmem:[%s28853_s1 + $0x18] sm:$0xff] }
 0x1d3   :  { %22288 = vmatmul.mubr.msk.f32.vlgmr.msra.gmra.mxu0 %vm1610_vm11, %v22279_v42  ;;  %22297 = vmatpush1.msk.msra.mxu1 %vm1614_vm10, %v22905_v44  ;;  %v24508_v42 = vrot.slane %v22150_v22, %v29281_v15  ;;  %v24511_v44 = vrot.slane %v22150_v22, %v29276_v5 }
 0x1d4   :  { %22294 = vmatpush1.msk.msra.mxu0 %vm1614_vm10, %v22906_v20  ;;  %4955 = vmatprep.mubr.f32.mxu1 %v29264_v37  ;;  %v5133_v20 = vsel %vm5128_vm4, %v29330_v35, %v29329_v54  ;;  %v24535_v54 = vrot.slane %v22150_v22, %v23284_v49  ;;  %v24546_v35 = vrot.slane %v22150_v22, %v23309_v60 }
 0x1d5   :  { %29332 = vst [vmem:[#allocation62_spill] sm:$0xff] %v24508_v42  ;;  %29333 = vst [vmem:[#allocation61_spill] sm:$0xff] %v24511_v44  ;;  %22302 = vmatprep.subr.msk.mxu1 %vm1614_vm10, %v23193_v27  ;;  %4884 = vmatprep.mubr.f32.mxu0 %v29264_v37  ;;  %v5127_v18 = vpop.permute.xlu0 %5126  ;;  %v24516_v36 = vpop.permute.xlu1 %6614  ;;  %v5180_v51 = vmul.f32 %v24511_v44, %v5133_v20 }
 0x1d6   :  { %22298 = vmatmul.mubr.msk.f32.vlgmr.msra.gmra.mxu1 %vm1610_vm11, %v22292_v23  ;;  %22299 = vmatprep.subr.msk.mxu0 %vm1614_vm10, %v23187_v26  ;;  %v5136_v27 = vsel %vm5128_vm4, %v5127_v18, %v29334_v28  ;;  %29335 = vst [vmem:[#allocation63_spill] sm:$0xff] %v24535_v54  ;;  %v24543_v26 = vrot.slane %v22150_v22, %v23307_v59  ;;  %29337 = vst [vmem:[#allocation66_spill] sm:$0xff] %v24546_v35  ;;  %v22908_v28 = vld [vmem:[%s28853_s1 + $0x10] sm:$0xff] }
 0x1d7   :  { %22303 = vmatpush1.msk.msra.mxu1 %vm1614_vm10, %v22907_v19  ;;  %22295 = vmatmul.mubr.msk.f32.vlgmr.msra.gmra.mxu0 %vm1610_vm11, %v22292_v23  ;;  %v5129_v16 = vsel %vm5128_vm4, %v23963_v6, %v5127_v18  ;;  %v24558_v19 = vrot.slane %v22150_v22, %v23280_v47  ;;  %v5185_v3 = vmul.f32 %v24535_v54, %v5136_v27 }
 0x1d8   :  { %29336 = vst [vmem:[#allocation64_spill] sm:$0xff] %v24543_v26  ;;  %22300 = vmatpush1.msk.msra.mxu0 %vm1614_vm10, %v22908_v28  ;;  %22309 = vmatprep.subr.msk.mxu1 %vm1614_vm10, %v5181_v1  ;;  %v5178_v1 = vmul.f32 %v24508_v42, %v5135_v29  ;;  %v5526_v22 = vsel %vm5128_vm4, %v24030_v57, %v23959_v48 }
 0x1d9   :  { %29338 = vst [vmem:[#allocation65_spill] sm:$0xff] %v24558_v19  ;;  %22306 = vmatprep.subr.msk.mxu0 %vm1614_vm10, %v5179_v0  ;;  %5097 = vmatprep.mubr.f32.mxu1 %v29264_v37  ;;  %v5123_v63 = vpop.permute.xlu0 %5122  ;;  %v24563_v33 = vpop.permute.xlu1 %6612  ;;  %v5184_v20 = vmul.f32 %v24558_v19, %v5129_v16  ;;  %v22151_v16 = vsel %vm23084_vm6, 1.0, %v29264_v37  ;;  %vm6624_vm6 = vcmp.lt.s32.totalorder %v23253_v32, 96 }
 0x1da   :  { %5026 = vmatprep.mubr.f32.mxu0 %v29264_v37  ;;  %22304 = vmatmul.mubr.msk.f32.vlgmr.msra.gmra.mxu1 %vm1610_vm11, %v22292_v23  ;;  %v5130_v18 = vsel %vm5128_vm4, %v5123_v63, %v23963_v6  ;;  %v5131_v0 = vsel %vm5128_vm4, %v29328_v46, %v5123_v63  ;;  %v22305_v6 = vld [vmem:[%s28856_s4 + $0x14] sm:$0xf]  ;;  %v5528_v63 = vsel %vm5128_vm4, %v23993_v12, %v24073_v55 }
 0x1db   :  { %22310 = vmatpush1.msk.msra.mxu1 %vm1614_vm10, %v5180_v51  ;;  %22301 = vmatmul.mubr.msk.f32.vlgmr.msra.gmra.mxu0 %vm1610_vm11, %v22292_v23  ;;  %v5183_v29 = vmul.f32 %v24546_v35, %v5130_v18  ;;  %v5182_v46 = vmul.f32 %v24543_v26, %v5131_v0  ;;  %v5534_v51 = vmul.f32 %v5526_v22, %v24478_v38 }
 0x1dc   :  { %22307 = vmatpush1.msk.msra.mxu0 %vm1614_vm10, %v5178_v1  ;;  %5350 = vmatprep.mubr.f32.mxu1 %v29264_v37  ;;  %v5527_v1 = vsel %vm5128_vm4, %v24073_v55, %v24030_v57  ;;  %v5530_v18 = vsel %vm5128_vm4, %v24028_v52, %v24119_v17  ;;  %v5532_v57 = vmul.f32 %v5528_v63, %v24484_v39 }
 0x1dd   :  { %22315 = vmatprep.subr.msk.mxu1 %vm1614_vm10, %v5185_v3  ;;  %5279 = vmatprep.mubr.f32.mxu0 %v29264_v37  ;;  %v24594_v23 = vpop.permute.xlu0 %7017  ;;  %v24596_v27 = vpop.permute.xlu1 %6608  ;;  %v5529_v3 = vsel %vm5128_vm4, %v24119_v17, %v23993_v12  ;;  %v5524_v55 = vsel %vm5128_vm4, %v24117_v30, %v24199_v2  ;;  %v5533_v12 = vmul.f32 %v5527_v1, %v24511_v44 }
 0x1de   :  { %22311 = vmatmul.mubr.msk.f32.vlgmr.msra.gmra.mxu1 %vm1610_vm11, %v22305_v6  ;;  %22312 = vmatprep.subr.msk.mxu0 %vm1614_vm10, %v5183_v29  ;;  %v5525_v17 = vsel %vm5128_vm4, %v23959_v48, %v24117_v30  ;;  %v24632_v0 = vrot.slane %v22151_v16, %v23257_v34  ;;  %v5531_v29 = vmul.f32 %v5529_v3, %v24508_v42 }
 0x1df   :  { %22316 = vmatpush1.msk.msra.mxu1 %vm1614_vm10, %v5184_v20  ;;  %22308 = vmatmul.mubr.msk.f32.vlgmr.msra.gmra.mxu0 %vm1610_vm11, %v22305_v6  ;;  %v5538_v63 = vmul.f32 %v5530_v18, %v24535_v54  ;;  %v5523_v48 = vsel %vm5128_vm4, %v24199_v2, %v24028_v52  ;;  %v5536_v30 = vmul.f32 %v5524_v55, %v24546_v35  ;;  %v22318_v52 = vld [vmem:[%s28855_s5 + $0x14] sm:$0xf] }
 0x1e0   :  { %22322 = vmatprep.subr.msk.mxu1 %vm1614_vm10, %v5534_v51  ;;  %5492 = vmatprep.mubr.f32.mxu1 %v29264_v37  ;;  %29340 = vst [vmem:[#allocation37_spill] sm:$0xff] %v24632_v0  ;;  %v24654_v28 = vrot.slane %v22151_v16, %v23269_v40  ;;  %v24662_v2 = vrot.slane %v22151_v16, %v29276_v5 }
 0x1e1   :  { %22313 = vmatpush1.msk.msra.mxu0 %vm1614_vm10, %v5182_v46  ;;  %5421 = vmatprep.mubr.f32.mxu0 %v29264_v37  ;;  %v24636_v22 = vpop.permute.xlu0 %7013  ;;  %v24638_v20 = vpop.permute.xlu1 %6620  ;;  %v5880_v46 = vsel %vm5876_vm1, %v24238_v14, %v24159_v41  ;;  %v5882_v51 = vsel %vm5876_vm1, %v24197_v31, %v24283_v9  ;;  %v5535_v1 = vmul.f32 %v5525_v17, %v24543_v26  ;;  %v29470_v26 = vld [vmem:[#allocation26_spill] sm:$0xff] }
 0x1e2   :  { %22317 = vmatmul.mubr.msk.f32.vlgmr.msra.gmra.mxu1 %vm1610_vm11, %v22305_v6  ;;  %22319 = vmatprep.subr.msk.mxu0 %vm1614_vm10, %v5532_v57  ;;  %29341 = vst [vmem:[#allocation42_spill] sm:$0xff] %v24654_v28  ;;  %29342 = vst [vmem:[#allocation28_spill] sm:$0xff] %v24662_v2  ;;  %v24673_v3 = vrot.slane %v22151_v16, %v29281_v15  ;;  %v5929_v55 = vmul.f32 %v24632_v0, %v5880_v46 }
 0x1e3   :  { %22323 = vmatpush1.msk.msra.mxu1 %vm1614_vm10, %v5533_v12  ;;  %22314 = vmatmul.mubr.msk.f32.vlgmr.msra.gmra.mxu0 %vm1610_vm11, %v22305_v6  ;;  %v5537_v6 = vmul.f32 %v5523_v48, %v24558_v19  ;;  %v5881_v12 = vsel %vm5876_vm1, %v24283_v9, %v24238_v14  ;;  %v24695_v48 = vrot.slane %v22151_v16, %v23284_v49 }
 0x1e4   :  { %22328 = vmatprep.subr.msk.mxu1 %vm1614_vm10, %v5538_v63  ;;  %22320 = vmatpush1.msk.msra.mxu0 %vm1614_vm10, %v5531_v29  ;;  %29343 = vst [vmem:[#allocation29_spill] sm:$0xff] %v24673_v3  ;;  %v5927_v29 = vmul.f32 %v24654_v28, %v5882_v51  ;;  %v5883_v63 = vsel %vm5876_vm1, %v24363_v43, %v24197_v31 }
 0x1e5   :  { %5703 = vmatprep.mubr.f32.mxu1 %v29264_v37  ;;  %22325 = vmatprep.subr.msk.mxu0 %vm1614_vm10, %v5536_v30  ;;  %v5875_v18 = vpop.permute.xlu0 %5874  ;;  %v24677_v57 = vpop.permute.xlu1 %7009  ;;  %29344 = vst [vmem:[#allocation57_spill] sm:$0xff] %v24695_v48  ;;  %v24700_v9 = vrot.slane %v22151_v16, %v23307_v59  ;;  %v24703_v14 = vrot.slane %v22151_v16, %v23309_v60 }
 0x1e6   :  { %5632 = vmatprep.mubr.f32.mxu0 %v29264_v37  ;;  %22324 = vmatmul.mubr.msk.f32.vlgmr.msra.gmra.mxu1 %vm1610_vm11, %v22318_v52  ;;  %v5884_v17 = vsel %vm5876_vm1, %v5875_v18, %v24363_v43  ;;  %v5877_v31 = vsel %vm5876_vm1, %v24395_v24, %v5875_v18  ;;  %v5928_v43 = vmul.f32 %v24662_v2, %v5881_v12 }
 0x1e7   :  { %22329 = vmatpush1.msk.msra.mxu1 %vm1614_vm10, %v5537_v6  ;;  %22321 = vmatmul.mubr.msk.f32.vlgmr.msra.gmra.mxu0 %vm1610_vm11, %v22318_v52  ;;  %29345 = vst [vmem:[#allocation58_spill] sm:$0xff] %v24700_v9  ;;  %29346 = vst [vmem:[#allocation52_spill] sm:$0xff] %v24703_v14  ;;  %v24712_v30 = vrot.slane %v22151_v16, %v23280_v47  ;;  %v5933_v46 = vmul.f32 %v24695_v48, %v5884_v17 }
 0x1e8   :  { %22326 = vmatpush1.msk.msra.mxu0 %vm1614_vm10, %v5535_v1  ;;  %22335 = vmatprep.subr.msk.mxu1 %vm1614_vm10, %v5929_v55  ;;  %v5926_v1 = vmul.f32 %v24673_v3, %v5883_v63  ;;  %v6274_v55 = vsel %vm5876_vm1, %v24422_v50, %v24281_v4  ;;  %v29348_v63 = vld [vmem:[#allocation3_spill] sm:$0xff] }
 0x1e9   :  { %29347 = vst [vmem:[#allocation47_spill] sm:$0xff] %v24712_v30  ;;  %22332 = vmatprep.subr.msk.mxu0 %vm1614_vm10, %v5927_v29  ;;  %5845 = vmatprep.mubr.f32.mxu1 %v29264_v37  ;;  %v5871_v51 = vpop.permute.xlu0 %5870  ;;  %v24726_v18 = vpop.permute.xlu1 %7007  ;;  %v5932_v12 = vmul.f32 %v24712_v30, %v5877_v31  ;;  %vm29349_vm5 = vcmp.lt.s32.totalorder %v29348_v63, 31 }
 0x1ea   :  { %5774 = vmatprep.mubr.f32.mxu0 %v29264_v37  ;;  %22330 = vmatmul.mubr.msk.f32.vlgmr.msra.gmra.mxu1 %vm1610_vm11, %v22318_v52  ;;  %v5878_v6 = vsel %vm5876_vm1, %v5871_v51, %v24395_v24  ;;  %v5879_v16 = vsel %vm5876_vm1, %v24159_v41, %v5871_v51  ;;  %v22331_v24 = vld [vmem:[%s28856_s4 + $0x18] sm:$0xf]  ;;  %v6276_v41 = vsel %vm5876_vm1, %v24323_v62, %v24437_v13  ;;  %v22152_v31 = vsel %vm29349_vm5, 1.0, %v29264_v37  ;;  %vm29372_vm5 = vmmov %vm29370_vm8 }
 0x1eb   :  { %22336 = vmatpush1.msk.msra.mxu1 %vm1614_vm10, %v5928_v43  ;;  %22327 = vmatmul.mubr.msk.f32.vlgmr.msra.gmra.mxu0 %vm1610_vm11, %v22318_v52  ;;  %v5931_v17 = vmul.f32 %v24703_v14, %v5878_v6  ;;  %v5930_v29 = vmul.f32 %v24700_v9, %v5879_v16  ;;  %v6282_v43 = vmul.f32 %v6274_v55, %v24632_v0 }
 0x1ec   :  { %22333 = vmatpush1.msk.msra.mxu0 %vm1614_vm10, %v5926_v1  ;;  %6098 = vmatprep.mubr.f32.mxu1 %v29264_v37  ;;  %v6275_v51 = vsel %vm5876_vm1, %v24437_v13, %v24422_v50  ;;  %v6277_v1 = vsel %vm5876_vm1, %v24456_v10, %v24323_v62  ;;  %v6278_v6 = vsel %vm5876_vm1, %v24361_v45, %v24456_v10 }
 0x1ed   :  { %22341 = vmatprep.subr.msk.mxu1 %vm1614_vm10, %v5933_v46  ;;  %6027 = vmatprep.mubr.f32.mxu0 %v29264_v37  ;;  %v24748_v52 = vpop.permute.xlu0 %7364  ;;  %v24760_v46 = vpop.permute.xlu1 %7003  ;;  %v6280_v50 = vmul.f32 %v6276_v41, %v24654_v28  ;;  %v6272_v13 = vsel %vm5876_vm1, %v24393_v25, %v24475_v8  ;;  %v6273_v62 = vsel %vm5876_vm1, %v24281_v4, %v24393_v25 }
 0x1ee   :  { %22337 = vmatmul.mubr.msk.f32.vlgmr.msra.gmra.mxu1 %vm1610_vm11, %v22331_v24  ;;  %22338 = vmatprep.subr.msk.mxu0 %vm1614_vm10, %v5931_v17  ;;  %v6281_v10 = vmul.f32 %v6275_v51, %v24662_v2  ;;  %v24786_v16 = vrot.slane %v22152_v31, %v23257_v34  ;;  %v6286_v17 = vmul.f32 %v6278_v6, %v24695_v48  ;;  %v29469_v48 = vld [vmem:[#allocation31_spill] sm:$0xff] }
 0x1ef   :  { %22342 = vmatpush1.msk.msra.mxu1 %vm1614_vm10, %v5932_v12  ;;  %22334 = vmatmul.mubr.msk.f32.vlgmr.msra.gmra.mxu0 %vm1610_vm11, %v22331_v24  ;;  %v6279_v12 = vmul.f32 %v6277_v1, %v24673_v3  ;;  %v6271_v4 = vsel %vm5876_vm1, %v24475_v8, %v24361_v45  ;;  %v6284_v41 = vmul.f32 %v6272_v13, %v24703_v14  ;;  %v22344_v45 = vld [vmem:[%s28855_s5 + $0x18] sm:$0xf] }
 0x1f0   :  { %22348 = vmatprep.subr.msk.mxu1 %vm1614_vm10, %v6282_v43  ;;  %6240 = vmatprep.mubr.f32.mxu1 %v29264_v37  ;;  %29350 = vst [vmem:[#allocation75_spill] sm:$0xff] %v24786_v16  ;;  %v24808_v63 = vrot.slane %v22152_v31, %v23269_v40  ;;  %v24816_v8 = vrot.slane %v22152_v31, %v29276_v5 }
 0x1f1   :  { %22339 = vmatpush1.msk.msra.mxu0 %vm1614_vm10, %v5930_v29  ;;  %6169 = vmatprep.mubr.f32.mxu0 %v29264_v37  ;;  %v24790_v55 = vpop.permute.xlu0 %7358  ;;  %v24800_v25 = vpop.permute.xlu1 %7015  ;;  %v6628_v29 = vsel %vm6624_vm6, %v24516_v36, %v24420_v56  ;;  %v6630_v43 = vsel %vm6624_vm6, %v24435_v58, %v24563_v33  ;;  %v6283_v51 = vmul.f32 %v6273_v62, %v24700_v9 }
 0x1f2   :  { %22343 = vmatmul.mubr.msk.f32.vlgmr.msra.gmra.mxu1 %vm1610_vm11, %v22331_v24  ;;  %22345 = vmatprep.subr.msk.mxu0 %vm1614_vm10, %v6280_v50  ;;  %29351 = vst [vmem:[#allocation73_spill] sm:$0xff] %v24808_v63  ;;  %29352 = vst [vmem:[#allocation69_spill] sm:$0xff] %v24816_v8  ;;  %v24827_v1 = vrot.slane %v22152_v31, %v29281_v15  ;;  %v6677_v50 = vmul.f32 %v24786_v16, %v6628_v29 }
 0x1f3   :  { %22349 = vmatpush1.msk.msra.mxu1 %vm1614_vm10, %v6281_v10  ;;  %22340 = vmatmul.mubr.msk.f32.vlgmr.msra.gmra.mxu0 %vm1610_vm11, %v22331_v24  ;;  %v6285_v24 = vmul.f32 %v6271_v4, %v24712_v30  ;;  %v6629_v13 = vsel %vm6624_vm6, %v24563_v33, %v24516_v36  ;;  %v24849_v4 = vrot.slane %v22152_v31, %v23284_v49 }
 0x1f4   :  { %22354 = vmatprep.subr.msk.mxu1 %vm1614_vm10, %v6286_v17  ;;  %22346 = vmatpush1.msk.msra.mxu0 %vm1614_vm10, %v6279_v12  ;;  %29353 = vst [vmem:[#allocation71_spill] sm:$0xff] %v24827_v1  ;;  %v6675_v12 = vmul.f32 %v24808_v63, %v6630_v43  ;;  %v6631_v17 = vsel %vm6624_vm6, %v24596_v27, %v24435_v58 }
 0x1f5   :  { %6451 = vmatprep.mubr.f32.mxu1 %v29264_v37  ;;  %22351 = vmatprep.subr.msk.mxu0 %vm1614_vm10, %v6284_v41  ;;  %v6623_v6 = vpop.permute.xlu0 %6622  ;;  %v24841_v10 = vpop.permute.xlu1 %7362  ;;  %29354 = vst [vmem:[#allocation70_spill] sm:$0xff] %v24849_v4  ;;  %v24854_v33 = vrot.slane %v22152_v31, %v23307_v59  ;;  %v24857_v36 = vrot.slane %v22152_v31, %v23309_v60 }
 0x1f6   :  { %6380 = vmatprep.mubr.f32.mxu0 %v29264_v37  ;;  %22350 = vmatmul.mubr.msk.f32.vlgmr.msra.gmra.mxu1 %vm1610_vm11, %v22344_v45  ;;  %v6632_v62 = vsel %vm6624_vm6, %v6623_v6, %v24596_v27  ;;  %v6625_v58 = vsel %vm6624_vm6, %v24638_v20, %v6623_v6  ;;  %v6676_v27 = vmul.f32 %v24816_v8, %v6629_v13 }
 0x1f7   :  { %22355 = vmatpush1.msk.msra.mxu1 %vm1614_vm10, %v6285_v24  ;;  %22347 = vmatmul.mubr.msk.f32.vlgmr.msra.gmra.mxu0 %vm1610_vm11, %v22344_v45  ;;  %29355 = vst [vmem:[#allocation5_spill] sm:$0xff] %v24854_v33  ;;  %29356 = vst [vmem:[#allocation3_spill] sm:$0xff] %v24857_v36  ;;  %v24866_v41 = vrot.slane %v22152_v31, %v23280_v47  ;;  %v6681_v29 = vmul.f32 %v24849_v4, %v6632_v62 }
 0x1f8   :  { %22352 = vmatpush1.msk.msra.mxu0 %vm1614_vm10, %v6283_v51  ;;  %22361 = vmatprep.subr.msk.mxu1 %vm1614_vm10, %v6677_v50  ;;  %v6674_v51 = vmul.f32 %v24827_v1, %v6631_v17  ;;  %v7022_v50 = vsel %vm6624_vm6, %v24677_v57, %v24454_v21 }
 0x1f9   :  { %29357 = vst [vmem:[#allocation92_spill] sm:$0xff] %v24866_v41  ;;  %22358 = vmatprep.subr.msk.mxu0 %vm1614_vm10, %v6675_v12  ;;  %6593 = vmatprep.mubr.f32.mxu1 %v29264_v37  ;;  %v6619_v43 = vpop.permute.xlu0 %6618  ;;  %v7361_v6 = vpop.permute.xlu1 %7360  ;;  %v6680_v13 = vmul.f32 %v24866_v41, %v6625_v58  ;;  %v22153_v58 = vsel %vm23094_vm7, 1.0, %v29264_v37  ;;  %vm7372_vm7 = vcmp.lt.s32.totalorder %v23253_v32, 95 }
 0x1fa   :  { %6522 = vmatprep.mubr.f32.mxu0 %v29264_v37  ;;  %22356 = vmatmul.mubr.msk.f32.vlgmr.msra.gmra.mxu1 %vm1610_vm11, %v22344_v45  ;;  %v6626_v24 = vsel %vm6624_vm6, %v6619_v43, %v24638_v20  ;;  %v6627_v31 = vsel %vm6624_vm6, %v24420_v56, %v6619_v43  ;;  %v22357_v20 = vld [vmem:[%s28856_s4 + $0x1c] sm:$0xf]  ;;  %v7024_v56 = vsel %vm6624_vm6, %v24473_v61, %v24726_v18 }
 0x1fb   :  { %22362 = vmatpush1.msk.msra.mxu1 %vm1614_vm10, %v6676_v27  ;;  %22353 = vmatmul.mubr.msk.f32.vlgmr.msra.gmra.mxu0 %vm1610_vm11, %v22344_v45  ;;  %v6679_v62 = vmul.f32 %v24857_v36, %v6626_v24  ;;  %v6678_v12 = vmul.f32 %v24854_v33, %v6627_v31  ;;  %v7030_v27 = vmul.f32 %v7022_v50, %v24786_v16  ;;  %v29468_v16 = vld [vmem:[#allocation30_spill] sm:$0xff] }
 0x1fc   :  { %22359 = vmatpush1.msk.msra.mxu0 %vm1614_vm10, %v6674_v51  ;;  %6846 = vmatprep.mubr.f32.mxu1 %v29264_v37  ;;  %v7023_v43 = vsel %vm6624_vm6, %v24726_v18, %v24677_v57  ;;  %v7025_v51 = vsel %vm6624_vm6, %v24760_v46, %v24473_v61  ;;  %v7026_v24 = vsel %vm6624_vm6, %v24594_v23, %v24760_v46 }
 0x1fd   :  { %22367 = vmatprep.subr.msk.mxu1 %vm1614_vm10, %v6681_v29  ;;  %6775 = vmatprep.mubr.f32.mxu0 %v29264_v37  ;;  %v24900_v45 = vpop.permute.xlu0 %7370  ;;  %v7357_v29 = vpop.permute.xlu1 %7356  ;;  %v7028_v57 = vmul.f32 %v7024_v56, %v24808_v63  ;;  %v7020_v18 = vsel %vm6624_vm6, %v24636_v22, %v24800_v25  ;;  %v7021_v61 = vsel %vm6624_vm6, %v24454_v21, %v24636_v22 }
 0x1fe   :  { %22363 = vmatmul.mubr.msk.f32.vlgmr.msra.gmra.mxu1 %vm1610_vm11, %v22357_v20  ;;  %22364 = vmatprep.subr.msk.mxu0 %vm1614_vm10, %v6679_v62  ;;  %v7029_v46 = vmul.f32 %v7023_v43, %v24816_v8  ;;  %v24936_v31 = vrot.slane %v22153_v58, %v23257_v34  ;;  %v7034_v62 = vmul.f32 %v7026_v24, %v24849_v4  ;;  %v29466_v4 = vld [vmem:[#allocation27_spill] sm:$0xff] }
 0x1ff   :  { %22368 = vmatpush1.msk.msra.mxu1 %vm1614_vm10, %v6680_v13  ;;  %22360 = vmatmul.mubr.msk.f32.vlgmr.msra.gmra.mxu0 %vm1610_vm11, %v22357_v20  ;;  %v7027_v13 = vmul.f32 %v7025_v51, %v24827_v1  ;;  %v7019_v56 = vsel %vm6624_vm6, %v24800_v25, %v24594_v23  ;;  %v7032_v21 = vmul.f32 %v7020_v18, %v24857_v36  ;;  %v22370_v23 = vld [vmem:[%s28855_s5 + $0x1c] sm:$0xf]  ;;  %v29467_v36 = vld [vmem:[#allocation24_spill] sm:$0xff] }
 0x200   :  { %22374 = vmatprep.subr.msk.mxu1 %vm1614_vm10, %v7030_v27  ;;  %6988 = vmatprep.mubr.f32.mxu1 %v29264_v37  ;;  %29359 = vst [vmem:[#allocation6_spill] sm:$0xff] %v24936_v31  ;;  %v7376_v22 = vsel %vm7372_vm7, %v24841_v10, %v24748_v52  ;;  %v24962_v25 = vrot.slane %v22153_v58, %v29276_v5 }
 0x201   :  { %22365 = vmatpush1.msk.msra.mxu0 %vm1614_vm10, %v6678_v12  ;;  %6917 = vmatprep.mubr.f32.mxu0 %v29264_v37  ;;  %v7367_v50 = vpop.permute.xlu0 %7366  ;;  %v7369_v34 = vpop.permute.xlu1 %7368  ;;  %v24954_v12 = vrot.slane %v22153_v58, %v23269_v40  ;;  %v7378_v17 = vsel %vm7372_vm7, %v24790_v55, %v7361_v6  ;;  %v24968_v27 = vrot.slane %v22153_v58, %v29281_v15 }
 0x202   :  { %22369 = vmatmul.mubr.msk.f32.vlgmr.msra.gmra.mxu1 %vm1610_vm11, %v22357_v20  ;;  %22371 = vmatprep.subr.msk.mxu0 %vm1614_vm10, %v7028_v57  ;;  %29361 = vst [vmem:[#allocation94_spill] sm:$0xff] %v24962_v25  ;;  %v7031_v40 = vmul.f32 %v7021_v61, %v24854_v33  ;;  %v24975_v43 = vrot.slane %v22153_v58, %v23284_v49 }
 0x203   :  { %29360 = vst [vmem:[#allocation93_spill] sm:$0xff] %v24954_v12  ;;  %22375 = vmatpush1.msk.msra.mxu1 %vm1614_vm10, %v7029_v46  ;;  %22366 = vmatmul.mubr.msk.f32.vlgmr.msra.gmra.mxu0 %vm1610_vm11, %v22357_v20  ;;  %29362 = vst [vmem:[#allocation95_spill] sm:$0xff] %v24968_v27  ;;  %v7033_v20 = vmul.f32 %v7019_v56, %v24866_v41  ;;  %v7425_v15 = vmul.f32 %v24936_v31, %v7376_v22 }
 0x204   :  { %22380 = vmatprep.subr.msk.mxu1 %vm1614_vm10, %v7034_v62  ;;  %22372 = vmatpush1.msk.msra.mxu0 %vm1614_vm10, %v7027_v13  ;;  %29363 = vst [vmem:[#allocation96_spill] sm:$0xff] %v24975_v43  ;;  %v7377_v51 = vsel %vm7372_vm7, %v7361_v6, %v24841_v10  ;;  %v7379_v24 = vsel %vm7372_vm7, %v7357_v29, %v24790_v55 }
 0x205   :  { %7199 = vmatprep.mubr.f32.mxu1 %v29264_v37  ;;  %22377 = vmatprep.subr.msk.mxu0 %vm1614_vm10, %v7032_v21  ;;  %v24979_v5 = vpop.permute.xlu0 %7759  ;;  %v7423_v57 = vmul.f32 %v24954_v12, %v7378_v17  ;;  %v7380_v18 = vsel %vm7372_vm7, %v24900_v45, %v7357_v29  ;;  %v24995_v61 = vrot.slane %v22153_v58, %v23309_v60 }
 0x206   :  { %7128 = vmatprep.mubr.f32.mxu0 %v29264_v37  ;;  %22376 = vmatmul.mubr.msk.f32.vlgmr.msra.gmra.mxu1 %vm1610_vm11, %v22370_v23  ;;  %v7758_v49 = vpop.permute.xlu1 %7757  ;;  %v25000_v55 = vrot.slane %v22153_v58, %v23307_v59  ;;  %v7374_v10 = vsel %vm7372_vm7, %v7367_v50, %v7369_v34  ;;  %v7424_v6 = vmul.f32 %v24962_v25, %v7377_v51 }
 0x207   :  { %29364 = vst [vmem:[#allocation97_spill] sm:$0xff] %v24995_v61  ;;  %22381 = vmatpush1.msk.msra.mxu1 %vm1614_vm10, %v7033_v20  ;;  %22373 = vmatmul.mubr.msk.f32.vlgmr.msra.gmra.mxu0 %vm1610_vm11, %v22370_v23  ;;  %v7422_v29 = vmul.f32 %v24968_v27, %v7379_v24  ;;  %v25009_v60 = vrot.slane %v22153_v58, %v23280_v47 }
 0x208   :  { %29365 = vst [vmem:[#allocation98_spill] sm:$0xff] %v25000_v55  ;;  %22378 = vmatpush1.msk.msra.mxu0 %vm1614_vm10, %v7031_v40  ;;  %22387 = vmatprep.subr.msk.mxu1 %vm1614_vm10, %v7425_v15  ;;  %v7429_v46 = vmul.f32 %v24975_v43, %v7380_v18  ;;  %v7375_v13 = vsel %vm7372_vm7, %v24748_v52, %v7367_v50  ;;  %v22396_v18 = vld [vmem:[%s28855_s5 + $0x20] sm:$0xf] }
 0x209   :  { %29366 = vst [vmem:[#allocation99_spill] sm:$0xff] %v25009_v60  ;;  %22384 = vmatprep.subr.msk.mxu0 %vm1614_vm10, %v7423_v57  ;;  %7341 = vmatprep.mubr.f32.mxu1 %v29264_v37  ;;  %v7754_v59 = vpop.permute.xlu0 %7753  ;;  %v7373_v62 = vsel %vm7372_vm7, %v7369_v34, %v24900_v45  ;;  %v7427_v58 = vmul.f32 %v24995_v61, %v7374_v10  ;;  %v22383_v45 = vld [vmem:[%s28856_s4 + $0x20] sm:$0xf] }
 0x20a   :  { %7270 = vmatprep.mubr.f32.mxu0 %v29264_v37  ;;  %22382 = vmatmul.mubr.msk.f32.vlgmr.msra.gmra.mxu1 %vm1610_vm11, %v22370_v23  ;;  %v7756_v47 = vpop.permute.xlu1 %7755  ;;  %v7770_v56 = vsel %vm7372_vm7, %v7758_v49, %v24979_v5  ;;  %v7428_v34 = vmul.f32 %v25009_v60, %v7373_v62  ;;  %v7426_v22 = vmul.f32 %v25000_v55, %v7375_v13 }
 0x20b   :  { %22388 = vmatpush1.msk.msra.mxu1 %vm1614_vm10, %v7424_v6  ;;  %22379 = vmatmul.mubr.msk.f32.vlgmr.msra.gmra.mxu0 %vm1610_vm11, %v22370_v23  ;;  %v7772_v52 = vsel %vm7372_vm7, %v7754_v59, %v7756_v47  ;;  %v7771_v50 = vsel %vm7372_vm7, %v7756_v47, %v7758_v49  ;;  %v7778_v23 = vmul.f32 %v7770_v56, %v24936_v31  ;;  %v25092_v47 = vld [vmem:[%s28850_s0 + $0x58] sm:$0xff]  ;;  %v22411_v56 = vld [vmem:[%s28850_s0 + $0x50] sm:$0xff] }
 0x20c   :  { %22385 = vmatpush1.msk.msra.mxu0 %vm1614_vm10, %v7422_v29  ;;  %22393 = vmatprep.subr.msk.mxu1 %vm1614_vm10, %v7429_v46  ;;  %v7776_v21 = vmul.f32 %v7772_v52, %v24954_v12  ;;  %v7777_v40 = vmul.f32 %v7771_v50, %v24962_v25  ;;  %v25073_v29 = vld [vmem:[%s28853_s1 + $0x20] sm:$0xff]  ;;  %v22414_v50 = vld [vmem:[%s28850_s0 + $0x68] sm:$0xff] }
 0x20d   :  { %22390 = vmatprep.subr.msk.mxu0 %vm1614_vm10, %v7427_v58  ;;  %7594 = vmatprep.mubr.f32.mxu1 %v29264_v37  ;;  %v25099_v58 = vld [vmem:[%s28850_s0 + $0x48] sm:$0xff]  ;;  %v22409_v52 = vld [vmem:[%s28850_s0 + $0x40] sm:$0xff] }
 0x20e   :  { %7523 = vmatprep.mubr.f32.mxu0 %v29264_v37  ;;  %22389 = vmatmul.mubr.msk.f32.vlgmr.msra.gmra.mxu1 %vm1610_vm11, %v22383_v45  ;;  %v7766_v17 = vpop.permute.xlu0 %7765 }
 0x20f   :  { %22394 = vmatpush1.msk.msra.mxu1 %vm1614_vm10, %v7428_v34  ;;  %22386 = vmatmul.mubr.msk.f32.vlgmr.msra.gmra.mxu0 %vm1610_vm11, %v22383_v45  ;;  %v7752_v20 = vpop.permute.xlu1 %7751  ;;  %v22415_v34 = vld [vmem:[%s28850_s0 + $0x70] sm:$0xff] }
 0x210   :  { %22391 = vmatpush1.msk.msra.mxu0 %vm1614_vm10, %v7426_v22  ;;  %22400 = vmatprep.subr.msk.mxu1 %vm1614_vm10, %v7778_v23  ;;  %v7773_v15 = vsel %vm7372_vm7, %v7752_v20, %v7754_v59  ;;  %v7774_v51 = vsel %vm7372_vm7, %v7766_v17, %v7752_v20  ;;  %v22413_v22 = vld [vmem:[%s28850_s0 + $0x60] sm:$0xff]  ;;  %v25172_v20 = vcombine.high %v25073_v29, %v25073_v29 }
 0x211   :  { %7736 = vmatprep.mubr.f32.mxu1 %v29264_v37  ;;  %22397 = vmatprep.subr.msk.mxu0 %vm1614_vm10, %v7776_v21  ;;  %v7775_v24 = vmul.f32 %v7773_v15, %v24968_v27  ;;  %v7782_v49 = vmul.f32 %v7774_v51, %v24975_v43  ;;  %v22909_v21 = vld [vmem:[%s28851_s3] sm:$0xf]  ;;  %v22910_v23 = vld [vmem:[%s28851_s3 + $0x4] sm:$0xf]  ;;  %v25179_v15 = vld [vmem:[%s28853_s1 + $0x38] sm:$0xff] }
 0x212   :  { %7665 = vmatprep.mubr.f32.mxu0 %v29264_v37  ;;  %22395 = vmatmul.mubr.msk.f32.vlgmr.msra.gmra.mxu1 %vm1610_vm11, %v22383_v45  ;;  %v25189_v51 = vld [vmem:[%s28853_s1 + $0x28] sm:$0xff] }
 0x213   :  { %22401 = vmatpush1.msk.msra.mxu1 %vm1614_vm10, %v7777_v40  ;;  %22392 = vmatmul.mubr.msk.f32.vlgmr.msra.gmra.mxu0 %vm1610_vm11, %v22383_v45  ;;  %v7762_v57 = vpop.permute.xlu0 %7761  ;;  %v22416_v45 = vld [vmem:[%s28850_s0 + $0x78] sm:$0xff]  ;;  %v22912_v40 = vld [vmem:[%s28851_s3 + $0xc] sm:$0xf] }
 0x214   :  { %v7769_v10 = vsel %vm7372_vm7, %v24979_v5, %v7762_v57  ;;  %22398 = vmatpush1.msk.msra.mxu0 %vm1614_vm10, %v7775_v24  ;;  %7947 = vmatprep.mubr.f32.mxu1 %v29264_v37  ;;  %v7764_v6 = vpop.permute.xlu1 %7763  ;;  %v25194_v24 = vcombine.high %v25179_v15, %v25179_v15 }
 0x215   :  { %v7779_v59 = vmul.f32 %v7769_v10, %v25000_v55  ;;  %22406 = vmatprep.subr.msk.mxu1 %vm1614_vm10, %v7782_v49  ;;  %v7767_v46 = vsel %vm7372_vm7, %v7764_v6, %v7766_v17  ;;  %v7768_v5 = vsel %vm7372_vm7, %v7762_v57, %v7764_v6  ;;  %7876 = vmatprep.mubr.f32.mxu0 %v29264_v37  ;;  %v22911_v17 = vld [vmem:[%s28851_s3 + $0x8] sm:$0xf]  ;;  %v25204_v49 = vld [vmem:[%s28853_s1 + $0x30] sm:$0xff]  ;;  %v1776_v57 = vpop.f32.mrf.mxu1  ;;  %v1705_v10 = vpop.f32.mrf.mxu0 }
 0x216   :  { %v7780_v13 = vmul.f32 %v7768_v5, %v24995_v61  ;;  %v7781_v62 = vmul.f32 %v7767_v46, %v25009_v60  ;;  %22402 = vmatmul.mubr.msk.f32.vlgmr.msra.gmra.mxu1 %vm1610_vm11, %v22396_v18  ;;  %9392 = vrot.lane.b32.xlu1 %v25073_v29, %s22937_s16 }
 0x217   :  { %22399 = vmatmul.mubr.msk.f32.vlgmr.msra.gmra.mxu0 %vm1610_vm11, %v22396_v18  ;;  %8089 = vmatprep.mubr.f32.mxu1 %v29264_v37  ;;  %v25214_v6 = vpop.f32.mrf.mxu1  ;;  %v25220_v46 = vpop.f32.mrf.mxu0 }
 0x218   :  { %22403 = vmatprep.subr.msk.mxu0 %vm1614_vm10, %v7780_v13  ;;  %22407 = vmatpush1.msk.msra.mxu1 %vm1614_vm10, %v7781_v62  ;;  %29382 = vst [vmem:[#allocation100_spill] sm:$0xff] %v25214_v6  ;;  %29383 = vst [vmem:[#allocation101_spill] sm:$0xff] %v25220_v46 }
 0x219   :  { %22404 = vmatpush1.msk.msra.mxu0 %vm1614_vm10, %v7779_v59  ;;  %8018 = vmatprep.mubr.f32.mxu0 %v29264_v37  ;;  %v25218_v59 = vcombine.high %v25204_v49, %v25204_v49  ;;  %v1918_v5 = vpop.f32.mrf.mxu1  ;;  %v1847_v13 = vpop.f32.mrf.mxu0 }
 0x21a   :  { %22408 = vmatmul.mubr.msk.f32.vlgmr.msra.gmra.mxu1 %vm1610_vm11, %v22396_v18  ;;  %8244 = vmatprep.subr.mxu1 %v25092_v47 }
 0x21b   :  { %22405 = vmatmul.mubr.msk.f32.vlgmr.msra.gmra.mxu0 %vm1610_vm11, %v22396_v18  ;;  %8173 = vmatprep.subr.mxu0 %v25099_v58  ;;  %v25208_v18 = vcombine.high %v25189_v51, %v25189_v51  ;;  %v25230_v62 = vpop.f32.mrf.mxu1 }
 0x21c   :  { %8245 = vmatpush1.msra.mxu1 %v22411_v56  ;;  %8278 = vmatprep.mubr.f32.mxu1 %v29264_v37  ;;  %29384 = vst [vmem:[#allocation102_spill] sm:$0xff] %v25230_v62 }
 0x21d   :  { %8174 = vmatpush1.msra.mxu0 %v22409_v52  ;;  %8207 = vmatprep.mubr.f32.mxu0 %v29264_v37 }
 0x21e   :  { %22418 = vmatmul.mubr.msk.f32.vlgmr.msra.gmra.mxu1 %vm29367_vm12, %v22909_v21  ;;  %8386 = vmatprep.subr.mxu1 %v22416_v45  ;;  %vm29373_vm12 = vmmov %vm29372_vm5 }
 0x21f   :  { %22417 = vmatmul.mubr.msk.f32.vlgmr.msra.gmra.mxu0 %vm29368_vm14, %v22909_v21  ;;  %8315 = vmatprep.subr.mxu0 %v22414_v50  ;;  %vm29374_vm14 = vmmov %vm29372_vm5 }
 0x220   :  { %8387 = vmatpush1.msra.mxu1 %v22415_v34  ;;  %8420 = vmatprep.mubr.f32.mxu1 %v29264_v37 }
 0x221   :  { %8316 = vmatpush1.msra.mxu0 %v22413_v22  ;;  %8349 = vmatprep.mubr.f32.mxu0 %v29264_v37 }
 0x222   :  { %22420 = vmatmul.mubr.msk.f32.vlgmr.msra.gmra.mxu1 %vm29369_vm15, %v22909_v21  ;;  %8536 = vmatprep.subr.mxu1 %v25092_v47  ;;  %vm29375_vm15 = vmmov %vm29372_vm5 }
 0x223   :  { %22419 = vmatmul.mubr.msk.f32.vlgmr.msra.gmra.mxu0 %vm29370_vm8, %v22909_v21  ;;  %8465 = vmatprep.subr.mxu0 %v25099_v58  ;;  %vm29376_vm8 = vmmov %vm29372_vm5 }
 0x224   :  { %8537 = vmatpush1.msra.mxu1 %v22411_v56  ;;  %8570 = vmatprep.mubr.f32.mxu1 %v29264_v37 }
 0x225   :  { %8466 = vmatpush1.msra.mxu0 %v22409_v52  ;;  %8499 = vmatprep.mubr.f32.mxu0 %v29264_v37 }
 0x226   :  { %22422 = vmatmul.mubr.msk.f32.vlgmr.msra.gmra.mxu1 %vm29371_vm13, %v22910_v23  ;;  %8678 = vmatprep.subr.mxu1 %v22416_v45  ;;  %vm29377_vm13 = vmmov %vm29372_vm5 }
 0x227   :  { %22421 = vmatmul.mubr.msk.f32.vlgmr.msra.gmra.mxu0 %vm29372_vm5, %v22910_v23  ;;  %8607 = vmatprep.subr.mxu0 %v22414_v50 }
 0x228   :  { %8679 = vmatpush1.msra.mxu1 %v22415_v34  ;;  %8712 = vmatprep.mubr.f32.mxu1 %v29264_v37 }
 0x229   :  { %8608 = vmatpush1.msra.mxu0 %v22413_v22  ;;  %8641 = vmatprep.mubr.f32.mxu0 %v29264_v37 }
 0x22a   :  { %22424 = vmatmul.mubr.msk.f32.vlgmr.msra.gmra.mxu1 %vm29373_vm12, %v22910_v23  ;;  %8836 = vmatprep.subr.mxu1 %v25092_v47  ;;  %vm29378_vm12 = vmmov %vm29372_vm5 }
 0x22b   :  { %22423 = vmatmul.mubr.msk.f32.vlgmr.msra.gmra.mxu0 %vm29374_vm14, %v22910_v23  ;;  %8765 = vmatprep.subr.mxu0 %v25099_v58  ;;  %vm29379_vm14 = vmmov %vm29372_vm5 }
 0x22c   :  { %8837 = vmatpush1.msra.mxu1 %v22411_v56  ;;  %8870 = vmatprep.mubr.f32.mxu1 %v29264_v37 }
 0x22d   :  { %8766 = vmatpush1.msra.mxu0 %v22409_v52  ;;  %8799 = vmatprep.mubr.f32.mxu0 %v29264_v37 }
 0x22e   :  { %22426 = vmatmul.mubr.msk.f32.vlgmr.msra.gmra.mxu1 %vm29375_vm15, %v22911_v17  ;;  %8978 = vmatprep.subr.mxu1 %v22416_v45  ;;  %vm29380_vm15 = vmmov %vm29372_vm5 }
 0x22f   :  { %22425 = vmatmul.mubr.msk.f32.vlgmr.msra.gmra.mxu0 %vm29376_vm8, %v22911_v17  ;;  %8907 = vmatprep.subr.mxu0 %v22414_v50  ;;  %vm29381_vm8 = vmmov %vm29372_vm5 }
 0x230   :  { %8979 = vmatpush1.msra.mxu1 %v22415_v34  ;;  %9012 = vmatprep.mubr.f32.mxu1 %v29264_v37 }
 0x231   :  { %8908 = vmatpush1.msra.mxu0 %v22413_v22  ;;  %8941 = vmatprep.mubr.f32.mxu0 %v29264_v37 }
 0x232   :  { %22428 = vmatmul.mubr.msk.f32.vlgmr.msra.gmra.mxu1 %vm29377_vm13, %v22911_v17  ;;  %9136 = vmatprep.subr.mxu1 %v25092_v47  ;;  %v25232_v47 = vpop.f32.mrf.mxu0 }
 0x233   :  { %22427 = vmatmul.mubr.msk.f32.vlgmr.msra.gmra.mxu0 %vm29372_vm5, %v22911_v17  ;;  %9065 = vmatprep.subr.mxu0 %v25099_v58  ;;  %29385 = vst [vmem:[#allocation103_spill] sm:$0xff] %v25232_v47  ;;  %v2087_v58 = vpop.f32.mrf.mxu1 }
 0x234   :  { %9137 = vmatpush1.msra.mxu1 %v22411_v56  ;;  %9170 = vmatprep.mubr.f32.mxu1 %v29264_v37  ;;  %v2088_v17 = vadd.f32 %v2087_v58, %v1776_v57 }
 0x235   :  { %9066 = vmatpush1.msra.mxu0 %v22409_v52  ;;  %9099 = vmatprep.mubr.f32.mxu0 %v29264_v37  ;;  %v25242_v52 = vpop.f32.mrf.mxu1 }
 0x236   :  { %22430 = vmatmul.mubr.msk.f32.vlgmr.msra.gmra.mxu1 %vm29378_vm12, %v22912_v40  ;;  %9278 = vmatprep.subr.mxu1 %v22416_v45  ;;  %29386 = vst [vmem:[#allocation104_spill] sm:$0xff] %v25242_v52  ;;  %v29465_v52 = vld [vmem:[#allocation21_spill] sm:$0xff] }
 0x237   :  { %22429 = vmatmul.mubr.msk.f32.vlgmr.msra.gmra.mxu0 %vm29379_vm14, %v22912_v40  ;;  %9207 = vmatprep.subr.mxu0 %v22414_v50 }
 0x238   :  { %9279 = vmatpush1.msra.mxu1 %v22415_v34  ;;  %9312 = vmatprep.mubr.f32.mxu1 %v29264_v37 }
 0x239   :  { %9208 = vmatpush1.msra.mxu0 %v22413_v22  ;;  %9241 = vmatprep.mubr.f32.mxu0 %v29264_v37 }
 0x23a   :  { %22432 = vmatmul.mubr.msk.f32.vlgmr.msra.gmra.mxu1 %vm29380_vm15, %v22912_v40  ;;  %9394 = vrot.lane.b32.xlu0 %v25172_v20, %s22937_s16 }
 0x23b   :  { %22431 = vmatmul.mubr.msk.f32.vlgmr.msra.gmra.mxu0 %vm29381_vm8, %v22912_v40  ;;  %9583 = vmatprep.mubr.f32.mxu1 %v29264_v37 }
 0x23c   :  { %9512 = vmatprep.mubr.f32.mxu0 %v29264_v37  ;;  %9406 = vrot.lane.b32.xlu1 %v25194_v24, %s22937_s16 }
 0x23e   :  { %9396 = vrot.lane.b32.xlu0 %v25189_v51, %s22937_s16 }
 0x240   :  { %9398 = vrot.lane.b32.xlu1 %v25208_v18, %s22937_s16 }
 0x242   :  { %9400 = vrot.lane.b32.xlu0 %v25204_v49, %s22937_s16 }
 0x244   :  { %9402 = vrot.lane.b32.xlu1 %v25218_v59, %s22937_s16 }
 0x246   :  { %9404 = vrot.lane.b32.xlu0 %v25179_v15, %s22937_s16 }
 0x248   :  { %10388 = vrot.lane.b32.xlu1 %v25073_v29, %s22938_s21 }
 0x24a   :  { %10390 = vrot.lane.b32.xlu0 %v25172_v20, %s22938_s21 }
 0x24c   :  { %10402 = vrot.lane.b32.xlu1 %v25194_v24, %s22938_s21 }
 0x24e   :  { %10392 = vrot.lane.b32.xlu0 %v25189_v51, %s22938_s21 }
 0x250   :  { %10394 = vrot.lane.b32.xlu1 %v25208_v18, %s22938_s21 }
 0x252   :  { %v2016_v56 = vpop.f32.mrf.mxu0  ;;  %10396 = vrot.lane.b32.xlu0 %v25204_v49, %s22938_s21 }
 0x253   :  { %v2017_v22 = vadd.f32 %v2016_v56, %v1705_v10 }
 0x254   :  { %v25244_v45 = vpop.f32.mrf.mxu0  ;;  %10398 = vrot.lane.b32.xlu1 %v25218_v59, %s22938_s21 }
 0x255   :  { %29387 = vst [vmem:[#allocation105_spill] sm:$0xff] %v25244_v45 }
 0x256   :  { %v2229_v50 = vpop.f32.mrf.mxu1  ;;  %10400 = vrot.lane.b32.xlu0 %v25179_v15, %s22938_s21 }
 0x257   :  { %v2230_v61 = vadd.f32 %v2229_v50, %v1918_v5 }
 0x258   :  { %v2158_v34 = vpop.f32.mrf.mxu0  ;;  %v25250_v21 = vpop.f32.mrf.mxu1  ;;  %11084 = vrot.lane.b32.xlu1 %v25073_v29, %s22939_s22 }
 0x259   :  { %29388 = vst [vmem:[#allocation106_spill] sm:$0xff] %v25250_v21  ;;  %v2159_v10 = vadd.f32 %v2158_v34, %v1847_v13  ;;  %v29436_v21 = vld [vmem:[#allocation11_spill] sm:$0xff] }
 0x25a   :  { %v25252_v23 = vpop.f32.mrf.mxu0  ;;  %11086 = vrot.lane.b32.xlu0 %v25172_v20, %s22939_s22 }
 0x25b   :  { %29389 = vst [vmem:[#allocation107_spill] sm:$0xff] %v25252_v23 }
 0x25c   :  { %v2474_v40 = vpop.f32.mrf.mxu1  ;;  %11098 = vrot.lane.b32.xlu1 %v25194_v24, %s22939_s22 }
 0x25d   :  { %v2623_v55 = vadd.f32 %v2474_v40, %v2088_v17  ;;  %v2403_v60 = vpop.f32.mrf.mxu0 }
 0x25e   :  { %v2621_v43 = vadd.f32 %v2403_v60, %v2017_v22  ;;  %v25258_v27 = vpop.f32.mrf.mxu1  ;;  %11088 = vrot.lane.b32.xlu0 %v25189_v51, %s22939_s22 }
 0x25f   :  { %29390 = vst [vmem:[#allocation108_spill] sm:$0xff] %v25258_v27  ;;  %v25262_v56 = vpop.f32.mrf.mxu0 }
 0x260   :  { %29391 = vst [vmem:[#allocation109_spill] sm:$0xff] %v25262_v56  ;;  %v2616_v57 = vpop.f32.mrf.mxu1  ;;  %11090 = vrot.lane.b32.xlu1 %v25208_v18, %s22939_s22 }
 0x261   :  { %v2627_v58 = vadd.f32 %v2616_v57, %v2230_v61 }
 0x262   :  { %v2545_v25 = vpop.f32.mrf.mxu0  ;;  %v25266_v12 = vpop.f32.mrf.mxu1  ;;  %11092 = vrot.lane.b32.xlu0 %v25204_v49, %s22939_s22 }
 0x263   :  { %29392 = vst [vmem:[#allocation110_spill] sm:$0xff] %v25266_v12  ;;  %v2625_v60 = vadd.f32 %v2545_v25, %v2159_v10 }
 0x264   :  { %v25272_v22 = vpop.f32.mrf.mxu0  ;;  %11094 = vrot.lane.b32.xlu1 %v25218_v59, %s22939_s22 }
 0x265   :  { %29393 = vst [vmem:[#allocation111_spill] sm:$0xff] %v25272_v22 }
 0x266   :  { %v2827_v5 = vpop.f32.mrf.mxu1  ;;  %11096 = vrot.lane.b32.xlu0 %v25179_v15, %s22939_s22 }
 0x267   :  { %v2976_v13 = vadd.f32 %v2827_v5, %v2623_v55  ;;  %v2756_v50 = vpop.f32.mrf.mxu0 }
 0x268   :  { %v2974_v61 = vadd.f32 %v2756_v50, %v2621_v43  ;;  %v25278_v34 = vpop.f32.mrf.mxu1  ;;  %11780 = vrot.lane.b32.xlu1 %v25073_v29, %s22940_s23 }
 0x269   :  { %29394 = vst [vmem:[#allocation112_spill] sm:$0xff] %v25278_v34  ;;  %v25280_v17 = vpop.f32.mrf.mxu0 }
 0x26a   :  { %29395 = vst [vmem:[#allocation113_spill] sm:$0xff] %v25280_v17  ;;  %v2969_v25 = vpop.f32.mrf.mxu1  ;;  %11782 = vrot.lane.b32.xlu0 %v25172_v20, %s22940_s23 }
 0x26b   :  { %v2980_v40 = vadd.f32 %v2969_v25, %v2627_v58  ;;  %v2898_v10 = vpop.f32.mrf.mxu0 }
 0x26c   :  { %v2978_v57 = vadd.f32 %v2898_v10, %v2625_v60  ;;  %v25286_v55 = vpop.f32.mrf.mxu1  ;;  %11794 = vrot.lane.b32.xlu1 %v25194_v24, %s22940_s23 }
 0x26d   :  { %29396 = vst [vmem:[#allocation114_spill] sm:$0xff] %v25286_v55  ;;  %v25288_v5 = vpop.f32.mrf.mxu0 }
 0x26e   :  { %29397 = vst [vmem:[#allocation115_spill] sm:$0xff] %v25288_v5  ;;  %v3222_v31 = vpop.f32.mrf.mxu1  ;;  %11784 = vrot.lane.b32.xlu0 %v25189_v51, %s22940_s23 }
 0x26f   :  { %v3371_v43 = vadd.f32 %v3222_v31, %v2976_v13  ;;  %v3151_v50 = vpop.f32.mrf.mxu0 }
 0x270   :  { %v3369_v34 = vadd.f32 %v3151_v50, %v2974_v61  ;;  %v25294_v58 = vpop.f32.mrf.mxu1  ;;  %11786 = vrot.lane.b32.xlu1 %v25208_v18, %s22940_s23 }
 0x271   :  { %29398 = vst [vmem:[#allocation116_spill] sm:$0xff] %v25294_v58  ;;  %v25296_v25 = vpop.f32.mrf.mxu0 }
 0x272   :  { %29399 = vst [vmem:[#allocation117_spill] sm:$0xff] %v25296_v25  ;;  %v3364_v29 = vpop.f32.mrf.mxu1  ;;  %11788 = vrot.lane.b32.xlu0 %v25204_v49, %s22940_s23 }
 0x273   :  { %v3375_v60 = vadd.f32 %v3364_v29, %v2980_v40  ;;  %v3293_v10 = vpop.f32.mrf.mxu0 }
 0x274   :  { %v3373_v55 = vadd.f32 %v3293_v10, %v2978_v57  ;;  %v25302_v31 = vpop.f32.mrf.mxu1  ;;  %11790 = vrot.lane.b32.xlu1 %v25218_v59, %s22940_s23 }
 0x275   :  { %29400 = vst [vmem:[#allocation118_spill] sm:$0xff] %v25302_v31  ;;  %v25304_v13 = vpop.f32.mrf.mxu0 }
 0x276   :  { %29401 = vst [vmem:[#allocation119_spill] sm:$0xff] %v25304_v13  ;;  %v3575_v5 = vpop.f32.mrf.mxu1  ;;  %11792 = vrot.lane.b32.xlu0 %v25179_v15, %s22940_s23 }
 0x277   :  { %v3724_v61 = vadd.f32 %v3575_v5, %v3371_v43  ;;  %v3504_v50 = vpop.f32.mrf.mxu0 }
 0x278   :  { %v3722_v58 = vadd.f32 %v3504_v50, %v3369_v34  ;;  %v25310_v40 = vpop.f32.mrf.mxu1 }
 0x279   :  { %29402 = vst [vmem:[#allocation120_spill] sm:$0xff] %v25310_v40  ;;  %v25312_v29 = vpop.f32.mrf.mxu0 }
 0x27a   :  { %29403 = vst [vmem:[#allocation121_spill] sm:$0xff] %v25312_v29  ;;  %v3717_v25 = vpop.f32.mrf.mxu1 }
 0x27b   :  { %v3728_v57 = vadd.f32 %v3717_v25, %v3375_v60  ;;  %v3646_v10 = vpop.f32.mrf.mxu0 }
 0x27c   :  { %v3726_v31 = vadd.f32 %v3646_v10, %v3373_v55  ;;  %v25314_v17 = vpop.f32.mrf.mxu1 }
 0x27d   :  { %29404 = vst [vmem:[#allocation122_spill] sm:$0xff] %v25314_v17  ;;  %v25316_v13 = vpop.f32.mrf.mxu0 }
 0x27e   :  { %29405 = vst [vmem:[#allocation123_spill] sm:$0xff] %v25316_v13  ;;  %v3970_v22 = vpop.f32.mrf.mxu1 }
 0x27f   :  { %v4119_v12 = vadd.f32 %v3970_v22, %v3724_v61  ;;  %v3899_v5 = vpop.f32.mrf.mxu0 }
 0x280   :  { %v4117_v43 = vadd.f32 %v3899_v5, %v3722_v58  ;;  %v25318_v56 = vpop.f32.mrf.mxu1 }
 0x281   :  { %29406 = vst [vmem:[#allocation124_spill] sm:$0xff] %v25318_v56  ;;  %v25320_v27 = vpop.f32.mrf.mxu0 }
 0x282   :  { %29407 = vst [vmem:[#allocation125_spill] sm:$0xff] %v25320_v27  ;;  %v4112_v34 = vpop.f32.mrf.mxu1 }
 0x283   :  { %v4123_v50 = vadd.f32 %v4112_v34, %v3728_v57  ;;  %v4041_v40 = vpop.f32.mrf.mxu0 }
 0x284   :  { %v4121_v29 = vadd.f32 %v4041_v40, %v3726_v31  ;;  %v25322_v23 = vpop.f32.mrf.mxu1 }
 0x285   :  { %29408 = vst [vmem:[#allocation126_spill] sm:$0xff] %v25322_v23  ;;  %v25324_v25 = vpop.f32.mrf.mxu0 }
 0x286   :  { %29409 = vst [vmem:[#allocation127_spill] sm:$0xff] %v25324_v25  ;;  %v4323_v55 = vpop.f32.mrf.mxu1 }
 0x287   :  { %v4472_v60 = vadd.f32 %v4323_v55, %v4119_v12  ;;  %v4252_v10 = vpop.f32.mrf.mxu0 }
 0x288   :  { %v4470_v17 = vadd.f32 %v4252_v10, %v4117_v43  ;;  %v25326_v13 = vpop.f32.mrf.mxu1 }
 0x289   :  { %29410 = vst [vmem:[#allocation128_spill] sm:$0xff] %v25326_v13  ;;  %v25328_v22 = vpop.f32.mrf.mxu0 }
 0x28a   :  { %29411 = vst [vmem:[#allocation129_spill] sm:$0xff] %v25328_v22  ;;  %v4465_v58 = vpop.f32.mrf.mxu1 }
 0x28b   :  { %v4476_v61 = vadd.f32 %v4465_v58, %v4123_v50  ;;  %v4394_v5 = vpop.f32.mrf.mxu0 }
 0x28c   :  { %v4474_v56 = vadd.f32 %v4394_v5, %v4121_v29  ;;  %v25330_v27 = vpop.f32.mrf.mxu1 }
 0x28d   :  { %29412 = vst [vmem:[#allocation130_spill] sm:$0xff] %v25330_v27  ;;  %v25332_v57 = vpop.f32.mrf.mxu0 }
 0x28e   :  { %29413 = vst [vmem:[#allocation131_spill] sm:$0xff] %v25332_v57  ;;  %v4644_v31 = vpop.f32.mrf.mxu1 }
 0x28f   :  { %v4793_v40 = vadd.f32 %v4644_v31, %v4472_v60  ;;  %v4573_v34 = vpop.f32.mrf.mxu0 }
 0x290   :  { %v4791_v23 = vadd.f32 %v4573_v34, %v4470_v17  ;;  %v25334_v25 = vpop.f32.mrf.mxu1 }
 0x291   :  { %29414 = vst [vmem:[#allocation132_spill] sm:$0xff] %v25334_v25  ;;  %v25336_v12 = vpop.f32.mrf.mxu0 }
 0x292   :  { %29415 = vst [vmem:[#allocation133_spill] sm:$0xff] %v25336_v12  ;;  %v4786_v43 = vpop.f32.mrf.mxu1 }
 0x293   :  { %v4797_v55 = vadd.f32 %v4786_v43, %v4476_v61  ;;  %v4715_v10 = vpop.f32.mrf.mxu0 }
 0x294   :  { %v4795_v13 = vadd.f32 %v4715_v10, %v4474_v56  ;;  %v25338_v22 = vpop.f32.mrf.mxu1 }
 0x295   :  { %29416 = vst [vmem:[#allocation134_spill] sm:$0xff] %v25338_v22  ;;  %v25340_v50 = vpop.f32.mrf.mxu0 }
 0x296   :  { %29417 = vst [vmem:[#allocation135_spill] sm:$0xff] %v25340_v50  ;;  %v4957_v29 = vpop.f32.mrf.mxu1 }
 0x297   :  { %v5106_v58 = vadd.f32 %v4957_v29, %v4793_v40  ;;  %v4886_v5 = vpop.f32.mrf.mxu0 }
 0x298   :  { %v5104_v27 = vadd.f32 %v4886_v5, %v4791_v23  ;;  %v25342_v57 = vpop.f32.mrf.mxu1 }
 0x299   :  { %29418 = vst [vmem:[#allocation136_spill] sm:$0xff] %v25342_v57  ;;  %v25344_v60 = vpop.f32.mrf.mxu0 }
 0x29a   :  { %29419 = vst [vmem:[#allocation137_spill] sm:$0xff] %v25344_v60  ;;  %v5099_v17 = vpop.f32.mrf.mxu1 }
 0x29b   :  { %v5110_v31 = vadd.f32 %v5099_v17, %v4797_v55  ;;  %v5028_v34 = vpop.f32.mrf.mxu0 }
 0x29c   :  { %v5108_v25 = vadd.f32 %v5028_v34, %v4795_v13  ;;  %v25346_v12 = vpop.f32.mrf.mxu1 }
 0x29d   :  { %29420 = vst [vmem:[#allocation138_spill] sm:$0xff] %v25346_v12  ;;  %v25348_v61 = vpop.f32.mrf.mxu0 }
 0x29e   :  { %29421 = vst [vmem:[#allocation139_spill] sm:$0xff] %v25348_v61  ;;  %v5352_v56 = vpop.f32.mrf.mxu1 }
 0x29f   :  { %v5501_v43 = vadd.f32 %v5352_v56, %v5106_v58  ;;  %v5281_v10 = vpop.f32.mrf.mxu0 }
 0x2a0   :  { %v5499_v22 = vadd.f32 %v5281_v10, %v5104_v27  ;;  %v25350_v50 = vpop.f32.mrf.mxu1 }
 0x2a1   :  { %29422 = vst [vmem:[#allocation140_spill] sm:$0xff] %v25350_v50  ;;  %v25352_v40 = vpop.f32.mrf.mxu0  ;;  %v9393_v50 = vpop.permute.xlu1 %9392 }
 0x2a2   :  { %29423 = vst [vmem:[#allocation141_spill] sm:$0xff] %v25352_v40  ;;  %v5494_v23 = vpop.f32.mrf.mxu1 }
 0x2a3   :  { %v5505_v29 = vadd.f32 %v5494_v23, %v5110_v31  ;;  %v5423_v5 = vpop.f32.mrf.mxu0 }
 0x2a4   :  { %v5503_v57 = vadd.f32 %v5423_v5, %v5108_v25  ;;  %v25354_v60 = vpop.f32.mrf.mxu1 }
 0x2a5   :  { %29424 = vst [vmem:[#allocation142_spill] sm:$0xff] %v25354_v60  ;;  %v25356_v55 = vpop.f32.mrf.mxu0 }
 0x2a6   :  { %29425 = vst [vmem:[#allocation143_spill] sm:$0xff] %v25356_v55  ;;  %v5705_v13 = vpop.f32.mrf.mxu1 }
 0x2a7   :  { %v5854_v17 = vadd.f32 %v5705_v13, %v5501_v43  ;;  %v5634_v34 = vpop.f32.mrf.mxu0  ;;  %v29430_v13 = vld [vmem:[#allocation12_spill] sm:$0xff] }
 0x2a8   :  { %v5852_v12 = vadd.f32 %v5634_v34, %v5499_v22  ;;  %v25358_v61 = vpop.f32.mrf.mxu1 }
 0x2a9   :  { %29426 = vst [vmem:[#allocation144_spill] sm:$0xff] %v25358_v61  ;;  %v25360_v58 = vpop.f32.mrf.mxu0 }
 0x2aa   :  { %29427 = vst [vmem:[#allocation145_spill] sm:$0xff] %v25360_v58  ;;  %v5847_v27 = vpop.f32.mrf.mxu1 }
 0x2ab   :  { %v5858_v56 = vadd.f32 %v5847_v27, %v5505_v29  ;;  %v5776_v10 = vpop.f32.mrf.mxu0 }
 0x2ac   :  { %v5856_v40 = vadd.f32 %v5776_v10, %v5503_v57  ;;  %v25362_v31 = vpop.f32.mrf.mxu1  ;;  %v9395_v25 = vpop.permute.xlu0 %9394 }
 0x2ad   :  { %29428 = vst [vmem:[#allocation146_spill] sm:$0xff] %v25362_v31  ;;  %v25364_v23 = vpop.f32.mrf.mxu0  ;;  %v9414_v5 = vsel %vm1506_vm9, %v9393_v50, %v9395_v25 }
 0x2ae   :  { %29429 = vst [vmem:[#allocation147_spill] sm:$0xff] %v25364_v23  ;;  %v6100_v43 = vpop.f32.mrf.mxu1  ;;  %v9417_v22 = vmul.f32 %v9414_v5, %v29430_v13  ;;  %v9407_v27 = vpop.permute.xlu1 %9406 }
 0x2af   :  { %v6249_v34 = vadd.f32 %v6100_v43, %v5854_v17  ;;  %v6029_v60 = vpop.f32.mrf.mxu0  ;;  %v9415_v31 = vsel %vm1506_vm9, %v9407_v27, %v9393_v50  ;;  %v29433_v17 = vld [vmem:[#allocation15_spill] sm:$0xff] }
 0x2b0   :  { %v6247_v55 = vadd.f32 %v6029_v60, %v5852_v12  ;;  %v25369_v61 = vpop.f32.mrf.mxu1  ;;  %v9397_v29 = vpop.permute.xlu0 %9396  ;;  %22437 = vmatprep.subr.msk.mxu0 %vm1614_vm10, %v9417_v22  ;;  %v9416_v43 = vmul.f32 %v9415_v31, %v29433_v17 }
 0x2b1   :  { %29431 = vst [vmem:[#allocation148_spill] sm:$0xff] %v25369_v61  ;;  %v25372_v57 = vpop.f32.mrf.mxu0  ;;  %v9413_v5 = vsel %vm1506_vm9, %v9395_v25, %v9397_v29  ;;  %v29437_v25 = vld [vmem:[#allocation10_spill] sm:$0xff] }
 0x2b2   :  { %29432 = vst [vmem:[#allocation149_spill] sm:$0xff] %v25372_v57  ;;  %v6242_v10 = vpop.f32.mrf.mxu1  ;;  %v9399_v22 = vpop.permute.xlu1 %9398  ;;  %22438 = vmatpush1.msk.msra.mxu0 %vm1614_vm10, %v9416_v43  ;;  %v9418_v62 = vmul.f32 %v9413_v5, %v29436_v21 }
 0x2b3   :  { %v6253_v23 = vadd.f32 %v6242_v10, %v5858_v56  ;;  %v6171_v58 = vpop.f32.mrf.mxu0  ;;  %v9412_v50 = vsel %vm1506_vm9, %v9397_v29, %v9399_v22  ;;  %v22913_v56 = vld [vmem:[%s28855_s5] sm:$0xf] }
 0x2b4   :  { %v6251_v12 = vadd.f32 %v6171_v58, %v5856_v40  ;;  %v25379_v60 = vpop.f32.mrf.mxu1  ;;  %v9401_v61 = vpop.permute.xlu0 %9400  ;;  %22439 = vmatmul.mubr.msk.f32.vlgmr.msra.gmra.mxu0 %vm1610_vm11, %v22913_v56  ;;  %v9419_v10 = vmul.f32 %v9412_v50, %v29437_v25 }
 0x2b5   :  { %29434 = vst [vmem:[#allocation150_spill] sm:$0xff] %v25379_v60  ;;  %v25381_v47 = vpop.f32.mrf.mxu0  ;;  %v9411_v31 = vsel %vm1506_vm9, %v9399_v22, %v9401_v61  ;;  %9654 = vmatprep.mubr.f32.mxu0 %v29264_v37  ;;  %v29440_v22 = vld [vmem:[#allocation16_spill] sm:$0xff] }
 0x2b6   :  { %29435 = vst [vmem:[#allocation151_spill] sm:$0xff] %v25381_v47  ;;  %v6453_v57 = vpop.f32.mrf.mxu1  ;;  %22440 = vmatprep.subr.msk.mxu1 %vm1614_vm10, %v9419_v10  ;;  %v9420_v45 = vmul.f32 %v9411_v31, %v29280_v7 }
 0x2b7   :  { %v6602_v40 = vadd.f32 %v6453_v57, %v6249_v34  ;;  %v6382_v58 = vpop.f32.mrf.mxu0  ;;  %v9403_v34 = vpop.permute.xlu1 %9402  ;;  %22441 = vmatpush1.msk.msra.mxu1 %vm1614_vm10, %v9418_v62 }
 0x2b8   :  { %v6600_v43 = vadd.f32 %v6382_v58, %v6247_v55  ;;  %v25395_v5 = vpop.f32.mrf.mxu1  ;;  %v9405_v60 = vpop.permute.xlu0 %9404  ;;  %v9410_v50 = vsel %vm1506_vm9, %v9401_v61, %v9403_v34  ;;  %22442 = vmatmul.mubr.msk.f32.vlgmr.msra.gmra.mxu1 %vm1610_vm11, %v22913_v56 }
 0x2b9   :  { %29438 = vst [vmem:[#allocation152_spill] sm:$0xff] %v25395_v5  ;;  %v25397_v29 = vpop.f32.mrf.mxu0  ;;  %v9408_v47 = vsel %vm1506_vm9, %v9405_v60, %v9407_v27  ;;  %v9409_v55 = vsel %vm1506_vm9, %v9403_v34, %v9405_v60  ;;  %v9421_v27 = vmul.f32 %v9410_v50, %v29278_v11  ;;  %9725 = vmatprep.mubr.f32.mxu1 %v29264_v37 }
 0x2ba   :  { %29439 = vst [vmem:[#allocation153_spill] sm:$0xff] %v25397_v29  ;;  %v6595_v57 = vpop.f32.mrf.mxu1  ;;  %v9423_v46 = vmul.f32 %v9408_v47, %v29440_v22  ;;  %v29441_v29 = vld [vmem:[#allocation14_spill] sm:$0xff] }
 0x2bb   :  { %v6606_v58 = vadd.f32 %v6595_v57, %v6253_v23  ;;  %v6524_v5 = vpop.f32.mrf.mxu0  ;;  %v9422_v10 = vmul.f32 %v9409_v55, %v29441_v29  ;;  %22443 = vmatprep.subr.msk.mxu0 %vm1614_vm10, %v9421_v27 }
 0x2bc   :  { %v6604_v33 = vadd.f32 %v6524_v5, %v6251_v12  ;;  %v25412_v31 = vpop.f32.mrf.mxu1  ;;  %22446 = vmatprep.subr.msk.mxu1 %vm1614_vm10, %v9423_v46  ;;  %22444 = vmatpush1.msk.msra.mxu0 %vm1614_vm10, %v9420_v45 }
 0x2bd   :  { %29442 = vst [vmem:[#allocation154_spill] sm:$0xff] %v25412_v31  ;;  %v25416_v62 = vpop.f32.mrf.mxu0  ;;  %22447 = vmatpush1.msk.msra.mxu1 %vm1614_vm10, %v9422_v10  ;;  %22445 = vmatmul.mubr.msk.f32.vlgmr.msra.gmra.mxu0 %vm1610_vm11, %v22913_v56 }
 0x2be   :  { %29443 = vst [vmem:[#allocation155_spill] sm:$0xff] %v25416_v62  ;;  %v6848_v47 = vpop.f32.mrf.mxu1  ;;  %22448 = vmatmul.mubr.msk.f32.vlgmr.msra.gmra.mxu1 %vm1610_vm11, %v22913_v56  ;;  %9820 = vmatprep.mubr.f32.mxu0 %v29264_v37 }
 0x2bf   :  { %v6997_v61 = vadd.f32 %v6848_v47, %v6602_v40  ;;  %v6777_v23 = vpop.f32.mrf.mxu0  ;;  %9891 = vmatprep.mubr.f32.mxu1 %v29264_v37 }
 0x2c0   :  { %v6995_v12 = vadd.f32 %v6777_v23, %v6600_v43  ;;  %v25423_v60 = vpop.f32.mrf.mxu1 }
 0x2c1   :  { %29444 = vst [vmem:[#allocation156_spill] sm:$0xff] %v25423_v60  ;;  %v25427_v46 = vpop.f32.mrf.mxu0 }
 0x2c2   :  { %29445 = vst [vmem:[#allocation157_spill] sm:$0xff] %v25427_v46  ;;  %v6990_v5 = vpop.f32.mrf.mxu1 }
 0x2c3   :  { %v7001_v34 = vadd.f32 %v6990_v5, %v6606_v58  ;;  %v6919_v57 = vpop.f32.mrf.mxu0 }
 0x2c4   :  { %v6999_v55 = vadd.f32 %v6919_v57, %v6604_v33  ;;  %v25429_v45 = vpop.f32.mrf.mxu1 }
 0x2c5   :  { %29446 = vst [vmem:[#allocation158_spill] sm:$0xff] %v25429_v45  ;;  %v25431_v40 = vpop.f32.mrf.mxu0 }
 0x2c6   :  { %29447 = vst [vmem:[#allocation159_spill] sm:$0xff] %v25431_v40  ;;  %v7201_v50 = vpop.f32.mrf.mxu1 }
 0x2c7   :  { %v7350_v27 = vadd.f32 %v7201_v50, %v6997_v61  ;;  %v7130_v56 = vpop.f32.mrf.mxu0 }
 0x2c8   :  { %v7348_v43 = vadd.f32 %v7130_v56, %v6995_v12  ;;  %v25433_v10 = vpop.f32.mrf.mxu1 }
 0x2c9   :  { %29448 = vst [vmem:[#allocation160_spill] sm:$0xff] %v25433_v10  ;;  %v25435_v47 = vpop.f32.mrf.mxu0 }
 0x2ca   :  { %29449 = vst [vmem:[#allocation161_spill] sm:$0xff] %v25435_v47  ;;  %v7343_v23 = vpop.f32.mrf.mxu1 }
 0x2cb   :  { %v7354_v31 = vadd.f32 %v7343_v23, %v7001_v34  ;;  %v7272_v62 = vpop.f32.mrf.mxu0 }
 0x2cc   :  { %v7352_v60 = vadd.f32 %v7272_v62, %v6999_v55  ;;  %v25437_v46 = vpop.f32.mrf.mxu1 }
 0x2cd   :  { %29450 = vst [vmem:[#allocation162_spill] sm:$0xff] %v25437_v46  ;;  %v25439_v58 = vpop.f32.mrf.mxu0 }
 0x2ce   :  { %29451 = vst [vmem:[#allocation163_spill] sm:$0xff] %v25439_v58  ;;  %v7596_v33 = vpop.f32.mrf.mxu1 }
 0x2cf   :  { %v7745_v5 = vadd.f32 %v7596_v33, %v7350_v27  ;;  %v7525_v57 = vpop.f32.mrf.mxu0 }
 0x2d0   :  { %v7743_v45 = vadd.f32 %v7525_v57, %v7348_v43  ;;  %v25441_v40 = vpop.f32.mrf.mxu1 }
 0x2d1   :  { %29452 = vst [vmem:[#allocation164_spill] sm:$0xff] %v25441_v40  ;;  %v25443_v61 = vpop.f32.mrf.mxu0 }
 0x2d2   :  { %29453 = vst [vmem:[#allocation165_spill] sm:$0xff] %v25443_v61  ;;  %v7738_v12 = vpop.f32.mrf.mxu1 }
 0x2d3   :  { %v7749_v50 = vadd.f32 %v7738_v12, %v7354_v31  ;;  %v7667_v56 = vpop.f32.mrf.mxu0 }
 0x2d4   :  { %v7747_v10 = vadd.f32 %v7667_v56, %v7352_v60  ;;  %v25445_v47 = vpop.f32.mrf.mxu1 }
 0x2d5   :  { %29454 = vst [vmem:[#allocation166_spill] sm:$0xff] %v25445_v47  ;;  %v25447_v34 = vpop.f32.mrf.mxu0 }
 0x2d6   :  { %29455 = vst [vmem:[#allocation167_spill] sm:$0xff] %v25447_v34  ;;  %v7949_v62 = vpop.f32.mrf.mxu1 }
 0x2d7   :  { %v25449_v55 = vadd.f32 %v7949_v62, %v7745_v5  ;;  %v7878_v23 = vpop.f32.mrf.mxu0 }
 0x2d8   :  { %v25451_v46 = vadd.f32 %v7878_v23, %v7743_v45  ;;  %v25453_v27 = vpop.f32.mrf.mxu1 }
 0x2d9   :  { %29456 = vst [vmem:[#allocation168_spill] sm:$0xff] %v25449_v55  ;;  %29458 = vst [vmem:[#allocation170_spill] sm:$0xff] %v25453_v27  ;;  %v25455_v43 = vpop.f32.mrf.mxu0 }
 0x2da   :  { %29457 = vst [vmem:[#allocation169_spill] sm:$0xff] %v25451_v46  ;;  %29459 = vst [vmem:[#allocation171_spill] sm:$0xff] %v25455_v43  ;;  %v8091_v33 = vpop.f32.mrf.mxu1  ;;  %v29464_v43 = vld [vmem:[#allocation20_spill] sm:$0xff] }
 0x2db   :  { %v25457_v57 = vadd.f32 %v8091_v33, %v7749_v50  ;;  %v8020_v31 = vpop.f32.mrf.mxu0 }
 0x2dc   :  { %v25459_v12 = vadd.f32 %v8020_v31, %v7747_v10  ;;  %v25461_v60 = vpop.f32.mrf.mxu1 }
 0x2dd   :  { %29460 = vst [vmem:[#allocation172_spill] sm:$0xff] %v25457_v57  ;;  %29462 = vst [vmem:[#allocation174_spill] sm:$0xff] %v25461_v60  ;;  %v25463_v56 = vpop.f32.mrf.mxu0 }
 0x2de   :  { %29461 = vst [vmem:[#allocation173_spill] sm:$0xff] %v25459_v12  ;;  %29463 = vst [vmem:[#allocation175_spill] sm:$0xff] %v25463_v56  ;;  %v8280_v47 = vpop.f32.mrf.mxu1 }
 0x2df   :  { %v8209_v5 = vpop.f32.mrf.mxu0  ;;  %v8429_v6 = vmul.f32 %v8280_v47, %v29465_v52  ;;  %v29471_v52 = vld [vmem:[#allocation32_spill] sm:$0xff] }
 0x2e0   :  { %v8282_v62 = vpop.f32.mrf.mxu1 }
 0x2e1   :  { %v25465_v34 = vpop.f32.mrf.mxu0  ;;  %v8430_v9 = vmul.f32 %v8282_v62, %v29468_v16  ;;  %v29479_v62 = vld [vmem:[#allocation44_spill] sm:$0xff] }
 0x2e2   :  { %v8422_v45 = vpop.f32.mrf.mxu1 }
 0x2e3   :  { %v25467_v23 = vpop.f32.mrf.mxu0 }
 0x2e4   :  { %v25469_v55 = vpop.f32.mrf.mxu1 }
 0x2e5   :  { %v25471_v46 = vpop.f32.mrf.mxu0 }
 0x2e6   :  { %v8572_v50 = vpop.f32.mrf.mxu1 }
 0x2e7   :  { %v8501_v33 = vpop.f32.mrf.mxu0  ;;  %v8721_v40 = vmul.f32 %v8572_v50, %v29464_v43 }
 0x2e8   :  { %v8574_v10 = vpop.f32.mrf.mxu1 }
 0x2e9   :  { %v8503_v31 = vpop.f32.mrf.mxu0  ;;  %v8722_v1 = vmul.f32 %v8574_v10, %v29466_v4  ;;  %v8729_v30 = vadd.f32 %v8721_v40, %v8429_v6  ;;  %v29480_v10 = vld [vmem:[#allocation45_spill] sm:$0xff] }
 0x2ea   :  { %v8714_v57 = vpop.f32.mrf.mxu1 }
 0x2eb   :  { %v25473_v60 = vpop.f32.mrf.mxu0  ;;  %v8730_v28 = vadd.f32 %v8722_v1, %v8430_v9  ;;  %v29478_v1 = vld [vmem:[#allocation43_spill] sm:$0xff] }
 0x2ec   :  { %v25475_v12 = vpop.f32.mrf.mxu1  ;;  %v8725_v40 = vmul.f32 %v8714_v57, %v29478_v1 }
 0x2ed   :  { %v25477_v56 = vpop.f32.mrf.mxu0 }
 0x2ee   :  { %v8872_v27 = vpop.f32.mrf.mxu1 }
 0x2ef   :  { %v8801_v61 = vpop.f32.mrf.mxu0  ;;  %v9021_v8 = vmul.f32 %v8872_v27, %v29467_v36  ;;  %v29472_v36 = vld [vmem:[#allocation9_spill] sm:$0xff] }
 0x2f0   :  { %v8874_v58 = vpop.f32.mrf.mxu1 }
 0x2f1   :  { %v9022_v3 = vmul.f32 %v8874_v58, %v29469_v48  ;;  %v8803_v14 = vpop.f32.mrf.mxu0  ;;  %v9029_v0 = vadd.f32 %v9021_v8, %v8729_v30  ;;  %v29477_v30 = vld [vmem:[#allocation25_spill] sm:$0xff] }
 0x2f2   :  { %v9014_v41 = vpop.f32.mrf.mxu1 }
 0x2f3   :  { %v9030_v19 = vadd.f32 %v9022_v3, %v8730_v28  ;;  %v25487_v4 = vpop.f32.mrf.mxu0  ;;  %v29475_v28 = vld [vmem:[#allocation19_spill] sm:$0xff] }
 0x2f4   :  { %v9016_v63 = vpop.f32.mrf.mxu1  ;;  %v29476_v3 = vld [vmem:[#allocation23_spill] sm:$0xff] }
 0x2f5   :  { %v25497_v48 = vpop.f32.mrf.mxu0  ;;  %v9019_v9 = vmul.f32 %v8801_v61, %v29476_v3 }
 0x2f6   :  { %v9172_v2 = vpop.f32.mrf.mxu1 }
 0x2f7   :  { %v9321_v43 = vmul.f32 %v9172_v2, %v29470_v26  ;;  %v29474_v26 = vld [vmem:[#allocation22_spill] sm:$0xff] }
 0x2f8   :  { %v9174_v50 = vpop.f32.mrf.mxu1  ;;  %v8427_v2 = vmul.f32 %v8209_v5, %v29474_v26  ;;  %v29484_v26 = vld [vmem:[#allocation33_spill] sm:$0xff] }
 0x2f9   :  { %v9329_v54 = vadd.f32 %v9321_v43, %v9029_v0  ;;  %v9322_v47 = vmul.f32 %v9174_v50, %v29471_v52  ;;  %v8719_v0 = vmul.f32 %v8501_v33, %v29475_v28  ;;  %v8433_v33 = vmul.f32 %v8422_v45, %v29479_v62  ;;  %v29481_v52 = vld [vmem:[#allocation46_spill] sm:$0xff] }
 0x2fa   :  { %v9314_v5 = vpop.f32.mrf.mxu1  ;;  %v9025_v43 = vmul.f32 %v9014_v41, %v29480_v10  ;;  %v29483_v45 = vld [vmem:[#allocation34_spill] sm:$0xff] }
 0x2fb   :  { %v25490_v27 = vadd.f32 %v9329_v54, %v29472_v36  ;;  %v9330_v16 = vadd.f32 %v9322_v47, %v9030_v19  ;;  %v9101_v54 = vpop.f32.mrf.mxu0  ;;  %v8727_v19 = vadd.f32 %v8719_v0, %v8427_v2  ;;  %v8733_v50 = vadd.f32 %v8725_v40, %v8433_v33  ;;  %v29489_v62 = vld [vmem:[#allocation50_spill] sm:$0xff] }
 0x2fc   :  { %v9319_v8 = vmul.f32 %v9101_v54, %v29477_v30  ;;  %v9325_v47 = vmul.f32 %v9314_v5, %v29481_v52  ;;  %v8428_v41 = vmul.f32 %v25465_v34, %v29483_v45  ;;  %v8720_v2 = vmul.f32 %v8503_v31, %v29484_v26  ;;  %v29486_v34 = vld [vmem:[#allocation36_spill] sm:$0xff]  ;;  %v29491_v52 = vld [vmem:[#allocation39_spill] sm:$0xff] }
 0x2fd   :  { %29473 = vst [vmem:[#allocation20_spill] sm:$0xff] %v25490_v27  ;;  %v25493_v6 = vadd.f32 %v9330_v16, %v29472_v36  ;;  %9352 = vrot.lane.b32.xlu0 %v25490_v27, %s22937_s16  ;;  %v9027_v58 = vadd.f32 %v9019_v9, %v8727_v19  ;;  %v9033_v57 = vadd.f32 %v9025_v43, %v8733_v50  ;;  %v9103_v0 = vpop.f32.mrf.mxu0  ;;  %v29485_v19 = vld [vmem:[#allocation35_spill] sm:$0xff]  ;;  %v29493_v26 = vld [vmem:[#allocation40_spill] sm:$0xff] }
 0x2fe   :  { %v8728_v54 = vadd.f32 %v8720_v2, %v8428_v41  ;;  %v9020_v3 = vmul.f32 %v8803_v14, %v29485_v19  ;;  %v9320_v30 = vmul.f32 %v9103_v0, %v29486_v34  ;;  %v9316_v14 = vpop.f32.mrf.mxu1  ;;  %v9026_v33 = vmul.f32 %v9016_v63, %v29489_v62  ;;  %v29492_v63 = vld [vmem:[#allocation38_spill] sm:$0xff]  ;;  %v29496_v0 = vld [vmem:[#allocation51_spill] sm:$0xff]  ;;  %v29497_v19 = vld [vmem:[#allocation41_spill] sm:$0xff] }
 0x2ff   :  { %9354 = vrot.lane.b32.xlu1 %v25493_v6, %s22937_s16  ;;  %v9327_v61 = vadd.f32 %v9319_v8, %v9027_v58  ;;  %v9333_v28 = vadd.f32 %v9325_v47, %v9033_v57  ;;  %v29487_v8 = vld [vmem:[#allocation48_spill] sm:$0xff]  ;;  %v29488_v58 = vld [vmem:[#allocation49_spill] sm:$0xff]  ;;  %v8723_v47 = vmul.f32 %v25473_v60, %v29492_v63  ;;  %v9243_v45 = vpop.f32.mrf.mxu0  ;;  %v9023_v2 = vmul.f32 %v25487_v4, %v29493_v26  ;;  %v25585_v4 = vpop.permute.xlu0 %10390 }
 0x300   :  { %v9028_v31 = vadd.f32 %v9020_v3, %v8728_v54  ;;  %v8726_v1 = vmul.f32 %v25475_v12, %v29487_v8  ;;  %v8434_v5 = vmul.f32 %v25469_v55, %v29488_v58  ;;  %v8431_v55 = vmul.f32 %v25467_v23, %v29491_v52  ;;  %v29495_v23 = vld [vmem:[#allocation54_spill] sm:$0xff]  ;;  %v29498_v8 = vld [vmem:[#allocation55_spill] sm:$0xff] }
 0x301   :  { %10044 = vrot.lane.b32.xlu0 %v25490_v27, %s22938_s21  ;;  %v25522_v16 = vadd.f32 %v9327_v61, %v29472_v36  ;;  %v25535_v9 = vadd.f32 %v9333_v28, %v29472_v36  ;;  %v29490_v61 = vld [vmem:[#allocation53_spill] sm:$0xff]  ;;  %v8432_v60 = vmul.f32 %v25471_v46, %v29495_v23  ;;  %v8724_v54 = vmul.f32 %v25477_v56, %v29496_v0  ;;  %v25591_v56 = vpop.permute.xlu1 %10388 }
 0x302   :  { %v9328_v40 = vadd.f32 %v9320_v30, %v9028_v31  ;;  %v8734_v10 = vadd.f32 %v8726_v1, %v8434_v5  ;;  %v9326_v50 = vmul.f32 %v9316_v14, %v29490_v61  ;;  %v8731_v41 = vadd.f32 %v8723_v47, %v8431_v55  ;;  %v9245_v30 = vpop.f32.mrf.mxu0 }
 0x303   :  { %10046 = vrot.lane.b32.xlu1 %v25493_v6, %s22938_s21  ;;  %29482 = vst [vmem:[#allocation21_spill] sm:$0xff] %v25522_v16  ;;  %v9323_v3 = vmul.f32 %v9243_v45, %v29497_v19  ;;  %v8732_v31 = vadd.f32 %v8724_v54, %v8432_v60  ;;  %v9024_v1 = vmul.f32 %v25497_v48, %v29498_v8  ;;  %v25601_v62 = vpop.permute.xlu0 %10392 }
 0x304   :  { %v25554_v43 = vadd.f32 %v9328_v40, %v29472_v36  ;;  %v9034_v12 = vadd.f32 %v9026_v33, %v8734_v10  ;;  %v9031_v34 = vadd.f32 %v9023_v2, %v8731_v41  ;;  %v29499_v40 = vld [vmem:[#allocation56_spill] sm:$0xff] }
 0x305   :  { %10740 = vrot.lane.b32.xlu0 %v25490_v27, %s22939_s22  ;;  %v9324_v14 = vmul.f32 %v9245_v30, %v29499_v40  ;;  %v9032_v58 = vadd.f32 %v9024_v1, %v8732_v31  ;;  %v25605_v33 = vpop.permute.xlu1 %10402 }
 0x306   :  { %v9334_v57 = vadd.f32 %v9326_v50, %v9034_v12  ;;  %v9331_v46 = vadd.f32 %v9323_v3, %v9031_v34 }
 0x307   :  { %10742 = vrot.lane.b32.xlu1 %v25493_v6, %s22939_s22  ;;  %v9332_v48 = vadd.f32 %v9324_v14, %v9032_v58  ;;  %v25614_v61 = vpop.permute.xlu0 %10396 }
 0x308   :  { %v25572_v28 = vadd.f32 %v9334_v57, %v29472_v36  ;;  %v25597_v5 = vadd.f32 %v9331_v46, %v29472_v36  ;;  %v25653_v57 = vld [vmem:[%s28853_s1 + $0x20] sm:$0xff] }
 0x309   :  { %11436 = vrot.lane.b32.xlu0 %v25490_v27, %s22940_s23  ;;  %v25610_v10 = vadd.f32 %v9332_v48, %v29472_v36  ;;  %v25618_v50 = vpop.permute.xlu1 %10394 }
 0x30a   :  { %29494 = vst [vmem:[#allocation27_spill] sm:$0xff] %v25572_v28  ;;  %29500 = vst [vmem:[#allocation24_spill] sm:$0xff] %v25597_v5 }
 0x30b   :  { %11438 = vrot.lane.b32.xlu1 %v25493_v6, %s22940_s23  ;;  %29501 = vst [vmem:[#allocation30_spill] sm:$0xff] %v25610_v10  ;;  %v25624_v12 = vpop.permute.xlu0 %10400 }
 0x30d   :  { %12756 = vrot.lane.b32.xlu0 %v25490_v27, %s22941_s26  ;;  %v25628_v36 = vpop.permute.xlu1 %10398 }
 0x30f   :  { %10040 = vrot.lane.b32.xlu1 %v25522_v16, %s22938_s21  ;;  %v25634_v52 = vpop.permute.xlu0 %11086 }
 0x311   :  { %9348 = vrot.lane.b32.xlu0 %v25522_v16, %s22937_s16  ;;  %v25638_v55 = vpop.permute.xlu1 %11084 }
 0x313   :  { %10736 = vrot.lane.b32.xlu1 %v25522_v16, %s22939_s22  ;;  %v25644_v63 = vpop.permute.xlu0 %11088 }
 0x315   :  { %9360 = vrot.lane.b32.xlu0 %v25535_v9, %s22937_s16  ;;  %v25648_v47 = vpop.permute.xlu1 %11098 }
 0x317   :  { %11432 = vrot.lane.b32.xlu1 %v25522_v16, %s22940_s23  ;;  %v25659_v45 = vpop.permute.xlu0 %11092 }
 0x319   :  { %10052 = vrot.lane.b32.xlu0 %v25535_v9, %s22938_s21  ;;  %v25663_v41 = vpop.permute.xlu1 %11090 }
 0x31b   :  { %12752 = vrot.lane.b32.xlu1 %v25522_v16, %s22941_s26  ;;  %v25669_v26 = vpop.permute.xlu0 %11096 }
 0x31d   :  { %10748 = vrot.lane.b32.xlu0 %v25535_v9, %s22939_s22  ;;  %v25673_v2 = vpop.permute.xlu1 %11094 }
 0x31f   :  { %9350 = vrot.lane.b32.xlu1 %v25554_v43, %s22937_s16  ;;  %v25677_v23 = vpop.permute.xlu0 %11782 }
 0x320   :  { %29502 = vst [vmem:[#allocation31_spill] sm:$0xff] %v25677_v23 }
 0x321   :  { %11444 = vrot.lane.b32.xlu0 %v25535_v9, %s22940_s23  ;;  %v25683_v60 = vpop.permute.xlu1 %11780 }
 0x322   :  { %29503 = vst [vmem:[#allocation26_spill] sm:$0xff] %v25683_v60 }
 0x323   :  { %12754 = vrot.lane.b32.xlu1 %v25554_v43, %s22941_s26  ;;  %v25687_v0 = vpop.permute.xlu0 %11784 }
 0x325   :  { %10042 = vrot.lane.b32.xlu0 %v25554_v43, %s22938_s21  ;;  %v25693_v54 = vpop.permute.xlu1 %11794 }
 0x326   :  { %29504 = vst [vmem:[#allocation32_spill] sm:$0xff] %v25693_v54 }
 0x327   :  { %9362 = vrot.lane.b32.xlu1 %v25572_v28, %s22937_s16  ;;  %v25697_v19 = vpop.permute.xlu0 %11788 }
 0x328   :  { %29505 = vst [vmem:[#allocation9_spill] sm:$0xff] %v25697_v19 }
 0x329   :  { %10738 = vrot.lane.b32.xlu0 %v25554_v43, %s22939_s22  ;;  %v25701_v3 = vpop.permute.xlu1 %11786 }
 0x32b   :  { %10054 = vrot.lane.b32.xlu1 %v25572_v28, %s22938_s21  ;;  %v25707_v34 = vpop.permute.xlu0 %11792 }
 0x32c   :  { %29506 = vst [vmem:[#allocation22_spill] sm:$0xff] %v25707_v34 }
 0x32d   :  { %11434 = vrot.lane.b32.xlu0 %v25554_v43, %s22940_s23  ;;  %v25711_v30 = vpop.permute.xlu1 %11790 }
 0x32e   :  { %29507 = vst [vmem:[#allocation19_spill] sm:$0xff] %v25711_v30 }
 0x32f   :  { %10750 = vrot.lane.b32.xlu1 %v25572_v28, %s22939_s22 }
 0x331   :  { %9356 = vrot.lane.b32.xlu0 %v25597_v5, %s22937_s16 }
 0x333   :  { %11446 = vrot.lane.b32.xlu1 %v25572_v28, %s22940_s23 }
 0x335   :  { %12758 = vrot.lane.b32.xlu0 %v25493_v6, %s22941_s26 }
 0x337   :  { %9358 = vrot.lane.b32.xlu1 %v25610_v10, %s22937_s16 }
 0x339   :  { %10048 = vrot.lane.b32.xlu0 %v25597_v5, %s22938_s21 }
 0x33b   :  { %12760 = vrot.lane.b32.xlu1 %v25597_v5, %s22941_s26 }
 0x33d   :  { %10744 = vrot.lane.b32.xlu0 %v25597_v5, %s22939_s22 }
 0x33f   :  { %10050 = vrot.lane.b32.xlu1 %v25610_v10, %s22938_s21 }
 0x341   :  { %11440 = vrot.lane.b32.xlu0 %v25597_v5, %s22940_s23 }
 0x343   :  { %12764 = vrot.lane.b32.xlu1 %v25535_v9, %s22941_s26 }
 0x345   :  { %12766 = vrot.lane.b32.xlu0 %v25572_v28, %s22941_s26 }
 0x347   :  { %13102 = vrot.lane.b32.xlu1 %v25172_v20, %s22941_s26 }
 0x349   :  { %13104 = vrot.lane.b32.xlu0 %v25189_v51, %s22941_s26 }
 0x34b   :  { %13100 = vrot.lane.b32.xlu1 %v25653_v57, %s22941_s26 }
 0x34d   :  { %13106 = vrot.lane.b32.xlu0 %v25208_v18, %s22941_s26 }
 0x34f   :  { %10746 = vrot.lane.b32.xlu1 %v25610_v10, %s22939_s22 }
 0x351   :  { %13110 = vrot.lane.b32.xlu0 %v25218_v59, %s22941_s26 }
 0x353   :  { %13108 = vrot.lane.b32.xlu1 %v25204_v49, %s22941_s26 }
 0x355   :  { %13114 = vrot.lane.b32.xlu0 %v25194_v24, %s22941_s26 }
 0x357   :  { %13112 = vrot.lane.b32.xlu1 %v25179_v15, %s22941_s26 }
 0x359   :  { %13452 = vrot.lane.b32.xlu0 %v25490_v27, %s22942_s27 }
 0x35b   :  { %13450 = vrot.lane.b32.xlu1 %v25554_v43, %s22942_s27 }
 0x35d   :  { %13454 = vrot.lane.b32.xlu0 %v25493_v6, %s22942_s27 }
 0x35f   :  { %11442 = vrot.lane.b32.xlu1 %v25610_v10, %s22940_s23 }
 0x361   :  { %13462 = vrot.lane.b32.xlu0 %v25572_v28, %s22942_s27 }
 0x363   :  { %13448 = vrot.lane.b32.xlu1 %v25522_v16, %s22942_s27 }
 0x365   :  { %13800 = vrot.lane.b32.xlu0 %v25189_v51, %s22942_s27 }
 0x367   :  { %13456 = vrot.lane.b32.xlu1 %v25597_v5, %s22942_s27 }
 0x369   :  { %13802 = vrot.lane.b32.xlu0 %v25208_v18, %s22942_s27 }
 0x36b   :  { %13460 = vrot.lane.b32.xlu1 %v25535_v9, %s22942_s27 }
 0x36d   :  { %13806 = vrot.lane.b32.xlu0 %v25218_v59, %s22942_s27 }
 0x36f   :  { %v9353_v31 = vpop.permute.xlu0 %9352  ;;  %13798 = vrot.lane.b32.xlu1 %v25172_v20, %s22942_s27 }
 0x371   :  { %13810 = vrot.lane.b32.xlu0 %v25194_v24, %s22942_s27  ;;  %v25719_v8 = vpop.permute.xlu1 %9354 }
 0x372   :  { %v9368_v1 = vsel %vm1506_vm9, %v9353_v31, %v25719_v8 }
 0x373   :  { %v9375_v46 = vmul.f32 %v9368_v1, %v29437_v25  ;;  %v25725_v40 = vpop.permute.xlu0 %10044  ;;  %13796 = vrot.lane.b32.xlu1 %v25653_v57, %s22942_s27 }
 0x375   :  { %14148 = vrot.lane.b32.xlu0 %v25490_v27, %s22943_s28  ;;  %22452 = vmatprep.subr.msk.mxu1 %vm1614_vm10, %v9375_v46  ;;  %v25732_v14 = vpop.permute.xlu1 %10046 }
 0x377   :  { %v25734_v58 = vpop.permute.xlu0 %10740  ;;  %13804 = vrot.lane.b32.xlu1 %v25204_v49, %s22942_s27 }
 0x379   :  { %12762 = vrot.lane.b32.xlu0 %v25610_v10, %s22941_s26  ;;  %v25740_v48 = vpop.permute.xlu1 %10742 }
 0x37b   :  { %v25742_v1 = vpop.permute.xlu0 %11436  ;;  %13808 = vrot.lane.b32.xlu1 %v25179_v15, %s22942_s27 }
 0x37d   :  { %14150 = vrot.lane.b32.xlu0 %v25493_v6, %s22943_s28  ;;  %v25748_v46 = vpop.permute.xlu1 %11438 }
 0x37f   :  { %v25750_v25 = vpop.permute.xlu0 %12756  ;;  %14146 = vrot.lane.b32.xlu1 %v25554_v43, %s22943_s28 }
 0x380   :  { %29508 = vst [vmem:[#allocation23_spill] sm:$0xff] %v25750_v25 }
 0x381   :  { %14158 = vrot.lane.b32.xlu0 %v25572_v28, %s22943_s28  ;;  %v25756_v42 = vpop.permute.xlu1 %10040 }
 0x383   :  { %v9349_v35 = vpop.permute.xlu0 %9348  ;;  %14144 = vrot.lane.b32.xlu1 %v25522_v16, %s22943_s28 }
 0x385   :  { %14496 = vrot.lane.b32.xlu0 %v25189_v51, %s22943_s28  ;;  %v25762_v15 = vpop.permute.xlu1 %10736 }
 0x387   :  { %v9361_v44 = vpop.permute.xlu0 %9360  ;;  %14152 = vrot.lane.b32.xlu1 %v25597_v5, %s22943_s28 }
 0x389   :  { %13458 = vrot.lane.b32.xlu0 %v25610_v10, %s22942_s27  ;;  %v25768_v39 = vpop.permute.xlu1 %11432 }
 0x38b   :  { %v25770_v38 = vpop.permute.xlu0 %10052  ;;  %14156 = vrot.lane.b32.xlu1 %v25535_v9, %s22943_s28 }
 0x38d   :  { %14498 = vrot.lane.b32.xlu0 %v25208_v18, %s22943_s28  ;;  %v25776_v51 = vpop.permute.xlu1 %12752 }
 0x38e   :  { %29509 = vst [vmem:[#allocation25_spill] sm:$0xff] %v25776_v51 }
 0x38f   :  { %v25778_v25 = vpop.permute.xlu0 %10748  ;;  %14494 = vrot.lane.b32.xlu1 %v25172_v20, %s22943_s28 }
 0x391   :  { %14502 = vrot.lane.b32.xlu0 %v25218_v59, %s22943_s28  ;;  %v9351_v19 = vpop.permute.xlu1 %9350 }
 0x392   :  { %v9369_v30 = vsel %vm1506_vm9, %v9351_v19, %v9353_v31  ;;  %v9370_v34 = vsel %vm1506_vm9, %v9349_v35, %v9351_v19  ;;  %v22915_v19 = vld [vmem:[%s28856_s4] sm:$0xf] }
 0x393   :  { %v9373_v54 = vmul.f32 %v9370_v34, %v29430_v13  ;;  %v9374_v60 = vmul.f32 %v9369_v30, %v29436_v21  ;;  %v25790_v51 = vpop.permute.xlu0 %11444  ;;  %14492 = vrot.lane.b32.xlu1 %v25653_v57, %s22943_s28  ;;  %v25820_v13 = vld [vmem:[%s28853_s1 + $0x38] sm:$0xff] }
 0x395   :  { %14506 = vrot.lane.b32.xlu0 %v25194_v24, %s22943_s28  ;;  %22449 = vmatprep.subr.msk.mxu0 %vm1614_vm10, %v9373_v54  ;;  %v25797_v23 = vpop.permute.xlu1 %12754 }
 0x396   :  { %29510 = vst [vmem:[#allocation43_spill] sm:$0xff] %v25797_v23  ;;  %22453 = vmatpush1.msk.msra.mxu1 %vm1614_vm10, %v9374_v60  ;;  %v10060_v23 = vsel %vm2250_vm0, %v25725_v40, %v25732_v14 }
 0x397   :  { %v10043_v31 = vpop.permute.xlu0 %10042  ;;  %14500 = vrot.lane.b32.xlu1 %v25204_v49, %s22943_s28  ;;  %22454 = vmatmul.mubr.msk.f32.vlgmr.msra.gmra.mxu1 %vm1610_vm11, %v22915_v19 }
 0x398   :  { %10033 = vmatprep.mubr.f32.mxu1 %v29264_v37 }
 0x399   :  { %14154 = vrot.lane.b32.xlu0 %v25610_v10, %s22943_s28  ;;  %v9363_v54 = vpop.permute.xlu1 %9362 }
 0x39a   :  { %v9364_v34 = vsel %vm1506_vm9, %v9361_v44, %v9363_v54  ;;  %v9371_v60 = vsel %vm1506_vm9, %v9363_v54, %v9349_v35 }
 0x39b   :  { %v9372_v49 = vmul.f32 %v9371_v60, %v29433_v17  ;;  %v9379_v30 = vmul.f32 %v9364_v34, %v29440_v22  ;;  %v25815_v21 = vpop.permute.xlu0 %10738  ;;  %14504 = vrot.lane.b32.xlu1 %v25820_v13, %s22943_s28 }
 0x39d   :  { %14844 = vrot.lane.b32.xlu0 %v25490_v27, %s22944_s30  ;;  %22450 = vmatpush1.msk.msra.mxu0 %vm1614_vm10, %v9372_v49  ;;  %v10055_v35 = vpop.permute.xlu1 %10054  ;;  %v10062_v27 = vsel %vm2250_vm0, %v25756_v42, %v10043_v31 }
 0x39e   :  { %22458 = vmatprep.subr.msk.mxu1 %vm1614_vm10, %v9379_v30  ;;  %22451 = vmatmul.mubr.msk.f32.vlgmr.msra.gmra.mxu0 %vm1610_vm11, %v22915_v19 }
 0x39f   :  { %v25829_v54 = vpop.permute.xlu0 %11434  ;;  %14842 = vrot.lane.b32.xlu1 %v25554_v43, %s22944_s30  ;;  %9962 = vmatprep.mubr.f32.mxu0 %v29264_v37 }
 0x3a1   :  { %14846 = vrot.lane.b32.xlu0 %v25493_v6, %s22944_s30  ;;  %v25836_v34 = vpop.permute.xlu1 %10750 }
 0x3a3   :  { %v9357_v60 = vpop.permute.xlu0 %9356  ;;  %14840 = vrot.lane.b32.xlu1 %v25522_v16, %s22944_s30 }
 0x3a4   :  { %v9367_v22 = vsel %vm1506_vm9, %v25719_v8, %v9357_v60 }
 0x3a5   :  { %14854 = vrot.lane.b32.xlu0 %v25572_v28, %s22944_s30  ;;  %v25842_v49 = vpop.permute.xlu1 %11446 }
 0x3a7   :  { %v25844_v30 = vpop.permute.xlu0 %12758  ;;  %14848 = vrot.lane.b32.xlu1 %v25597_v5, %s22944_s30 }
 0x3a8   :  { %29511 = vst [vmem:[#allocation44_spill] sm:$0xff] %v25844_v30 }
 0x3a9   :  { %14850 = vrot.lane.b32.xlu0 %v25610_v10, %s22944_s30  ;;  %v9359_v17 = vpop.permute.xlu1 %9358  ;;  %v10061_v10 = vsel %vm2250_vm0, %v10043_v31, %v25725_v40  ;;  %v25882_v40 = vld [vmem:[%s28853_s1 + $0x28] sm:$0xff] }
 0x3aa   :  { %v9365_v28 = vsel %vm1506_vm9, %v9359_v17, %v9361_v44  ;;  %v9366_v30 = vsel %vm1506_vm9, %v9357_v60, %v9359_v17  ;;  %v9376_v44 = vmul.f32 %v9367_v22, %v29280_v7  ;;  %v10067_v17 = vmul.f32 %v10060_v23, %v23920_v53  ;;  %v29512_v23 = vld [vmem:[#allocation78_spill] sm:$0xff]  ;;  %v29515_v7 = vld [vmem:[#allocation79_spill] sm:$0xff] }
 0x3ab   :  { %v9377_v5 = vmul.f32 %v9366_v30, %v29278_v11  ;;  %v9378_v16 = vmul.f32 %v9365_v28, %v29441_v29  ;;  %v10049_v8 = vpop.permute.xlu0 %10048  ;;  %14852 = vrot.lane.b32.xlu1 %v25535_v9, %s22944_s30  ;;  %v10056_v28 = vsel %vm2250_vm0, %v25770_v38, %v10055_v35  ;;  %v10063_v60 = vsel %vm2250_vm0, %v10055_v35, %v25756_v42  ;;  %v29513_v30 = vld [vmem:[#allocation8_spill] sm:$0xff]  ;;  %v29514_v29 = vld [vmem:[#allocation13_spill] sm:$0xff] }
 0x3ac   :  { %v10065_v31 = vmul.f32 %v10062_v27, %v29512_v23  ;;  %v10066_v42 = vmul.f32 %v10061_v10, %v29513_v30  ;;  %v10064_v11 = vmul.f32 %v10063_v60, %v29514_v29 }
 0x3ad   :  { %15192 = vrot.lane.b32.xlu0 %v25882_v40, %s22944_s30  ;;  %22455 = vmatprep.subr.msk.mxu0 %vm1614_vm10, %v9377_v5  ;;  %v25887_v22 = vpop.permute.xlu1 %12760  ;;  %v10071_v5 = vmul.f32 %v10056_v28, %v29515_v7 }
 0x3ae   :  { %22459 = vmatpush1.msk.msra.mxu1 %vm1614_vm10, %v9378_v16  ;;  %22456 = vmatpush1.msk.msra.mxu0 %vm1614_vm10, %v9376_v44  ;;  %v29516_v44 = vld [vmem:[#allocation80_spill] sm:$0xff] }
 0x3af   :  { %22460 = vmatmul.mubr.msk.f32.vlgmr.msra.gmra.mxu1 %vm1610_vm11, %v22915_v19  ;;  %22464 = vmatprep.subr.msk.mxu1 %vm1614_vm10, %v10067_v17  ;;  %v25895_v35 = vpop.permute.xlu0 %10744  ;;  %v29517_v17 = vld [vmem:[#allocation81_spill] sm:$0xff] }
 0x3b0   :  { %15190 = vrot.lane.b32.xlu1 %v25172_v20, %s22944_s30  ;;  %22457 = vmatmul.mubr.msk.f32.vlgmr.msra.gmra.mxu0 %vm1610_vm11, %v22915_v19  ;;  %v10059_v19 = vsel %vm2250_vm0, %v25732_v14, %v10049_v8  ;;  %v22918_v14 = vld [vmem:[%s28856_s4 + $0x4] sm:$0xf] }
 0x3b1   :  { %22461 = vmatprep.subr.msk.mxu0 %vm1614_vm10, %v10065_v31  ;;  %22465 = vmatpush1.msk.msra.mxu1 %vm1614_vm10, %v10066_v42  ;;  %v10051_v27 = vpop.permute.xlu1 %10050  ;;  %v10409_v31 = vsel %vm2250_vm0, %v25585_v4, %v25601_v62  ;;  %v10410_v42 = vsel %vm2250_vm0, %v25591_v56, %v25585_v4 }
 0x3b2   :  { %22462 = vmatpush1.msk.msra.mxu0 %vm1614_vm10, %v10064_v11  ;;  %22470 = vmatprep.subr.msk.mxu1 %vm1614_vm10, %v10071_v5  ;;  %v10057_v16 = vsel %vm2250_vm0, %v10051_v27, %v25770_v38  ;;  %v10058_v10 = vsel %vm2250_vm0, %v10049_v8, %v10051_v27  ;;  %v10408_v38 = vsel %vm2250_vm0, %v25601_v62, %v25618_v50  ;;  %v29518_v5 = vld [vmem:[#allocation82_spill] sm:$0xff] }
 0x3b3   :  { %15194 = vrot.lane.b32.xlu0 %v25208_v18, %s22944_s30  ;;  %10231 = vmatprep.mubr.f32.mxu1 %v29264_v37  ;;  %v10069_v11 = vmul.f32 %v10058_v10, %v29516_v44  ;;  %v10070_v28 = vmul.f32 %v10057_v16, %v29517_v17  ;;  %v25919_v60 = vpop.permute.xlu0 %11440  ;;  %v10068_v27 = vmul.f32 %v10059_v19, %v29518_v5 }
 0x3b4   :  { %10160 = vmatprep.mubr.f32.mxu0 %v29264_v37  ;;  %22466 = vmatmul.mubr.msk.f32.vlgmr.msra.gmra.mxu1 %vm1610_vm11, %v22918_v14  ;;  %v10411_v16 = vsel %vm2250_vm0, %v25605_v33, %v25591_v56  ;;  %v10404_v62 = vsel %vm2250_vm0, %v25624_v12, %v25605_v33  ;;  %v10415_v10 = vmul.f32 %v10408_v38, %v23920_v53 }
 0x3b5   :  { %15188 = vrot.lane.b32.xlu1 %v25653_v57, %s22944_s30  ;;  %22463 = vmatmul.mubr.msk.f32.vlgmr.msra.gmra.mxu0 %vm1610_vm11, %v22918_v14  ;;  %v25933_v8 = vpop.permute.xlu1 %12764  ;;  %v10414_v56 = vmul.f32 %v10409_v31, %v29513_v30  ;;  %v10413_v19 = vmul.f32 %v10410_v42, %v29512_v23  ;;  %v10406_v33 = vsel %vm2250_vm0, %v25614_v61, %v25628_v36  ;;  %v25977_v31 = vld [vmem:[%s28853_s1 + $0x30] sm:$0xff] }
 0x3b6   :  { %22467 = vmatprep.subr.msk.mxu0 %vm1614_vm10, %v10069_v11  ;;  %22471 = vmatpush1.msk.msra.mxu1 %vm1614_vm10, %v10070_v28  ;;  %v10412_v28 = vmul.f32 %v10411_v16, %v29514_v29  ;;  %v10419_v38 = vmul.f32 %v10404_v62, %v29515_v7  ;;  %v10405_v42 = vsel %vm2250_vm0, %v25628_v36, %v25624_v12  ;;  %v29524_v7 = vld [vmem:[#allocation87_spill] sm:$0xff] }
 0x3b7   :  { %15198 = vrot.lane.b32.xlu0 %v25218_v59, %s22944_s30  ;;  %10373 = vmatprep.mubr.f32.mxu1 %v29264_v37  ;;  %v25958_v4 = vpop.permute.xlu0 %12766  ;;  %v10407_v16 = vsel %vm2250_vm0, %v25618_v50, %v25614_v61  ;;  %v10417_v62 = vmul.f32 %v10406_v33, %v29516_v44  ;;  %v10758_v12 = vsel %vm2998_vm2, %v25762_v15, %v25815_v21  ;;  %v22920_v33 = vld [vmem:[%s28855_s5 + $0x4] sm:$0xf] }
 0x3b8   :  { %22468 = vmatpush1.msk.msra.mxu0 %vm1614_vm10, %v10068_v27  ;;  %10302 = vmatprep.mubr.f32.mxu0 %v29264_v37  ;;  %v10418_v50 = vmul.f32 %v10405_v42, %v29517_v17  ;;  %v10416_v36 = vmul.f32 %v10407_v16, %v29518_v5  ;;  %v10752_v16 = vsel %vm2998_vm2, %v25778_v25, %v25836_v34 }
 0x3b9   :  { %22472 = vmatmul.mubr.msk.f32.vlgmr.msra.gmra.mxu1 %vm1610_vm11, %v22918_v14  ;;  %22476 = vmatprep.subr.msk.mxu1 %vm1614_vm10, %v10415_v10  ;;  %v25970_v11 = vpop.permute.xlu1 %13102  ;;  %v29519_v10 = vld [vmem:[#allocation4_spill] sm:$0xff] }
 0x3ba   :  { %15196 = vrot.lane.b32.xlu1 %v25977_v31, %s22944_s30  ;;  %22469 = vmatmul.mubr.msk.f32.vlgmr.msra.gmra.mxu0 %vm1610_vm11, %v22918_v14  ;;  %v10756_v14 = vsel %vm2998_vm2, %v25734_v58, %v25740_v48 }
 0x3bb   :  { %22473 = vmatprep.subr.msk.mxu0 %vm1614_vm10, %v10413_v19  ;;  %22477 = vmatpush1.msk.msra.mxu1 %vm1614_vm10, %v10414_v56  ;;  %v25988_v27 = vpop.permute.xlu0 %13104  ;;  %v10763_v56 = vmul.f32 %v10756_v14, %v29519_v10  ;;  %v10757_v19 = vsel %vm2998_vm2, %v25815_v21, %v25734_v58  ;;  %v10759_v21 = vsel %vm2998_vm2, %v25836_v34, %v25762_v15  ;;  %v22140_v58 = vld [vmem:[%s28854_s7 + $0x4] sm:$0xf]  ;;  %v29521_v14 = vld [vmem:[#allocation85_spill] sm:$0xff] }
 0x3bc   :  { %22474 = vmatpush1.msk.msra.mxu0 %vm1614_vm10, %v10412_v28  ;;  %22482 = vmatprep.subr.msk.mxu1 %vm1614_vm10, %v10419_v38  ;;  %v29520_v38 = vld [vmem:[#allocation84_spill] sm:$0xff]  ;;  %v29522_v34 = vld [vmem:[#allocation86_spill] sm:$0xff] }
 0x3bd   :  { %15202 = vrot.lane.b32.xlu0 %v25194_v24, %s22944_s30  ;;  %10579 = vmatprep.mubr.f32.mxu1 %v29264_v37  ;;  %v26008_v61 = vpop.permute.xlu1 %13100  ;;  %v10761_v42 = vmul.f32 %v10758_v12, %v29520_v38  ;;  %v10762_v12 = vmul.f32 %v10757_v19, %v29521_v14  ;;  %v29523_v19 = vld [vmem:[#allocation83_spill] sm:$0xff] }
 0x3be   :  { %22479 = vmatprep.subr.msk.mxu0 %vm1614_vm10, %v10417_v62  ;;  %10508 = vmatprep.mubr.f32.mxu0 %v29264_v37 }
 0x3bf   :  { %22478 = vmatmul.mubr.msk.f32.vlgmr.msra.gmra.mxu1 %vm1610_vm11, %v22920_v33  ;;  %15200 = vrot.lane.b32.xlu1 %v25820_v13, %s22944_s30  ;;  %v26025_v28 = vpop.permute.xlu0 %13106 }
 0x3c0   :  { %22483 = vmatpush1.msk.msra.mxu1 %vm1614_vm10, %v10418_v50  ;;  %22475 = vmatmul.mubr.msk.f32.vlgmr.msra.gmra.mxu0 %vm1610_vm11, %v22920_v33 }
 0x3c1   :  { %22480 = vmatpush1.msk.msra.mxu0 %vm1614_vm10, %v10416_v36  ;;  %22488 = vmatprep.subr.msk.mxu1 %vm1614_vm10, %v10763_v56  ;;  %v10747_v62 = vpop.permute.xlu1 %10746  ;;  %v10767_v36 = vmul.f32 %v10752_v16, %v29522_v34  ;;  %v10755_v16 = vsel %vm2998_vm2, %v25740_v48, %v25895_v35  ;;  %v11105_v48 = vsel %vm2998_vm2, %v25634_v52, %v25644_v63 }
 0x3c2   :  { %22485 = vmatprep.subr.msk.mxu0 %vm1614_vm10, %v10761_v42  ;;  %10721 = vmatprep.mubr.f32.mxu1 %v29264_v37  ;;  %v10753_v50 = vsel %vm2998_vm2, %v10747_v62, %v25778_v25  ;;  %v10754_v15 = vsel %vm2998_vm2, %v25895_v35, %v10747_v62  ;;  %v10760_v42 = vmul.f32 %v10759_v21, %v29523_v19  ;;  %v29525_v25 = vld [vmem:[#allocation88_spill] sm:$0xff] }
 0x3c3   :  { %10650 = vmatprep.mubr.f32.mxu0 %v29264_v37  ;;  %22484 = vmatmul.mubr.msk.f32.vlgmr.msra.gmra.mxu1 %vm1610_vm11, %v22920_v33  ;;  %v26055_v56 = vpop.permute.xlu0 %13110  ;;  %v10765_v17 = vmul.f32 %v10754_v15, %v29524_v7  ;;  %v10766_v44 = vmul.f32 %v10753_v50, %v29525_v25  ;;  %v11104_v21 = vsel %vm2998_vm2, %v25644_v63, %v25663_v41 }
 0x3c4   :  { %22489 = vmatpush1.msk.msra.mxu1 %vm1614_vm10, %v10762_v12  ;;  %8106 = vperm.xlu1 %22892, %v22140_v58   ;;  %v11106_v35 = vsel %vm2998_vm2, %v25638_v55, %v25634_v52  ;;  %v11100_v63 = vsel %vm2998_vm2, %v25669_v26, %v25648_v47  ;;  %v29526_v12 = vld [vmem:[#allocation89_spill] sm:$0xff]  ;;  %v11107_v52 = vsel %vm2998_vm2, %v25648_v47, %v25638_v55 }
 0x3c5   :  { %22481 = vmatmul.mubr.msk.f32.vlgmr.msra.gmra.mxu0 %vm1610_vm11, %v22920_v33  ;;  %22494 = vmatprep.subr.msk.mxu1 %vm1614_vm10, %v10767_v36  ;;  %v26067_v62 = vpop.permute.xlu1 %13108  ;;  %v22921_v33 = vld [vmem:[%s28856_s4 + $0x8] sm:$0xf]  ;;  %v10764_v50 = vmul.f32 %v10755_v16, %v29526_v12  ;;  %v11111_v15 = vmul.f32 %v11104_v21, %v29519_v10  ;;  %v11109_v16 = vmul.f32 %v11106_v35, %v29520_v38 }
 0x3c6   :  { %22486 = vmatpush1.msk.msra.mxu0 %vm1614_vm10, %v10760_v42  ;;  %10927 = vmatprep.mubr.f32.mxu1 %v29264_v37  ;;  %v11110_v42 = vmul.f32 %v11105_v48, %v29521_v14  ;;  %v11115_v55 = vmul.f32 %v11100_v63, %v29522_v34  ;;  %v11101_v21 = vsel %vm2998_vm2, %v25673_v2, %v25669_v26 }
 0x3c7   :  { %10856 = vmatprep.mubr.f32.mxu0 %v29264_v37  ;;  %22490 = vmatmul.mubr.msk.f32.vlgmr.msra.gmra.mxu1 %vm1610_vm11, %v22921_v33  ;;  %v26088_v58 = vpop.permute.xlu0 %13114  ;;  %v11103_v48 = vsel %vm2998_vm2, %v25663_v41, %v25659_v45  ;;  %v11452_v63 = vsel %vm3746_vm3, %v25742_v1, %v25748_v46 }
 0x3c8   :  { %22491 = vmatprep.subr.msk.mxu0 %vm1614_vm10, %v10765_v17  ;;  %22495 = vmatpush1.msk.msra.mxu1 %vm1614_vm10, %v10766_v44  ;;  %v11102_v44 = vsel %vm2998_vm2, %v25659_v45, %v25673_v2  ;;  %v11108_v17 = vmul.f32 %v11107_v52, %v29523_v19  ;;  %v11454_v2 = vsel %vm3746_vm3, %v25768_v39, %v25829_v54 }
 0x3c9   :  { %22487 = vmatmul.mubr.msk.f32.vlgmr.msra.gmra.mxu0 %vm1610_vm11, %v22921_v33  ;;  %11069 = vmatprep.mubr.f32.mxu1 %v29264_v37  ;;  %v26104_v36 = vpop.permute.xlu1 %13112  ;;  %v11113_v35 = vmul.f32 %v11102_v44, %v29524_v7  ;;  %v11114_v45 = vmul.f32 %v11101_v21, %v29525_v25  ;;  %v29538_v25 = vld [vmem:[#allocation22_spill] sm:$0xff]  ;;  %v29539_v7 = vld [vmem:[#allocation19_spill] sm:$0xff] }
 0x3ca   :  { %22492 = vmatpush1.msk.msra.mxu0 %vm1614_vm10, %v10764_v50  ;;  %10998 = vmatprep.mubr.f32.mxu0 %v29264_v37  ;;  %v29527_v50 = vld [vmem:[#allocation2_spill] sm:$0xff] }
 0x3cb   :  { %22496 = vmatmul.mubr.msk.f32.vlgmr.msra.gmra.mxu1 %vm1610_vm11, %v22921_v33  ;;  %22500 = vmatprep.subr.msk.mxu1 %vm1614_vm10, %v11111_v15  ;;  %v26117_v47 = vpop.permute.xlu0 %13452  ;;  %v11459_v52 = vmul.f32 %v11452_v63, %v29527_v50  ;;  %v11453_v15 = vsel %vm3746_vm3, %v25829_v54, %v25742_v1 }
 0x3cc   :  { %22497 = vmatprep.subr.msk.mxu0 %vm1614_vm10, %v11109_v16  ;;  %22501 = vmatpush1.msk.msra.mxu1 %vm1614_vm10, %v11110_v42  ;;  %v22922_v42 = vld [vmem:[%s28855_s5 + $0x8] sm:$0xf]  ;;  %v29528_v16 = vld [vmem:[#allocation72_spill] sm:$0xff] }
 0x3cd   :  { %22493 = vmatmul.mubr.msk.f32.vlgmr.msra.gmra.mxu0 %vm1610_vm11, %v22921_v33  ;;  %22506 = vmatprep.subr.msk.mxu1 %vm1614_vm10, %v11115_v55  ;;  %v26137_v26 = vpop.permute.xlu1 %13450  ;;  %v11112_v33 = vmul.f32 %v11103_v48, %v29526_v12  ;;  %v11457_v44 = vmul.f32 %v11454_v2, %v29528_v16  ;;  %v11448_v55 = vsel %vm3746_vm3, %v25790_v51, %v25842_v49  ;;  %v29529_v48 = vld [vmem:[#allocation68_spill] sm:$0xff]  ;;  %v29540_v12 = vld [vmem:[#allocation9_spill] sm:$0xff] }
 0x3ce   :  { %22498 = vmatpush1.msk.msra.mxu0 %vm1614_vm10, %v11108_v17  ;;  %11275 = vmatprep.mubr.f32.mxu1 %v29264_v37  ;;  %v11455_v17 = vsel %vm3746_vm3, %v25842_v49, %v25768_v39  ;;  %v29530_v49 = vld [vmem:[#allocation67_spill] sm:$0xff]  ;;  %v29531_v2 = vld [vmem:[#allocation76_spill] sm:$0xff] }
 0x3cf   :  { %22503 = vmatprep.subr.msk.mxu0 %vm1614_vm10, %v11113_v35  ;;  %11204 = vmatprep.mubr.f32.mxu0 %v29264_v37  ;;  %v26148_v41 = vpop.permute.xlu0 %13454  ;;  %v11458_v35 = vmul.f32 %v11453_v15, %v29529_v48  ;;  %v11456_v63 = vmul.f32 %v11455_v17, %v29530_v49  ;;  %v29533_v15 = vld [vmem:[#allocation91_spill] sm:$0xff] }
 0x3d0   :  { %22502 = vmatmul.mubr.msk.f32.vlgmr.msra.gmra.mxu1 %vm1610_vm11, %v22922_v42 }
 0x3d1   :  { %22507 = vmatpush1.msk.msra.mxu1 %vm1614_vm10, %v11114_v45  ;;  %22499 = vmatmul.mubr.msk.f32.vlgmr.msra.gmra.mxu0 %vm1610_vm11, %v22922_v42  ;;  %v11443_v1 = vpop.permute.xlu1 %11442  ;;  %v11463_v45 = vmul.f32 %v11448_v55, %v29531_v2  ;;  %v11800_v55 = vsel %vm3746_vm3, %v25687_v0, %v25701_v3 }
 0x3d2   :  { %22504 = vmatpush1.msk.msra.mxu0 %vm1614_vm10, %v11112_v33  ;;  %22512 = vmatprep.subr.msk.mxu1 %vm1614_vm10, %v11459_v52  ;;  %v11449_v54 = vsel %vm3746_vm3, %v11443_v1, %v25790_v51  ;;  %v11450_v21 = vsel %vm3746_vm3, %v25919_v60, %v11443_v1  ;;  %v29532_v51 = vld [vmem:[#allocation90_spill] sm:$0xff]  ;;  %v11451_v52 = vsel %vm3746_vm3, %v25748_v46, %v25919_v60  ;;  %v29534_v1 = vld [vmem:[#allocation31_spill] sm:$0xff] }
 0x3d3   :  { %22509 = vmatprep.subr.msk.mxu0 %vm1614_vm10, %v11457_v44  ;;  %11417 = vmatprep.mubr.f32.mxu1 %v29264_v37  ;;  %v26182_v39 = vpop.permute.xlu0 %13462  ;;  %v11461_v33 = vmul.f32 %v11450_v21, %v29532_v51  ;;  %v11462_v44 = vmul.f32 %v11449_v54, %v29533_v15  ;;  %v29535_v21 = vld [vmem:[#allocation26_spill] sm:$0xff] }
 0x3d4   :  { %11346 = vmatprep.mubr.f32.mxu0 %v29264_v37  ;;  %22508 = vmatmul.mubr.msk.f32.vlgmr.msra.gmra.mxu1 %vm1610_vm11, %v22922_v42  ;;  %v11802_v46 = vsel %vm3746_vm3, %v29535_v21, %v29534_v1  ;;  %v29536_v54 = vld [vmem:[#allocation74_spill] sm:$0xff] }
 0x3d5   :  { %22513 = vmatpush1.msk.msra.mxu1 %vm1614_vm10, %v11458_v35  ;;  %22505 = vmatmul.mubr.msk.f32.vlgmr.msra.gmra.mxu0 %vm1610_vm11, %v22922_v42  ;;  %v26196_v17 = vpop.permute.xlu1 %13448  ;;  %v11801_v42 = vsel %vm3746_vm3, %v29534_v1, %v25687_v0  ;;  %v11460_v35 = vmul.f32 %v11451_v52, %v29536_v54  ;;  %v11807_v52 = vmul.f32 %v11800_v55, %v29527_v50 }
 0x3d6   :  { %22510 = vmatpush1.msk.msra.mxu0 %vm1614_vm10, %v11456_v63  ;;  %22518 = vmatprep.subr.msk.mxu1 %vm1614_vm10, %v11463_v45  ;;  %v22923_v63 = vld [vmem:[%s28856_s4 + $0xc] sm:$0xf]  ;;  %v29537_v45 = vld [vmem:[#allocation32_spill] sm:$0xff]  ;;  %v11797_v50 = vsel %vm3746_vm3, %v29539_v7, %v29538_v25 }
 0x3d7   :  { %11623 = vmatprep.mubr.f32.mxu1 %v29264_v37  ;;  %11552 = vmatprep.mubr.f32.mxu0 %v29264_v37  ;;  %v26210_v60 = vpop.permute.xlu0 %13800  ;;  %v11803_v34 = vsel %vm3746_vm3, %v29537_v45, %v29535_v21  ;;  %v11796_v0 = vsel %vm3746_vm3, %v29538_v25, %v29537_v45  ;;  %v11798_v21 = vsel %vm3746_vm3, %v29540_v12, %v29539_v7 }
 0x3d8   :  { %22514 = vmatmul.mubr.msk.f32.vlgmr.msra.gmra.mxu1 %vm1610_vm11, %v22923_v63  ;;  %22515 = vmatprep.subr.msk.mxu0 %vm1614_vm10, %v11461_v33  ;;  %v11805_v33 = vmul.f32 %v11802_v46, %v29528_v16  ;;  %v11806_v45 = vmul.f32 %v11801_v42, %v29529_v48  ;;  %v11804_v55 = vmul.f32 %v11803_v34, %v29530_v49 }
 0x3d9   :  { %22511 = vmatmul.mubr.msk.f32.vlgmr.msra.gmra.mxu0 %vm1610_vm11, %v22923_v63  ;;  %22519 = vmatpush1.msk.msra.mxu1 %vm1614_vm10, %v11462_v44  ;;  %v26233_v1 = vpop.permute.xlu1 %13456  ;;  %v11811_v46 = vmul.f32 %v11796_v0, %v29531_v2  ;;  %v11799_v42 = vsel %vm3746_vm3, %v25701_v3, %v29540_v12  ;;  %v11810_v7 = vmul.f32 %v11797_v50, %v29533_v15  ;;  %v22924_v12 = vld [vmem:[%s28855_s5 + $0xc] sm:$0xf]  ;;  %v29541_v0 = vld [vmem:[#allocation20_spill] sm:$0xff] }
 0x3da   :  { %11765 = vmatprep.mubr.f32.mxu1 %v29264_v37  ;;  %22516 = vmatpush1.msk.msra.mxu0 %vm1614_vm10, %v11460_v35  ;;  %v11809_v35 = vmul.f32 %v11798_v21, %v29532_v51  ;;  %v11808_v3 = vmul.f32 %v11799_v42, %v29536_v54  ;;  %v12768_v15 = vsel %vm5128_vm4, %v25933_v8, %v25958_v4 }
 0x3db   :  { %11694 = vmatprep.mubr.f32.mxu0 %v29264_v37  ;;  %22524 = vmatprep.subr.msk.mxu1 %vm1614_vm10, %v11807_v52  ;;  %v26245_v44 = vpop.permute.xlu0 %13802 }
 0x3dc   :  { %22520 = vmatmul.mubr.msk.f32.vlgmr.msra.gmra.mxu1 %vm1610_vm11, %v22923_v63  ;;  %22521 = vmatprep.subr.msk.mxu0 %vm1614_vm10, %v11805_v33  ;;  %v29542_v33 = vld [vmem:[#allocation21_spill] sm:$0xff] }
 0x3dd   :  { %22517 = vmatmul.mubr.msk.f32.vlgmr.msra.gmra.mxu0 %vm1610_vm11, %v22923_v63  ;;  %22525 = vmatpush1.msk.msra.mxu1 %vm1614_vm10, %v11806_v45  ;;  %v26262_v34 = vpop.permute.xlu1 %13460  ;;  %v22925_v45 = vld [vmem:[%s28856_s4 + $0x10] sm:$0xf] }
 0x3de   :  { %22522 = vmatpush1.msk.msra.mxu0 %vm1614_vm10, %v11804_v55  ;;  %22530 = vmatprep.subr.msk.mxu1 %vm1614_vm10, %v11811_v46  ;;  %v29545_v46 = vld [vmem:[#allocation24_spill] sm:$0xff] }
 0x3df   :  { %11971 = vmatprep.mubr.f32.mxu1 %v29264_v37  ;;  %22527 = vmatprep.subr.msk.mxu0 %vm1614_vm10, %v11809_v35  ;;  %v26269_v25 = vpop.permute.xlu0 %13806 }
 0x3e0   :  { %11900 = vmatprep.mubr.f32.mxu0 %v29264_v37  ;;  %22526 = vmatmul.mubr.msk.f32.vlgmr.msra.gmra.mxu1 %vm1610_vm11, %v22924_v12 }
 0x3e1   :  { %22531 = vmatpush1.msk.msra.mxu1 %vm1614_vm10, %v11810_v7  ;;  %22523 = vmatmul.mubr.msk.f32.vlgmr.msra.gmra.mxu0 %vm1610_vm11, %v22924_v12  ;;  %v26279_v50 = vpop.permute.xlu1 %13798 }
 0x3e2   :  { %22528 = vmatpush1.msk.msra.mxu0 %vm1614_vm10, %v11808_v3  ;;  %22536 = vmatprep.subr.msk.mxu1 %vm1614_vm10, %v25493_v6  ;;  %v29543_v6 = vld [vmem:[#allocation27_spill] sm:$0xff] }
 0x3e3   :  { %22533 = vmatprep.subr.msk.mxu0 %vm1614_vm10, %v25554_v43  ;;  %12113 = vmatprep.mubr.f32.mxu1 %v29264_v37  ;;  %v26287_v63 = vpop.permute.xlu0 %13810  ;;  %v29544_v43 = vld [vmem:[#allocation30_spill] sm:$0xff]  ;;  %v29547_v3 = vld [vmem:[#allocation23_spill] sm:$0xff] }
 0x3e4   :  { %12042 = vmatprep.mubr.f32.mxu0 %v29264_v37  ;;  %22532 = vmatmul.mubr.msk.f32.vlgmr.msra.gmra.mxu1 %vm1610_vm11, %v22924_v12 }
 0x3e5   :  { %22537 = vmatpush1.msk.msra.mxu1 %vm1614_vm10, %v29541_v0  ;;  %22529 = vmatmul.mubr.msk.f32.vlgmr.msra.gmra.mxu0 %vm1610_vm11, %v22924_v12  ;;  %v26294_v52 = vpop.permute.xlu1 %13796  ;;  %v29549_v0 = vld [vmem:[#allocation59_spill] sm:$0xff] }
 0x3e6   :  { %22534 = vmatpush1.msk.msra.mxu0 %vm1614_vm10, %v29542_v33  ;;  %22542 = vmatprep.subr.msk.mxu1 %vm1614_vm10, %v29543_v6  ;;  %v29550_v6 = vld [vmem:[#allocation25_spill] sm:$0xff] }
 0x3e7   :  { %22539 = vmatprep.subr.msk.mxu0 %vm1614_vm10, %v29544_v43  ;;  %12287 = vmatprep.mubr.f32.mxu1 %v29264_v37  ;;  %v26303_v21 = vpop.permute.xlu0 %14148 }
 0x3e8   :  { %12216 = vmatprep.mubr.f32.mxu0 %v29264_v37  ;;  %22538 = vmatmul.mubr.msk.f32.vlgmr.msra.gmra.mxu1 %vm1610_vm11, %v22925_v45 }
 0x3e9   :  { %22543 = vmatpush1.msk.msra.mxu1 %vm1614_vm10, %v25535_v9  ;;  %22535 = vmatmul.mubr.msk.f32.vlgmr.msra.gmra.mxu0 %vm1610_vm11, %v22925_v45  ;;  %v26313_v55 = vpop.permute.xlu1 %13804  ;;  %v29546_v9 = vld [vmem:[#allocation44_spill] sm:$0xff] }
 0x3ea   :  { %22540 = vmatpush1.msk.msra.mxu0 %vm1614_vm10, %v29545_v46  ;;  %12429 = vmatprep.mubr.f32.mxu1 %v29264_v37  ;;  %v12771_v35 = vsel %vm5128_vm4, %v29546_v9, %v25887_v22 }
 0x3eb   :  { %12358 = vmatprep.mubr.f32.mxu0 %v29264_v37  ;;  %22548 = vmatprep.subr.msk.mxu1 %vm1614_vm10, %v25208_v18  ;;  %v12763_v42 = vpop.permute.xlu0 %12762  ;;  %v29548_v18 = vld [vmem:[#allocation43_spill] sm:$0xff]  ;;  %v12779_v33 = vmul.f32 %v12771_v35, %v29549_v0  ;;  %v29552_v35 = vld [vmem:[#allocation61_spill] sm:$0xff] }
 0x3ec   :  { %22544 = vmatmul.mubr.msk.f32.vlgmr.msra.gmra.mxu1 %vm1610_vm11, %v22925_v45  ;;  %22545 = vmatprep.subr.msk.mxu0 %vm1614_vm10, %v25172_v20  ;;  %v12773_v12 = vsel %vm5128_vm4, %v29548_v18, %v29547_v3  ;;  %v12774_v43 = vsel %vm5128_vm4, %v29550_v6, %v29548_v18  ;;  %v29553_v18 = vld [vmem:[#allocation66_spill] sm:$0xff] }
 0x3ed   :  { %22541 = vmatmul.mubr.msk.f32.vlgmr.msra.gmra.mxu0 %vm1610_vm11, %v22925_v45  ;;  %22549 = vmatpush1.msk.msra.mxu1 %vm1614_vm10, %v25882_v40  ;;  %v26331_v7 = vpop.permute.xlu1 %13808  ;;  %v12772_v40 = vsel %vm5128_vm4, %v29547_v3, %v29546_v9  ;;  %v29551_v45 = vld [vmem:[#allocation60_spill] sm:$0xff]  ;;  %v12775_v9 = vsel %vm5128_vm4, %v25958_v4, %v29550_v6  ;;  %v13121_v4 = vsel %vm5128_vm4, %v25970_v11, %v25988_v27 }
 0x3ee   :  { %22546 = vmatpush1.msk.msra.mxu0 %vm1614_vm10, %v25653_v57  ;;  %12595 = vmatprep.mubr.f32.mxu1 %v29264_v37  ;;  %v22926_v57 = vld [vmem:[%s28855_s5 + $0x10] sm:$0xf]  ;;  %v12777_v46 = vmul.f32 %v12773_v12, %v29551_v45  ;;  %v12778_v3 = vmul.f32 %v12772_v40, %v29552_v35  ;;  %v13119_v40 = vsel %vm5128_vm4, %v26025_v28, %v26067_v62 }
 0x3ef   :  { %22554 = vmatprep.subr.msk.mxu1 %vm1614_vm10, %v25194_v24  ;;  %12524 = vmatprep.mubr.f32.mxu0 %v29264_v37  ;;  %v26343_v20 = vpop.permute.xlu0 %14150  ;;  %v12769_v24 = vsel %vm5128_vm4, %v12763_v42, %v25933_v8 }
 0x3f0   :  { %22550 = vmatmul.mubr.msk.f32.vlgmr.msra.gmra.mxu1 %vm1610_vm11, %v22926_v57  ;;  %22551 = vmatprep.subr.msk.mxu0 %vm1614_vm10, %v25218_v59  ;;  %v12781_v12 = vmul.f32 %v12769_v24, %v29553_v18  ;;  %v29556_v24 = vld [vmem:[#allocation65_spill] sm:$0xff] }
 0x3f1   :  { %22555 = vmatpush1.msk.msra.mxu1 %vm1614_vm10, %v25820_v13  ;;  %22547 = vmatmul.mubr.msk.f32.vlgmr.msra.gmra.mxu0 %vm1610_vm11, %v22926_v57  ;;  %v26371_v59 = vpop.permute.xlu1 %14146  ;;  %v29554_v13 = vld [vmem:[#allocation62_spill] sm:$0xff] }
 0x3f2   :  { %22552 = vmatpush1.msk.msra.mxu0 %vm1614_vm10, %v25977_v31  ;;  %22560 = vmatprep.subr.msk.mxu1 %vm1614_vm10, %v12779_v33  ;;  %v12776_v2 = vmul.f32 %v12774_v43, %v29554_v13  ;;  %v29555_v31 = vld [vmem:[#allocation63_spill] sm:$0xff]  ;;  %v12770_v33 = vsel %vm5128_vm4, %v25887_v22, %v12763_v42  ;;  %v12782_v43 = vmul.f32 %v12768_v15, %v29556_v24 }
 0x3f3   :  { %22557 = vmatprep.subr.msk.mxu0 %vm1614_vm10, %v12777_v46  ;;  %12737 = vmatprep.mubr.f32.mxu1 %v29264_v37  ;;  %v26380_v6 = vpop.permute.xlu0 %14158  ;;  %v12783_v51 = vmul.f32 %v12775_v9, %v29555_v31  ;;  %v13122_v22 = vsel %vm5128_vm4, %v26008_v61, %v25970_v11  ;;  %v22927_v11 = vld [vmem:[%s28856_s4 + $0x14] sm:$0xf]  ;;  %v13125_v46 = vmul.f32 %v13121_v4, %v29551_v45 }
 0x3f4   :  { %12666 = vmatprep.mubr.f32.mxu0 %v29264_v37  ;;  %22556 = vmatmul.mubr.msk.f32.vlgmr.msra.gmra.mxu1 %vm1610_vm11, %v22926_v57  ;;  %v13123_v9 = vsel %vm5128_vm4, %v26088_v58, %v26008_v61  ;;  %v13116_v4 = vsel %vm5128_vm4, %v26104_v36, %v26088_v58 }
 0x3f5   :  { %22561 = vmatpush1.msk.msra.mxu1 %vm1614_vm10, %v12778_v3  ;;  %22553 = vmatmul.mubr.msk.f32.vlgmr.msra.gmra.mxu0 %vm1610_vm11, %v22926_v57  ;;  %v26399_v8 = vpop.permute.xlu1 %14144  ;;  %v29557_v57 = vld [vmem:[#allocation64_spill] sm:$0xff]  ;;  %v13124_v3 = vmul.f32 %v13122_v22, %v29554_v13  ;;  %v13467_v22 = vsel %vm5876_vm1, %v26148_v41, %v26233_v1 }
 0x3f6   :  { %22558 = vmatpush1.msk.msra.mxu0 %vm1614_vm10, %v12776_v2  ;;  %22566 = vmatprep.subr.msk.mxu1 %vm1614_vm10, %v12783_v51  ;;  %v13120_v2 = vsel %vm5128_vm4, %v25988_v27, %v26025_v28  ;;  %v13127_v51 = vmul.f32 %v13119_v40, %v29549_v0  ;;  %v12780_v15 = vmul.f32 %v12770_v33, %v29557_v57 }
 0x3f7   :  { %22563 = vmatprep.subr.msk.mxu0 %vm1614_vm10, %v12781_v12  ;;  %12943 = vmatprep.mubr.f32.mxu1 %v29264_v37  ;;  %v26414_v42 = vpop.permute.xlu0 %14496  ;;  %v13117_v28 = vsel %vm5128_vm4, %v26055_v56, %v26104_v36  ;;  %v13126_v12 = vmul.f32 %v13120_v2, %v29552_v35  ;;  %v13118_v40 = vsel %vm5128_vm4, %v26067_v62, %v26055_v56 }
 0x3f8   :  { %12872 = vmatprep.mubr.f32.mxu0 %v29264_v37  ;;  %22562 = vmatmul.mubr.msk.f32.vlgmr.msra.gmra.mxu1 %vm1610_vm11, %v22927_v11  ;;  %v13131_v33 = vmul.f32 %v13123_v9, %v29555_v31  ;;  %v13469_v62 = vsel %vm5876_vm1, %v26137_v26, %v26117_v47  ;;  %v13128_v58 = vmul.f32 %v13118_v40, %v29557_v57  ;;  %v29560_v40 = vld [vmem:[#allocation28_spill] sm:$0xff] }
 0x3f9   :  { %22567 = vmatpush1.msk.msra.mxu1 %vm1614_vm10, %v12782_v43  ;;  %22559 = vmatmul.mubr.msk.f32.vlgmr.msra.gmra.mxu0 %vm1610_vm11, %v22927_v11  ;;  %v26434_v27 = vpop.permute.xlu1 %14152  ;;  %v13129_v43 = vmul.f32 %v13117_v28, %v29553_v18  ;;  %v13130_v36 = vmul.f32 %v13116_v4, %v29556_v24  ;;  %v29559_v28 = vld [vmem:[#allocation42_spill] sm:$0xff]  ;;  %v29561_v4 = vld [vmem:[#allocation52_spill] sm:$0xff] }
 0x3fa   :  { %22564 = vmatpush1.msk.msra.mxu0 %vm1614_vm10, %v12780_v15  ;;  %22572 = vmatprep.subr.msk.mxu1 %vm1614_vm10, %v13127_v51  ;;  %v13468_v51 = vsel %vm5876_vm1, %v26117_v47, %v26148_v41  ;;  %v29558_v15 = vld [vmem:[#allocation37_spill] sm:$0xff]  ;;  %v13470_v47 = vsel %vm5876_vm1, %v26196_v17, %v26137_v26  ;;  %v13471_v41 = vsel %vm5876_vm1, %v26182_v39, %v26196_v17 }
 0x3fb   :  { %22569 = vmatprep.subr.msk.mxu0 %vm1614_vm10, %v13125_v46  ;;  %13085 = vmatprep.mubr.f32.mxu1 %v29264_v37  ;;  %v13459_v61 = vpop.permute.xlu0 %13458  ;;  %v22928_v46 = vld [vmem:[%s28855_s5 + $0x14] sm:$0xf]  ;;  %v29562_v17 = vld [vmem:[#allocation29_spill] sm:$0xff] }
 0x3fc   :  { %13014 = vmatprep.mubr.f32.mxu0 %v29264_v37  ;;  %22568 = vmatmul.mubr.msk.f32.vlgmr.msra.gmra.mxu1 %vm1610_vm11, %v22927_v11  ;;  %v13465_v9 = vsel %vm5876_vm1, %v13459_v61, %v26262_v34 }
 0x3fd   :  { %22573 = vmatpush1.msk.msra.mxu1 %vm1614_vm10, %v13126_v12  ;;  %22565 = vmatmul.mubr.msk.f32.vlgmr.msra.gmra.mxu0 %vm1610_vm11, %v22927_v11  ;;  %v26464_v56 = vpop.permute.xlu1 %14156  ;;  %v13475_v11 = vmul.f32 %v13467_v22, %v29558_v15  ;;  %v13472_v22 = vmul.f32 %v13470_v47, %v29562_v17 }
 0x3fe   :  { %22570 = vmatpush1.msk.msra.mxu0 %vm1614_vm10, %v13124_v3  ;;  %22578 = vmatprep.subr.msk.mxu1 %vm1614_vm10, %v13131_v33  ;;  %v13473_v3 = vmul.f32 %v13469_v62, %v29559_v28  ;;  %v13474_v33 = vmul.f32 %v13468_v51, %v29560_v40  ;;  %v29563_v62 = vld [vmem:[#allocation57_spill] sm:$0xff]  ;;  %v13815_v51 = vsel %vm5876_vm1, %v26245_v44, %v26313_v55 }
 0x3ff   :  { %22575 = vmatprep.subr.msk.mxu0 %vm1614_vm10, %v13129_v43  ;;  %13291 = vmatprep.mubr.f32.mxu1 %v29264_v37  ;;  %v26476_v2 = vpop.permute.xlu0 %14498  ;;  %v13477_v43 = vmul.f32 %v13465_v9, %v29561_v4  ;;  %v13823_v47 = vmul.f32 %v13815_v51, %v29558_v15 }
 0x400   :  { %13220 = vmatprep.mubr.f32.mxu0 %v29264_v37  ;;  %22574 = vmatmul.mubr.msk.f32.vlgmr.msra.gmra.mxu1 %vm1610_vm11, %v22928_v46 }
 0x401   :  { %22579 = vmatpush1.msk.msra.mxu1 %vm1614_vm10, %v13130_v36  ;;  %22571 = vmatmul.mubr.msk.f32.vlgmr.msra.gmra.mxu0 %vm1610_vm11, %v22928_v46  ;;  %v26502_v12 = vpop.permute.xlu1 %14494  ;;  %v13479_v36 = vmul.f32 %v13471_v41, %v29563_v62  ;;  %v29565_v41 = vld [vmem:[#allocation58_spill] sm:$0xff] }
 0x402   :  { %22576 = vmatpush1.msk.msra.mxu0 %vm1614_vm10, %v13128_v58  ;;  %22584 = vmatprep.subr.msk.mxu1 %vm1614_vm10, %v13475_v11  ;;  %v13464_v58 = vsel %vm5876_vm1, %v26262_v34, %v26182_v39  ;;  %v13466_v11 = vsel %vm5876_vm1, %v26233_v1, %v13459_v61  ;;  %v13817_v39 = vsel %vm5876_vm1, %v26279_v50, %v26210_v60  ;;  %v29564_v34 = vld [vmem:[#allocation47_spill] sm:$0xff] }
 0x403   :  { %22581 = vmatprep.subr.msk.mxu0 %vm1614_vm10, %v13473_v3  ;;  %13433 = vmatprep.mubr.f32.mxu1 %v29264_v37  ;;  %v26510_v26 = vpop.permute.xlu0 %14502  ;;  %v13816_v1 = vsel %vm5876_vm1, %v26210_v60, %v26245_v44  ;;  %v13478_v61 = vmul.f32 %v13464_v58, %v29564_v34  ;;  %v13818_v3 = vsel %vm5876_vm1, %v26294_v52, %v26279_v50  ;;  %v22929_v60 = vld [vmem:[%s28856_s4 + $0x18] sm:$0xf] }
 0x404   :  { %13362 = vmatprep.mubr.f32.mxu0 %v29264_v37  ;;  %22580 = vmatmul.mubr.msk.f32.vlgmr.msra.gmra.mxu1 %vm1610_vm11, %v22928_v46  ;;  %v13821_v44 = vmul.f32 %v13817_v39, %v29559_v28  ;;  %v13820_v58 = vmul.f32 %v13818_v3, %v29562_v17  ;;  %v13812_v39 = vsel %vm5876_vm1, %v26331_v7, %v26287_v63 }
 0x405   :  { %22585 = vmatpush1.msk.msra.mxu1 %vm1614_vm10, %v13474_v33  ;;  %22577 = vmatmul.mubr.msk.f32.vlgmr.msra.gmra.mxu0 %vm1610_vm11, %v22928_v46  ;;  %v26529_v9 = vpop.permute.xlu1 %14492  ;;  %v13476_v33 = vmul.f32 %v13466_v11, %v29565_v41  ;;  %v13814_v11 = vsel %vm5876_vm1, %v26313_v55, %v26269_v25 }
 0x406   :  { %22582 = vmatpush1.msk.msra.mxu0 %vm1614_vm10, %v13472_v22  ;;  %22590 = vmatprep.subr.msk.mxu1 %vm1614_vm10, %v13479_v36  ;;  %v13813_v22 = vsel %vm5876_vm1, %v26269_v25, %v26331_v7  ;;  %v13822_v36 = vmul.f32 %v13816_v1, %v29560_v40  ;;  %v13824_v55 = vmul.f32 %v13814_v11, %v29565_v41 }
 0x407   :  { %22587 = vmatprep.subr.msk.mxu0 %vm1614_vm10, %v13477_v43  ;;  %13639 = vmatprep.mubr.f32.mxu1 %v29264_v37  ;;  %v26544_v46 = vpop.permute.xlu0 %14506  ;;  %v13819_v43 = vsel %vm5876_vm1, %v26287_v63, %v26294_v52  ;;  %v13825_v1 = vmul.f32 %v13813_v22, %v29561_v4  ;;  %v14165_v63 = vsel %vm6624_vm6, %v26371_v59, %v26303_v21  ;;  %v29567_v22 = vld [vmem:[#allocation73_spill] sm:$0xff]  ;;  %v29581_v4 = vld [vmem:[#allocation107_spill] sm:$0xff] }
 0x408   :  { %13568 = vmatprep.mubr.f32.mxu0 %v29264_v37  ;;  %22586 = vmatmul.mubr.msk.f32.vlgmr.msra.gmra.mxu1 %vm1610_vm11, %v22929_v60  ;;  %v13827_v51 = vmul.f32 %v13819_v43, %v29563_v62  ;;  %v13826_v7 = vmul.f32 %v13812_v39, %v29564_v34  ;;  %v29569_v39 = vld [vmem:[#allocation3_spill] sm:$0xff] }
 0x409   :  { %22591 = vmatpush1.msk.msra.mxu1 %vm1614_vm10, %v13478_v61  ;;  %22583 = vmatmul.mubr.msk.f32.vlgmr.msra.gmra.mxu0 %vm1610_vm11, %v22929_v60  ;;  %v26564_v50 = vpop.permute.xlu1 %14500  ;;  %v14163_v61 = vsel %vm6624_vm6, %v26343_v20, %v26434_v27  ;;  %v29580_v34 = vld [vmem:[#allocation103_spill] sm:$0xff] }
 0x40a   :  { %22588 = vmatpush1.msk.msra.mxu0 %vm1614_vm10, %v13476_v33  ;;  %22596 = vmatprep.subr.msk.mxu1 %vm1614_vm10, %v13823_v47  ;;  %v14164_v47 = vsel %vm6624_vm6, %v26303_v21, %v26343_v20  ;;  %v29566_v33 = vld [vmem:[#allocation75_spill] sm:$0xff]  ;;  %v14166_v21 = vsel %vm6624_vm6, %v26399_v8, %v26371_v59  ;;  %v14167_v20 = vsel %vm6624_vm6, %v26380_v6, %v26399_v8 }
 0x40b   :  { %22593 = vmatprep.subr.msk.mxu0 %vm1614_vm10, %v13821_v44  ;;  %13781 = vmatprep.mubr.f32.mxu1 %v29264_v37  ;;  %v14155_v52 = vpop.permute.xlu0 %14154  ;;  %v22930_v44 = vld [vmem:[%s28855_s5 + $0x18] sm:$0xf]  ;;  %v29570_v8 = vld [vmem:[#allocation71_spill] sm:$0xff]  ;;  %v2161_v41 = vadd.f32 %v29581_v4, %v29580_v34 }
 0x40c   :  { %13710 = vmatprep.mubr.f32.mxu0 %v29264_v37  ;;  %22592 = vmatmul.mubr.msk.f32.vlgmr.msra.gmra.mxu1 %vm1610_vm11, %v22929_v60  ;;  %v14161_v43 = vsel %vm6624_vm6, %v14155_v52, %v26464_v56 }
 0x40d   :  { %22597 = vmatpush1.msk.msra.mxu1 %vm1614_vm10, %v13822_v36  ;;  %22589 = vmatmul.mubr.msk.f32.vlgmr.msra.gmra.mxu0 %vm1610_vm11, %v22929_v60  ;;  %v26594_v25 = vpop.permute.xlu1 %14504  ;;  %v14171_v60 = vmul.f32 %v14163_v61, %v29566_v33  ;;  %v14169_v36 = vmul.f32 %v14165_v63, %v29567_v22  ;;  %v14168_v61 = vmul.f32 %v14166_v21, %v29570_v8  ;;  %v29571_v63 = vld [vmem:[#allocation70_spill] sm:$0xff] }
 0x40e   :  { %22594 = vmatpush1.msk.msra.mxu0 %vm1614_vm10, %v13820_v58  ;;  %22602 = vmatprep.subr.msk.mxu1 %vm1614_vm10, %v13827_v51  ;;  %v29568_v51 = vld [vmem:[#allocation69_spill] sm:$0xff] }
 0x40f   :  { %22599 = vmatprep.subr.msk.mxu0 %vm1614_vm10, %v13825_v1  ;;  %13987 = vmatprep.mubr.f32.mxu1 %v29264_v37  ;;  %v26606_v3 = vpop.permute.xlu0 %14844  ;;  %v14170_v11 = vmul.f32 %v14164_v47, %v29568_v51  ;;  %v14173_v1 = vmul.f32 %v14161_v43, %v29569_v39  ;;  %v14511_v47 = vsel %vm6624_vm6, %v26476_v2, %v26564_v50 }
 0x410   :  { %13916 = vmatprep.mubr.f32.mxu0 %v29264_v37  ;;  %22598 = vmatmul.mubr.msk.f32.vlgmr.msra.gmra.mxu1 %vm1610_vm11, %v22930_v44 }
 0x411   :  { %22603 = vmatpush1.msk.msra.mxu1 %vm1614_vm10, %v13826_v7  ;;  %22595 = vmatmul.mubr.msk.f32.vlgmr.msra.gmra.mxu0 %vm1610_vm11, %v22930_v44  ;;  %v26632_v58 = vpop.permute.xlu1 %14842  ;;  %v14175_v7 = vmul.f32 %v14167_v20, %v29571_v63  ;;  %v29574_v20 = vld [vmem:[#allocation92_spill] sm:$0xff] }
 0x412   :  { %22600 = vmatpush1.msk.msra.mxu0 %vm1614_vm10, %v13824_v55  ;;  %22608 = vmatprep.subr.msk.mxu1 %vm1614_vm10, %v14171_v60  ;;  %v14160_v55 = vsel %vm6624_vm6, %v26464_v56, %v26380_v6  ;;  %v14162_v60 = vsel %vm6624_vm6, %v26434_v27, %v14155_v52  ;;  %v14513_v6 = vsel %vm6624_vm6, %v26502_v12, %v26414_v42  ;;  %v29572_v56 = vld [vmem:[#allocation100_spill] sm:$0xff] }
 0x413   :  { %22605 = vmatprep.subr.msk.mxu0 %vm1614_vm10, %v14169_v36  ;;  %14129 = vmatprep.mubr.f32.mxu1 %v29264_v37  ;;  %v26640_v59 = vpop.permute.xlu0 %14846  ;;  %v29573_v36 = vld [vmem:[#allocation104_spill] sm:$0xff]  ;;  %v14174_v27 = vmul.f32 %v14160_v55, %v29574_v20  ;;  %v14512_v52 = vsel %vm6624_vm6, %v26414_v42, %v26476_v2  ;;  %v22931_v42 = vld [vmem:[%s28856_s4 + $0x1c] sm:$0xf] }
 0x414   :  { %14058 = vmatprep.mubr.f32.mxu0 %v29264_v37  ;;  %22604 = vmatmul.mubr.msk.f32.vlgmr.msra.gmra.mxu1 %vm1610_vm11, %v22930_v44  ;;  %v2090_v21 = vadd.f32 %v29573_v36, %v29572_v56  ;;  %v29576_v2 = vld [vmem:[#allocation101_spill] sm:$0xff]  ;;  %v14517_v36 = vmul.f32 %v14513_v6, %v29567_v22  ;;  %v14509_v6 = vsel %vm6624_vm6, %v26510_v26, %v26594_v25 }
 0x415   :  { %22609 = vmatpush1.msk.msra.mxu1 %vm1614_vm10, %v14170_v11  ;;  %22601 = vmatmul.mubr.msk.f32.vlgmr.msra.gmra.mxu0 %vm1610_vm11, %v22930_v44  ;;  %v26659_v43 = vpop.permute.xlu1 %14840  ;;  %v14514_v11 = vsel %vm6624_vm6, %v26529_v9, %v26502_v12  ;;  %v14515_v12 = vsel %vm6624_vm6, %v26544_v46, %v26529_v9  ;;  %v29582_v9 = vld [vmem:[#allocation108_spill] sm:$0xff] }
 0x416   :  { %22606 = vmatpush1.msk.msra.mxu0 %vm1614_vm10, %v14168_v61  ;;  %22614 = vmatprep.subr.msk.mxu1 %vm1614_vm10, %v14175_v7  ;;  %v14519_v61 = vmul.f32 %v14511_v47, %v29566_v33  ;;  %v29575_v7 = vld [vmem:[#allocation5_spill] sm:$0xff]  ;;  %v29579_v33 = vld [vmem:[#allocation106_spill] sm:$0xff]  ;;  %v14523_v34 = vmul.f32 %v14515_v12, %v29571_v63  ;;  %v29585_v12 = vld [vmem:[#allocation111_spill] sm:$0xff] }
 0x417   :  { %22611 = vmatprep.subr.msk.mxu0 %vm1614_vm10, %v14173_v1  ;;  %14335 = vmatprep.mubr.f32.mxu1 %v29264_v37  ;;  %v14855_v44 = vpop.permute.xlu0 %14854  ;;  %v14172_v56 = vmul.f32 %v14162_v60, %v29575_v7  ;;  %v29577_v1 = vld [vmem:[#allocation105_spill] sm:$0xff]  ;;  %v29578_v60 = vld [vmem:[#allocation102_spill] sm:$0xff] }
 0x418   :  { %14264 = vmatprep.mubr.f32.mxu0 %v29264_v37  ;;  %22610 = vmatmul.mubr.msk.f32.vlgmr.msra.gmra.mxu1 %vm1610_vm11, %v22931_v42  ;;  %v2019_v55 = vadd.f32 %v29577_v1, %v29576_v2  ;;  %v2232_v62 = vadd.f32 %v29579_v33, %v29578_v60  ;;  %v14518_v2 = vmul.f32 %v14512_v52, %v29568_v51  ;;  %v29583_v52 = vld [vmem:[#allocation109_spill] sm:$0xff] }
 0x419   :  { %22615 = vmatpush1.msk.msra.mxu1 %vm1614_vm10, %v14174_v27  ;;  %22607 = vmatmul.mubr.msk.f32.vlgmr.msra.gmra.mxu0 %vm1610_vm11, %v22931_v42  ;;  %v26696_v47 = vpop.permute.xlu1 %14848  ;;  %v2624_v27 = vadd.f32 %v29582_v9, %v2090_v21  ;;  %v14516_v1 = vmul.f32 %v14514_v11, %v29570_v8  ;;  %v14508_v33 = vsel %vm6624_vm6, %v26594_v25, %v26544_v46  ;;  %v29584_v25 = vld [vmem:[#allocation110_spill] sm:$0xff] }
 0x41a   :  { %22612 = vmatpush1.msk.msra.mxu0 %vm1614_vm10, %v14172_v56  ;;  %22620 = vmatprep.subr.msk.mxu1 %vm1614_vm10, %v14519_v61  ;;  %v14859_v21 = vsel %vm7372_vm7, %v26640_v59, %v26696_v47  ;;  %v2622_v11 = vadd.f32 %v29583_v52, %v2019_v55  ;;  %v14510_v61 = vsel %vm6624_vm6, %v26564_v50, %v26510_v26  ;;  %v29586_v26 = vld [vmem:[#allocation113_spill] sm:$0xff] }
 0x41b   :  { %22617 = vmatprep.subr.msk.mxu0 %vm1614_vm10, %v14517_v36  ;;  %14477 = vmatprep.mubr.f32.mxu1 %v29264_v37  ;;  %v14851_v4 = vpop.permute.xlu0 %14850  ;;  %v14521_v56 = vmul.f32 %v14509_v6, %v29569_v39  ;;  %v2628_v36 = vadd.f32 %v29584_v25, %v2232_v62  ;;  %v2626_v60 = vadd.f32 %v29585_v12, %v2161_v41  ;;  %v29587_v62 = vld [vmem:[#allocation6_spill] sm:$0xff]  ;;  %v29591_v12 = vld [vmem:[#allocation117_spill] sm:$0xff] }
 0x41c   :  { %14406 = vmatprep.mubr.f32.mxu0 %v29264_v37  ;;  %22616 = vmatmul.mubr.msk.f32.vlgmr.msra.gmra.mxu1 %vm1610_vm11, %v22931_v42  ;;  %v14861_v55 = vsel %vm7372_vm7, %v26632_v58, %v26606_v3  ;;  %v2975_v50 = vadd.f32 %v29586_v26, %v2622_v11  ;;  %v14522_v6 = vmul.f32 %v14508_v33, %v29574_v20  ;;  %v29588_v33 = vld [vmem:[#allocation93_spill] sm:$0xff]  ;;  %v29592_v26 = vld [vmem:[#allocation94_spill] sm:$0xff]  ;;  %v29601_v20 = vld [vmem:[#allocation120_spill] sm:$0xff] }
 0x41d   :  { %22621 = vmatpush1.msk.msra.mxu1 %vm1614_vm10, %v14518_v2  ;;  %22613 = vmatmul.mubr.msk.f32.vlgmr.msra.gmra.mxu0 %vm1610_vm11, %v22931_v42  ;;  %v14853_v46 = vpop.permute.xlu1 %14852  ;;  %v14867_v42 = vmul.f32 %v14859_v21, %v29587_v62  ;;  %v14520_v9 = vmul.f32 %v14510_v61, %v29575_v7  ;;  %v14860_v2 = vsel %vm7372_vm7, %v26606_v3, %v26640_v59  ;;  %v29589_v59 = vld [vmem:[#allocation112_spill] sm:$0xff]  ;;  %v29590_v61 = vld [vmem:[#allocation115_spill] sm:$0xff] }
 0x41e   :  { %22618 = vmatpush1.msk.msra.mxu0 %vm1614_vm10, %v14516_v1  ;;  %22626 = vmatprep.subr.msk.mxu1 %vm1614_vm10, %v14523_v34  ;;  %v22932_v1 = vld [vmem:[%s28855_s5 + $0x1c] sm:$0xf]  ;;  %v14857_v34 = vsel %vm7372_vm7, %v14851_v4, %v14853_v46  ;;  %v14865_v21 = vmul.f32 %v14861_v55, %v29588_v33  ;;  %v14862_v52 = vsel %vm7372_vm7, %v26659_v43, %v26632_v58 }
 0x41f   :  { %22623 = vmatprep.subr.msk.mxu0 %vm1614_vm10, %v14521_v56  ;;  %14683 = vmatprep.mubr.f32.mxu1 %v29264_v37  ;;  %v26745_v41 = vpop.permute.xlu0 %15192  ;;  %v14863_v3 = vsel %vm7372_vm7, %v14855_v44, %v26659_v43  ;;  %v2977_v11 = vadd.f32 %v29589_v59, %v2624_v27  ;;  %v2979_v56 = vadd.f32 %v29590_v61, %v2626_v60  ;;  %v29594_v59 = vld [vmem:[#allocation95_spill] sm:$0xff]  ;;  %v29595_v61 = vld [vmem:[#allocation96_spill] sm:$0xff] }
 0x420   :  { %14612 = vmatprep.mubr.f32.mxu0 %v29264_v37  ;;  %22622 = vmatmul.mubr.msk.f32.vlgmr.msra.gmra.mxu1 %vm1610_vm11, %v22932_v1  ;;  %v14856_v25 = vsel %vm7372_vm7, %v14853_v46, %v14855_v44  ;;  %v3370_v55 = vadd.f32 %v29591_v12, %v2975_v50  ;;  %v14866_v43 = vmul.f32 %v14860_v2, %v29592_v26  ;;  %v29596_v46 = vld [vmem:[#allocation116_spill] sm:$0xff]  ;;  %v29597_v2 = vld [vmem:[#allocation99_spill] sm:$0xff]  ;;  %v29599_v12 = vld [vmem:[#allocation121_spill] sm:$0xff] }
 0x421   :  { %22627 = vmatpush1.msk.msra.mxu1 %vm1614_vm10, %v14522_v6  ;;  %22619 = vmatmul.mubr.msk.f32.vlgmr.msra.gmra.mxu0 %vm1610_vm11, %v22932_v1  ;;  %v29593_v6 = vld [vmem:[#allocation97_spill] sm:$0xff]  ;;  %v14864_v60 = vmul.f32 %v14862_v52, %v29594_v59  ;;  %v3372_v50 = vadd.f32 %v29596_v46, %v2977_v11  ;;  %v29598_v52 = vld [vmem:[#allocation114_spill] sm:$0xff]  ;;  %v29600_v11 = vld [vmem:[#allocation119_spill] sm:$0xff] }
 0x422   :  { %22624 = vmatpush1.msk.msra.mxu0 %vm1614_vm10, %v14520_v9  ;;  %14825 = vmatprep.mubr.f32.mxu1 %v29264_v37  ;;  %v15191_v58 = vpop.permute.xlu1 %15190  ;;  %v14869_v27 = vmul.f32 %v14857_v34, %v29593_v6  ;;  %v14871_v9 = vmul.f32 %v14863_v3, %v29595_v61  ;;  %v14870_v34 = vmul.f32 %v14856_v25, %v29597_v2 }
 0x423   :  { %22629 = vmatprep.subr.msk.mxu0 %vm1614_vm10, %v14865_v21  ;;  %22632 = vmatprep.subr.msk.mxu1 %vm1614_vm10, %v14867_v42  ;;  %v15209_v44 = vsel %vm7372_vm7, %v15191_v58, %v26745_v41  ;;  %v14858_v42 = vsel %vm7372_vm7, %v26696_v47, %v14851_v4  ;;  %v2981_v3 = vadd.f32 %v29598_v52, %v2628_v36  ;;  %v29603_v36 = vld [vmem:[#allocation98_spill] sm:$0xff] }
 0x424   :  { %14754 = vmatprep.mubr.f32.mxu0 %v29264_v37  ;;  %22628 = vmatmul.mubr.msk.f32.vlgmr.msra.gmra.mxu1 %vm1610_vm11, %v22932_v1  ;;  %v3723_v63 = vadd.f32 %v29599_v12, %v3370_v55  ;;  %v3374_v46 = vadd.f32 %v29600_v11, %v2979_v56  ;;  %v3725_v39 = vadd.f32 %v29601_v20, %v3372_v50  ;;  %v22933_v55 = vld [vmem:[%s28856_s4 + $0x20] sm:$0xf] }
 0x425   :  { %22633 = vmatpush1.msk.msra.mxu1 %vm1614_vm10, %v14866_v43  ;;  %22625 = vmatmul.mubr.msk.f32.vlgmr.msra.gmra.mxu0 %vm1610_vm11, %v22932_v1  ;;  %v15195_v21 = vpop.permute.xlu0 %15194  ;;  %v15213_v47 = vmul.f32 %v15209_v44, %v29588_v33  ;;  %v29602_v1 = vld [vmem:[#allocation125_spill] sm:$0xff]  ;;  %v14868_v43 = vmul.f32 %v14858_v42, %v29603_v36  ;;  %v29604_v56 = vld [vmem:[#allocation118_spill] sm:$0xff]  ;;  %v29606_v44 = vld [vmem:[#allocation123_spill] sm:$0xff] }
 0x426   :  { %22630 = vmatpush1.msk.msra.mxu0 %vm1614_vm10, %v14864_v60  ;;  %22638 = vmatprep.subr.msk.mxu1 %vm1614_vm10, %v14871_v9  ;;  %v4118_v25 = vadd.f32 %v29602_v1, %v3723_v63  ;;  %v29605_v60 = vld [vmem:[#allocation124_spill] sm:$0xff]  ;;  %v3727_v50 = vadd.f32 %v29606_v44, %v3374_v46  ;;  %v29607_v42 = vld [vmem:[#allocation129_spill] sm:$0xff] }
 0x427   :  { %15031 = vmatprep.mubr.f32.mxu1 %v29264_v37  ;;  %22635 = vmatprep.subr.msk.mxu0 %vm1614_vm10, %v14869_v27  ;;  %v15189_v4 = vpop.permute.xlu1 %15188  ;;  %v3376_v27 = vadd.f32 %v29604_v56, %v2981_v3  ;;  %v4120_v9 = vadd.f32 %v29605_v60, %v3725_v39  ;;  %v29609_v3 = vld [vmem:[#allocation128_spill] sm:$0xff]  ;;  %v29610_v39 = vld [vmem:[#allocation127_spill] sm:$0xff]  ;;  %v29611_v56 = vld [vmem:[#allocation133_spill] sm:$0xff] }
 0x428   :  { %14960 = vmatprep.mubr.f32.mxu0 %v29264_v37  ;;  %22634 = vmatmul.mubr.msk.f32.vlgmr.msra.gmra.mxu1 %vm1610_vm11, %v22933_v55  ;;  %v15210_v20 = vsel %vm7372_vm7, %v15189_v4, %v15191_v58  ;;  %v4471_v52 = vadd.f32 %v29607_v42, %v4118_v25  ;;  %v29608_v58 = vld [vmem:[#allocation122_spill] sm:$0xff]  ;;  %v15208_v25 = vsel %vm7372_vm7, %v26745_v41, %v15195_v21  ;;  %v29615_v42 = vld [vmem:[#allocation137_spill] sm:$0xff] }
 0x429   :  { %22639 = vmatpush1.msk.msra.mxu1 %vm1614_vm10, %v14870_v34  ;;  %22631 = vmatmul.mubr.msk.f32.vlgmr.msra.gmra.mxu0 %vm1610_vm11, %v22933_v55  ;;  %v15199_v63 = vpop.permute.xlu0 %15198  ;;  %v15212_v12 = vmul.f32 %v15210_v20, %v29594_v59  ;;  %v3729_v11 = vadd.f32 %v29608_v58, %v3376_v27  ;;  %v4473_v1 = vadd.f32 %v29609_v3, %v4120_v9  ;;  %v29612_v20 = vld [vmem:[#allocation126_spill] sm:$0xff]  ;;  %v29613_v27 = vld [vmem:[#allocation132_spill] sm:$0xff]  ;;  %v29614_v9 = vld [vmem:[#allocation131_spill] sm:$0xff] }
 0x42a   :  { %22636 = vmatpush1.msk.msra.mxu0 %vm1614_vm10, %v14868_v43  ;;  %15173 = vmatprep.mubr.f32.mxu1 %v29264_v37  ;;  %v4122_v34 = vadd.f32 %v29610_v39, %v3727_v50  ;;  %v4792_v46 = vadd.f32 %v29611_v56, %v4471_v52  ;;  %v29616_v58 = vld [vmem:[#allocation136_spill] sm:$0xff]  ;;  %v15214_v3 = vmul.f32 %v15208_v25, %v29592_v26  ;;  %v22934_v25 = vld [vmem:[%s28855_s5 + $0x20] sm:$0xf] }
 0x42b   :  { %22641 = vmatprep.subr.msk.mxu0 %vm1614_vm10, %v15213_v47  ;;  %15102 = vmatprep.mubr.f32.mxu0 %v29264_v37  ;;  %v4124_v60 = vadd.f32 %v29612_v20, %v3729_v11  ;;  %v4794_v44 = vadd.f32 %v29613_v27, %v4473_v1  ;;  %v29617_v1 = vld [vmem:[#allocation130_spill] sm:$0xff]  ;;  %v29619_v20 = vld [vmem:[#allocation141_spill] sm:$0xff] }
 0x42c   :  { %22640 = vmatmul.mubr.msk.f32.vlgmr.msra.gmra.mxu1 %vm1610_vm11, %v22933_v55  ;;  %v15197_v43 = vpop.permute.xlu1 %15196  ;;  %v4475_v50 = vadd.f32 %v29614_v9, %v4122_v34  ;;  %v5105_v52 = vadd.f32 %v29615_v42, %v4792_v46  ;;  %v29621_v9 = vld [vmem:[#allocation145_spill] sm:$0xff] }
 0x42d   :  { %22637 = vmatmul.mubr.msk.f32.vlgmr.msra.gmra.mxu0 %vm1610_vm11, %v22933_v55  ;;  %v15207_v47 = vsel %vm7372_vm7, %v15195_v21, %v15197_v43  ;;  %15379 = vmatprep.mubr.f32.mxu1 %v29264_v37  ;;  %v5107_v11 = vadd.f32 %v29616_v58, %v4794_v44  ;;  %v4477_v39 = vadd.f32 %v29617_v1, %v4124_v60  ;;  %v29618_v21 = vld [vmem:[#allocation135_spill] sm:$0xff] }
 0x42e   :  { %22642 = vmatpush1.msk.msra.mxu0 %vm1614_vm10, %v15212_v12  ;;  %v15215_v41 = vmul.f32 %v15207_v47, %v29587_v62  ;;  %15308 = vmatprep.mubr.f32.mxu0 %v29264_v37  ;;  %v4796_v56 = vadd.f32 %v29618_v21, %v4475_v50  ;;  %v5500_v27 = vadd.f32 %v29619_v20, %v5105_v52  ;;  %v29620_v12 = vld [vmem:[#allocation140_spill] sm:$0xff]  ;;  %v29625_v21 = vld [vmem:[#allocation134_spill] sm:$0xff] }
 0x42f   :  { %v15203_v55 = vpop.permute.xlu0 %15202  ;;  %v5502_v46 = vadd.f32 %v29620_v12, %v5107_v11  ;;  %v15206_v47 = vsel %vm7372_vm7, %v15197_v43, %v15199_v63  ;;  %v29622_v43 = vld [vmem:[#allocation139_spill] sm:$0xff]  ;;  %v29623_v11 = vld [vmem:[#allocation144_spill] sm:$0xff]  ;;  %v4798_v20 = vadd.f32 %v29625_v21, %v4477_v39  ;;  %v29637_v21 = vld [vmem:[#allocation146_spill] sm:$0xff] }
 0x430   :  { %v15211_v34 = vsel %vm7372_vm7, %v15203_v55, %v15189_v4  ;;  %22644 = vmatprep.subr.msk.mxu1 %vm1614_vm10, %v15215_v41  ;;  %v5853_v4 = vadd.f32 %v29621_v9, %v5500_v27  ;;  %v5109_v52 = vadd.f32 %v29622_v43, %v4796_v56  ;;  %v29626_v27 = vld [vmem:[#allocation143_spill] sm:$0xff]  ;;  %v29627_v56 = vld [vmem:[#allocation148_spill] sm:$0xff] }
 0x431   :  { %v15219_v44 = vmul.f32 %v15211_v34, %v29595_v61  ;;  %22643 = vmatmul.mubr.msk.f32.vlgmr.msra.gmra.mxu0 %vm1610_vm11, %v22934_v25  ;;  %v15201_v60 = vpop.permute.xlu1 %15200  ;;  %22645 = vmatpush1.msk.msra.mxu1 %vm1614_vm10, %v15214_v3  ;;  %v5855_v3 = vadd.f32 %v29623_v11, %v5502_v46  ;;  %v29629_v46 = vld [vmem:[#allocation138_spill] sm:$0xff]  ;;  %v29631_v39 = vld [vmem:[#allocation152_spill] sm:$0xff] }
 0x432   :  { %v15204_v50 = vsel %vm7372_vm7, %v15201_v60, %v15203_v55  ;;  %v15205_v42 = vsel %vm7372_vm7, %v15199_v63, %v15201_v60  ;;  %22646 = vmatmul.mubr.msk.f32.vlgmr.msra.gmra.mxu1 %vm1610_vm11, %v22934_v25  ;;  %15450 = vmatprep.mubr.f32.mxu0 %v29264_v37  ;;  %v29624_v55 = vld [vmem:[#allocation149_spill] sm:$0xff]  ;;  %v15216_v63 = vmul.f32 %v15206_v47, %v29603_v36 }
 0x433   :  { %v15217_v41 = vmul.f32 %v15205_v42, %v29593_v6  ;;  %v15218_v58 = vmul.f32 %v15204_v50, %v29597_v2  ;;  %22650 = vmatprep.subr.msk.mxu1 %vm1614_vm10, %v15219_v44  ;;  %15521 = vmatprep.mubr.f32.mxu1 %v29264_v37  ;;  %v6248_v1 = vadd.f32 %v29624_v55, %v5853_v4  ;;  %v29628_v60 = vld [vmem:[#allocation153_spill] sm:$0xff]  ;;  %v29630_v4 = vld [vmem:[#allocation147_spill] sm:$0xff] }
 0x434   :  { %v5504_v34 = vadd.f32 %v29626_v27, %v5109_v52  ;;  %v6250_v12 = vadd.f32 %v29627_v56, %v5855_v3  ;;  %v5111_v9 = vadd.f32 %v29629_v46, %v4798_v20  ;;  %v29632_v42 = vld [vmem:[#allocation157_spill] sm:$0xff]  ;;  %v29633_v52 = vld [vmem:[#allocation142_spill] sm:$0xff]  ;;  %v29635_v3 = vld [vmem:[#allocation156_spill] sm:$0xff] }
 0x435   :  { %22647 = vmatprep.subr.msk.mxu0 %vm1614_vm10, %v15217_v41  ;;  %22651 = vmatpush1.msk.msra.mxu1 %vm1614_vm10, %v15218_v58  ;;  %v6601_v44 = vadd.f32 %v29628_v60, %v6248_v1  ;;  %v29634_v58 = vld [vmem:[#allocation151_spill] sm:$0xff]  ;;  %v29636_v1 = vld [vmem:[#allocation161_spill] sm:$0xff]  ;;  %v29641_v46 = vld [vmem:[#allocation150_spill] sm:$0xff] }
 0x436   :  { %22648 = vmatpush1.msk.msra.mxu0 %vm1614_vm10, %v15216_v63  ;;  %22652 = vmatmul.mubr.msk.f32.vlgmr.msra.gmra.mxu1 %vm1610_vm11, %v22934_v25  ;;  %v5857_v47 = vadd.f32 %v29630_v4, %v5504_v34  ;;  %v6603_v50 = vadd.f32 %v29631_v39, %v6250_v12  ;;  %v5506_v41 = vadd.f32 %v29633_v52, %v5111_v9  ;;  %v29638_v27 = vld [vmem:[#allocation155_spill] sm:$0xff]  ;;  %v29639_v34 = vld [vmem:[#allocation160_spill] sm:$0xff]  ;;  %v29640_v60 = vld [vmem:[#allocation165_spill] sm:$0xff] }
 0x437   :  { %22649 = vmatmul.mubr.msk.f32.vlgmr.msra.gmra.mxu0 %vm1610_vm11, %v22934_v25  ;;  %15899 = vmatprep.mubr.f32.mxu1 %v29264_v37  ;;  %v6996_v43 = vadd.f32 %v29632_v42, %v6601_v44  ;;  %v29642_v4 = vld [vmem:[#allocation159_spill] sm:$0xff]  ;;  %v29643_v42 = vld [vmem:[#allocation164_spill] sm:$0xff] }
 0x438   :  { %15828 = vmatprep.mubr.f32.mxu0 %v29264_v37  ;;  %v6252_v11 = vadd.f32 %v29634_v58, %v5857_v47  ;;  %v6998_v55 = vadd.f32 %v29635_v3, %v6603_v50  ;;  %v5859_v20 = vadd.f32 %v29637_v21, %v5506_v41  ;;  %v29644_v52 = vld [vmem:[#allocation171_spill] sm:$0xff]  ;;  %v29645_v58 = vld [vmem:[#allocation154_spill] sm:$0xff]  ;;  %v29649_v21 = vld [vmem:[#allocation169_spill] sm:$0xff] }
 0x439   :  { %v7349_v63 = vadd.f32 %v29636_v1, %v6996_v43  ;;  %v29646_v3 = vld [vmem:[#allocation163_spill] sm:$0xff]  ;;  %v29648_v41 = vld [vmem:[#allocation170_spill] sm:$0xff] }
 0x43a   :  { %v6605_v25 = vadd.f32 %v29638_v27, %v6252_v11  ;;  %v7351_v56 = vadd.f32 %v29639_v34, %v6998_v55  ;;  %v6254_v44 = vadd.f32 %v29641_v46, %v5859_v20  ;;  %v29652_v20 = vld [vmem:[#allocation168_spill] sm:$0xff] }
 0x43b   :  { %v7744_v12 = vadd.f32 %v29640_v60, %v7349_v63 }
 0x43c   :  { %v7000_v39 = vadd.f32 %v29642_v4, %v6605_v25  ;;  %v7746_v9 = vadd.f32 %v29643_v42, %v7351_v56  ;;  %v6607_v50 = vadd.f32 %v29645_v58, %v6254_v44  ;;  %v29654_v25 = vld [vmem:[#allocation158_spill] sm:$0xff]  ;;  %v29655_v56 = vld [vmem:[#allocation167_spill] sm:$0xff] }
 0x43d   :  { %v8097_v47 = vadd.f32 %v29644_v52, %v7744_v12 }
 0x43e   :  { %v7353_v43 = vadd.f32 %v29646_v3, %v7000_v39  ;;  %v8099_v11 = vadd.f32 %v29648_v41, %v7746_v9  ;;  %v7002_v34 = vadd.f32 %v29654_v25, %v6607_v50  ;;  %v29657_v39 = vld [vmem:[#allocation162_spill] sm:$0xff]  ;;  %v29658_v9 = vld [vmem:[#allocation175_spill] sm:$0xff] }
 0x43f   :  { %v26903_v1 = vpop.permute.xlu1 %8106  ;;  %v29663_v25 = vld [vmem:[#allocation174_spill] sm:$0xff] }
 0x440   :  { %29647 = vst [vmem:[#allocation45_spill] sm:$0xff] %v26903_v1  ;;  %v26908_v55 = vadd.f32 %v26903_v1, %v29649_v21  ;;  %v26911_v63 = vadd.f32 %v26903_v1, %v8097_v47  ;;  %v26915_v27 = vadd.f32 %v26903_v1, %v29652_v20  ;;  %v7748_v60 = vadd.f32 %v29655_v56, %v7353_v43  ;;  %v29659_v47 = vld [vmem:[#allocation173_spill] sm:$0xff]  ;;  %v29661_v43 = vld [vmem:[#allocation166_spill] sm:$0xff]  ;;  %v29664_v56 = vld [vmem:[#allocation172_spill] sm:$0xff] }
 0x441   :  { %v26920_v12 = vadd.f32 %v26903_v1, %v8099_v11  ;;  %v7355_v42 = vadd.f32 %v29657_v39, %v7002_v34  ;;  %v26930_v58 = vadd.f32 %v26903_v1, %v29659_v47 }
 0x442   :  { %29650 = vst [vmem:[#allocation46_spill] sm:$0xff] %v26908_v55  ;;  %29651 = vst [vmem:[#allocation34_spill] sm:$0xff] %v26911_v63  ;;  %v8117_v46 = vsel %vm1614_vm10, %v26908_v55, 0.0  ;;  %v8118_v44 = vsel %vm1614_vm10, %v26911_v63, 0.0  ;;  %v8101_v52 = vadd.f32 %v29658_v9, %v7748_v60  ;;  %v8120_v50 = vsel %vm1614_vm10, %v26915_v27, 0.0 }
 0x443   :  { %29653 = vst [vmem:[#allocation33_spill] sm:$0xff] %v26915_v27  ;;  %29656 = vst [vmem:[#allocation35_spill] sm:$0xff] %v26920_v12  ;;  %v8119_v4 = vadd.f32 %v8118_v44, %v8117_v46  ;;  %v7750_v41 = vadd.f32 %v29661_v43, %v7355_v42  ;;  %v8122_v21 = vsel %vm1614_vm10, %v26920_v12, 0.0  ;;  %v26943_v60 = vadd.f32 %v26903_v1, %v29664_v56  ;;  %v9514_v43 = vpop.f32.mrf.mxu0 }
 0x444   :  { %29660 = vst [vmem:[#allocation36_spill] sm:$0xff] %v26930_v58  ;;  %v26936_v11 = vadd.f32 %v26903_v1, %v8101_v52  ;;  %v8124_v46 = vsel %vm1614_vm10, %v26930_v58, 0.0 }
 0x445   :  { %v8121_v3 = vadd.f32 %v8120_v50, %v8119_v4  ;;  %v8103_v34 = vadd.f32 %v29663_v25, %v7750_v41  ;;  %29665 = vst [vmem:[#allocation49_spill] sm:$0xff] %v26943_v60  ;;  %v8128_v9 = vsel %vm1614_vm10, %v26943_v60, 0.0 }
 0x446   :  { %29662 = vst [vmem:[#allocation48_spill] sm:$0xff] %v26936_v11  ;;  %v8126_v39 = vsel %vm1614_vm10, %v26936_v11, 0.0 }
 0x447   :  { %v8123_v20 = vadd.f32 %v8122_v21, %v8121_v3  ;;  %v26948_v4 = vadd.f32 %v26903_v1, %v8103_v34  ;;  %v9585_v3 = vpop.f32.mrf.mxu1  ;;  %v26958_v21 = vpop.f32.mrf.mxu0 }
 0x449   :  { %v8125_v44 = vadd.f32 %v8124_v46, %v8123_v20  ;;  %29666 = vst [vmem:[#allocation50_spill] sm:$0xff] %v26948_v4  ;;  %v8130_v47 = vsel %vm1614_vm10, %v26948_v4, 0.0  ;;  %v26956_v41 = vpop.f32.mrf.mxu1  ;;  %v9656_v25 = vpop.f32.mrf.mxu0 }
 0x44b   :  { %v8127_v42 = vadd.f32 %v8126_v39, %v8125_v44  ;;  %v9727_v20 = vpop.f32.mrf.mxu1  ;;  %v26962_v56 = vpop.f32.mrf.mxu0 }
 0x44d   :  { %v8129_v52 = vadd.f32 %v8128_v9, %v8127_v42  ;;  %v26960_v34 = vpop.f32.mrf.mxu1 }
 0x44f   :  { %v8131_v50 = vadd.f32 %v8130_v47, %v8129_v52 }
 0x451   :  { %8132 = vadd.xlane.f32.xlu0 %v8131_v50 }
 0x457   :  { %v9893_v46 = vpop.f32.mrf.mxu1 }
 0x458   :  { %v9894_v61 = vadd.f32 %v9893_v46, %v9585_v3 }
 0x459   :  { %v26964_v39 = vpop.f32.mrf.mxu1 }
 0x45e   :  { %v9822_v44 = vpop.f32.mrf.mxu0 }
 0x45f   :  { %v9823_v2 = vadd.f32 %v9822_v44, %v9514_v43 }
 0x460   :  { %v26966_v42 = vpop.f32.mrf.mxu0 }
 0x46f   :  { %v10035_v9 = vpop.f32.mrf.mxu1 }
 0x470   :  { %v9964_v52 = vpop.f32.mrf.mxu0  ;;  %v10036_v7 = vadd.f32 %v10035_v9, %v9727_v20 }
 0x471   :  { %v26968_v47 = vpop.f32.mrf.mxu1  ;;  %v9965_v51 = vadd.f32 %v9964_v52, %v9656_v25 }
 0x472   :  { %v26970_v50 = vpop.f32.mrf.mxu0 }
 0x474   :  { %v10233_v6 = vpop.f32.mrf.mxu1 }
 0x475   :  { %v10382_v36 = vadd.f32 %v10233_v6, %v9894_v61  ;;  %v10162_v62 = vpop.f32.mrf.mxu0 }
 0x476   :  { %v10380_v26 = vadd.f32 %v10162_v62, %v9823_v2  ;;  %v26972_v59 = vpop.f32.mrf.mxu1 }
 0x477   :  { %v26974_v33 = vpop.f32.mrf.mxu0 }
 0x479   :  { %v10375_v8 = vpop.f32.mrf.mxu1 }
 0x47a   :  { %v10386_v22 = vadd.f32 %v10375_v8, %v10036_v7  ;;  %v10304_v15 = vpop.f32.mrf.mxu0 }
 0x47b   :  { %v10384_v40 = vadd.f32 %v10304_v15, %v9965_v51  ;;  %v26976_v17 = vpop.f32.mrf.mxu1 }
 0x47c   :  { %v26978_v28 = vpop.f32.mrf.mxu0 }
 0x47f   :  { %v10581_v3 = vpop.f32.mrf.mxu1 }
 0x480   :  { %v10730_v43 = vadd.f32 %v10581_v3, %v10382_v36  ;;  %v10510_v46 = vpop.f32.mrf.mxu0 }
 0x481   :  { %v10728_v6 = vadd.f32 %v10510_v46, %v10380_v26  ;;  %v26980_v61 = vpop.f32.mrf.mxu1 }
 0x482   :  { %v26982_v62 = vpop.f32.mrf.mxu0 }
 0x483   :  { %v10723_v2 = vpop.f32.mrf.mxu1 }
 0x484   :  { %v10734_v44 = vadd.f32 %v10723_v2, %v10386_v22 }
 0x485   :  { %v10652_v20 = vpop.f32.mrf.mxu0  ;;  %v26984_v25 = vpop.f32.mrf.mxu1 }
 0x486   :  { %v10732_v8 = vadd.f32 %v10652_v20, %v10384_v40 }
 0x487   :  { %v26986_v7 = vpop.f32.mrf.mxu0  ;;  %v10929_v15 = vpop.f32.mrf.mxu1 }
 0x488   :  { %v11078_v51 = vadd.f32 %v10929_v15, %v10730_v43 }
 0x489   :  { %v10858_v9 = vpop.f32.mrf.mxu0  ;;  %v26988_v52 = vpop.f32.mrf.mxu1 }
 0x48a   :  { %v11076_v36 = vadd.f32 %v10858_v9, %v10728_v6 }
 0x48b   :  { %v26990_v3 = vpop.f32.mrf.mxu0  ;;  %v11071_v26 = vpop.f32.mrf.mxu1 }
 0x48c   :  { %v11082_v46 = vadd.f32 %v11071_v26, %v10734_v44 }
 0x48d   :  { %v11000_v24 = vpop.f32.mrf.mxu0  ;;  %v26992_v31 = vpop.f32.mrf.mxu1 }
 0x48e   :  { %v11080_v22 = vadd.f32 %v11000_v24, %v10732_v8 }
 0x48f   :  { %v26994_v2 = vpop.f32.mrf.mxu0 }
 0x490   :  { %v11277_v57 = vpop.f32.mrf.mxu1 }
 0x491   :  { %v11426_v40 = vadd.f32 %v11277_v57, %v11078_v51  ;;  %v11206_v20 = vpop.f32.mrf.mxu0 }
 0x492   :  { %v11424_v35 = vadd.f32 %v11206_v20, %v11076_v36  ;;  %v26996_v18 = vpop.f32.mrf.mxu1 }
 0x493   :  { %v26998_v43 = vpop.f32.mrf.mxu0 }
 0x494   :  { %v11419_v15 = vpop.f32.mrf.mxu1 }
 0x495   :  { %v11430_v6 = vadd.f32 %v11419_v15, %v11082_v46  ;;  %v11348_v9 = vpop.f32.mrf.mxu0 }
 0x496   :  { %v11428_v0 = vadd.f32 %v11348_v9, %v11080_v22  ;;  %v27000_v13 = vpop.f32.mrf.mxu1 }
 0x497   :  { %v27002_v44 = vpop.f32.mrf.mxu0 }
 0x498   :  { %v11625_v26 = vpop.f32.mrf.mxu1 }
 0x499   :  { %v27004_v24 = vadd.f32 %v11625_v26, %v11426_v40  ;;  %v11554_v8 = vpop.f32.mrf.mxu0 }
 0x49a   :  { %v27006_v45 = vadd.f32 %v11554_v8, %v11424_v35  ;;  %v27008_v57 = vpop.f32.mrf.mxu1 }
 0x49b   :  { %v27010_v51 = vpop.f32.mrf.mxu0 }
 0x49c   :  { %v11767_v36 = vpop.f32.mrf.mxu1 }
 0x49d   :  { %v11778_v20 = vadd.f32 %v11767_v36, %v11430_v6  ;;  %v11696_v54 = vpop.f32.mrf.mxu0 }
 0x49e   :  { %v11776_v46 = vadd.f32 %v11696_v54, %v11428_v0  ;;  %v27012_v15 = vpop.f32.mrf.mxu1 }
 0x49f   :  { %v27014_v22 = vpop.f32.mrf.mxu0 }
 0x4a0   :  { %v27016_v9 = vpop.f32.mrf.mxu1 }
 0x4a1   :  { %v27018_v48 = vpop.f32.mrf.mxu0 }
 0x4a2   :  { %v27020_v40 = vpop.f32.mrf.mxu1 }
 0x4a3   :  { %v27022_v35 = vpop.f32.mrf.mxu0 }
 0x4a4   :  { %v12115_v26 = vpop.f32.mrf.mxu1 }
 0x4a5   :  { %v27024_v8 = vadd.f32 %v12115_v26, %v11778_v20  ;;  %v12044_v49 = vpop.f32.mrf.mxu0 }
 0x4a6   :  { %v27026_v16 = vadd.f32 %v12044_v49, %v11776_v46  ;;  %v27028_v6 = vpop.f32.mrf.mxu1 }
 0x4a7   :  { %v27030_v54 = vpop.f32.mrf.mxu0 }
 0x4a8   :  { %v27032_v0 = vpop.f32.mrf.mxu1 }
 0x4a9   :  { %v27034_v36 = vpop.f32.mrf.mxu0 }
 0x4aa   :  { %v27036_v10 = vpop.f32.mrf.mxu1 }
 0x4ab   :  { %v27038_v14 = vpop.f32.mrf.mxu0 }
 0x4ac   :  { %v27040_v19 = vpop.f32.mrf.mxu1 }
 0x4ad   :  { %v27042_v38 = vpop.f32.mrf.mxu0 }
 0x4ae   :  { %v27044_v20 = vpop.f32.mrf.mxu1 }
 0x4af   :  { %29667 = vst [vmem:[#allocation53_spill] sm:$0xff] %v27044_v20  ;;  %v27046_v49 = vpop.f32.mrf.mxu0 }
 0x4b0   :  { %v27048_v46 = vpop.f32.mrf.mxu1 }
 0x4b1   :  { %v27050_v26 = vpop.f32.mrf.mxu0 }
 0x4b2   :  { %v27052_v5 = vpop.f32.mrf.mxu1 }
 0x4b3   :  { %v27054_v37 = vpop.f32.mrf.mxu0 }
 0x4b4   :  { %v27056_v53 = vpop.f32.mrf.mxu1 }
 0x4b5   :  { %29668 = vst [vmem:[#allocation39_spill] sm:$0xff] %v27056_v53  ;;  %v27058_v30 = vpop.f32.mrf.mxu0 }
 0x4b6   :  { %29669 = vst [vmem:[#allocation38_spill] sm:$0xff] %v27058_v30  ;;  %v27060_v29 = vpop.f32.mrf.mxu1 }
 0x4b7   :  { %29670 = vst [vmem:[#allocation40_spill] sm:$0xff] %v27060_v29  ;;  %v27062_v23 = vpop.f32.mrf.mxu0 }
 0x4b8   :  { %29671 = vst [vmem:[#allocation54_spill] sm:$0xff] %v27062_v23  ;;  %v27064_v32 = vpop.f32.mrf.mxu1 }
 0x4b9   :  { %v27066_v4 = vpop.f32.mrf.mxu0 }
 0x4ba   :  { %v27068_v60 = vpop.f32.mrf.mxu1 }
 0x4bb   :  { %29672 = vst [vmem:[#allocation51_spill] sm:$0xff] %v27068_v60  ;;  %v27070_v11 = vpop.f32.mrf.mxu0 }
 0x4bc   :  { %v27072_v58 = vpop.f32.mrf.mxu1 }
 0x4bd   :  { %29673 = vst [vmem:[#allocation41_spill] sm:$0xff] %v27072_v58  ;;  %v27074_v12 = vpop.f32.mrf.mxu0 }
 0x4be   :  { %29674 = vst [vmem:[#allocation55_spill] sm:$0xff] %v27074_v12  ;;  %v27076_v27 = vpop.f32.mrf.mxu1 }
 0x4bf   :  { %29675 = vst [vmem:[#allocation56_spill] sm:$0xff] %v27076_v27  ;;  %v27078_v63 = vpop.f32.mrf.mxu0 }
 0x4c0   :  { %29676 = vst [vmem:[#allocation31_spill] sm:$0xff] %v27078_v63  ;;  %v27080_v55 = vpop.f32.mrf.mxu1 }
 0x4c1   :  { %29677 = vst [vmem:[#allocation26_spill] sm:$0xff] %v27080_v55  ;;  %v27082_v1 = vpop.f32.mrf.mxu0 }
 0x4c2   :  { %v27084_v29 = vpop.f32.mrf.mxu1 }
 0x4c3   :  { %29678 = vst [vmem:[#allocation32_spill] sm:$0xff] %v27084_v29  ;;  %v27086_v23 = vpop.f32.mrf.mxu0 }
 0x4c4   :  { %29679 = vst [vmem:[#allocation22_spill] sm:$0xff] %v27086_v23  ;;  %v27088_v53 = vpop.f32.mrf.mxu1 }
 0x4c5   :  { %29680 = vst [vmem:[#allocation19_spill] sm:$0xff] %v27088_v53  ;;  %v27090_v30 = vpop.f32.mrf.mxu0 }
 0x4c6   :  { %29681 = vst [vmem:[#allocation9_spill] sm:$0xff] %v27090_v30  ;;  %v27092_v20 = vpop.f32.mrf.mxu1 }
 0x4c7   :  { %29682 = vst [vmem:[#allocation20_spill] sm:$0xff] %v27092_v20  ;;  %v27094_v58 = vpop.f32.mrf.mxu0 }
 0x4c8   :  { %29683 = vst [vmem:[#allocation21_spill] sm:$0xff] %v27094_v58  ;;  %v27096_v12 = vpop.f32.mrf.mxu1 }
 0x4c9   :  { %29684 = vst [vmem:[#allocation27_spill] sm:$0xff] %v27096_v12  ;;  %v27098_v27 = vpop.f32.mrf.mxu0 }
 0x4ca   :  { %v27100_v63 = vpop.f32.mrf.mxu1 }
 0x4cb   :  { %29685 = vst [vmem:[#allocation30_spill] sm:$0xff] %v27100_v63  ;;  %v27102_v55 = vpop.f32.mrf.mxu0  ;;  %v9825_v63 = vadd.f32 %v26966_v42, %v26958_v21  ;;  %v9967_v21 = vadd.f32 %v26970_v50, %v26962_v56 }
 0x4cc   :  { %29686 = vst [vmem:[#allocation24_spill] sm:$0xff] %v27102_v55  ;;  %v27104_v60 = vpop.f32.mrf.mxu1 }
 0x4cd   :  { %29687 = vst [vmem:[#allocation44_spill] sm:$0xff] %v27104_v60  ;;  %v27106_v29 = vpop.f32.mrf.mxu0  ;;  %v9896_v60 = vadd.f32 %v26964_v39, %v26956_v41 }
 0x4ce   :  { %29688 = vst [vmem:[#allocation23_spill] sm:$0xff] %v27106_v29  ;;  %v27108_v23 = vpop.f32.mrf.mxu1 }
 0x4cf   :  { %29689 = vst [vmem:[#allocation43_spill] sm:$0xff] %v27108_v23  ;;  %v27110_v53 = vpop.f32.mrf.mxu0  ;;  %v10381_v23 = vadd.f32 %v26974_v33, %v9825_v63  ;;  %v10038_v33 = vadd.f32 %v26968_v47, %v26960_v34 }
 0x4d0   :  { %29690 = vst [vmem:[#allocation25_spill] sm:$0xff] %v27110_v53  ;;  %v27112_v30 = vpop.f32.mrf.mxu1 }
 0x4d1   :  { %29691 = vst [vmem:[#allocation100_spill] sm:$0xff] %v27112_v30  ;;  %v27114_v20 = vpop.f32.mrf.mxu0  ;;  %v10383_v30 = vadd.f32 %v26972_v59, %v9896_v60  ;;  %v10385_v59 = vadd.f32 %v26978_v28, %v9967_v21 }
 0x4d2   :  { %29692 = vst [vmem:[#allocation104_spill] sm:$0xff] %v27114_v20  ;;  %v27116_v58 = vpop.f32.mrf.mxu1 }
 0x4d3   :  { %29693 = vst [vmem:[#allocation101_spill] sm:$0xff] %v27116_v58  ;;  %v27118_v12 = vpop.f32.mrf.mxu0  ;;  %v10729_v58 = vadd.f32 %v26982_v62, %v10381_v23  ;;  %v10731_v42 = vadd.f32 %v26980_v61, %v10383_v30  ;;  %v10387_v62 = vadd.f32 %v26976_v17, %v10038_v33  ;;  %v10733_v50 = vadd.f32 %v26986_v7, %v10385_v59 }
 0x4d4   :  { %29694 = vst [vmem:[#allocation105_spill] sm:$0xff] %v27118_v12  ;;  %v27122_v55 = vpop.f32.mrf.mxu1  ;;  %v12120_v61 = vadd.f32 %v27018_v48, %v27006_v45  ;;  %v12122_v7 = vadd.f32 %v27016_v9, %v27004_v24 }
 0x4d5   :  { %v27126_v29 = vpop.f32.mrf.mxu0  ;;  %v11077_v63 = vadd.f32 %v26990_v3, %v10729_v58  ;;  %v11079_v23 = vadd.f32 %v26988_v52, %v10731_v42  ;;  %v10735_v58 = vadd.f32 %v26984_v25, %v10387_v62  ;;  %v11081_v17 = vadd.f32 %v26994_v2, %v10733_v50  ;;  %v29696_v62 = vld [vmem:[#allocation26_spill] sm:$0xff] }
 0x4d6   :  { %v27129_v53 = vpop.f32.mrf.mxu1  ;;  %v12438_v2 = vadd.f32 %v27032_v0, %v12122_v7  ;;  %v29703_v7 = vld [vmem:[#allocation27_spill] sm:$0xff] }
 0x4d7   :  { %v27132_v20 = vpop.f32.mrf.mxu0  ;;  %v11425_v56 = vadd.f32 %v26998_v43, %v11077_v63  ;;  %v11427_v34 = vadd.f32 %v26996_v18, %v11079_v23  ;;  %v11083_v18 = vadd.f32 %v26992_v31, %v10735_v58  ;;  %v11429_v48 = vadd.f32 %v27002_v44, %v11081_v17  ;;  %v29695_v23 = vld [vmem:[#allocation51_spill] sm:$0xff] }
 0x4d8   :  { %v27135_v12 = vpop.f32.mrf.mxu1  ;;  %v12746_v33 = vadd.f32 %v27048_v46, %v12438_v2  ;;  %v12440_v46 = vadd.f32 %v27042_v38, %v27026_v16  ;;  %v29698_v38 = vld [vmem:[#allocation38_spill] sm:$0xff] }
 0x4d9   :  { %v27140_v41 = vpop.f32.mrf.mxu0  ;;  %v11773_v28 = vadd.f32 %v27010_v51, %v11425_v56  ;;  %v11775_v3 = vadd.f32 %v27008_v57, %v11427_v34  ;;  %v12436_v51 = vadd.f32 %v27034_v36, %v12120_v61  ;;  %v11431_v42 = vadd.f32 %v27000_v13, %v11083_v18  ;;  %v29700_v61 = vld [vmem:[#allocation39_spill] sm:$0xff] }
 0x4da   :  { %v27145_v39 = vpop.f32.mrf.mxu1  ;;  %v13094_v59 = vadd.f32 %v27064_v32, %v12746_v33  ;;  %v12748_v16 = vadd.f32 %v29698_v38, %v12440_v46  ;;  %v29712_v46 = vld [vmem:[#allocation56_spill] sm:$0xff] }
 0x4db   :  { %v27149_v60 = vpop.f32.mrf.mxu0  ;;  %v12121_v25 = vadd.f32 %v27022_v35, %v11773_v28  ;;  %v12123_v45 = vadd.f32 %v27020_v40, %v11775_v3  ;;  %v12744_v9 = vadd.f32 %v27050_v26, %v12436_v51  ;;  %v11777_v35 = vadd.f32 %v27014_v22, %v11429_v48  ;;  %v29704_v51 = vld [vmem:[#allocation40_spill] sm:$0xff] }
 0x4dc   :  { %v27153_v30 = vpop.f32.mrf.mxu1  ;;  %v11779_v40 = vadd.f32 %v27012_v15, %v11431_v42  ;;  %v13442_v56 = vadd.f32 %v29696_v62, %v13094_v59  ;;  %v29706_v42 = vld [vmem:[#allocation24_spill] sm:$0xff] }
 0x4dd   :  { %v27157_v47 = vpop.f32.mrf.mxu0  ;;  %v12437_v24 = vadd.f32 %v27038_v14, %v12121_v25  ;;  %v12439_v36 = vadd.f32 %v27036_v10, %v12123_v45  ;;  %v13092_v63 = vadd.f32 %v27066_v4, %v12744_v9  ;;  %v12125_v14 = vadd.f32 %v27030_v54, %v11777_v35  ;;  %v29705_v45 = vld [vmem:[#allocation55_spill] sm:$0xff]  ;;  %v29707_v9 = vld [vmem:[#allocation104_spill] sm:$0xff] }
 0x4de   :  { %v27163_v52 = vpop.f32.mrf.mxu1  ;;  %v12127_v10 = vadd.f32 %v27028_v6, %v11779_v40  ;;  %v12442_v54 = vadd.f32 %v27040_v19, %v27024_v8  ;;  %v29697_v6 = vld [vmem:[#allocation53_spill] sm:$0xff]  ;;  %v29701_v19 = vld [vmem:[#allocation54_spill] sm:$0xff]  ;;  %v13790_v18 = vadd.f32 %v29703_v7, %v13442_v56  ;;  %v13096_v2 = vadd.f32 %v29705_v45, %v12748_v16  ;;  %v29709_v40 = vld [vmem:[#allocation31_spill] sm:$0xff] }
 0x4df   :  { %v27169_v43 = vpop.f32.mrf.mxu0  ;;  %v12745_v0 = vadd.f32 %v27054_v37, %v12437_v24  ;;  %v12747_v26 = vadd.f32 %v27052_v5, %v12439_v36  ;;  %v13440_v37 = vadd.f32 %v27082_v1, %v13092_v63  ;;  %v12441_v5 = vadd.f32 %v27046_v49, %v12125_v14  ;;  %v29702_v49 = vld [vmem:[#allocation32_spill] sm:$0xff]  ;;  %v29710_v63 = vld [vmem:[#allocation30_spill] sm:$0xff]  ;;  %v29715_v56 = vld [vmem:[#allocation19_spill] sm:$0xff] }
 0x4e0   :  { %v27174_v21 = vpop.f32.mrf.mxu1  ;;  %v12443_v34 = vadd.f32 %v29697_v6, %v12127_v10  ;;  %v12750_v17 = vadd.f32 %v29700_v61, %v12442_v54  ;;  %v29717_v16 = vld [vmem:[#allocation101_spill] sm:$0xff]  ;;  %v29718_v61 = vld [vmem:[#allocation20_spill] sm:$0xff] }
 0x4e1   :  { %v14614_v57 = vpop.f32.mrf.mxu0  ;;  %v13093_v15 = vadd.f32 %v27070_v11, %v12745_v0  ;;  %v13095_v32 = vadd.f32 %v29695_v23, %v12747_v26  ;;  %v29699_v11 = vld [vmem:[#allocation22_spill] sm:$0xff]  ;;  %v13788_v1 = vadd.f32 %v27098_v27, %v13440_v37  ;;  %v12749_v8 = vadd.f32 %v29701_v19, %v12441_v5  ;;  %v29708_v27 = vld [vmem:[#allocation41_spill] sm:$0xff]  ;;  %v29711_v26 = vld [vmem:[#allocation100_spill] sm:$0xff] }
 0x4e2   :  { %v27182_v31 = vpop.f32.mrf.mxu1  ;;  %v12751_v48 = vadd.f32 %v29704_v51, %v12443_v34  ;;  %v13098_v33 = vadd.f32 %v29708_v27, %v12750_v17  ;;  %v14138_v59 = vadd.f32 %v29711_v26, %v13790_v18  ;;  %v29713_v37 = vld [vmem:[#allocation9_spill] sm:$0xff]  ;;  %v29719_v19 = vld [vmem:[#allocation23_spill] sm:$0xff]  ;;  %v29720_v7 = vld [vmem:[#allocation44_spill] sm:$0xff] }
 0x4e3   :  { %v14616_v44 = vpop.f32.mrf.mxu0  ;;  %v13441_v58 = vadd.f32 %v29699_v11, %v13093_v15  ;;  %v13443_v3 = vadd.f32 %v29702_v49, %v13095_v32  ;;  %v14136_v35 = vadd.f32 %v29707_v9, %v13788_v1  ;;  %v13097_v0 = vadd.f32 %v29709_v40, %v12749_v8  ;;  %v29714_v5 = vld [vmem:[#allocation105_spill] sm:$0xff] }
 0x4e4   :  { %v27190_v13 = vpop.f32.mrf.mxu1  ;;  %v13099_v15 = vadd.f32 %v29712_v46, %v12751_v48  ;;  %v13444_v54 = vadd.f32 %v29713_v37, %v13096_v2  ;;  %v13446_v6 = vadd.f32 %v29715_v56, %v13098_v33  ;;  %v29716_v34 = vld [vmem:[#allocation21_spill] sm:$0xff] }
 0x4e5   :  { %v27195_v22 = vpop.f32.mrf.mxu0  ;;  %v13789_v24 = vadd.f32 %v29706_v42, %v13441_v58  ;;  %v13791_v14 = vadd.f32 %v29710_v63, %v13443_v3  ;;  %v14484_v32 = vadd.f32 %v27140_v41, %v14136_v35  ;;  %v13445_v38 = vadd.f32 %v29716_v34, %v13097_v0  ;;  %v29721_v41 = vld [vmem:[#allocation25_spill] sm:$0xff]  ;;  %v29722_v42 = vld [vmem:[#allocation43_spill] sm:$0xff] }
 0x4e6   :  { %v27202_v4 = vpop.f32.mrf.mxu1  ;;  %v14486_v58 = vadd.f32 %v27135_v12, %v14138_v59  ;;  %v13447_v17 = vadd.f32 %v29718_v61, %v13099_v15  ;;  %v13792_v8 = vadd.f32 %v29719_v19, %v13444_v54  ;;  %v13794_v18 = vadd.f32 %v29720_v7, %v13446_v6 }
 0x4e7   :  { %v27209_v50 = vpop.f32.mrf.mxu0  ;;  %v14137_v23 = vadd.f32 %v29714_v5, %v13789_v24  ;;  %v14139_v11 = vadd.f32 %v29717_v16, %v13791_v14  ;;  %v14832_v3 = vadd.f32 %v14614_v57, %v14484_v32  ;;  %v13793_v51 = vadd.f32 %v29721_v41, %v13445_v38 }
 0x4e8   :  { %v15033_v28 = vpop.f32.mrf.mxu1  ;;  %v14834_v45 = vadd.f32 %v27174_v21, %v14486_v58  ;;  %v13795_v24 = vadd.f32 %v29722_v42, %v13447_v17  ;;  %v14140_v12 = vadd.f32 %v27126_v29, %v13792_v8  ;;  %v14142_v33 = vadd.f32 %v27122_v55, %v13794_v18 }
 0x4e9   :  { %v14962_v25 = vpop.f32.mrf.mxu0  ;;  %v14485_v49 = vadd.f32 %v27149_v60, %v14137_v23  ;;  %v14487_v48 = vadd.f32 %v27145_v39, %v14139_v11  ;;  %v14141_v60 = vadd.f32 %v27132_v20, %v13793_v51 }
 0x4ea   :  { %v15035_v36 = vpop.f32.mrf.mxu1  ;;  %v15180_v35 = vadd.f32 %v14962_v25, %v14832_v3  ;;  %v15182_v40 = vadd.f32 %v15033_v28, %v14834_v45  ;;  %v14143_v39 = vadd.f32 %v27129_v53, %v13795_v24  ;;  %v14488_v21 = vadd.f32 %v27157_v47, %v14140_v12  ;;  %v29723_v28 = vld [vmem:[#allocation45_spill] sm:$0xff]  ;;  %v8133_v24 = vpop.xlane.xlu0 %8132 }
 0x4eb   :  { %v14964_v10 = vpop.f32.mrf.mxu0  ;;  %v14833_v9 = vadd.f32 %v14616_v44, %v14485_v49  ;;  %v14835_v57 = vadd.f32 %v27182_v31, %v14487_v48  ;;  %v14490_v29 = vadd.f32 %v27153_v30, %v14142_v33  ;;  %v14489_v44 = vadd.f32 %v27169_v43, %v14141_v60  ;;  %v29725_v60 = vld [vmem:[#allocation34_spill] sm:$0xff] }
 0x4ec   :  { %v15175_v62 = vpop.f32.mrf.mxu1  ;;  %v14491_v20 = vadd.f32 %v27163_v52, %v14143_v39  ;;  %v14836_v31 = vadd.f32 %v27195_v22, %v14488_v21  ;;  %v29727_v39 = vld [vmem:[#allocation35_spill] sm:$0xff] }
 0x4ed   :  { %v15104_v1 = vpop.f32.mrf.mxu0  ;;  %v15181_v63 = vadd.f32 %v14964_v10, %v14833_v9  ;;  %v15183_v25 = vadd.f32 %v15035_v36, %v14835_v57  ;;  %v14838_v47 = vadd.f32 %v27190_v13, %v14490_v29  ;;  %v14837_v10 = vadd.f32 %v27209_v50, %v14489_v44 }
 0x4ee   :  { %v15177_v27 = vpop.f32.mrf.mxu1  ;;  %v15184_v36 = vadd.f32 %v15104_v1, %v14836_v31  ;;  %v14839_v22 = vadd.f32 %v27202_v4, %v14491_v20 }
 0x4ef   :  { %v15106_v2 = vpop.f32.mrf.mxu0  ;;  %v15186_v54 = vadd.f32 %v15175_v62, %v14838_v47 }
 0x4f0   :  { %v15185_v5 = vadd.f32 %v15106_v2, %v14837_v10  ;;  %v15187_v34 = vadd.f32 %v15177_v27, %v14839_v22  ;;  %v29724_v27 = vld [vmem:[#allocation46_spill] sm:$0xff] }
 0x4f1   :  { %v15310_v0 = vpop.f32.mrf.mxu0  ;;  %v29731_v22 = vld [vmem:[#allocation50_spill] sm:$0xff] }
 0x4f2   :  { %v15528_v14 = vadd.f32 %v15310_v0, %v15180_v35  ;;  %v15381_v26 = vpop.f32.mrf.mxu1 }
 0x4f3   :  { %v15312_v59 = vpop.f32.mrf.mxu0  ;;  %v15530_v55 = vadd.f32 %v15381_v26, %v15182_v40  ;;  %v29726_v40 = vld [vmem:[#allocation33_spill] sm:$0xff] }
 0x4f4   :  { %v27254_v46 = vadd.f32 %v15528_v14, %v29723_v28  ;;  %v15529_v53 = vadd.f32 %v15312_v59, %v15181_v63  ;;  %v15383_v15 = vpop.f32.mrf.mxu1  ;;  %v29728_v63 = vld [vmem:[#allocation36_spill] sm:$0xff] }
 0x4f5   :  { %v27259_v30 = vadd.f32 %v15530_v55, %v29723_v28  ;;  %v15531_v43 = vadd.f32 %v15383_v15, %v15183_v25  ;;  %v29729_v25 = vld [vmem:[#allocation48_spill] sm:$0xff] }
 0x4f6   :  { %v27262_v37 = vadd.f32 %v15529_v53, %v29723_v28  ;;  %v15523_v52 = vpop.f32.mrf.mxu1  ;;  %v15544_v13 = vsel %vm1614_vm10, %v27254_v46, 0.0 }
 0x4f7   :  { %v27266_v23 = vadd.f32 %v15531_v43, %v29723_v28  ;;  %v15452_v32 = vpop.f32.mrf.mxu0  ;;  %v15547_v56 = vsel %vm1614_vm10, %v27259_v30, 0.0  ;;  %v15534_v58 = vadd.f32 %v15523_v52, %v15186_v54 }
 0x4f8   :  { %v15545_v50 = vsel %vm1614_vm10, %v27262_v37, 0.0  ;;  %v15532_v6 = vadd.f32 %v15452_v32, %v15184_v36  ;;  %v15525_v4 = vpop.f32.mrf.mxu1 }
 0x4f9   :  { %v15546_v38 = vadd.f32 %v15545_v50, %v15544_v13  ;;  %v15454_v16 = vpop.f32.mrf.mxu0  ;;  %v15549_v62 = vsel %vm1614_vm10, %v27266_v23, 0.0  ;;  %v15535_v8 = vadd.f32 %v15525_v4, %v15187_v34  ;;  %v27285_v3 = vadd.f32 %v15534_v58, %v29723_v28 }
 0x4fa   :  { %v27277_v11 = vadd.f32 %v15532_v6, %v29723_v28  ;;  %v15533_v1 = vadd.f32 %v15454_v16, %v15185_v5 }
 0x4fb   :  { %v15548_v61 = vadd.f32 %v15547_v56, %v15546_v38  ;;  %v27290_v41 = vadd.f32 %v15535_v8, %v29723_v28  ;;  %v15555_v48 = vsel %vm1614_vm10, %v27285_v3, 0.0 }
 0x4fc   :  { %v15551_v17 = vsel %vm1614_vm10, %v27277_v11, 0.0  ;;  %v27282_v19 = vadd.f32 %v15533_v1, %v29723_v28  ;;  %v29730_v28 = vld [vmem:[#allocation49_spill] sm:$0xff] }
 0x4fd   :  { %v15550_v49 = vadd.f32 %v15549_v62, %v15548_v61  ;;  %v15557_v2 = vsel %vm1614_vm10, %v27290_v41, 0.0 }
 0x4fe   :  { %v15553_v7 = vsel %vm1614_vm10, %v27282_v19, 0.0 }
 0x4ff   :  { %v15552_v18 = vadd.f32 %v15551_v17, %v15550_v49 }
 0x501   :  { %v15554_v51 = vadd.f32 %v15553_v7, %v15552_v18 }
 0x503   :  { %v15556_v45 = vadd.f32 %v15555_v48, %v15554_v51 }
 0x505   :  { %v15558_v42 = vadd.f32 %v15557_v2, %v15556_v45 }
 0x507   :  { %15559 = vadd.xlane.f32.xlu1 %v15558_v42 }
 0x590   :  { %v15560_v12 = vpop.xlane.xlu1 %15559 }
 0x591   :  { %v15561_v9 = vadd.f32 %v15560_v12, %v8133_v24 }
 0x593   :  { %v27296_v35 = vmul.f32 0.00048828125, %v15561_v9 }
 0x595   :  { %v15563_v33 = vsub.f32 %v29724_v27, %v27296_v35  ;;  %v15564_v57 = vsub.f32 %v29725_v60, %v27296_v35  ;;  %v15565_v0 = vsub.f32 %v29726_v40, %v27296_v35  ;;  %v15566_v21 = vsub.f32 %v29727_v39, %v27296_v35 }
 0x596   :  { %v15567_v14 = vsub.f32 %v29728_v63, %v27296_v35  ;;  %v15568_v59 = vsub.f32 %v29729_v25, %v27296_v35  ;;  %v15569_v53 = vsub.f32 %v29730_v28, %v27296_v35  ;;  %v15596_v43 = vsub.f32 %v27254_v46, %v27296_v35 }
 0x597   :  { %v15571_v26 = vmul.f32 %v15563_v33, %v15563_v33  ;;  %v15572_v29 = vmul.f32 %v15564_v57, %v15564_v57  ;;  %v15573_v44 = vmul.f32 %v15565_v0, %v15565_v0  ;;  %v15574_v55 = vmul.f32 %v15566_v21, %v15566_v21 }
 0x598   :  { %v15575_v15 = vmul.f32 %v15567_v14, %v15567_v14  ;;  %v15597_v36 = vsub.f32 %v27262_v37, %v27296_v35  ;;  %v15598_v52 = vsub.f32 %v27259_v30, %v27296_v35  ;;  %v15570_v54 = vsub.f32 %v29731_v22, %v27296_v35 }
 0x599   :  { %v15579_v20 = vsel %vm1614_vm10, %v15571_v26, 0.0  ;;  %v15580_v31 = vsel %vm1614_vm10, %v15572_v29, 0.0  ;;  %v15582_v10 = vsel %vm1614_vm10, %v15573_v44, 0.0  ;;  %v15599_v32 = vsub.f32 %v27266_v23, %v27296_v35 }
 0x59a   :  { %v15581_v47 = vadd.f32 %v15580_v31, %v15579_v20  ;;  %v15576_v13 = vmul.f32 %v15568_v59, %v15568_v59  ;;  %v15584_v50 = vsel %vm1614_vm10, %v15574_v55, 0.0  ;;  %v15604_v56 = vmul.f32 %v15596_v43, %v15596_v43 }
 0x59b   :  { %v15605_v6 = vmul.f32 %v15597_v36, %v15597_v36  ;;  %v15600_v38 = vsub.f32 %v27277_v11, %v27296_v35  ;;  %v15606_v16 = vmul.f32 %v15598_v52, %v15598_v52  ;;  %v15577_v4 = vmul.f32 %v15569_v53, %v15569_v53 }
 0x59c   :  { %v15583_v5 = vadd.f32 %v15582_v10, %v15581_v47  ;;  %v15586_v62 = vsel %vm1614_vm10, %v15575_v15, 0.0  ;;  %v15612_v58 = vsel %vm1614_vm10, %v15604_v56, 0.0  ;;  %v15601_v61 = vsub.f32 %v27282_v19, %v27296_v35 }
 0x59d   :  { %v15607_v17 = vmul.f32 %v15599_v32, %v15599_v32  ;;  %v15613_v8 = vsel %vm1614_vm10, %v15605_v6, 0.0  ;;  %v15578_v49 = vmul.f32 %v15570_v54, %v15570_v54  ;;  %v15588_v7 = vsel %vm1614_vm10, %v15576_v13, 0.0 }
 0x59e   :  { %v15585_v34 = vadd.f32 %v15584_v50, %v15583_v5  ;;  %v15614_v18 = vadd.f32 %v15613_v8, %v15612_v58  ;;  %v15602_v48 = vsub.f32 %v27285_v3, %v27296_v35  ;;  %v15608_v45 = vmul.f32 %v15600_v38, %v15600_v38  ;;  %v22142_v5 = vld [vmem:[%s28854_s7 + $0xc] sm:$0xf]  ;;  %v22143_v50 = vld [vmem:[%s28854_s7 + $0x10] sm:$0xf] }
 0x59f   :  { %v15615_v2 = vsel %vm1614_vm10, %v15606_v16, 0.0  ;;  %v15590_v42 = vsel %vm1614_vm10, %v15577_v4, 0.0  ;;  %v15603_v9 = vsub.f32 %v27290_v41, %v27296_v35  ;;  %v15609_v33 = vmul.f32 %v15601_v61, %v15601_v61 }
 0x5a0   :  { %v15587_v1 = vadd.f32 %v15586_v62, %v15585_v34  ;;  %v15616_v24 = vadd.f32 %v15615_v2, %v15614_v18  ;;  %v15617_v57 = vsel %vm1614_vm10, %v15607_v17, 0.0  ;;  %v15592_v0 = vsel %vm1614_vm10, %v15578_v49, 0.0 }
 0x5a1   :  { %v15610_v26 = vmul.f32 %v15602_v48, %v15602_v48  ;;  %v15619_v29 = vsel %vm1614_vm10, %v15608_v45, 0.0  ;;  %v15611_v59 = vmul.f32 %v15603_v9, %v15603_v9  ;;  %v15621_v55 = vsel %vm1614_vm10, %v15609_v33, 0.0 }
 0x5a2   :  { %v15589_v51 = vadd.f32 %v15588_v7, %v15587_v1  ;;  %v15618_v21 = vadd.f32 %v15617_v57, %v15616_v24 }
 0x5a3   :  { %v15623_v31 = vsel %vm1614_vm10, %v15610_v26, 0.0  ;;  %v15625_v15 = vsel %vm1614_vm10, %v15611_v59, 0.0  ;;  %v29733_v26 = vld [vmem:[#allocation78_spill] sm:$0xff] }
 0x5a4   :  { %v15591_v12 = vadd.f32 %v15590_v42, %v15589_v51  ;;  %v15620_v44 = vadd.f32 %v15619_v29, %v15618_v21 }
 0x5a6   :  { %v15593_v14 = vadd.f32 %v15592_v0, %v15591_v12  ;;  %v15622_v20 = vadd.f32 %v15621_v55, %v15620_v44  ;;  %v29734_v44 = vld [vmem:[#allocation13_spill] sm:$0xff] }
 0x5a8   :  { %15594 = vadd.xlane.f32.xlu0 %v15593_v14  ;;  %v15624_v53 = vadd.f32 %v15623_v31, %v15622_v20 }
 0x5aa   :  { %v15626_v47 = vadd.f32 %v15625_v15, %v15624_v53  ;;  %v27542_v15 = vld [vmem:[%s28857_s6 + $0x4] sm:$0xf] }
 0x5ac   :  { %15627 = vadd.xlane.f32.xlu0 %v15626_v47 }
 0x631   :  { %v15595_v10 = vpop.xlane.xlu0 %15594 }
 0x635   :  { %v15628_v43 = vpop.xlane.xlu0 %15627 }
 0x636   :  { %v15629_v36 = vadd.f32 %v15628_v43, %v15595_v10  ;;  %v29735_v43 = vld [vmem:[#allocation8_spill] sm:$0xff] }
 0x638   :  { %v15630_v52 = vmul.f32 0.00048828125, %v15629_v36 }
 0x63a   :  { %v15631_v54 = vadd.f32 1e-05, %v15630_v52  ;;  %v29736_v52 = vld [vmem:[#allocation77_spill] sm:$0xff] }
 0x63c   :  { %22901 = vrsqrt.f32 %v15631_v54 }
 0x649   :  { %v22902_v32 = vpop.eup %22901 }
 0x64a   :  { %v15633_v13 = vmul.f32 %v22902_v32, %v22142_v5 }
 0x64c   :  { %15638 = vperm.xlu1 %22892, %v15633_v13   ;;  %v15634_v56 = vmul.f32 %v15633_v13, %v27296_v35 }
 0x64e   :  { %v15635_v6 = vsub.f32 %v22143_v50, %v15634_v56 }
 0x650   :  { %15651 = vperm.xlu0 %22891, %v15635_v6   ;;  %v29737_v6 = vmov 0.0  }
 0x6c7   :  { %v27353_v34 = vpop.permute.xlu1 %15638 }
 0x6c8   :  { %v15648_v38 = vmul.f32 %v27353_v34, %v29731_v22  ;;  %v15641_v16 = vmul.f32 %v27353_v34, %v29724_v27  ;;  %v15644_v1 = vmul.f32 %v27353_v34, %v29727_v39  ;;  %v15642_v35 = vmul.f32 %v27353_v34, %v29725_v60 }
 0x6c9   :  { %v15646_v39 = vmul.f32 %v27353_v34, %v29729_v25  ;;  %v15643_v60 = vmul.f32 %v27353_v34, %v29726_v40  ;;  %v15645_v25 = vmul.f32 %v27353_v34, %v29728_v63  ;;  %v15647_v63 = vmul.f32 %v27353_v34, %v29730_v28 }
 0x6ca   :  { %v18828_v12 = vmul.f32 %v27353_v34, %v27254_v46  ;;  %v18835_v46 = vmul.f32 %v27353_v34, %v27290_v41  ;;  %v18829_v10 = vmul.f32 %v27353_v34, %v27262_v37  ;;  %v18831_v5 = vmul.f32 %v27353_v34, %v27266_v23 }
 0x6cb   :  { %v27359_v4 = vpop.permute.xlu0 %15651 }
 0x6cc   :  { %v15661_v62 = vadd.f32 %v27359_v4, %v15648_v38  ;;  %v15654_v58 = vadd.f32 %v27359_v4, %v15641_v16  ;;  %v15657_v22 = vadd.f32 %v27359_v4, %v15644_v1  ;;  %v15655_v27 = vadd.f32 %v27359_v4, %v15642_v35  ;;  %v29739_v1 = vld [vmem:[#allocation80_spill] sm:$0xff] }
 0x6cd   :  { %v15659_v7 = vadd.f32 %v27359_v4, %v15646_v39  ;;  %v15656_v18 = vadd.f32 %v27359_v4, %v15643_v60  ;;  %v15658_v48 = vadd.f32 %v27359_v4, %v15645_v25  ;;  %v15660_v2 = vadd.f32 %v27359_v4, %v15647_v63 }
 0x6ce   :  { %v27367_v61 = vmax.f32 %v15661_v62, 0.0  ;;  %v27369_v17 = vmax.f32 %v15654_v58, 0.0  ;;  %v27381_v8 = vmax.f32 %v15657_v22, 0.0  ;;  %v27383_v49 = vmax.f32 %v15655_v27, 0.0  ;;  %v29738_v62 = vld [vmem:[#allocation82_spill] sm:$0xff] }
 0x6cf   :  { %v27393_v51 = vmax.f32 %v15659_v7, 0.0  ;;  %v27395_v40 = vmax.f32 %v15656_v18, 0.0  ;;  %v27402_v45 = vmax.f32 %v15658_v48, 0.0  ;;  %v27415_v42 = vmax.f32 %v15660_v2, 0.0  ;;  %v29740_v48 = vld [vmem:[#allocation15_spill] sm:$0xff]  ;;  %v29741_v2 = vld [vmem:[#allocation12_spill] sm:$0xff] }
 0x6d0   :  { %15717 = vrot.lane.b32.xlu0 %v27367_v61, %s22938_s21  ;;  %15703 = vrot.lane.b32.xlu1 %v27369_v17, %s22938_s21  ;;  %v18836_v21 = vadd.f32 %v18828_v12, %v27359_v4  ;;  %v18843_v53 = vadd.f32 %v18835_v46, %v27359_v4  ;;  %v18837_v50 = vadd.f32 %v18829_v10, %v27359_v4 }
 0x6d1   :  { %v18839_v56 = vadd.f32 %v18831_v5, %v27359_v4  ;;  %v18830_v16 = vmul.f32 %v27353_v34, %v27259_v30  ;;  %v18833_v22 = vmul.f32 %v27353_v34, %v27282_v19  ;;  %v18832_v12 = vmul.f32 %v27353_v34, %v27277_v11 }
 0x6d2   :  { %v27536_v31 = vmax.f32 %v18836_v21, 0.0  ;;  %v27562_v13 = vmax.f32 %v18843_v53, 0.0  ;;  %v27587_v39 = vmax.f32 %v18837_v50, 0.0  ;;  %v29743_v53 = vld [vmem:[#allocation79_spill] sm:$0xff] }
 0x6d3   :  { %v27589_v60 = vmax.f32 %v18839_v56, 0.0  ;;  %v18838_v7 = vadd.f32 %v18830_v16, %v27359_v4  ;;  %v18841_v18 = vadd.f32 %v18833_v22, %v27359_v4  ;;  %v18834_v56 = vmul.f32 %v27353_v34, %v27285_v3  ;;  %v29746_v3 = vld [vmem:[#allocation17_spill] sm:$0xff] }
 0x6d4   :  { %15709 = vrot.lane.b32.xlu0 %v27381_v8, %s22938_s21  ;;  %15705 = vrot.lane.b32.xlu1 %v27383_v49, %s22938_s21 }
 0x6d5   :  { %v27613_v21 = vmax.f32 %v18841_v18, 0.0 }
 0x6d8   :  { %15713 = vrot.lane.b32.xlu0 %v27393_v51, %s22938_s21  ;;  %15707 = vrot.lane.b32.xlu1 %v27395_v40, %s22938_s21 }
 0x6dc   :  { %15672 = vrot.lane.b32.xlu0 %v27383_v49, %s22937_s16  ;;  %15711 = vrot.lane.b32.xlu1 %v27402_v45, %s22938_s21 }
 0x6e0   :  { %15684 = vrot.lane.b32.xlu0 %v27367_v61, %s22937_s16  ;;  %15670 = vrot.lane.b32.xlu1 %v27369_v17, %s22937_s16 }
 0x6e4   :  { %15676 = vrot.lane.b32.xlu0 %v27381_v8, %s22937_s16  ;;  %15715 = vrot.lane.b32.xlu1 %v27415_v42, %s22938_s21 }
 0x6e8   :  { %15680 = vrot.lane.b32.xlu0 %v27393_v51, %s22937_s16  ;;  %15674 = vrot.lane.b32.xlu1 %v27395_v40, %s22937_s16 }
 0x6ec   :  { %16359 = vrot.lane.b32.xlu0 %v27369_v17, %s22939_s22  ;;  %15678 = vrot.lane.b32.xlu1 %v27402_v45, %s22937_s16 }
 0x6f0   :  { %16373 = vrot.lane.b32.xlu0 %v27367_v61, %s22939_s22  ;;  %15682 = vrot.lane.b32.xlu1 %v27415_v42, %s22937_s16 }
 0x6f4   :  { %16365 = vrot.lane.b32.xlu0 %v27381_v8, %s22939_s22  ;;  %16361 = vrot.lane.b32.xlu1 %v27383_v49, %s22939_s22 }
 0x6f8   :  { %16369 = vrot.lane.b32.xlu0 %v27393_v51, %s22939_s22  ;;  %16363 = vrot.lane.b32.xlu1 %v27395_v40, %s22939_s22 }
 0x6fc   :  { %16712 = vrot.lane.b32.xlu0 %v27369_v17, %s22940_s23  ;;  %16367 = vrot.lane.b32.xlu1 %v27402_v45, %s22939_s22 }
 0x700   :  { %16726 = vrot.lane.b32.xlu0 %v27367_v61, %s22940_s23  ;;  %16371 = vrot.lane.b32.xlu1 %v27415_v42, %s22939_s22 }
 0x704   :  { %16718 = vrot.lane.b32.xlu0 %v27381_v8, %s22940_s23  ;;  %16714 = vrot.lane.b32.xlu1 %v27383_v49, %s22940_s23 }
 0x708   :  { %16722 = vrot.lane.b32.xlu0 %v27393_v51, %s22940_s23  ;;  %16716 = vrot.lane.b32.xlu1 %v27395_v40, %s22940_s23 }
 0x70c   :  { %17388 = vrot.lane.b32.xlu0 %v27383_v49, %s22941_s26  ;;  %16720 = vrot.lane.b32.xlu1 %v27402_v45, %s22940_s23 }
 0x710   :  { %17386 = vrot.lane.b32.xlu0 %v27369_v17, %s22941_s26  ;;  %16724 = vrot.lane.b32.xlu1 %v27415_v42, %s22940_s23 }
 0x714   :  { %17394 = vrot.lane.b32.xlu0 %v27402_v45, %s22941_s26  ;;  %17390 = vrot.lane.b32.xlu1 %v27395_v40, %s22941_s26 }
 0x718   :  { %17398 = vrot.lane.b32.xlu0 %v27415_v42, %s22941_s26  ;;  %17392 = vrot.lane.b32.xlu1 %v27381_v8, %s22941_s26 }
 0x71c   :  { %17741 = vrot.lane.b32.xlu0 %v27383_v49, %s22942_s27  ;;  %17396 = vrot.lane.b32.xlu1 %v27393_v51, %s22941_s26 }
 0x720   :  { %17739 = vrot.lane.b32.xlu0 %v27369_v17, %s22942_s27  ;;  %17400 = vrot.lane.b32.xlu1 %v27367_v61, %s22941_s26 }
 0x724   :  { %17747 = vrot.lane.b32.xlu0 %v27402_v45, %s22942_s27  ;;  %17743 = vrot.lane.b32.xlu1 %v27395_v40, %s22942_s27 }
 0x728   :  { %17751 = vrot.lane.b32.xlu0 %v27415_v42, %s22942_s27  ;;  %17745 = vrot.lane.b32.xlu1 %v27381_v8, %s22942_s27 }
 0x72c   :  { %18094 = vrot.lane.b32.xlu0 %v27383_v49, %s22943_s28  ;;  %17749 = vrot.lane.b32.xlu1 %v27393_v51, %s22942_s27 }
 0x730   :  { %18092 = vrot.lane.b32.xlu0 %v27369_v17, %s22943_s28  ;;  %17753 = vrot.lane.b32.xlu1 %v27367_v61, %s22942_s27 }
 0x734   :  { %18100 = vrot.lane.b32.xlu0 %v27402_v45, %s22943_s28  ;;  %18096 = vrot.lane.b32.xlu1 %v27395_v40, %s22943_s28 }
 0x738   :  { %18104 = vrot.lane.b32.xlu0 %v27415_v42, %s22943_s28  ;;  %18098 = vrot.lane.b32.xlu1 %v27381_v8, %s22943_s28 }
 0x73c   :  { %18447 = vrot.lane.b32.xlu0 %v27383_v49, %s22944_s30  ;;  %18102 = vrot.lane.b32.xlu1 %v27393_v51, %s22943_s28 }
 0x740   :  { %18445 = vrot.lane.b32.xlu0 %v27369_v17, %s22944_s30  ;;  %18106 = vrot.lane.b32.xlu1 %v27367_v61, %s22943_s28 }
 0x742   :  { %v27513_v28 = vpop.permute.xlu0 %15717  ;;  %v15704_v24 = vpop.permute.xlu1 %15703 }
 0x743   :  { %v15726_v33 = vsel %vm2250_vm0, %v27513_v28, %v15704_v24 }
 0x744   :  { %18453 = vrot.lane.b32.xlu0 %v27402_v45, %s22944_s30  ;;  %18449 = vrot.lane.b32.xlu1 %v27395_v40, %s22944_s30  ;;  %v15727_v59 = vmul.f32 %v15726_v33, %v29734_v44 }
 0x746   :  { %v15710_v57 = vpop.permute.xlu0 %15709  ;;  %v15706_v0 = vpop.permute.xlu1 %15705 }
 0x747   :  { %v15725_v14 = vsel %vm2250_vm0, %v15704_v24, %v15706_v0 }
 0x748   :  { %v15728_v29 = vmul.f32 %v15725_v14, %v29733_v26  ;;  %18457 = vrot.lane.b32.xlu0 %v27415_v42, %s22944_s30  ;;  %18451 = vrot.lane.b32.xlu1 %v27381_v8, %s22944_s30  ;;  %v18840_v14 = vadd.f32 %v18832_v12, %v27359_v4 }
 0x74a   :  { %v15714_v55 = vpop.permute.xlu0 %15713  ;;  %22654 = vmatprep.subr.msk.mxu0 %vm1614_vm10, %v15728_v29  ;;  %v15708_v20 = vpop.permute.xlu1 %15707  ;;  %v27620_v29 = vld [vmem:[%s28857_s6] sm:$0xf] }
 0x74b   :  { %v15723_v47 = vsel %vm2250_vm0, %v15708_v20, %v15710_v57  ;;  %v15724_v41 = vsel %vm2250_vm0, %v15706_v0, %v15708_v20  ;;  %22655 = vmatpush1.msk.msra.mxu0 %vm1614_vm10, %v15727_v59  ;;  %v27611_v0 = vmax.f32 %v18838_v7, 0.0  ;;  %v29742_v59 = vld [vmem:[#allocation81_spill] sm:$0xff] }
 0x74c   :  { %v15729_v36 = vmul.f32 %v15724_v41, %v29735_v43  ;;  %v15730_v54 = vmul.f32 %v15723_v47, %v29736_v52  ;;  %18455 = vrot.lane.b32.xlu1 %v27393_v51, %s22944_s30  ;;  %18884 = vrot.lane.b32.xlu0 %v27536_v31, %s22938_s21 }
 0x74d   :  { %22656 = vmatmul.mubr.msk.f32.vlgmr.msra.gmra.mxu0 %vm1610_vm11, %v27542_v15 }
 0x74e   :  { %v15673_v32 = vpop.permute.xlu0 %15672  ;;  %22657 = vmatprep.subr.msk.mxu1 %vm1614_vm10, %v15730_v54  ;;  %v15712_v37 = vpop.permute.xlu1 %15711  ;;  %15970 = vmatprep.mubr.f32.mxu0 %v29737_v6  ;;  %v29744_v54 = vld [vmem:[#allocation11_spill] sm:$0xff] }
 0x74f   :  { %v15721_v38 = vsel %vm2250_vm0, %v15712_v37, %v15714_v55  ;;  %v15722_v23 = vsel %vm2250_vm0, %v15710_v57, %v15712_v37  ;;  %22658 = vmatpush1.msk.msra.mxu1 %vm1614_vm10, %v15729_v36  ;;  %v29745_v37 = vld [vmem:[#allocation10_spill] sm:$0xff] }
 0x750   :  { %v15731_v58 = vmul.f32 %v15722_v23, %v29738_v62  ;;  %v15732_v35 = vmul.f32 %v15721_v38, %v29739_v1  ;;  %18459 = vrot.lane.b32.xlu1 %v27367_v61, %s22944_s30  ;;  %18898 = vrot.lane.b32.xlu0 %v27562_v13, %s22938_s21  ;;  %v18842_v23 = vadd.f32 %v18834_v56, %v27359_v4 }
 0x751   :  { %22659 = vmatmul.mubr.msk.f32.vlgmr.msra.gmra.mxu1 %vm1610_vm11, %v27542_v15 }
 0x752   :  { %v27584_v27 = vpop.permute.xlu0 %15684  ;;  %22660 = vmatprep.subr.msk.mxu0 %vm1614_vm10, %v15732_v35  ;;  %v15671_v30 = vpop.permute.xlu1 %15670  ;;  %16041 = vmatprep.mubr.f32.mxu1 %v29737_v6  ;;  %v29747_v35 = vld [vmem:[#allocation18_spill] sm:$0xff]  ;;  %v27672_v7 = vmax.f32 %v18842_v23, 0.0 }
 0x753   :  { %v15692_v19 = vsel %vm1506_vm9, %v15671_v30, %v15673_v32  ;;  %v15693_v25 = vsel %vm1506_vm9, %v27584_v27, %v15671_v30  ;;  %22661 = vmatpush1.msk.msra.mxu0 %vm1614_vm10, %v15731_v58 }
 0x754   :  { %v15694_v63 = vmul.f32 %v15693_v25, %v29740_v48  ;;  %v15695_v24 = vmul.f32 %v15692_v19, %v29741_v2  ;;  %18886 = vrot.lane.b32.xlu1 %v27587_v39, %s22938_s21  ;;  %18890 = vrot.lane.b32.xlu0 %v27589_v60, %s22938_s21  ;;  %v29748_v25 = vld [vmem:[#allocation14_spill] sm:$0xff] }
 0x755   :  { %22662 = vmatmul.mubr.msk.f32.vlgmr.msra.gmra.mxu0 %vm1610_vm11, %v27542_v15 }
 0x756   :  { %v15677_v33 = vpop.permute.xlu0 %15676  ;;  %22666 = vmatprep.subr.msk.mxu0 %vm1614_vm10, %v15695_v24  ;;  %v15716_v57 = vpop.permute.xlu1 %15715  ;;  %16139 = vmatprep.mubr.f32.mxu0 %v29737_v6  ;;  %v29749_v24 = vld [vmem:[#allocation16_spill] sm:$0xff] }
 0x757   :  { %v15719_v11 = vsel %vm2250_vm0, %v15716_v57, %v27513_v28  ;;  %v15720_v46 = vsel %vm2250_vm0, %v15714_v55, %v15716_v57  ;;  %22667 = vmatpush1.msk.msra.mxu0 %vm1614_vm10, %v15694_v63  ;;  %v27637_v55 = vmax.f32 %v18840_v14, 0.0 }
 0x758   :  { %v15733_v20 = vmul.f32 %v15720_v46, %v29742_v59  ;;  %v15734_v47 = vmul.f32 %v15719_v11, %v29743_v53  ;;  %18888 = vrot.lane.b32.xlu1 %v27611_v0, %s22938_s21  ;;  %18894 = vrot.lane.b32.xlu0 %v27613_v21, %s22938_s21  ;;  %v29750_v11 = vld [vmem:[#allocation84_spill] sm:$0xff] }
 0x759   :  { %22668 = vmatmul.mubr.msk.f32.vlgmr.msra.gmra.mxu0 %vm1610_vm11, %v27620_v29 }
 0x75a   :  { %v15681_v41 = vpop.permute.xlu0 %15680  ;;  %22663 = vmatprep.subr.msk.mxu1 %vm1614_vm10, %v15734_v47  ;;  %v15675_v28 = vpop.permute.xlu1 %15674  ;;  %16281 = vmatprep.mubr.f32.mxu0 %v29737_v6 }
 0x75b   :  { %v15690_v10 = vsel %vm1506_vm9, %v15675_v28, %v15677_v33  ;;  %v15691_v36 = vsel %vm1506_vm9, %v15673_v32, %v15675_v28  ;;  %22664 = vmatpush1.msk.msra.mxu1 %vm1614_vm10, %v15733_v20  ;;  %v29751_v20 = vld [vmem:[#allocation83_spill] sm:$0xff] }
 0x75c   :  { %v15696_v5 = vmul.f32 %v15691_v36, %v29744_v54  ;;  %v15697_v50 = vmul.f32 %v15690_v10, %v29745_v37  ;;  %18892 = vrot.lane.b32.xlu1 %v27637_v55, %s22938_s21  ;;  %18854 = vrot.lane.b32.xlu0 %v27587_v39, %s22937_s16  ;;  %v27708_v10 = vld [vmem:[%s28857_s6 + $0x8] sm:$0xf] }
 0x75d   :  { %22665 = vmatmul.mubr.msk.f32.vlgmr.msra.gmra.mxu1 %vm1610_vm11, %v27542_v15 }
 0x75e   :  { %v16360_v38 = vpop.permute.xlu0 %16359  ;;  %22669 = vmatprep.subr.msk.mxu1 %vm1614_vm10, %v15697_v50  ;;  %v15679_v32 = vpop.permute.xlu1 %15678  ;;  %16210 = vmatprep.mubr.f32.mxu1 %v29737_v6  ;;  %v29752_v50 = vld [vmem:[#allocation85_spill] sm:$0xff] }
 0x75f   :  { %v15688_v16 = vsel %vm1506_vm9, %v15679_v32, %v15681_v41  ;;  %v15689_v58 = vsel %vm1506_vm9, %v15677_v33, %v15679_v32  ;;  %22670 = vmatpush1.msk.msra.mxu1 %vm1614_vm10, %v15696_v5 }
 0x760   :  { %v15698_v34 = vmul.f32 %v15689_v58, %v29746_v3  ;;  %v15699_v22 = vmul.f32 %v15688_v16, %v29747_v35  ;;  %18852 = vrot.lane.b32.xlu1 %v27536_v31, %s22937_s16  ;;  %18866 = vrot.lane.b32.xlu0 %v27562_v13, %s22937_s16 }
 0x761   :  { %22671 = vmatmul.mubr.msk.f32.vlgmr.msra.gmra.mxu1 %vm1610_vm11, %v27620_v29 }
 0x762   :  { %v16374_v4 = vpop.permute.xlu0 %16373  ;;  %22672 = vmatprep.subr.msk.mxu0 %vm1614_vm10, %v15699_v22  ;;  %v15683_v30 = vpop.permute.xlu1 %15682  ;;  %16352 = vmatprep.mubr.f32.mxu1 %v29737_v6  ;;  %v29754_v22 = vld [vmem:[#allocation89_spill] sm:$0xff] }
 0x763   :  { %v15686_v18 = vsel %vm1506_vm9, %v15683_v30, %v27584_v27  ;;  %v15687_v19 = vsel %vm1506_vm9, %v15681_v41, %v15683_v30  ;;  %22673 = vmatpush1.msk.msra.mxu0 %vm1614_vm10, %v15698_v34  ;;  %v16382_v27 = vsel %vm2998_vm2, %v16374_v4, %v16360_v38 }
 0x764   :  { %v15700_v63 = vmul.f32 %v15687_v19, %v29748_v25  ;;  %v15701_v12 = vmul.f32 %v15686_v18, %v29749_v24  ;;  %18896 = vrot.lane.b32.xlu1 %v27672_v7, %s22938_s21  ;;  %18858 = vrot.lane.b32.xlu0 %v27589_v60, %s22937_s16  ;;  %v16383_v47 = vmul.f32 %v16382_v27, %v29751_v20  ;;  %v29755_v18 = vld [vmem:[#allocation87_spill] sm:$0xff] }
 0x765   :  { %22674 = vmatmul.mubr.msk.f32.vlgmr.msra.gmra.mxu0 %vm1610_vm11, %v27620_v29 }
 0x766   :  { %v16366_v33 = vpop.permute.xlu0 %16365  ;;  %22675 = vmatprep.subr.msk.mxu1 %vm1614_vm10, %v15701_v12  ;;  %v16362_v57 = vpop.permute.xlu1 %16361  ;;  %16484 = vmatprep.mubr.f32.mxu0 %v29737_v6 }
 0x767   :  { %v16381_v14 = vsel %vm2998_vm2, %v16360_v38, %v16362_v57  ;;  %22676 = vmatpush1.msk.msra.mxu1 %vm1614_vm10, %v15700_v63  ;;  %v29753_v38 = vld [vmem:[#allocation4_spill] sm:$0xff] }
 0x768   :  { %v16384_v46 = vmul.f32 %v16381_v14, %v29750_v11  ;;  %18856 = vrot.lane.b32.xlu1 %v27611_v0, %s22937_s16  ;;  %18862 = vrot.lane.b32.xlu0 %v27613_v21, %s22937_s16 }
 0x769   :  { %22677 = vmatmul.mubr.msk.f32.vlgmr.msra.gmra.mxu1 %vm1610_vm11, %v27620_v29 }
 0x76a   :  { %v16370_v41 = vpop.permute.xlu0 %16369  ;;  %22679 = vmatprep.subr.msk.mxu0 %vm1614_vm10, %v16384_v46  ;;  %v16364_v28 = vpop.permute.xlu1 %16363  ;;  %16555 = vmatprep.mubr.f32.mxu1 %v29737_v6  ;;  %v29757_v46 = vld [vmem:[#allocation86_spill] sm:$0xff] }
 0x76b   :  { %v16379_v36 = vsel %vm2998_vm2, %v16364_v28, %v16366_v33  ;;  %v16380_v5 = vsel %vm2998_vm2, %v16362_v57, %v16364_v28  ;;  %22680 = vmatpush1.msk.msra.mxu0 %vm1614_vm10, %v16383_v47  ;;  %v29756_v57 = vld [vmem:[#allocation88_spill] sm:$0xff] }
 0x76c   :  { %v16385_v56 = vmul.f32 %v16380_v5, %v29752_v50  ;;  %v16386_v32 = vmul.f32 %v16379_v36, %v29753_v38  ;;  %18860 = vrot.lane.b32.xlu1 %v27637_v55, %s22937_s16  ;;  %19532 = vrot.lane.b32.xlu0 %v27536_v31, %s22939_s22  ;;  %v29758_v5 = vld [vmem:[#allocation72_spill] sm:$0xff] }
 0x76d   :  { %22681 = vmatmul.mubr.msk.f32.vlgmr.msra.gmra.mxu0 %vm1610_vm11, %v27708_v10 }
 0x76e   :  { %v16713_v23 = vpop.permute.xlu0 %16712  ;;  %22682 = vmatprep.subr.msk.mxu1 %vm1614_vm10, %v16386_v32  ;;  %v16368_v16 = vpop.permute.xlu1 %16367  ;;  %16626 = vmatprep.mubr.f32.mxu0 %v29737_v6  ;;  %v29759_v32 = vld [vmem:[#allocation67_spill] sm:$0xff] }
 0x76f   :  { %v16377_v58 = vsel %vm2998_vm2, %v16368_v16, %v16370_v41  ;;  %v16378_v34 = vsel %vm2998_vm2, %v16366_v33, %v16368_v16  ;;  %22683 = vmatpush1.msk.msra.mxu1 %vm1614_vm10, %v16385_v56 }
 0x770   :  { %v16387_v30 = vmul.f32 %v16378_v34, %v29754_v22  ;;  %v16388_v19 = vmul.f32 %v16377_v58, %v29755_v18  ;;  %18864 = vrot.lane.b32.xlu1 %v27672_v7, %s22937_s16  ;;  %19546 = vrot.lane.b32.xlu0 %v27562_v13, %s22939_s22 }
 0x771   :  { %22684 = vmatmul.mubr.msk.f32.vlgmr.msra.gmra.mxu1 %vm1610_vm11, %v27708_v10 }
 0x772   :  { %v16727_v63 = vpop.permute.xlu0 %16726  ;;  %22685 = vmatprep.subr.msk.mxu0 %vm1614_vm10, %v16388_v19  ;;  %v16372_v12 = vpop.permute.xlu1 %16371  ;;  %16697 = vmatprep.mubr.f32.mxu1 %v29737_v6 }
 0x773   :  { %v16375_v27 = vsel %vm2998_vm2, %v16372_v12, %v16374_v4  ;;  %v16376_v33 = vsel %vm2998_vm2, %v16370_v41, %v16372_v12  ;;  %22686 = vmatpush1.msk.msra.mxu0 %vm1614_vm10, %v16387_v30  ;;  %v16735_v4 = vsel %vm3746_vm3, %v16727_v63, %v16713_v23  ;;  %v29760_v12 = vld [vmem:[#allocation68_spill] sm:$0xff] }
 0x774   :  { %v16389_v14 = vmul.f32 %v16376_v33, %v29756_v57  ;;  %v16390_v47 = vmul.f32 %v16375_v27, %v29757_v46  ;;  %19534 = vrot.lane.b32.xlu1 %v27587_v39, %s22939_s22  ;;  %19538 = vrot.lane.b32.xlu0 %v27589_v60, %s22939_s22  ;;  %v16736_v16 = vmul.f32 %v16735_v4, %v29759_v32  ;;  %v29761_v33 = vld [vmem:[#allocation2_spill] sm:$0xff] }
 0x775   :  { %22687 = vmatmul.mubr.msk.f32.vlgmr.msra.gmra.mxu0 %vm1610_vm11, %v27708_v10 }
 0x776   :  { %v16719_v28 = vpop.permute.xlu0 %16718  ;;  %22688 = vmatprep.subr.msk.mxu1 %vm1614_vm10, %v16390_v47  ;;  %v16715_v41 = vpop.permute.xlu1 %16714  ;;  %16837 = vmatprep.mubr.f32.mxu0 %v29737_v6 }
 0x777   :  { %v16734_v36 = vsel %vm3746_vm3, %v16713_v23, %v16715_v41  ;;  %22689 = vmatpush1.msk.msra.mxu1 %vm1614_vm10, %v16389_v14  ;;  %v27773_v23 = vld [vmem:[%s28857_s6 + $0xc] sm:$0xf] }
 0x778   :  { %v16737_v56 = vmul.f32 %v16734_v36, %v29758_v5  ;;  %19536 = vrot.lane.b32.xlu1 %v27611_v0, %s22939_s22  ;;  %19542 = vrot.lane.b32.xlu0 %v27613_v21, %s22939_s22 }
 0x779   :  { %22690 = vmatmul.mubr.msk.f32.vlgmr.msra.gmra.mxu1 %vm1610_vm11, %v27708_v10 }
 0x77a   :  { %v16723_v58 = vpop.permute.xlu0 %16722  ;;  %22692 = vmatprep.subr.msk.mxu0 %vm1614_vm10, %v16737_v56  ;;  %v16717_v34 = vpop.permute.xlu1 %16716  ;;  %16908 = vmatprep.mubr.f32.mxu1 %v29737_v6  ;;  %v29762_v56 = vld [vmem:[#allocation74_spill] sm:$0xff] }
 0x77b   :  { %v16732_v30 = vsel %vm3746_vm3, %v16717_v34, %v16719_v28  ;;  %v16733_v19 = vsel %vm3746_vm3, %v16715_v41, %v16717_v34  ;;  %22693 = vmatpush1.msk.msra.mxu0 %vm1614_vm10, %v16736_v16  ;;  %v29763_v34 = vld [vmem:[#allocation90_spill] sm:$0xff] }
 0x77c   :  { %v16738_v27 = vmul.f32 %v16733_v19, %v29760_v12  ;;  %v16739_v14 = vmul.f32 %v16732_v30, %v29761_v33  ;;  %19540 = vrot.lane.b32.xlu1 %v27637_v55, %s22939_s22  ;;  %19880 = vrot.lane.b32.xlu0 %v27536_v31, %s22940_s23 }
 0x77d   :  { %22694 = vmatmul.mubr.msk.f32.vlgmr.msra.gmra.mxu0 %vm1610_vm11, %v27773_v23 }
 0x77e   :  { %v17389_v47 = vpop.permute.xlu0 %17388  ;;  %22695 = vmatprep.subr.msk.mxu1 %vm1614_vm10, %v16739_v14  ;;  %v16721_v4 = vpop.permute.xlu1 %16720  ;;  %16979 = vmatprep.mubr.f32.mxu0 %v29737_v6 }
 0x77f   :  { %v16730_v41 = vsel %vm3746_vm3, %v16721_v4, %v16723_v58  ;;  %v16731_v36 = vsel %vm3746_vm3, %v16719_v28, %v16721_v4  ;;  %22696 = vmatpush1.msk.msra.mxu1 %vm1614_vm10, %v16738_v27  ;;  %v29764_v4 = vld [vmem:[#allocation91_spill] sm:$0xff] }
 0x780   :  { %v16740_v16 = vmul.f32 %v16731_v36, %v29762_v56  ;;  %v16741_v30 = vmul.f32 %v16730_v41, %v29763_v34  ;;  %19544 = vrot.lane.b32.xlu1 %v27672_v7, %s22939_s22  ;;  %19894 = vrot.lane.b32.xlu0 %v27562_v13, %s22940_s23  ;;  %v29765_v36 = vld [vmem:[#allocation76_spill] sm:$0xff] }
 0x781   :  { %22697 = vmatmul.mubr.msk.f32.vlgmr.msra.gmra.mxu1 %vm1610_vm11, %v27773_v23 }
 0x782   :  { %v27804_v19 = vpop.permute.xlu0 %17386  ;;  %22698 = vmatprep.subr.msk.mxu0 %vm1614_vm10, %v16741_v30  ;;  %v16725_v28 = vpop.permute.xlu1 %16724  ;;  %17050 = vmatprep.mubr.f32.mxu1 %v29737_v6  ;;  %v29766_v30 = vld [vmem:[#allocation60_spill] sm:$0xff] }
 0x783   :  { %v16728_v27 = vsel %vm3746_vm3, %v16725_v28, %v16727_v63  ;;  %v16729_v14 = vsel %vm3746_vm3, %v16723_v58, %v16725_v28  ;;  %22699 = vmatpush1.msk.msra.mxu0 %vm1614_vm10, %v16740_v16  ;;  %v27829_v16 = vld [vmem:[%s28857_s6 + $0x10] sm:$0xf] }
 0x784   :  { %v16742_v41 = vmul.f32 %v16729_v14, %v29764_v4  ;;  %v16743_v34 = vmul.f32 %v16728_v27, %v29765_v36  ;;  %22700 = vmatmul.mubr.msk.f32.vlgmr.msra.gmra.mxu0 %vm1610_vm11, %v27773_v23  ;;  %22705 = vmatprep.subr.msk.mxu0 %vm1614_vm10, %v27383_v49  ;;  %v29768_v27 = vld [vmem:[#allocation59_spill] sm:$0xff] }
 0x785   :  { %19882 = vrot.lane.b32.xlu1 %v27587_v39, %s22940_s23  ;;  %19886 = vrot.lane.b32.xlu0 %v27589_v60, %s22940_s23 }
 0x786   :  { %22706 = vmatpush1.msk.msra.mxu0 %vm1614_vm10, %v27369_v17  ;;  %v17395_v63 = vpop.permute.xlu0 %17394  ;;  %22701 = vmatprep.subr.msk.mxu1 %vm1614_vm10, %v16743_v34  ;;  %v17391_v58 = vpop.permute.xlu1 %17390  ;;  %v17408_v17 = vsel %vm5128_vm4, %v27804_v19, %v17389_v47 }
 0x787   :  { %22711 = vmatprep.subr.msk.mxu0 %vm1614_vm10, %v27393_v51  ;;  %v17407_v49 = vsel %vm5128_vm4, %v17389_v47, %v17391_v58  ;;  %22702 = vmatpush1.msk.msra.mxu1 %vm1614_vm10, %v16742_v41 }
 0x788   :  { %v17411_v28 = vmul.f32 %v17407_v49, %v29766_v30  ;;  %17158 = vmatprep.mubr.f32.mxu0 %v29737_v6  ;;  %22703 = vmatmul.mubr.msk.f32.vlgmr.msra.gmra.mxu1 %vm1610_vm11, %v27773_v23 }
 0x789   :  { %22707 = vmatmul.mubr.msk.f32.vlgmr.msra.gmra.mxu0 %vm1610_vm11, %v27829_v16  ;;  %22708 = vmatprep.subr.msk.mxu1 %vm1614_vm10, %v27381_v8 }
 0x78a   :  { %22712 = vmatpush1.msk.msra.mxu0 %vm1614_vm10, %v27402_v45  ;;  %19884 = vrot.lane.b32.xlu1 %v27611_v0, %s22940_s23  ;;  %v17399_v51 = vpop.permute.xlu0 %17398  ;;  %v17393_v34 = vpop.permute.xlu1 %17392  ;;  %v29767_v45 = vld [vmem:[#allocation62_spill] sm:$0xff] }
 0x78b   :  { %19890 = vrot.lane.b32.xlu0 %v27613_v21, %s22940_s23  ;;  %22709 = vmatpush1.msk.msra.mxu1 %vm1614_vm10, %v27395_v40  ;;  %v17405_v8 = vsel %vm5128_vm4, %v17393_v34, %v17395_v63  ;;  %v17410_v47 = vmul.f32 %v17408_v17, %v29767_v45  ;;  %v17406_v41 = vsel %vm5128_vm4, %v17391_v58, %v17393_v34  ;;  %v29769_v58 = vld [vmem:[#allocation66_spill] sm:$0xff]  ;;  %v29770_v34 = vld [vmem:[#allocation61_spill] sm:$0xff] }
 0x78c   :  { %22714 = vmatprep.subr.msk.mxu1 %vm1614_vm10, %v27367_v61  ;;  %22718 = vmatprep.subr.msk.mxu0 %vm1614_vm10, %v17411_v28  ;;  %v17413_v14 = vmul.f32 %v17405_v8, %v29768_v27  ;;  %v17412_v8 = vmul.f32 %v17406_v41, %v29770_v34  ;;  %v27892_v27 = vld [vmem:[%s28857_s6 + $0x14] sm:$0xf] }
 0x78d   :  { %17229 = vmatprep.mubr.f32.mxu1 %v29737_v6  ;;  %17300 = vmatprep.mubr.f32.mxu0 %v29737_v6  ;;  %29772 = vst [vmem:[#allocation102_spill] sm:$0xff] %v27892_v27 }
 0x78e   :  { %22710 = vmatmul.mubr.msk.f32.vlgmr.msra.gmra.mxu1 %vm1610_vm11, %v27829_v16  ;;  %22713 = vmatmul.mubr.msk.f32.vlgmr.msra.gmra.mxu0 %vm1610_vm11, %v27829_v16  ;;  %v17742_v61 = vpop.permute.xlu0 %17741  ;;  %v17397_v40 = vpop.permute.xlu1 %17396 }
 0x78f   :  { %22715 = vmatpush1.msk.msra.mxu1 %vm1614_vm10, %v27415_v42  ;;  %22719 = vmatpush1.msk.msra.mxu0 %vm1614_vm10, %v17410_v47  ;;  %v17403_v49 = vsel %vm5128_vm4, %v17397_v40, %v17399_v51  ;;  %v17404_v28 = vsel %vm5128_vm4, %v17395_v63, %v17397_v40  ;;  %v29771_v42 = vld [vmem:[#allocation64_spill] sm:$0xff] }
 0x790   :  { %19888 = vrot.lane.b32.xlu1 %v27637_v55, %s22940_s23  ;;  %20546 = vrot.lane.b32.xlu0 %v27587_v39, %s22941_s26  ;;  %v17415_v17 = vmul.f32 %v17403_v49, %v29769_v58  ;;  %v17414_v47 = vmul.f32 %v17404_v28, %v29771_v42  ;;  %v29773_v49 = vld [vmem:[#allocation63_spill] sm:$0xff]  ;;  %v29774_v58 = vld [vmem:[#allocation65_spill] sm:$0xff] }
 0x791   :  { %22721 = vmatprep.subr.msk.mxu1 %vm1614_vm10, %v17413_v14  ;;  %17371 = vmatprep.mubr.f32.mxu1 %v29737_v6 }
 0x792   :  { %22716 = vmatmul.mubr.msk.f32.vlgmr.msra.gmra.mxu1 %vm1610_vm11, %v27829_v16  ;;  %v17740_v63 = vpop.permute.xlu0 %17739  ;;  %17511 = vmatprep.mubr.f32.mxu0 %v29737_v6  ;;  %v17401_v40 = vpop.permute.xlu1 %17400 }
 0x793   :  { %22722 = vmatpush1.msk.msra.mxu1 %vm1614_vm10, %v17412_v8  ;;  %22724 = vmatprep.subr.msk.mxu0 %vm1614_vm10, %v17415_v17  ;;  %v17402_v14 = vsel %vm5128_vm4, %v17399_v51, %v17401_v40  ;;  %v17409_v41 = vsel %vm5128_vm4, %v17401_v40, %v27804_v19  ;;  %v17761_v51 = vsel %vm5876_vm1, %v17740_v63, %v17742_v61  ;;  %v29775_v40 = vld [vmem:[#allocation42_spill] sm:$0xff] }
 0x794   :  { %19892 = vrot.lane.b32.xlu1 %v27672_v7, %s22940_s23  ;;  %20544 = vrot.lane.b32.xlu0 %v27536_v31, %s22941_s26  ;;  %v17417_v28 = vmul.f32 %v17409_v41, %v29773_v49  ;;  %v17416_v42 = vmul.f32 %v17402_v14, %v29774_v58  ;;  %v29776_v14 = vld [vmem:[#allocation29_spill] sm:$0xff] }
 0x795   :  { %22720 = vmatmul.mubr.msk.f32.vlgmr.msra.gmra.mxu0 %vm1610_vm11, %v27892_v27  ;;  %17582 = vmatprep.mubr.f32.mxu1 %v29737_v6  ;;  %v17763_v41 = vmul.f32 %v17761_v51, %v29776_v14  ;;  %v29778_v51 = vld [vmem:[#allocation28_spill] sm:$0xff] }
 0x796   :  { %22725 = vmatpush1.msk.msra.mxu0 %vm1614_vm10, %v17414_v47  ;;  %v17748_v19 = vpop.permute.xlu0 %17747  ;;  %22727 = vmatprep.subr.msk.mxu1 %vm1614_vm10, %v17417_v28  ;;  %v17744_v17 = vpop.permute.xlu1 %17743 }
 0x797   :  { %v17760_v8 = vsel %vm5876_vm1, %v17742_v61, %v17744_v17  ;;  %22723 = vmatmul.mubr.msk.f32.vlgmr.msra.gmra.mxu1 %vm1610_vm11, %v27892_v27  ;;  %17653 = vmatprep.mubr.f32.mxu0 %v29737_v6 }
 0x798   :  { %20548 = vrot.lane.b32.xlu1 %v27611_v0, %s22941_s26  ;;  %20552 = vrot.lane.b32.xlu0 %v27637_v55, %s22941_s26  ;;  %v17764_v47 = vmul.f32 %v17760_v8, %v29775_v40 }
 0x799   :  { %22728 = vmatpush1.msk.msra.mxu1 %vm1614_vm10, %v17416_v42  ;;  %22726 = vmatmul.mubr.msk.f32.vlgmr.msra.gmra.mxu0 %vm1610_vm11, %v27892_v27  ;;  %v27940_v42 = vld [vmem:[%s28857_s6 + $0x18] sm:$0xf] }
 0x79a   :  { %v17752_v61 = vpop.permute.xlu0 %17751  ;;  %22731 = vmatprep.subr.msk.mxu0 %vm1614_vm10, %v17764_v47  ;;  %v17746_v28 = vpop.permute.xlu1 %17745  ;;  %17724 = vmatprep.mubr.f32.mxu1 %v29737_v6  ;;  %29777 = vst [vmem:[#allocation106_spill] sm:$0xff] %v27940_v42  ;;  %v29779_v47 = vld [vmem:[#allocation37_spill] sm:$0xff] }
 0x79b   :  { %v17758_v49 = vsel %vm5876_vm1, %v17746_v28, %v17748_v19  ;;  %v17759_v58 = vsel %vm5876_vm1, %v17744_v17, %v17746_v28  ;;  %22732 = vmatpush1.msk.msra.mxu0 %vm1614_vm10, %v17763_v41  ;;  %22729 = vmatmul.mubr.msk.f32.vlgmr.msra.gmra.mxu1 %vm1610_vm11, %v27892_v27 }
 0x79c   :  { %20550 = vrot.lane.b32.xlu1 %v27589_v60, %s22941_s26  ;;  %20556 = vrot.lane.b32.xlu0 %v27672_v7, %s22941_s26  ;;  %v17765_v8 = vmul.f32 %v17759_v58, %v29778_v51  ;;  %v17766_v17 = vmul.f32 %v17758_v49, %v29779_v47  ;;  %v29780_v58 = vld [vmem:[#allocation58_spill] sm:$0xff] }
 0x79d   :  { %17864 = vmatprep.mubr.f32.mxu0 %v29737_v6  ;;  %17935 = vmatprep.mubr.f32.mxu1 %v29737_v6 }
 0x79e   :  { %v18095_v41 = vpop.permute.xlu0 %18094  ;;  %22734 = vmatprep.subr.msk.mxu1 %vm1614_vm10, %v17766_v17  ;;  %v17750_v28 = vpop.permute.xlu1 %17749  ;;  %22733 = vmatmul.mubr.msk.f32.vlgmr.msra.gmra.mxu0 %vm1610_vm11, %v27940_v42  ;;  %v29781_v17 = vld [vmem:[#allocation52_spill] sm:$0xff] }
 0x79f   :  { %v17756_v14 = vsel %vm5876_vm1, %v17750_v28, %v17752_v61  ;;  %v17757_v40 = vsel %vm5876_vm1, %v17748_v19, %v17750_v28  ;;  %22735 = vmatpush1.msk.msra.mxu1 %vm1614_vm10, %v17765_v8  ;;  %18006 = vmatprep.mubr.f32.mxu0 %v29737_v6 }
 0x7a0   :  { %20554 = vrot.lane.b32.xlu1 %v27613_v21, %s22941_s26  ;;  %20894 = vrot.lane.b32.xlu0 %v27587_v39, %s22942_s27  ;;  %v17767_v49 = vmul.f32 %v17757_v40, %v29780_v58  ;;  %v17768_v47 = vmul.f32 %v17756_v14, %v29781_v17  ;;  %v29782_v40 = vld [vmem:[#allocation47_spill] sm:$0xff] }
 0x7a1   :  { %22736 = vmatmul.mubr.msk.f32.vlgmr.msra.gmra.mxu1 %vm1610_vm11, %v27940_v42 }
 0x7a2   :  { %v18093_v51 = vpop.permute.xlu0 %18092  ;;  %22737 = vmatprep.subr.msk.mxu0 %vm1614_vm10, %v17768_v47  ;;  %v17754_v19 = vpop.permute.xlu1 %17753  ;;  %18077 = vmatprep.mubr.f32.mxu1 %v29737_v6  ;;  %v29783_v47 = vld [vmem:[#allocation57_spill] sm:$0xff] }
 0x7a3   :  { %v17755_v8 = vsel %vm5876_vm1, %v17752_v61, %v17754_v19  ;;  %v17762_v28 = vsel %vm5876_vm1, %v17754_v19, %v17740_v63  ;;  %22738 = vmatpush1.msk.msra.mxu0 %vm1614_vm10, %v17767_v49  ;;  %v18114_v61 = vsel %vm6624_vm6, %v18093_v51, %v18095_v41  ;;  %v29784_v19 = vld [vmem:[#allocation73_spill] sm:$0xff] }
 0x7a4   :  { %20558 = vrot.lane.b32.xlu1 %v27562_v13, %s22941_s26  ;;  %20892 = vrot.lane.b32.xlu0 %v27536_v31, %s22942_s27  ;;  %v17769_v14 = vmul.f32 %v17755_v8, %v29782_v40  ;;  %v17770_v17 = vmul.f32 %v17762_v28, %v29783_v47  ;;  %v29785_v28 = vld [vmem:[#allocation71_spill] sm:$0xff] }
 0x7a5   :  { %22739 = vmatmul.mubr.msk.f32.vlgmr.msra.gmra.mxu0 %vm1610_vm11, %v27940_v42  ;;  %v18116_v47 = vmul.f32 %v18114_v61, %v29785_v28  ;;  %v29788_v28 = vld [vmem:[#allocation75_spill] sm:$0xff] }
 0x7a6   :  { %v18101_v58 = vpop.permute.xlu0 %18100  ;;  %22740 = vmatprep.subr.msk.mxu1 %vm1614_vm10, %v17770_v17  ;;  %v18097_v63 = vpop.permute.xlu1 %18096  ;;  %18217 = vmatprep.mubr.f32.mxu0 %v29737_v6 }
 0x7a7   :  { %v18113_v49 = vsel %vm6624_vm6, %v18095_v41, %v18097_v63  ;;  %22741 = vmatpush1.msk.msra.mxu1 %vm1614_vm10, %v17769_v14  ;;  %v28001_v41 = vld [vmem:[%s28857_s6 + $0x1c] sm:$0xf] }
 0x7a8   :  { %20896 = vrot.lane.b32.xlu1 %v27611_v0, %s22942_s27  ;;  %20900 = vrot.lane.b32.xlu0 %v27637_v55, %s22942_s27  ;;  %v18117_v8 = vmul.f32 %v18113_v49, %v29784_v19  ;;  %29786 = vst [vmem:[#allocation103_spill] sm:$0xff] %v28001_v41  ;;  %v29787_v49 = vld [vmem:[#allocation69_spill] sm:$0xff] }
 0x7a9   :  { %22742 = vmatmul.mubr.msk.f32.vlgmr.msra.gmra.mxu1 %vm1610_vm11, %v27940_v42 }
 0x7aa   :  { %v18105_v17 = vpop.permute.xlu0 %18104  ;;  %22744 = vmatprep.subr.msk.mxu0 %vm1614_vm10, %v18117_v8  ;;  %v18099_v40 = vpop.permute.xlu1 %18098  ;;  %18288 = vmatprep.mubr.f32.mxu1 %v29737_v6 }
 0x7ab   :  { %v18111_v14 = vsel %vm6624_vm6, %v18099_v40, %v18101_v58  ;;  %v18112_v61 = vsel %vm6624_vm6, %v18097_v63, %v18099_v40  ;;  %22745 = vmatpush1.msk.msra.mxu0 %vm1614_vm10, %v18116_v47  ;;  %v29789_v63 = vld [vmem:[#allocation5_spill] sm:$0xff] }
 0x7ac   :  { %20898 = vrot.lane.b32.xlu1 %v27589_v60, %s22942_s27  ;;  %20904 = vrot.lane.b32.xlu0 %v27672_v7, %s22942_s27  ;;  %v18118_v8 = vmul.f32 %v18112_v61, %v29787_v49  ;;  %v18119_v19 = vmul.f32 %v18111_v14, %v29788_v28 }
 0x7ad   :  { %22746 = vmatmul.mubr.msk.f32.vlgmr.msra.gmra.mxu0 %vm1610_vm11, %v28001_v41 }
 0x7ae   :  { %v18448_v42 = vpop.permute.xlu0 %18447  ;;  %22747 = vmatprep.subr.msk.mxu1 %vm1614_vm10, %v18119_v19  ;;  %v18103_v27 = vpop.permute.xlu1 %18102  ;;  %18359 = vmatprep.mubr.f32.mxu0 %v29737_v6  ;;  %v29790_v19 = vld [vmem:[#allocation3_spill] sm:$0xff] }
 0x7af   :  { %v18109_v40 = vsel %vm6624_vm6, %v18103_v27, %v18105_v17  ;;  %v18110_v47 = vsel %vm6624_vm6, %v18101_v58, %v18103_v27  ;;  %22748 = vmatpush1.msk.msra.mxu1 %vm1614_vm10, %v18118_v8  ;;  %v29791_v8 = vld [vmem:[#allocation92_spill] sm:$0xff] }
 0x7b0   :  { %20902 = vrot.lane.b32.xlu1 %v27613_v21, %s22942_s27  ;;  %21242 = vrot.lane.b32.xlu0 %v27587_v39, %s22943_s28  ;;  %v18120_v14 = vmul.f32 %v18110_v47, %v29789_v63  ;;  %v18121_v61 = vmul.f32 %v18109_v40, %v29790_v19  ;;  %v29792_v47 = vld [vmem:[#allocation70_spill] sm:$0xff] }
 0x7b1   :  { %22749 = vmatmul.mubr.msk.f32.vlgmr.msra.gmra.mxu1 %vm1610_vm11, %v28001_v41 }
 0x7b2   :  { %v18446_v28 = vpop.permute.xlu0 %18445  ;;  %22750 = vmatprep.subr.msk.mxu0 %vm1614_vm10, %v18121_v61  ;;  %v18107_v49 = vpop.permute.xlu1 %18106  ;;  %18430 = vmatprep.mubr.f32.mxu1 %v29737_v6 }
 0x7b3   :  { %v18108_v27 = vsel %vm6624_vm6, %v18105_v17, %v18107_v49  ;;  %v18115_v58 = vsel %vm6624_vm6, %v18107_v49, %v18093_v51  ;;  %22751 = vmatpush1.msk.msra.mxu0 %vm1614_vm10, %v18120_v14  ;;  %v18467_v17 = vsel %vm7372_vm7, %v18446_v28, %v18448_v42  ;;  %v29793_v14 = vld [vmem:[#allocation93_spill] sm:$0xff] }
 0x7b4   :  { %20906 = vrot.lane.b32.xlu1 %v27562_v13, %s22942_s27  ;;  %21240 = vrot.lane.b32.xlu0 %v27536_v31, %s22943_s28  ;;  %v18122_v40 = vmul.f32 %v18108_v27, %v29791_v8  ;;  %v18123_v61 = vmul.f32 %v18115_v58, %v29792_v47  ;;  %v29794_v58 = vld [vmem:[#allocation95_spill] sm:$0xff] }
 0x7b5   :  { %22752 = vmatmul.mubr.msk.f32.vlgmr.msra.gmra.mxu0 %vm1610_vm11, %v28001_v41  ;;  %v18469_v47 = vmul.f32 %v18467_v17, %v29794_v58  ;;  %v29796_v58 = vld [vmem:[#allocation6_spill] sm:$0xff] }
 0x7b6   :  { %v18454_v19 = vpop.permute.xlu0 %18453  ;;  %22753 = vmatprep.subr.msk.mxu1 %vm1614_vm10, %v18123_v61  ;;  %v18450_v51 = vpop.permute.xlu1 %18449  ;;  %18570 = vmatprep.mubr.f32.mxu0 %v29737_v6 }
 0x7b7   :  { %v18466_v49 = vsel %vm7372_vm7, %v18448_v42, %v18450_v51  ;;  %22754 = vmatpush1.msk.msra.mxu1 %vm1614_vm10, %v18122_v40  ;;  %v28066_v42 = vld [vmem:[%s28857_s6 + $0x20] sm:$0xf] }
 0x7b8   :  { %21244 = vrot.lane.b32.xlu1 %v27611_v0, %s22943_s28  ;;  %21248 = vrot.lane.b32.xlu0 %v27637_v55, %s22943_s28  ;;  %v18470_v27 = vmul.f32 %v18466_v49, %v29793_v14  ;;  %v29795_v49 = vld [vmem:[#allocation94_spill] sm:$0xff] }
 0x7b9   :  { %22755 = vmatmul.mubr.msk.f32.vlgmr.msra.gmra.mxu1 %vm1610_vm11, %v28001_v41 }
 0x7ba   :  { %v18458_v61 = vpop.permute.xlu0 %18457  ;;  %22757 = vmatprep.subr.msk.mxu0 %vm1614_vm10, %v18470_v27  ;;  %v18452_v8 = vpop.permute.xlu1 %18451  ;;  %18641 = vmatprep.mubr.f32.mxu1 %v29737_v6 }
 0x7bb   :  { %v18464_v40 = vsel %vm7372_vm7, %v18452_v8, %v18454_v19  ;;  %v18465_v17 = vsel %vm7372_vm7, %v18450_v51, %v18452_v8  ;;  %22758 = vmatpush1.msk.msra.mxu0 %vm1614_vm10, %v18469_v47  ;;  %v29797_v51 = vld [vmem:[#allocation98_spill] sm:$0xff] }
 0x7bc   :  { %21246 = vrot.lane.b32.xlu1 %v27589_v60, %s22943_s28  ;;  %21252 = vrot.lane.b32.xlu0 %v27672_v7, %s22943_s28  ;;  %v18471_v27 = vmul.f32 %v18465_v17, %v29795_v49  ;;  %v18472_v14 = vmul.f32 %v18464_v40, %v29796_v58  ;;  %v29798_v40 = vld [vmem:[#allocation97_spill] sm:$0xff] }
 0x7bd   :  { %22759 = vmatmul.mubr.msk.f32.vlgmr.msra.gmra.mxu0 %vm1610_vm11, %v28066_v42 }
 0x7be   :  { %22760 = vmatprep.subr.msk.mxu1 %vm1614_vm10, %v18472_v14  ;;  %v18456_v63 = vpop.permute.xlu1 %18455  ;;  %v18885_v41 = vpop.permute.xlu0 %18884  ;;  %18712 = vmatprep.mubr.f32.mxu0 %v29737_v6 }
 0x7bf   :  { %v18462_v8 = vsel %vm7372_vm7, %v18456_v63, %v18458_v61  ;;  %v18463_v47 = vsel %vm7372_vm7, %v18454_v19, %v18456_v63  ;;  %22761 = vmatpush1.msk.msra.mxu1 %vm1614_vm10, %v18471_v27  ;;  %v29799_v27 = vld [vmem:[#allocation99_spill] sm:$0xff] }
 0x7c0   :  { %21250 = vrot.lane.b32.xlu1 %v27613_v21, %s22943_s28  ;;  %21590 = vrot.lane.b32.xlu0 %v27587_v39, %s22944_s30  ;;  %v18473_v14 = vmul.f32 %v18463_v47, %v29797_v51  ;;  %v18474_v17 = vmul.f32 %v18462_v8, %v29798_v40  ;;  %v29800_v47 = vld [vmem:[#allocation96_spill] sm:$0xff] }
 0x7c1   :  { %22762 = vmatmul.mubr.msk.f32.vlgmr.msra.gmra.mxu1 %vm1610_vm11, %v28066_v42 }
 0x7c2   :  { %22763 = vmatprep.subr.msk.mxu0 %vm1614_vm10, %v18474_v17  ;;  %v18460_v58 = vpop.permute.xlu1 %18459  ;;  %v28098_v49 = vpop.permute.xlu0 %18898  ;;  %18783 = vmatprep.mubr.f32.mxu1 %v29737_v6 }
 0x7c3   :  { %v18461_v63 = vsel %vm7372_vm7, %v18458_v61, %v18460_v58  ;;  %v18468_v19 = vsel %vm7372_vm7, %v18460_v58, %v18446_v28  ;;  %22764 = vmatpush1.msk.msra.mxu0 %vm1614_vm10, %v18473_v14  ;;  %v18907_v61 = vsel %vm2250_vm0, %v28098_v49, %v18885_v41 }
 0x7c4   :  { %21254 = vrot.lane.b32.xlu1 %v27562_v13, %s22943_s28  ;;  %21588 = vrot.lane.b32.xlu0 %v27536_v31, %s22944_s30  ;;  %v18475_v8 = vmul.f32 %v18461_v63, %v29799_v27  ;;  %v18476_v17 = vmul.f32 %v18468_v19, %v29800_v47  ;;  %v18908_v19 = vmul.f32 %v18907_v61, %v29734_v44  ;;  %v22141_v61 = vld [vmem:[%s28854_s7 + $0x8] sm:$0xf] }
 0x7c5   :  { %22765 = vmatmul.mubr.msk.f32.vlgmr.msra.gmra.mxu0 %vm1610_vm11, %v28066_v42 }
 0x7c6   :  { %22766 = vmatprep.subr.msk.mxu1 %vm1614_vm10, %v18476_v17  ;;  %v18887_v28 = vpop.permute.xlu1 %18886  ;;  %v18891_v58 = vpop.permute.xlu0 %18890  ;;  %19004 = vmatprep.mubr.f32.mxu0 %v29737_v6 }
 0x7c7   :  { %v18906_v14 = vsel %vm2250_vm0, %v18885_v41, %v18887_v28  ;;  %22767 = vmatpush1.msk.msra.mxu1 %vm1614_vm10, %v18475_v8 }
 0x7c8   :  { %21592 = vrot.lane.b32.xlu1 %v27611_v0, %s22944_s30  ;;  %21596 = vrot.lane.b32.xlu0 %v27637_v55, %s22944_s30  ;;  %v18909_v63 = vmul.f32 %v18906_v14, %v29733_v26 }
 0x7c9   :  { %22768 = vmatmul.mubr.msk.f32.vlgmr.msra.gmra.mxu1 %vm1610_vm11, %v28066_v42 }
 0x7ca   :  { %v18889_v17 = vpop.permute.xlu1 %18888  ;;  %22769 = vmatprep.subr.msk.mxu0 %vm1614_vm10, %v18909_v63  ;;  %v18895_v47 = vpop.permute.xlu0 %18894  ;;  %19075 = vmatprep.mubr.f32.mxu1 %v29737_v6 }
 0x7cb   :  { %v18904_v41 = vsel %vm2250_vm0, %v18889_v17, %v18891_v58  ;;  %v18905_v8 = vsel %vm2250_vm0, %v18887_v28, %v18889_v17  ;;  %22770 = vmatpush1.msk.msra.mxu0 %vm1614_vm10, %v18908_v19 }
 0x7cc   :  { %21594 = vrot.lane.b32.xlu1 %v27589_v60, %s22944_s30  ;;  %21600 = vrot.lane.b32.xlu0 %v27672_v7, %s22944_s30  ;;  %v18910_v26 = vmul.f32 %v18905_v8, %v29735_v43  ;;  %v18911_v44 = vmul.f32 %v18904_v41, %v29736_v52 }
 0x7cd   :  { %22771 = vmatmul.mubr.msk.f32.vlgmr.msra.gmra.mxu0 %vm1610_vm11, %v27542_v15 }
 0x7ce   :  { %v18893_v28 = vpop.permute.xlu1 %18892  ;;  %22772 = vmatprep.subr.msk.mxu1 %vm1614_vm10, %v18911_v44  ;;  %v18855_v14 = vpop.permute.xlu0 %18854  ;;  %19146 = vmatprep.mubr.f32.mxu0 %v29737_v6 }
 0x7cf   :  { %v18902_v63 = vsel %vm2250_vm0, %v18893_v28, %v18895_v47  ;;  %v18903_v43 = vsel %vm2250_vm0, %v18891_v58, %v18893_v28  ;;  %22773 = vmatpush1.msk.msra.mxu1 %vm1614_vm10, %v18910_v26 }
 0x7d0   :  { %21598 = vrot.lane.b32.xlu1 %v27613_v21, %s22944_s30  ;;  %18800 = vperm.xlu0 %22891, %v22141_v61   ;;  %v18912_v52 = vmul.f32 %v18903_v43, %v29738_v62  ;;  %v18913_v19 = vmul.f32 %v18902_v63, %v29739_v1 }
 0x7d1   :  { %22774 = vmatmul.mubr.msk.f32.vlgmr.msra.gmra.mxu1 %vm1610_vm11, %v27542_v15 }
 0x7d2   :  { %v18853_v17 = vpop.permute.xlu1 %18852  ;;  %22775 = vmatprep.subr.msk.mxu0 %vm1614_vm10, %v18913_v19  ;;  %v18867_v41 = vpop.permute.xlu0 %18866  ;;  %19217 = vmatprep.mubr.f32.mxu1 %v29737_v6 }
 0x7d3   :  { %v18874_v58 = vsel %vm1506_vm9, %v18853_v17, %v18855_v14  ;;  %v18875_v8 = vsel %vm1506_vm9, %v18867_v41, %v18853_v17  ;;  %22776 = vmatpush1.msk.msra.mxu0 %vm1614_vm10, %v18912_v52 }
 0x7d4   :  { %21602 = vrot.lane.b32.xlu1 %v27562_v13, %s22944_s30  ;;  %v18877_v62 = vmul.f32 %v18874_v58, %v29741_v2  ;;  %v18876_v1 = vmul.f32 %v18875_v8, %v29740_v48  ;;  %22777 = vmatmul.mubr.msk.f32.vlgmr.msra.gmra.mxu0 %vm1610_vm11, %v27542_v15 }
 0x7d5   :  { %19312 = vmatprep.mubr.f32.mxu0 %v29737_v6 }
 0x7d6   :  { %v18897_v26 = vpop.permute.xlu1 %18896  ;;  %22781 = vmatprep.subr.msk.mxu0 %vm1614_vm10, %v18877_v62  ;;  %v18859_v44 = vpop.permute.xlu0 %18858 }
 0x7d7   :  { %v18900_v61 = vsel %vm2250_vm0, %v18897_v26, %v28098_v49  ;;  %v18901_v28 = vsel %vm2250_vm0, %v18895_v47, %v18897_v26  ;;  %22782 = vmatpush1.msk.msra.mxu0 %vm1614_vm10, %v18876_v1 }
 0x7d8   :  { %v18914_v48 = vmul.f32 %v18901_v28, %v29742_v59  ;;  %v18915_v2 = vmul.f32 %v18900_v61, %v29743_v53  ;;  %22783 = vmatmul.mubr.msk.f32.vlgmr.msra.gmra.mxu0 %vm1610_vm11, %v27620_v29 }
 0x7d9   :  { %19454 = vmatprep.mubr.f32.mxu0 %v29737_v6 }
 0x7da   :  { %v18857_v63 = vpop.permute.xlu1 %18856  ;;  %22778 = vmatprep.subr.msk.mxu1 %vm1614_vm10, %v18915_v2  ;;  %v18863_v43 = vpop.permute.xlu0 %18862 }
 0x7db   :  { %v18872_v49 = vsel %vm1506_vm9, %v18857_v63, %v18859_v44  ;;  %v18873_v47 = vsel %vm1506_vm9, %v18855_v14, %v18857_v63  ;;  %22779 = vmatpush1.msk.msra.mxu1 %vm1614_vm10, %v18914_v48 }
 0x7dc   :  { %v18878_v59 = vmul.f32 %v18873_v47, %v29744_v54  ;;  %v18879_v53 = vmul.f32 %v18872_v49, %v29745_v37  ;;  %22780 = vmatmul.mubr.msk.f32.vlgmr.msra.gmra.mxu1 %vm1610_vm11, %v27542_v15 }
 0x7dd   :  { %19383 = vmatprep.mubr.f32.mxu1 %v29737_v6 }
 0x7de   :  { %v18861_v52 = vpop.permute.xlu1 %18860  ;;  %22784 = vmatprep.subr.msk.mxu1 %vm1614_vm10, %v18879_v53  ;;  %v19533_v19 = vpop.permute.xlu0 %19532 }
 0x7df   :  { %v18870_v17 = vsel %vm1506_vm9, %v18861_v52, %v18863_v43  ;;  %v18871_v14 = vsel %vm1506_vm9, %v18859_v44, %v18861_v52  ;;  %22785 = vmatpush1.msk.msra.mxu1 %vm1614_vm10, %v18878_v59 }
 0x7e0   :  { %v18880_v54 = vmul.f32 %v18871_v14, %v29746_v3  ;;  %v18881_v37 = vmul.f32 %v18870_v17, %v29747_v35  ;;  %22786 = vmatmul.mubr.msk.f32.vlgmr.msra.gmra.mxu1 %vm1610_vm11, %v27620_v29 }
 0x7e1   :  { %19525 = vmatprep.mubr.f32.mxu1 %v29737_v6 }
 0x7e2   :  { %v18865_v15 = vpop.permute.xlu1 %18864  ;;  %22787 = vmatprep.subr.msk.mxu0 %vm1614_vm10, %v18881_v37  ;;  %v19547_v58 = vpop.permute.xlu0 %19546 }
 0x7e3   :  { %v18868_v8 = vsel %vm1506_vm9, %v18865_v15, %v18867_v41  ;;  %v18869_v62 = vsel %vm1506_vm9, %v18863_v43, %v18865_v15  ;;  %22788 = vmatpush1.msk.msra.mxu0 %vm1614_vm10, %v18880_v54  ;;  %v19555_v1 = vsel %vm2998_vm2, %v19547_v58, %v19533_v19 }
 0x7e4   :  { %v18882_v3 = vmul.f32 %v18869_v62, %v29748_v25  ;;  %v18883_v35 = vmul.f32 %v18868_v8, %v29749_v24  ;;  %22789 = vmatmul.mubr.msk.f32.vlgmr.msra.gmra.mxu0 %vm1610_vm11, %v27620_v29  ;;  %v19556_v24 = vmul.f32 %v19555_v1, %v29751_v20 }
 0x7e5   :  { %19652 = vmatprep.mubr.f32.mxu0 %v29737_v6 }
 0x7e6   :  { %v19535_v26 = vpop.permute.xlu1 %19534  ;;  %22790 = vmatprep.subr.msk.mxu1 %vm1614_vm10, %v18883_v35  ;;  %v19539_v41 = vpop.permute.xlu0 %19538 }
 0x7e7   :  { %v19554_v44 = vsel %vm2998_vm2, %v19533_v19, %v19535_v26  ;;  %22791 = vmatpush1.msk.msra.mxu1 %vm1614_vm10, %v18882_v3 }
 0x7e8   :  { %v19557_v25 = vmul.f32 %v19554_v44, %v29750_v11  ;;  %22792 = vmatmul.mubr.msk.f32.vlgmr.msra.gmra.mxu1 %vm1610_vm11, %v27620_v29 }
 0x7e9   :  { %19723 = vmatprep.mubr.f32.mxu1 %v29737_v6 }
 0x7ea   :  { %v19537_v61 = vpop.permute.xlu1 %19536  ;;  %22793 = vmatprep.subr.msk.mxu0 %vm1614_vm10, %v19557_v25  ;;  %v19543_v28 = vpop.permute.xlu0 %19542 }
 0x7eb   :  { %v19552_v48 = vsel %vm2998_vm2, %v19537_v61, %v19539_v41  ;;  %v19553_v2 = vsel %vm2998_vm2, %v19535_v26, %v19537_v61  ;;  %22794 = vmatpush1.msk.msra.mxu0 %vm1614_vm10, %v19556_v24 }
 0x7ec   :  { %v19558_v11 = vmul.f32 %v19553_v2, %v29752_v50  ;;  %v19559_v29 = vmul.f32 %v19552_v48, %v29753_v38  ;;  %22795 = vmatmul.mubr.msk.f32.vlgmr.msra.gmra.mxu0 %vm1610_vm11, %v27708_v10  ;;  %v29802_v48 = vld [vmem:[#allocation59_spill] sm:$0xff] }
 0x7ed   :  { %19794 = vmatprep.mubr.f32.mxu0 %v29737_v6 }
 0x7ee   :  { %v19541_v20 = vpop.permute.xlu1 %19540  ;;  %22796 = vmatprep.subr.msk.mxu1 %vm1614_vm10, %v19559_v29  ;;  %v19881_v63 = vpop.permute.xlu0 %19880 }
 0x7ef   :  { %v19550_v43 = vsel %vm2998_vm2, %v19541_v20, %v19543_v28  ;;  %v19551_v49 = vsel %vm2998_vm2, %v19539_v41, %v19541_v20  ;;  %22797 = vmatpush1.msk.msra.mxu1 %vm1614_vm10, %v19558_v11 }
 0x7f0   :  { %v19560_v50 = vmul.f32 %v19551_v49, %v29754_v22  ;;  %v19561_v38 = vmul.f32 %v19550_v43, %v29755_v18  ;;  %22798 = vmatmul.mubr.msk.f32.vlgmr.msra.gmra.mxu1 %vm1610_vm11, %v27708_v10  ;;  %v29804_v43 = vld [vmem:[#allocation66_spill] sm:$0xff] }
 0x7f1   :  { %19865 = vmatprep.mubr.f32.mxu1 %v29737_v6 }
 0x7f2   :  { %v19545_v47 = vpop.permute.xlu1 %19544  ;;  %22799 = vmatprep.subr.msk.mxu0 %vm1614_vm10, %v19561_v38  ;;  %v19895_v59 = vpop.permute.xlu0 %19894 }
 0x7f3   :  { %v19548_v53 = vsel %vm2998_vm2, %v19545_v47, %v19547_v58  ;;  %v19549_v52 = vsel %vm2998_vm2, %v19543_v28, %v19545_v47  ;;  %22800 = vmatpush1.msk.msra.mxu0 %vm1614_vm10, %v19560_v50  ;;  %v19903_v19 = vsel %vm3746_vm3, %v19895_v59, %v19881_v63  ;;  %v29805_v50 = vld [vmem:[#allocation102_spill] sm:$0xff] }
 0x7f4   :  { %v19562_v22 = vmul.f32 %v19549_v52, %v29756_v57  ;;  %v19563_v18 = vmul.f32 %v19548_v53, %v29757_v46  ;;  %22801 = vmatmul.mubr.msk.f32.vlgmr.msra.gmra.mxu0 %vm1610_vm11, %v27708_v10  ;;  %v19904_v46 = vmul.f32 %v19903_v19, %v29759_v32  ;;  %v29806_v52 = vld [vmem:[#allocation65_spill] sm:$0xff] }
 0x7f5   :  { %20000 = vmatprep.mubr.f32.mxu0 %v29737_v6 }
 0x7f6   :  { %22802 = vmatprep.subr.msk.mxu1 %vm1614_vm10, %v19563_v18  ;;  %v29807_v18 = vld [vmem:[#allocation63_spill] sm:$0xff] }
 0x7f7   :  { %v19883_v17 = vpop.permute.xlu1 %19882  ;;  %v19887_v14 = vpop.permute.xlu0 %19886  ;;  %22803 = vmatpush1.msk.msra.mxu1 %vm1614_vm10, %v19562_v22 }
 0x7f8   :  { %v19902_v54 = vsel %vm3746_vm3, %v19881_v63, %v19883_v17  ;;  %22804 = vmatmul.mubr.msk.f32.vlgmr.msra.gmra.mxu1 %vm1610_vm11, %v27708_v10 }
 0x7f9   :  { %v19905_v57 = vmul.f32 %v19902_v54, %v29758_v5  ;;  %20071 = vmatprep.mubr.f32.mxu1 %v29737_v6 }
 0x7fb   :  { %22805 = vmatprep.subr.msk.mxu0 %vm1614_vm10, %v19905_v57 }
 0x7fc   :  { %v19885_v37 = vpop.permute.xlu1 %19884  ;;  %22806 = vmatpush1.msk.msra.mxu0 %vm1614_vm10, %v19904_v46 }
 0x7fd   :  { %v19900_v15 = vsel %vm3746_vm3, %v19885_v37, %v19887_v14  ;;  %v19901_v58 = vsel %vm3746_vm3, %v19883_v17, %v19885_v37  ;;  %v19891_v8 = vpop.permute.xlu0 %19890  ;;  %22807 = vmatmul.mubr.msk.f32.vlgmr.msra.gmra.mxu0 %vm1610_vm11, %v27773_v23 }
 0x7fe   :  { %v19906_v10 = vmul.f32 %v19901_v58, %v29760_v12  ;;  %v19907_v5 = vmul.f32 %v19900_v15, %v29761_v33  ;;  %20142 = vmatprep.mubr.f32.mxu0 %v29737_v6  ;;  %v29801_v33 = vld [vmem:[#allocation90_spill] sm:$0xff] }
 0x7ff   :  { %v29808_v15 = vld [vmem:[#allocation42_spill] sm:$0xff] }
 0x800   :  { %22808 = vmatprep.subr.msk.mxu1 %vm1614_vm10, %v19907_v5 }
 0x801   :  { %22809 = vmatpush1.msk.msra.mxu1 %vm1614_vm10, %v19906_v10 }
 0x802   :  { %v19889_v32 = vpop.permute.xlu1 %19888  ;;  %v20547_v62 = vpop.permute.xlu0 %20546  ;;  %22810 = vmatmul.mubr.msk.f32.vlgmr.msra.gmra.mxu1 %vm1610_vm11, %v27773_v23 }
 0x803   :  { %v19898_v3 = vsel %vm3746_vm3, %v19889_v32, %v19891_v8  ;;  %v19899_v35 = vsel %vm3746_vm3, %v19887_v14, %v19889_v32  ;;  %20213 = vmatprep.mubr.f32.mxu1 %v29737_v6 }
 0x804   :  { %v19908_v12 = vmul.f32 %v19899_v35, %v29762_v56  ;;  %v19909_v1 = vmul.f32 %v19898_v3, %v29801_v33 }
 0x806   :  { %v19893_v26 = vpop.permute.xlu1 %19892  ;;  %22811 = vmatprep.subr.msk.mxu0 %vm1614_vm10, %v19909_v1  ;;  %v20545_v41 = vpop.permute.xlu0 %20544  ;;  %v29810_v1 = vld [vmem:[#allocation28_spill] sm:$0xff] }
 0x807   :  { %v19896_v44 = vsel %vm3746_vm3, %v19893_v26, %v19895_v59  ;;  %v19897_v25 = vsel %vm3746_vm3, %v19891_v8, %v19893_v26  ;;  %22812 = vmatpush1.msk.msra.mxu0 %vm1614_vm10, %v19908_v12  ;;  %v29809_v8 = vld [vmem:[#allocation29_spill] sm:$0xff] }
 0x808   :  { %v19910_v24 = vmul.f32 %v19897_v25, %v29764_v4  ;;  %v19911_v61 = vmul.f32 %v19896_v44, %v29765_v36  ;;  %22813 = vmatmul.mubr.msk.f32.vlgmr.msra.gmra.mxu0 %vm1610_vm11, %v27773_v23  ;;  %22817 = vmatprep.subr.msk.mxu0 %vm1614_vm10, %v27587_v39  ;;  %v29812_v25 = vld [vmem:[#allocation106_spill] sm:$0xff] }
 0x809   :  { %22818 = vmatpush1.msk.msra.mxu0 %vm1614_vm10, %v27536_v31  ;;  %20316 = vmatprep.mubr.f32.mxu0 %v29737_v6  ;;  %v20566_v31 = vsel %vm5128_vm4, %v20545_v41, %v20547_v62 }
 0x80a   :  { %v20549_v56 = vpop.permute.xlu1 %20548  ;;  %22814 = vmatprep.subr.msk.mxu1 %vm1614_vm10, %v19911_v61  ;;  %22823 = vmatprep.subr.msk.mxu0 %vm1614_vm10, %v27613_v21  ;;  %v20553_v4 = vpop.permute.xlu0 %20552 }
 0x80b   :  { %v20565_v36 = vsel %vm5128_vm4, %v20547_v62, %v20549_v56  ;;  %22815 = vmatpush1.msk.msra.mxu1 %vm1614_vm10, %v19910_v24 }
 0x80c   :  { %v20569_v28 = vmul.f32 %v20565_v36, %v29766_v30  ;;  %22816 = vmatmul.mubr.msk.f32.vlgmr.msra.gmra.mxu1 %vm1610_vm11, %v27773_v23  ;;  %22819 = vmatmul.mubr.msk.f32.vlgmr.msra.gmra.mxu0 %vm1610_vm11, %v27829_v16 }
 0x80d   :  { %22820 = vmatprep.subr.msk.mxu1 %vm1614_vm10, %v27589_v60  ;;  %22824 = vmatpush1.msk.msra.mxu0 %vm1614_vm10, %v27637_v55  ;;  %v28329_v39 = vpop.f32.mrf.mxu0  ;;  %v20568_v60 = vmul.f32 %v20566_v31, %v29767_v45  ;;  %v29813_v31 = vld [vmem:[#allocation58_spill] sm:$0xff] }
 0x80e   :  { %22821 = vmatpush1.msk.msra.mxu1 %vm1614_vm10, %v27611_v0  ;;  %v20551_v21 = vpop.permute.xlu1 %20550  ;;  %22829 = vmatprep.subr.msk.mxu0 %vm1614_vm10, %v20569_v28  ;;  %v20557_v23 = vpop.permute.xlu0 %20556 }
 0x80f   :  { %v20563_v30 = vsel %vm5128_vm4, %v20551_v21, %v20553_v4  ;;  %22826 = vmatprep.subr.msk.mxu1 %vm1614_vm10, %v27562_v13  ;;  %20387 = vmatprep.mubr.f32.mxu1 %v29737_v6  ;;  %v20564_v55 = vsel %vm5128_vm4, %v20549_v56, %v20551_v21  ;;  %v28350_v13 = vpop.f32.mrf.mxu0 }
 0x810   :  { %v20571_v2 = vmul.f32 %v20563_v30, %v29802_v48  ;;  %20458 = vmatprep.mubr.f32.mxu0 %v29737_v6  ;;  %22822 = vmatmul.mubr.msk.f32.vlgmr.msra.gmra.mxu1 %vm1610_vm11, %v27829_v16  ;;  %v20570_v11 = vmul.f32 %v20564_v55, %v29770_v34 }
 0x811   :  { %22825 = vmatmul.mubr.msk.f32.vlgmr.msra.gmra.mxu0 %vm1610_vm11, %v27829_v16  ;;  %22827 = vmatpush1.msk.msra.mxu1 %vm1614_vm10, %v27672_v7  ;;  %v29803_v7 = vld [vmem:[#allocation64_spill] sm:$0xff]  ;;  %v28368_v34 = vpop.f32.mrf.mxu1 }
 0x812   :  { %22830 = vmatpush1.msk.msra.mxu0 %vm1614_vm10, %v20568_v60  ;;  %v20555_v0 = vpop.permute.xlu1 %20554  ;;  %22832 = vmatprep.subr.msk.mxu1 %vm1614_vm10, %v20571_v2  ;;  %v20895_v45 = vpop.permute.xlu0 %20894 }
 0x813   :  { %v20561_v29 = vsel %vm5128_vm4, %v20555_v0, %v20557_v23  ;;  %v20562_v20 = vsel %vm5128_vm4, %v20553_v4, %v20555_v0  ;;  %20529 = vmatprep.mubr.f32.mxu1 %v29737_v6  ;;  %20664 = vmatprep.mubr.f32.mxu0 %v29737_v6  ;;  %v28387_v17 = vpop.f32.mrf.mxu1 }
 0x814   :  { %v20572_v63 = vmul.f32 %v20562_v20, %v29803_v7  ;;  %v20573_v49 = vmul.f32 %v20561_v29, %v29804_v43  ;;  %22828 = vmatmul.mubr.msk.f32.vlgmr.msra.gmra.mxu1 %vm1610_vm11, %v27829_v16  ;;  %v29816_v20 = vld [vmem:[#allocation57_spill] sm:$0xff] }
 0x815   :  { %22831 = vmatmul.mubr.msk.f32.vlgmr.msra.gmra.mxu0 %vm1610_vm11, %v29805_v50  ;;  %22833 = vmatpush1.msk.msra.mxu1 %vm1614_vm10, %v20570_v11  ;;  %v28370_v38 = vpop.f32.mrf.mxu0  ;;  %v29815_v11 = vld [vmem:[#allocation47_spill] sm:$0xff] }
 0x816   :  { %v20559_v47 = vpop.permute.xlu1 %20558  ;;  %22835 = vmatprep.subr.msk.mxu0 %vm1614_vm10, %v20573_v49  ;;  %v20893_v59 = vpop.permute.xlu0 %20892  ;;  %20735 = vmatprep.mubr.f32.mxu1 %v29737_v6 }
 0x817   :  { %v20560_v53 = vsel %vm5128_vm4, %v20557_v23, %v20559_v47  ;;  %v20567_v16 = vsel %vm5128_vm4, %v20559_v47, %v20545_v41  ;;  %22836 = vmatpush1.msk.msra.mxu0 %vm1614_vm10, %v20572_v63  ;;  %20806 = vmatprep.mubr.f32.mxu0 %v29737_v6  ;;  %v28389_v14 = vpop.f32.mrf.mxu0  ;;  %v20914_v54 = vsel %vm5876_vm1, %v20893_v59, %v20895_v45  ;;  %v29811_v41 = vld [vmem:[#allocation37_spill] sm:$0xff]  ;;  %v29814_v23 = vld [vmem:[#allocation52_spill] sm:$0xff] }
 0x818   :  { %v20574_v22 = vmul.f32 %v20560_v53, %v29806_v52  ;;  %v20575_v19 = vmul.f32 %v20567_v16, %v29807_v18  ;;  %22834 = vmatmul.mubr.msk.f32.vlgmr.msra.gmra.mxu1 %vm1610_vm11, %v29805_v50  ;;  %v20916_v10 = vmul.f32 %v20914_v54, %v29809_v8  ;;  %v29817_v53 = vld [vmem:[#allocation73_spill] sm:$0xff]  ;;  %v29818_v52 = vld [vmem:[#allocation71_spill] sm:$0xff] }
 0x819   :  { %22837 = vmatmul.mubr.msk.f32.vlgmr.msra.gmra.mxu0 %vm1610_vm11, %v29805_v50  ;;  %20877 = vmatprep.mubr.f32.mxu1 %v29737_v6  ;;  %v28405_v32 = vpop.f32.mrf.mxu0  ;;  %v29820_v8 = vld [vmem:[#allocation75_spill] sm:$0xff] }
 0x81a   :  { %v20897_v57 = vpop.permute.xlu1 %20896  ;;  %22838 = vmatprep.subr.msk.mxu1 %vm1614_vm10, %v20575_v19  ;;  %v20901_v46 = vpop.permute.xlu0 %20900  ;;  %21012 = vmatprep.mubr.f32.mxu0 %v29737_v6 }
 0x81b   :  { %v20913_v37 = vsel %vm5876_vm1, %v20895_v45, %v20897_v57  ;;  %22839 = vmatpush1.msk.msra.mxu1 %vm1614_vm10, %v20574_v22  ;;  %v28420_v24 = vpop.f32.mrf.mxu0 }
 0x81c   :  { %v20917_v58 = vmul.f32 %v20913_v37, %v29808_v15  ;;  %22840 = vmatmul.mubr.msk.f32.vlgmr.msra.gmra.mxu1 %vm1610_vm11, %v29805_v50  ;;  %v29819_v15 = vld [vmem:[#allocation69_spill] sm:$0xff] }
 0x81d   :  { %21083 = vmatprep.mubr.f32.mxu1 %v29737_v6  ;;  %v28403_v5 = vpop.f32.mrf.mxu1 }
 0x81e   :  { %v20899_v62 = vpop.permute.xlu1 %20898  ;;  %22841 = vmatprep.subr.msk.mxu0 %vm1614_vm10, %v20917_v58  ;;  %v20905_v3 = vpop.permute.xlu0 %20904 }
 0x81f   :  { %v20911_v35 = vsel %vm5876_vm1, %v20899_v62, %v20901_v46  ;;  %v20912_v12 = vsel %vm5876_vm1, %v20897_v57, %v20899_v62  ;;  %22842 = vmatpush1.msk.msra.mxu0 %vm1614_vm10, %v20916_v10  ;;  %v28413_v33 = vpop.f32.mrf.mxu1  ;;  %v29821_v62 = vld [vmem:[#allocation103_spill] sm:$0xff] }
 0x820   :  { %v20918_v26 = vmul.f32 %v20912_v12, %v29810_v1  ;;  %v20919_v44 = vmul.f32 %v20911_v35, %v29811_v41  ;;  %22843 = vmatmul.mubr.msk.f32.vlgmr.msra.gmra.mxu0 %vm1610_vm11, %v29812_v25 }
 0x821   :  { %21154 = vmatprep.mubr.f32.mxu0 %v29737_v6  ;;  %v28422_v61 = vpop.f32.mrf.mxu1 }
 0x822   :  { %v20903_v56 = vpop.permute.xlu1 %20902  ;;  %22844 = vmatprep.subr.msk.mxu1 %vm1614_vm10, %v20919_v44  ;;  %v21243_v4 = vpop.permute.xlu0 %21242  ;;  %v29822_v44 = vld [vmem:[#allocation5_spill] sm:$0xff] }
 0x823   :  { %v20909_v36 = vsel %vm5876_vm1, %v20903_v56, %v20905_v3  ;;  %v20910_v28 = vsel %vm5876_vm1, %v20901_v46, %v20903_v56  ;;  %22845 = vmatpush1.msk.msra.mxu1 %vm1614_vm10, %v20918_v26  ;;  %v28437_v55 = vpop.f32.mrf.mxu1  ;;  %v29823_v56 = vld [vmem:[#allocation3_spill] sm:$0xff] }
 0x824   :  { %v20920_v21 = vmul.f32 %v20910_v28, %v29813_v31  ;;  %v20921_v30 = vmul.f32 %v20909_v36, %v29814_v23  ;;  %22846 = vmatmul.mubr.msk.f32.vlgmr.msra.gmra.mxu1 %vm1610_vm11, %v29812_v25 }
 0x825   :  { %21225 = vmatprep.mubr.f32.mxu1 %v29737_v6  ;;  %v28435_v60 = vpop.f32.mrf.mxu0 }
 0x826   :  { %v20907_v48 = vpop.permute.xlu1 %20906  ;;  %22847 = vmatprep.subr.msk.mxu0 %vm1614_vm10, %v20921_v30  ;;  %v21241_v2 = vpop.permute.xlu0 %21240 }
 0x827   :  { %v20908_v0 = vsel %vm5876_vm1, %v20905_v3, %v20907_v48  ;;  %v20915_v45 = vsel %vm5876_vm1, %v20907_v48, %v20893_v59  ;;  %22848 = vmatpush1.msk.msra.mxu0 %vm1614_vm10, %v20920_v21  ;;  %v28450_v63 = vpop.f32.mrf.mxu0  ;;  %v21262_v49 = vsel %vm6624_vm6, %v21241_v2, %v21243_v4  ;;  %v29824_v48 = vld [vmem:[#allocation92_spill] sm:$0xff] }
 0x828   :  { %v20922_v29 = vmul.f32 %v20908_v0, %v29815_v11  ;;  %v20923_v7 = vmul.f32 %v20915_v45, %v29816_v20  ;;  %22849 = vmatmul.mubr.msk.f32.vlgmr.msra.gmra.mxu0 %vm1610_vm11, %v29812_v25  ;;  %v21264_v22 = vmul.f32 %v21262_v49, %v29818_v52  ;;  %v29825_v45 = vld [vmem:[#allocation70_spill] sm:$0xff] }
 0x829   :  { %21360 = vmatprep.mubr.f32.mxu0 %v29737_v6  ;;  %v28452_v43 = vpop.f32.mrf.mxu1 }
 0x82a   :  { %v21245_v50 = vpop.permute.xlu1 %21244  ;;  %22850 = vmatprep.subr.msk.mxu1 %vm1614_vm10, %v20923_v7  ;;  %v21249_v47 = vpop.permute.xlu0 %21248 }
 0x82b   :  { %v21261_v59 = vsel %vm6624_vm6, %v21243_v4, %v21245_v50  ;;  %22851 = vmatpush1.msk.msra.mxu1 %vm1614_vm10, %v20922_v29  ;;  %v28467_v19 = vpop.f32.mrf.mxu1 }
 0x82c   :  { %v21265_v16 = vmul.f32 %v21261_v59, %v29817_v53  ;;  %22852 = vmatmul.mubr.msk.f32.vlgmr.msra.gmra.mxu1 %vm1610_vm11, %v29812_v25  ;;  %v29827_v53 = vld [vmem:[#allocation95_spill] sm:$0xff] }
 0x82d   :  { %21431 = vmatprep.mubr.f32.mxu1 %v29737_v6  ;;  %v28465_v18 = vpop.f32.mrf.mxu0 }
 0x82e   :  { %v21247_v54 = vpop.permute.xlu1 %21246  ;;  %22853 = vmatprep.subr.msk.mxu0 %vm1614_vm10, %v21265_v16  ;;  %v21253_v57 = vpop.permute.xlu0 %21252 }
 0x82f   :  { %v21259_v46 = vsel %vm6624_vm6, %v21247_v54, %v21249_v47  ;;  %v21260_v37 = vsel %vm6624_vm6, %v21245_v50, %v21247_v54  ;;  %22854 = vmatpush1.msk.msra.mxu0 %vm1614_vm10, %v21264_v22  ;;  %v28480_v3 = vpop.f32.mrf.mxu0  ;;  %v29826_v50 = vld [vmem:[#allocation93_spill] sm:$0xff] }
 0x830   :  { %v21266_v58 = vmul.f32 %v21260_v37, %v29819_v15  ;;  %v21267_v10 = vmul.f32 %v21259_v46, %v29820_v8  ;;  %22855 = vmatmul.mubr.msk.f32.vlgmr.msra.gmra.mxu0 %vm1610_vm11, %v29821_v62  ;;  %v29828_v37 = vld [vmem:[#allocation94_spill] sm:$0xff] }
 0x831   :  { %21502 = vmatprep.mubr.f32.mxu0 %v29737_v6  ;;  %v28482_v35 = vpop.f32.mrf.mxu1 }
 0x832   :  { %v21251_v12 = vpop.permute.xlu1 %21250  ;;  %22856 = vmatprep.subr.msk.mxu1 %vm1614_vm10, %v21267_v10  ;;  %v21591_v1 = vpop.permute.xlu0 %21590 }
 0x833   :  { %v21257_v26 = vsel %vm6624_vm6, %v21251_v12, %v21253_v57  ;;  %v21258_v41 = vsel %vm6624_vm6, %v21249_v47, %v21251_v12  ;;  %22857 = vmatpush1.msk.msra.mxu1 %vm1614_vm10, %v21266_v58  ;;  %v28497_v28 = vpop.f32.mrf.mxu1  ;;  %v29829_v58 = vld [vmem:[#allocation6_spill] sm:$0xff] }
 0x834   :  { %v21268_v25 = vmul.f32 %v21258_v41, %v29822_v44  ;;  %v21269_v4 = vmul.f32 %v21257_v26, %v29823_v56  ;;  %22858 = vmatmul.mubr.msk.f32.vlgmr.msra.gmra.mxu1 %vm1610_vm11, %v29821_v62 }
 0x835   :  { %21573 = vmatprep.mubr.f32.mxu1 %v29737_v6  ;;  %v28495_v36 = vpop.f32.mrf.mxu0 }
 0x836   :  { %v21255_v31 = vpop.permute.xlu1 %21254  ;;  %22859 = vmatprep.subr.msk.mxu0 %vm1614_vm10, %v21269_v4  ;;  %v21589_v21 = vpop.permute.xlu0 %21588 }
 0x837   :  { %v21256_v23 = vsel %vm6624_vm6, %v21253_v57, %v21255_v31  ;;  %v21263_v30 = vsel %vm6624_vm6, %v21255_v31, %v21241_v2  ;;  %22860 = vmatpush1.msk.msra.mxu0 %vm1614_vm10, %v21268_v25  ;;  %v28510_v29 = vpop.f32.mrf.mxu0  ;;  %v21610_v7 = vsel %vm7372_vm7, %v21589_v21, %v21591_v1 }
 0x838   :  { %v21270_v0 = vmul.f32 %v21256_v23, %v29824_v48  ;;  %v21271_v11 = vmul.f32 %v21263_v30, %v29825_v45  ;;  %22861 = vmatmul.mubr.msk.f32.vlgmr.msra.gmra.mxu0 %vm1610_vm11, %v29821_v62  ;;  %v21612_v16 = vmul.f32 %v21610_v7, %v29827_v53  ;;  %v29830_v48 = vld [vmem:[#allocation96_spill] sm:$0xff] }
 0x839   :  { %21708 = vmatprep.mubr.f32.mxu0 %v29737_v6  ;;  %v28512_v20 = vpop.f32.mrf.mxu1 }
 0x83a   :  { %v21593_v49 = vpop.permute.xlu1 %21592  ;;  %22862 = vmatprep.subr.msk.mxu1 %vm1614_vm10, %v21271_v11  ;;  %v21597_v59 = vpop.permute.xlu0 %21596 }
 0x83b   :  { %v21609_v2 = vsel %vm7372_vm7, %v21591_v1, %v21593_v49  ;;  %22863 = vmatpush1.msk.msra.mxu1 %vm1614_vm10, %v21270_v0  ;;  %v28527_v22 = vpop.f32.mrf.mxu1 }
 0x83c   :  { %v21613_v47 = vmul.f32 %v21609_v2, %v29826_v50  ;;  %22864 = vmatmul.mubr.msk.f32.vlgmr.msra.gmra.mxu1 %vm1610_vm11, %v29821_v62 }
 0x83d   :  { %21779 = vmatprep.mubr.f32.mxu1 %v29737_v6  ;;  %v28525_v52 = vpop.f32.mrf.mxu0 }
 0x83e   :  { %v21595_v54 = vpop.permute.xlu1 %21594  ;;  %22865 = vmatprep.subr.msk.mxu0 %vm1614_vm10, %v21613_v47  ;;  %v21601_v12 = vpop.permute.xlu0 %21600 }
 0x83f   :  { %v21607_v57 = vsel %vm7372_vm7, %v21595_v54, %v21597_v59  ;;  %v21608_v46 = vsel %vm7372_vm7, %v21593_v49, %v21595_v54  ;;  %22866 = vmatpush1.msk.msra.mxu0 %vm1614_vm10, %v21612_v16  ;;  %v28539_v10 = vpop.f32.mrf.mxu0 }
 0x840   :  { %v21614_v15 = vmul.f32 %v21608_v46, %v29828_v37  ;;  %v21615_v8 = vmul.f32 %v21607_v57, %v29829_v58  ;;  %22867 = vmatmul.mubr.msk.f32.vlgmr.msra.gmra.mxu0 %vm1610_vm11, %v28066_v42 }
 0x841   :  { %21850 = vmatprep.mubr.f32.mxu0 %v29737_v6  ;;  %v28542_v62 = vpop.f32.mrf.mxu1 }
 0x842   :  { %v21599_v1 = vpop.permute.xlu1 %21598  ;;  %22868 = vmatprep.subr.msk.mxu1 %vm1614_vm10, %v21615_v8  ;;  %v16142_v8 = vadd.f32 %v28405_v32, %v28329_v39  ;;  %v16284_v39 = vadd.f32 %v28435_v60, %v28370_v38 }
 0x843   :  { %v21605_v26 = vsel %vm7372_vm7, %v21599_v1, %v21601_v12  ;;  %v21606_v41 = vsel %vm7372_vm7, %v21597_v59, %v21599_v1  ;;  %22869 = vmatpush1.msk.msra.mxu1 %vm1614_vm10, %v21614_v15  ;;  %v16912_v4 = vpop.f32.mrf.mxu1 }
 0x844   :  { %v21616_v44 = vmul.f32 %v21606_v41, %v29797_v51  ;;  %v21617_v25 = vmul.f32 %v21605_v26, %v29798_v40  ;;  %22870 = vmatmul.mubr.msk.f32.vlgmr.msra.gmra.mxu1 %vm1610_vm11, %v28066_v42  ;;  %v28554_v56 = vpop.f32.mrf.mxu0  ;;  %v16213_v41 = vadd.f32 %v28422_v61, %v28368_v34 }
 0x845   :  { %21921 = vmatprep.mubr.f32.mxu1 %v29737_v6 }
 0x846   :  { %v21603_v31 = vpop.permute.xlu1 %21602  ;;  %22871 = vmatprep.subr.msk.mxu0 %vm1614_vm10, %v21617_v25  ;;  %v28558_v23 = vpop.f32.mrf.mxu0  ;;  %v16215_v25 = vadd.f32 %v28437_v55, %v28387_v17  ;;  %v16706_v32 = vadd.f32 %v28482_v35, %v16213_v41  ;;  %v16355_v55 = vadd.f32 %v28452_v43, %v28403_v5  ;;  %v16357_v35 = vadd.f32 %v28467_v19, %v28413_v33 }
 0x847   :  { %v21604_v30 = vsel %vm7372_vm7, %v21601_v12, %v21603_v31  ;;  %v21611_v51 = vsel %vm7372_vm7, %v21603_v31, %v21589_v21  ;;  %22872 = vmatpush1.msk.msra.mxu0 %vm1614_vm10, %v21616_v44  ;;  %v16144_v12 = vadd.f32 %v28420_v24, %v28350_v13  ;;  %v16704_v44 = vadd.f32 %v28465_v18, %v16142_v8 }
 0x848   :  { %v21618_v40 = vmul.f32 %v21604_v30, %v29799_v27  ;;  %v21619_v0 = vmul.f32 %v21611_v51, %v29830_v48  ;;  %22873 = vmatmul.mubr.msk.f32.vlgmr.msra.gmra.mxu0 %vm1610_vm11, %v28066_v42  ;;  %v17052_v6 = vpop.f32.mrf.mxu1  ;;  %v16286_v24 = vadd.f32 %v28450_v63, %v28389_v14  ;;  %v16707_v34 = vadd.f32 %v28497_v28, %v16215_v25 }
 0x849   :  { %v17160_v45 = vpop.f32.mrf.mxu0  ;;  %v16705_v31 = vadd.f32 %v28480_v3, %v16144_v12  ;;  %v17057_v13 = vadd.f32 %v28525_v52, %v16704_v44  ;;  %v16708_v3 = vadd.f32 %v28495_v36, %v16284_v39  ;;  %v17059_v38 = vadd.f32 %v28542_v62, %v16706_v32 }
 0x84a   :  { %22874 = vmatprep.subr.msk.mxu1 %vm1614_vm10, %v21619_v0  ;;  %v28570_v11 = vpop.f32.mrf.mxu1  ;;  %v16709_v52 = vadd.f32 %v28510_v29, %v16286_v24  ;;  %v17060_v14 = vadd.f32 %v16912_v4, %v16707_v34  ;;  %v16711_v43 = vadd.f32 %v28527_v22, %v16357_v35 }
 0x84b   :  { %22875 = vmatpush1.msk.msra.mxu1 %vm1614_vm10, %v21618_v40  ;;  %v17162_v7 = vpop.f32.mrf.mxu0  ;;  %v17058_v61 = vadd.f32 %v28539_v10, %v16705_v31  ;;  %v17378_v60 = vadd.f32 %v17160_v45, %v17057_v13  ;;  %v16710_v10 = vadd.f32 %v28512_v20, %v16355_v55  ;;  %v17061_v48 = vadd.f32 %v28554_v56, %v16708_v3 }
 0x84c   :  { %22876 = vmatmul.mubr.msk.f32.vlgmr.msra.gmra.mxu1 %vm1610_vm11, %v28066_v42  ;;  %v17062_v36 = vadd.f32 %v28558_v23, %v16709_v52  ;;  %v17064_v12 = vadd.f32 %v28570_v11, %v16711_v43 }
 0x84d   :  { %v17379_v63 = vadd.f32 %v17162_v7, %v17058_v61  ;;  %v17063_v19 = vadd.f32 %v17052_v6, %v16710_v10 }
 0x84e   :  { %v17231_v9 = vpop.f32.mrf.mxu1  ;;  %v17302_v21 = vpop.f32.mrf.mxu0 }
 0x84f   :  { %v17380_v0 = vadd.f32 %v17231_v9, %v17059_v38  ;;  %v17382_v29 = vadd.f32 %v17302_v21, %v17061_v48 }
 0x850   :  { %v17233_v27 = vpop.f32.mrf.mxu1  ;;  %v17304_v49 = vpop.f32.mrf.mxu0 }
 0x851   :  { %v17381_v62 = vadd.f32 %v17233_v27, %v17060_v14  ;;  %v17383_v41 = vadd.f32 %v17304_v49, %v17062_v36 }
 0x852   :  { %v17373_v2 = vpop.f32.mrf.mxu1 }
 0x854   :  { %v28575_v50 = vpop.f32.mrf.mxu1 }
 0x855   :  { %v17513_v47 = vpop.f32.mrf.mxu0  ;;  %v17385_v23 = vadd.f32 %v28575_v50, %v17064_v12 }
 0x856   :  { %v17731_v5 = vadd.f32 %v17513_v47, %v17378_v60  ;;  %v17384_v47 = vadd.f32 %v17373_v2, %v17063_v19 }
 0x857   :  { %v17515_v59 = vpop.f32.mrf.mxu0  ;;  %v17584_v53 = vpop.f32.mrf.mxu1 }
 0x858   :  { %v17732_v45 = vadd.f32 %v17515_v59, %v17379_v63  ;;  %v17733_v4 = vadd.f32 %v17584_v53, %v17380_v0 }
 0x859   :  { %v17655_v16 = vpop.f32.mrf.mxu0  ;;  %v17586_v54 = vpop.f32.mrf.mxu1 }
 0x85a   :  { %v17734_v20 = vadd.f32 %v17586_v54, %v17381_v62  ;;  %v17735_v25 = vadd.f32 %v17655_v16, %v17382_v29  ;;  %v28613_v54 = vpop.permute.xlu0 %18800 }
 0x85b   :  { %v17657_v57 = vpop.f32.mrf.mxu0  ;;  %v28577_v46 = vpop.f32.mrf.mxu1 }
 0x85c   :  { %v17736_v27 = vadd.f32 %v17657_v57, %v17383_v41  ;;  %v17737_v53 = vadd.f32 %v28577_v46, %v17384_v47 }
 0x85d   :  { %v28579_v37 = vpop.f32.mrf.mxu1 }
 0x85e   :  { %v17866_v15 = vpop.f32.mrf.mxu0 }
 0x85f   :  { %v18084_v7 = vadd.f32 %v17866_v15, %v17731_v5 }
 0x860   :  { %v17868_v58 = vpop.f32.mrf.mxu0 }
 0x861   :  { %v17937_v42 = vpop.f32.mrf.mxu1  ;;  %v18085_v44 = vadd.f32 %v17868_v58, %v17732_v45  ;;  %v17738_v58 = vadd.f32 %v28579_v37, %v17385_v23 }
 0x862   :  { %v18086_v22 = vadd.f32 %v17937_v42, %v17733_v4 }
 0x863   :  { %v17939_v26 = vpop.f32.mrf.mxu1 }
 0x864   :  { %v18087_v59 = vadd.f32 %v17939_v26, %v17734_v20 }
 0x865   :  { %v18008_v1 = vpop.f32.mrf.mxu0 }
 0x866   :  { %v18088_v15 = vadd.f32 %v18008_v1, %v17735_v25 }
 0x867   :  { %v18010_v30 = vpop.f32.mrf.mxu0 }
 0x868   :  { %v18089_v2 = vadd.f32 %v18010_v30, %v17736_v27 }
 0x869   :  { %v18079_v51 = vpop.f32.mrf.mxu1 }
 0x86a   :  { %v18090_v26 = vadd.f32 %v18079_v51, %v17737_v53 }
 0x86b   :  { %v18081_v17 = vpop.f32.mrf.mxu1 }
 0x86c   :  { %v18091_v1 = vadd.f32 %v18081_v17, %v17738_v58 }
 0x86d   :  { %v18219_v18 = vpop.f32.mrf.mxu0 }
 0x86e   :  { %v18437_v31 = vadd.f32 %v18219_v18, %v18084_v7 }
 0x86f   :  { %v18221_v28 = vpop.f32.mrf.mxu0 }
 0x870   :  { %v18438_v39 = vadd.f32 %v18221_v28, %v18085_v44 }
 0x871   :  { %v18290_v40 = vpop.f32.mrf.mxu1 }
 0x872   :  { %v18439_v11 = vadd.f32 %v18290_v40, %v18086_v22 }
 0x873   :  { %v18292_v33 = vpop.f32.mrf.mxu1 }
 0x874   :  { %v18440_v42 = vadd.f32 %v18292_v33, %v18087_v59 }
 0x875   :  { %v18361_v8 = vpop.f32.mrf.mxu0 }
 0x876   :  { %v18441_v13 = vadd.f32 %v18361_v8, %v18088_v15 }
 0x877   :  { %v18363_v56 = vpop.f32.mrf.mxu0 }
 0x878   :  { %v18442_v34 = vadd.f32 %v18363_v56, %v18089_v2 }
 0x879   :  { %v18432_v9 = vpop.f32.mrf.mxu1 }
 0x87a   :  { %v18443_v38 = vadd.f32 %v18432_v9, %v18090_v26 }
 0x87b   :  { %v18434_v21 = vpop.f32.mrf.mxu1 }
 0x87c   :  { %v18444_v63 = vadd.f32 %v18434_v21, %v18091_v1 }
 0x87d   :  { %v18572_v6 = vpop.f32.mrf.mxu0 }
 0x87e   :  { %v18790_v49 = vadd.f32 %v18572_v6, %v18437_v31 }
 0x87f   :  { %v18574_v16 = vpop.f32.mrf.mxu0 }
 0x880   :  { %v28617_v32 = vadd.f32 %v28613_v54, %v18790_v49  ;;  %v18791_v50 = vadd.f32 %v18574_v16, %v18438_v39 }
 0x881   :  { %v18643_v57 = vpop.f32.mrf.mxu1 }
 0x882   :  { %29831 = vst [vmem:[#allocation107_spill] sm:$0xff] %v28617_v32  ;;  %v28620_v24 = vadd.f32 %v28613_v54, %v18791_v50  ;;  %v18792_v46 = vadd.f32 %v18643_v57, %v18439_v11  ;;  %v18811_v37 = vsel %vm1614_vm10, %v28617_v32, 0.0 }
 0x883   :  { %v18645_v61 = vpop.f32.mrf.mxu1 }
 0x884   :  { %29832 = vst [vmem:[#allocation108_spill] sm:$0xff] %v28620_v24  ;;  %v18812_v30 = vsel %vm1614_vm10, %v28620_v24, 0.0  ;;  %v28627_v18 = vadd.f32 %v28613_v54, %v18792_v46  ;;  %v18793_v55 = vadd.f32 %v18645_v61, %v18440_v42 }
 0x885   :  { %v18813_v3 = vadd.f32 %v18812_v30, %v18811_v37  ;;  %v18714_v51 = vpop.f32.mrf.mxu0 }
 0x886   :  { %29833 = vst [vmem:[#allocation109_spill] sm:$0xff] %v28627_v18  ;;  %v18814_v60 = vsel %vm1614_vm10, %v28627_v18, 0.0  ;;  %v28632_v17 = vadd.f32 %v28613_v54, %v18793_v55  ;;  %v18794_v35 = vadd.f32 %v18714_v51, %v18441_v13 }
 0x887   :  { %v18815_v52 = vadd.f32 %v18814_v60, %v18813_v3  ;;  %v18716_v14 = vpop.f32.mrf.mxu0 }
 0x888   :  { %29834 = vst [vmem:[#allocation110_spill] sm:$0xff] %v28632_v17  ;;  %v18816_v28 = vsel %vm1614_vm10, %v28632_v17, 0.0  ;;  %v28637_v40 = vadd.f32 %v28613_v54, %v18794_v35  ;;  %v18795_v10 = vadd.f32 %v18716_v14, %v18442_v34 }
 0x889   :  { %v18817_v48 = vadd.f32 %v18816_v28, %v18815_v52  ;;  %v18785_v0 = vpop.f32.mrf.mxu1 }
 0x88a   :  { %29835 = vst [vmem:[#allocation111_spill] sm:$0xff] %v28637_v40  ;;  %v18818_v5 = vsel %vm1614_vm10, %v28637_v40, 0.0  ;;  %v28642_v43 = vadd.f32 %v28613_v54, %v18795_v10  ;;  %v18796_v36 = vadd.f32 %v18785_v0, %v18443_v38 }
 0x88b   :  { %v18819_v62 = vadd.f32 %v18818_v5, %v18817_v48  ;;  %v18787_v45 = vpop.f32.mrf.mxu1 }
 0x88c   :  { %29836 = vst [vmem:[#allocation113_spill] sm:$0xff] %v28642_v43  ;;  %v18820_v8 = vsel %vm1614_vm10, %v28642_v43, 0.0  ;;  %v28647_v33 = vadd.f32 %v28613_v54, %v18796_v36  ;;  %v18797_v19 = vadd.f32 %v18787_v45, %v18444_v63 }
 0x88d   :  { %v18821_v29 = vadd.f32 %v18820_v8, %v18819_v62  ;;  %v19006_v44 = vpop.f32.mrf.mxu0 }
 0x88e   :  { %29837 = vst [vmem:[#allocation112_spill] sm:$0xff] %v28647_v33  ;;  %v28650_v4 = vadd.f32 %v28613_v54, %v18797_v19  ;;  %v18822_v7 = vsel %vm1614_vm10, %v28647_v33, 0.0 }
 0x88f   :  { %v18823_v12 = vadd.f32 %v18822_v7, %v18821_v29  ;;  %v19008_v56 = vpop.f32.mrf.mxu0 }
 0x890   :  { %29838 = vst [vmem:[#allocation115_spill] sm:$0xff] %v28650_v4  ;;  %v18824_v41 = vsel %vm1614_vm10, %v28650_v4, 0.0 }
 0x891   :  { %v18825_v20 = vadd.f32 %v18824_v41, %v18823_v12  ;;  %v19077_v9 = vpop.f32.mrf.mxu1 }
 0x893   :  { %18826 = vadd.xlane.f32.xlu1 %v18825_v20  ;;  %v19079_v25 = vpop.f32.mrf.mxu1 }
 0x894   :  { %v19148_v47 = vpop.f32.mrf.mxu0 }
 0x896   :  { %v28656_v22 = vpop.f32.mrf.mxu0 }
 0x898   :  { %v19314_v23 = vpop.f32.mrf.mxu0 }
 0x899   :  { %v19315_v12 = vadd.f32 %v19314_v23, %v19006_v44 }
 0x89a   :  { %v19316_v59 = vpop.f32.mrf.mxu0 }
 0x89b   :  { %v19317_v20 = vadd.f32 %v19316_v59, %v19008_v56 }
 0x89c   :  { %v28658_v31 = vpop.f32.mrf.mxu1 }
 0x89e   :  { %v28660_v27 = vpop.f32.mrf.mxu1 }
 0x8a0   :  { %v19385_v39 = vpop.f32.mrf.mxu1 }
 0x8a1   :  { %v19386_v43 = vadd.f32 %v19385_v39, %v19077_v9 }
 0x8a2   :  { %v19387_v21 = vpop.f32.mrf.mxu1 }
 0x8a3   :  { %v19388_v18 = vadd.f32 %v19387_v21, %v19079_v25 }
 0x8a4   :  { %v19456_v6 = vpop.f32.mrf.mxu0 }
 0x8a5   :  { %v19457_v32 = vadd.f32 %v19456_v6, %v19148_v47 }
 0x8a6   :  { %v19458_v53 = vpop.f32.mrf.mxu0 }
 0x8a7   :  { %v19459_v56 = vadd.f32 %v19458_v53, %v28656_v22 }
 0x8a8   :  { %v19527_v15 = vpop.f32.mrf.mxu1 }
 0x8a9   :  { %v19528_v59 = vadd.f32 %v19527_v15, %v28658_v31 }
 0x8aa   :  { %v28662_v49 = vpop.f32.mrf.mxu1 }
 0x8ac   :  { %v19654_v11 = vpop.f32.mrf.mxu0 }
 0x8ad   :  { %v19872_v40 = vadd.f32 %v19654_v11, %v19315_v12 }
 0x8ae   :  { %v19656_v58 = vpop.f32.mrf.mxu0 }
 0x8af   :  { %v19873_v24 = vadd.f32 %v19656_v58, %v19317_v20 }
 0x8b0   :  { %v19725_v2 = vpop.f32.mrf.mxu1 }
 0x8b2   :  { %v19727_v42 = vpop.f32.mrf.mxu1 }
 0x8b4   :  { %v19796_v16 = vpop.f32.mrf.mxu0 }
 0x8b6   :  { %v28664_v50 = vpop.f32.mrf.mxu0 }
 0x8b8   :  { %v28666_v57 = vpop.f32.mrf.mxu1 }
 0x8ba   :  { %v28668_v13 = vpop.f32.mrf.mxu1 }
 0x8bd   :  { %v20002_v26 = vpop.f32.mrf.mxu0 }
 0x8bf   :  { %v20004_v46 = vpop.f32.mrf.mxu0 }
 0x8c0   :  { %v20221_v44 = vadd.f32 %v20004_v46, %v19873_v24  ;;  %v19877_v24 = vadd.f32 %v28664_v50, %v19459_v56 }
 0x8c2   :  { %v20073_v1 = vpop.f32.mrf.mxu1 }
 0x8c4   :  { %v20075_v61 = vpop.f32.mrf.mxu1 }
 0x8c8   :  { %v20144_v34 = vpop.f32.mrf.mxu0 }
 0x8ca   :  { %v28670_v37 = vpop.f32.mrf.mxu0 }
 0x8cc   :  { %v28672_v30 = vpop.f32.mrf.mxu1  ;;  %v20318_v55 = vpop.f32.mrf.mxu0 }
 0x8ce   :  { %v28674_v3 = vpop.f32.mrf.mxu1  ;;  %v20320_v51 = vpop.f32.mrf.mxu0 }
 0x8cf   :  { %29839 = vst [vmem:[#allocation117_spill] sm:$0xff] %v28674_v3  ;;  %v19875_v3 = vadd.f32 %v19727_v42, %v19388_v18  ;;  %v20537_v11 = vadd.f32 %v20320_v51, %v20221_v44  ;;  %v19878_v18 = vadd.f32 %v28666_v57, %v19528_v59  ;;  %v20225_v42 = vadd.f32 %v28670_v37, %v19877_v24 }
 0x8d0   :  { %v20389_v38 = vpop.f32.mrf.mxu1 }
 0x8d1   :  { %v20460_v60 = vpop.f32.mrf.mxu0  ;;  %v20223_v47 = vadd.f32 %v20075_v61, %v19875_v3 }
 0x8d2   :  { %v20391_v35 = vpop.f32.mrf.mxu1 }
 0x8d3   :  { %v28676_v52 = vpop.f32.mrf.mxu0 }
 0x8d4   :  { %v28678_v14 = vpop.f32.mrf.mxu1 }
 0x8d5   :  { %29840 = vst [vmem:[#allocation116_spill] sm:$0xff] %v28678_v14  ;;  %v20666_v63 = vpop.f32.mrf.mxu0 }
 0x8d6   :  { %v28680_v28 = vpop.f32.mrf.mxu1 }
 0x8d7   :  { %29841 = vst [vmem:[#allocation114_spill] sm:$0xff] %v28680_v28  ;;  %v20668_v10 = vpop.f32.mrf.mxu0  ;;  %v19874_v28 = vadd.f32 %v19725_v2, %v19386_v43 }
 0x8d8   :  { %v20737_v48 = vpop.f32.mrf.mxu1  ;;  %v20885_v58 = vadd.f32 %v20668_v10, %v20537_v11 }
 0x8d9   :  { %v20808_v0 = vpop.f32.mrf.mxu0  ;;  %v20222_v39 = vadd.f32 %v20073_v1, %v19874_v28 }
 0x8da   :  { %v20739_v5 = vpop.f32.mrf.mxu1 }
 0x8db   :  { %v28682_v36 = vpop.f32.mrf.mxu0  ;;  %v20538_v6 = vadd.f32 %v20389_v38, %v20222_v39 }
 0x8dc   :  { %29842 = vst [vmem:[#allocation121_spill] sm:$0xff] %v28682_v36  ;;  %v28684_v62 = vpop.f32.mrf.mxu1 }
 0x8dd   :  { %29843 = vst [vmem:[#allocation119_spill] sm:$0xff] %v28684_v62  ;;  %v20886_v15 = vadd.f32 %v20737_v48, %v20538_v6 }
 0x8de   :  { %v28686_v8 = vpop.f32.mrf.mxu1 }
 0x8df   :  { %29844 = vst [vmem:[#allocation120_spill] sm:$0xff] %v28686_v8  ;;  %v20220_v8 = vadd.f32 %v20002_v26, %v19872_v40  ;;  %v19530_v40 = vadd.f32 %v28662_v49, %v28660_v27  ;;  %v20226_v49 = vadd.f32 %v28672_v30, %v19878_v18 }
 0x8e0   :  { %v21014_v45 = vpop.f32.mrf.mxu0 }
 0x8e1   :  { %v20536_v23 = vadd.f32 %v20318_v55, %v20220_v8  ;;  %v19879_v27 = vadd.f32 %v28668_v13, %v19530_v40 }
 0x8e2   :  { %v21016_v19 = vpop.f32.mrf.mxu0 }
 0x8e3   :  { %v20884_v25 = vadd.f32 %v20666_v63, %v20536_v23  ;;  %v21233_v2 = vadd.f32 %v21016_v19, %v20885_v58  ;;  %v29847_v63 = vld [vmem:[#allocation116_spill] sm:$0xff]  ;;  %v29848_v10 = vld [vmem:[#allocation121_spill] sm:$0xff] }
 0x8e4   :  { %v21085_v29 = vpop.f32.mrf.mxu1  ;;  %v20542_v28 = vadd.f32 %v29847_v63, %v20226_v49 }
 0x8e5   :  { %v21232_v43 = vadd.f32 %v21014_v45, %v20884_v25  ;;  %v21234_v61 = vadd.f32 %v21085_v29, %v20886_v15 }
 0x8e6   :  { %v21087_v41 = vpop.f32.mrf.mxu1  ;;  %v29851_v23 = vld [vmem:[#allocation120_spill] sm:$0xff] }
 0x8e8   :  { %v21156_v7 = vpop.f32.mrf.mxu0 }
 0x8ea   :  { %v28688_v4 = vpop.f32.mrf.mxu0 }
 0x8ec   :  { %v28690_v33 = vpop.f32.mrf.mxu1 }
 0x8ed   :  { %29845 = vst [vmem:[#allocation125_spill] sm:$0xff] %v28690_v33  ;;  %v19876_v33 = vadd.f32 %v19796_v16, %v19457_v32  ;;  %v20539_v32 = vadd.f32 %v20391_v35, %v20223_v47 }
 0x8ee   :  { %v28692_v62 = vpop.f32.mrf.mxu1 }
 0x8ef   :  { %v20224_v22 = vadd.f32 %v20144_v34, %v19876_v33  ;;  %v20887_v1 = vadd.f32 %v20739_v5, %v20539_v32  ;;  %v20541_v33 = vadd.f32 %v28676_v52, %v20225_v42 }
 0x8f0   :  { %v21362_v17 = vpop.f32.mrf.mxu0 }
 0x8f1   :  { %v21580_v16 = vadd.f32 %v21362_v17, %v21232_v43  ;;  %v20540_v26 = vadd.f32 %v20460_v60, %v20224_v22  ;;  %v21235_v51 = vadd.f32 %v21087_v41, %v20887_v1  ;;  %v29846_v60 = vld [vmem:[#allocation117_spill] sm:$0xff]  ;;  %v20889_v48 = vadd.f32 %v29848_v10, %v20541_v33 }
 0x8f2   :  { %v21364_v36 = vpop.f32.mrf.mxu0  ;;  %v20227_v35 = vadd.f32 %v29846_v60, %v19879_v27 }
 0x8f3   :  { %v21581_v55 = vadd.f32 %v21364_v36, %v21233_v2  ;;  %v20888_v50 = vadd.f32 %v20808_v0, %v20540_v26  ;;  %v29849_v36 = vld [vmem:[#allocation114_spill] sm:$0xff]  ;;  %v21237_v19 = vadd.f32 %v28688_v4, %v20889_v48 }
 0x8f4   :  { %v21433_v14 = vpop.f32.mrf.mxu1  ;;  %v20543_v45 = vadd.f32 %v29849_v36, %v20227_v35  ;;  %v29852_v59 = vld [vmem:[#allocation125_spill] sm:$0xff] }
 0x8f5   :  { %v21582_v38 = vadd.f32 %v21433_v14, %v21234_v61  ;;  %v21236_v13 = vadd.f32 %v21156_v7, %v20888_v50  ;;  %v29850_v14 = vld [vmem:[#allocation119_spill] sm:$0xff] }
 0x8f6   :  { %v21435_v21 = vpop.f32.mrf.mxu1  ;;  %v20890_v8 = vadd.f32 %v29850_v14, %v20542_v28  ;;  %v20891_v56 = vadd.f32 %v29851_v23, %v20543_v45 }
 0x8f7   :  { %v21583_v30 = vadd.f32 %v21435_v21, %v21235_v51 }
 0x8f8   :  { %v21504_v9 = vpop.f32.mrf.mxu0  ;;  %v21238_v39 = vadd.f32 %v29852_v59, %v20890_v8  ;;  %v21239_v6 = vadd.f32 %v28692_v62, %v20891_v56  ;;  %v29853_v8 = vld [vmem:[#allocation107_spill] sm:$0xff]  ;;  %v29856_v56 = vld [vmem:[#allocation110_spill] sm:$0xff] }
 0x8f9   :  { %v21584_v29 = vadd.f32 %v21504_v9, %v21236_v13 }
 0x8fa   :  { %v21506_v53 = vpop.f32.mrf.mxu0 }
 0x8fb   :  { %v21585_v21 = vadd.f32 %v21506_v53, %v21237_v19 }
 0x8fc   :  { %v21575_v31 = vpop.f32.mrf.mxu1 }
 0x8fd   :  { %v21586_v40 = vadd.f32 %v21575_v31, %v21238_v39 }
 0x8fe   :  { %v21577_v57 = vpop.f32.mrf.mxu1 }
 0x8ff   :  { %v21587_v15 = vadd.f32 %v21577_v57, %v21239_v6 }
 0x900   :  { %v21710_v46 = vpop.f32.mrf.mxu0 }
 0x901   :  { %v21928_v3 = vadd.f32 %v21710_v46, %v21580_v16 }
 0x902   :  { %v21712_v34 = vpop.f32.mrf.mxu0 }
 0x903   :  { %v28705_v17 = vadd.f32 %v21928_v3, %v28613_v54  ;;  %v21929_v37 = vadd.f32 %v21712_v34, %v21581_v55 }
 0x904   :  { %v21781_v5 = vpop.f32.mrf.mxu1 }
 0x905   :  { %v28711_v52 = vadd.f32 %v21929_v37, %v28613_v54  ;;  %v21930_v0 = vadd.f32 %v21781_v5, %v21582_v38  ;;  %v21944_v41 = vsel %vm1614_vm10, %v28705_v17, 0.0 }
 0x906   :  { %v21783_v12 = vpop.f32.mrf.mxu1 }
 0x907   :  { %v21945_v7 = vsel %vm1614_vm10, %v28711_v52, 0.0  ;;  %v28721_v20 = vadd.f32 %v21930_v0, %v28613_v54  ;;  %v21931_v44 = vadd.f32 %v21783_v12, %v21583_v30 }
 0x908   :  { %v21946_v11 = vadd.f32 %v21945_v7, %v21944_v41  ;;  %v21852_v25 = vpop.f32.mrf.mxu0  ;;  %v29855_v41 = vld [vmem:[#allocation109_spill] sm:$0xff] }
 0x909   :  { %v21947_v4 = vsel %vm1614_vm10, %v28721_v20, 0.0  ;;  %v28728_v9 = vadd.f32 %v21931_v44, %v28613_v54  ;;  %v21932_v47 = vadd.f32 %v21852_v25, %v21584_v29  ;;  %v29854_v29 = vld [vmem:[#allocation108_spill] sm:$0xff] }
 0x90a   :  { %v21948_v58 = vadd.f32 %v21947_v4, %v21946_v11  ;;  %v21854_v43 = vpop.f32.mrf.mxu0 }
 0x90b   :  { %v21949_v24 = vsel %vm1614_vm10, %v28728_v9, 0.0  ;;  %v28734_v18 = vadd.f32 %v21932_v47, %v28613_v54  ;;  %v21933_v22 = vadd.f32 %v21854_v43, %v21585_v21  ;;  %v29857_v47 = vld [vmem:[#allocation111_spill] sm:$0xff] }
 0x90c   :  { %v21950_v53 = vadd.f32 %v21949_v24, %v21948_v58  ;;  %v21923_v32 = vpop.f32.mrf.mxu1 }
 0x90d   :  { %v21951_v2 = vsel %vm1614_vm10, %v28734_v18, 0.0  ;;  %v28739_v16 = vadd.f32 %v21933_v22, %v28613_v54  ;;  %v21934_v62 = vadd.f32 %v21923_v32, %v21586_v40 }
 0x90e   :  { %v21952_v42 = vadd.f32 %v21951_v2, %v21950_v53  ;;  %v21925_v26 = vpop.f32.mrf.mxu1  ;;  %v29858_v53 = vld [vmem:[#allocation113_spill] sm:$0xff] }
 0x90f   :  { %v21953_v31 = vsel %vm1614_vm10, %v28739_v16, 0.0  ;;  %v28744_v46 = vadd.f32 %v21934_v62, %v28613_v54  ;;  %v21935_v1 = vadd.f32 %v21925_v26, %v21587_v15 }
 0x910   :  { %v21954_v61 = vadd.f32 %v21953_v31, %v21952_v42 }
 0x911   :  { %v28747_v55 = vadd.f32 %v21935_v1, %v28613_v54  ;;  %v21955_v3 = vsel %vm1614_vm10, %v28744_v46, 0.0  ;;  %v29859_v1 = vld [vmem:[#allocation112_spill] sm:$0xff] }
 0x912   :  { %v21956_v27 = vadd.f32 %v21955_v3, %v21954_v61 }
 0x913   :  { %v21957_v49 = vsel %vm1614_vm10, %v28747_v55, 0.0 }
 0x914   :  { %v21958_v33 = vadd.f32 %v21957_v49, %v21956_v27 }
 0x916   :  { %21959 = vadd.xlane.f32.xlu0 %v21958_v33 }
 0x91c   :  { %v18827_v50 = vpop.xlane.xlu1 %18826 }
 0x99f   :  { %v21960_v57 = vpop.xlane.xlu0 %21959 }
 0x9a0   :  { %v21961_v34 = vadd.f32 %v21960_v57, %v18827_v50  ;;  %v29860_v57 = vld [vmem:[#allocation115_spill] sm:$0xff] }
 0x9a2   :  { %v28753_v51 = vmul.f32 0.00048828125, %v21961_v34 }
 0x9a4   :  { %v21996_v38 = vsub.f32 %v28705_v17, %v28753_v51  ;;  %v21997_v54 = vsub.f32 %v28711_v52, %v28753_v51  ;;  %v21998_v37 = vsub.f32 %v28721_v20, %v28753_v51  ;;  %v21999_v60 = vsub.f32 %v28728_v9, %v28753_v51 }
 0x9a5   :  { %v22000_v35 = vsub.f32 %v28734_v18, %v28753_v51  ;;  %v22001_v48 = vsub.f32 %v28739_v16, %v28753_v51  ;;  %v22002_v0 = vsub.f32 %v28744_v46, %v28753_v51  ;;  %v21963_v19 = vsub.f32 %v29853_v8, %v28753_v51 }
 0x9a6   :  { %v22004_v63 = vmul.f32 %v21996_v38, %v21996_v38  ;;  %v22005_v28 = vmul.f32 %v21997_v54, %v21997_v54  ;;  %v22006_v10 = vmul.f32 %v21998_v37, %v21998_v37  ;;  %v22007_v13 = vmul.f32 %v21999_v60, %v21999_v60 }
 0x9a7   :  { %v22008_v36 = vmul.f32 %v22000_v35, %v22000_v35  ;;  %v21964_v12 = vsub.f32 %v29854_v29, %v28753_v51  ;;  %v21965_v7 = vsub.f32 %v29855_v41, %v28753_v51  ;;  %v22003_v44 = vsub.f32 %v28747_v55, %v28753_v51 }
 0x9a8   :  { %v22012_v5 = vsel %vm1614_vm10, %v22004_v63, 0.0  ;;  %v22013_v30 = vsel %vm1614_vm10, %v22005_v28, 0.0  ;;  %v22015_v14 = vsel %vm1614_vm10, %v22006_v10, 0.0  ;;  %v21966_v59 = vsub.f32 %v29856_v56, %v28753_v51 }
 0x9a9   :  { %v22014_v45 = vadd.f32 %v22013_v30, %v22012_v5  ;;  %v22009_v39 = vmul.f32 %v22001_v48, %v22001_v48  ;;  %v22017_v11 = vsel %vm1614_vm10, %v22007_v13, 0.0  ;;  %v21971_v25 = vmul.f32 %v21963_v19, %v21963_v19 }
 0x9aa   :  { %v21972_v21 = vmul.f32 %v21964_v12, %v21964_v12  ;;  %v21967_v6 = vsub.f32 %v29857_v47, %v28753_v51  ;;  %v21973_v58 = vmul.f32 %v21965_v7, %v21965_v7  ;;  %v22010_v43 = vmul.f32 %v22002_v0, %v22002_v0 }
 0x9ab   :  { %v22016_v23 = vadd.f32 %v22015_v14, %v22014_v45  ;;  %v22019_v40 = vsel %vm1614_vm10, %v22008_v36, 0.0  ;;  %v21979_v24 = vsel %vm1614_vm10, %v21971_v25, 0.0  ;;  %v21968_v32 = vsub.f32 %v29858_v53, %v28753_v51 }
 0x9ac   :  { %v21974_v15 = vmul.f32 %v21966_v59, %v21966_v59  ;;  %v21980_v2 = vsel %vm1614_vm10, %v21972_v21, 0.0  ;;  %v22011_v62 = vmul.f32 %v22003_v44, %v22003_v44  ;;  %v22021_v42 = vsel %vm1614_vm10, %v22009_v39, 0.0 }
 0x9ad   :  { %v22018_v4 = vadd.f32 %v22017_v11, %v22016_v23  ;;  %v21981_v26 = vadd.f32 %v21980_v2, %v21979_v24  ;;  %v21969_v61 = vsub.f32 %v29859_v1, %v28753_v51  ;;  %v21975_v3 = vmul.f32 %v21967_v6, %v21967_v6  ;;  %v22144_v23 = vld [vmem:[%s28854_s7 + $0x14] sm:$0xf]  ;;  %v22145_v11 = vld [vmem:[%s28854_s7 + $0x18] sm:$0xf] }
 0x9ae   :  { %v21982_v27 = vsel %vm1614_vm10, %v21973_v58, 0.0  ;;  %v22023_v49 = vsel %vm1614_vm10, %v22010_v43, 0.0  ;;  %v21970_v34 = vsub.f32 %v29860_v57, %v28753_v51  ;;  %v21976_v38 = vmul.f32 %v21968_v32, %v21968_v32 }
 0x9af   :  { %v22020_v22 = vadd.f32 %v22019_v40, %v22018_v4  ;;  %v21983_v33 = vadd.f32 %v21982_v27, %v21981_v26  ;;  %v21984_v54 = vsel %vm1614_vm10, %v21974_v15, 0.0  ;;  %v22025_v37 = vsel %vm1614_vm10, %v22011_v62, 0.0 }
 0x9b0   :  { %v21977_v63 = vmul.f32 %v21969_v61, %v21969_v61  ;;  %v21986_v28 = vsel %vm1614_vm10, %v21975_v3, 0.0  ;;  %v21978_v48 = vmul.f32 %v21970_v34, %v21970_v34  ;;  %v21988_v13 = vsel %vm1614_vm10, %v21976_v38, 0.0 }
 0x9b1   :  { %v22022_v31 = vadd.f32 %v22021_v42, %v22020_v22  ;;  %v21985_v60 = vadd.f32 %v21984_v54, %v21983_v33 }
 0x9b2   :  { %v21990_v30 = vsel %vm1614_vm10, %v21977_v63, 0.0  ;;  %v21992_v36 = vsel %vm1614_vm10, %v21978_v48, 0.0 }
 0x9b3   :  { %v22024_v50 = vadd.f32 %v22023_v49, %v22022_v31  ;;  %v21987_v10 = vadd.f32 %v21986_v28, %v21985_v60 }
 0x9b5   :  { %v22026_v35 = vadd.f32 %v22025_v37, %v22024_v50  ;;  %v21989_v5 = vadd.f32 %v21988_v13, %v21987_v10 }
 0x9b7   :  { %22027 = vadd.xlane.f32.xlu1 %v22026_v35  ;;  %v21991_v0 = vadd.f32 %v21990_v30, %v21989_v5 }
 0x9b9   :  { %v21993_v45 = vadd.f32 %v21992_v36, %v21991_v0 }
 0x9bb   :  { %21994 = vadd.xlane.f32.xlu0 %v21993_v45 }
 0xa40   :  { %v22028_v14 = vpop.xlane.xlu1 %22027 }
 0xa44   :  { %v21995_v19 = vpop.xlane.xlu0 %21994 }
 0xa45   :  { %v22029_v12 = vadd.f32 %v22028_v14, %v21995_v19 }
 0xa47   :  { %v22030_v7 = vmul.f32 0.00048828125, %v22029_v12 }
 0xa49   :  { %v22031_v44 = vadd.f32 1e-05, %v22030_v7 }
 0xa4b   :  { %22903 = vrsqrt.f32 %v22031_v44 }
 0xa58   :  { %v22904_v59 = vpop.eup %22903 }
 0xa59   :  { %v22033_v39 = vmul.f32 %v22904_v59, %v22144_v23 }
 0xa5b   :  { %22038 = vperm.xlu0 %22891, %v22033_v39   ;;  %v22034_v25 = vmul.f32 %v22033_v39, %v28753_v51 }
 0xa5d   :  { %v22035_v21 = vsub.f32 %v22145_v11, %v22034_v25 }
 0xa5f   :  { %22051 = vperm.xlu1 %22892, %v22035_v21  }
 0xad6   :  { %v22039_v4 = vpop.permute.xlu0 %22038 }
 0xad7   :  { %v22041_v6 = vmul.f32 %v22039_v4, %v29853_v8  ;;  %v22042_v58 = vmul.f32 %v22039_v4, %v29854_v29  ;;  %v22043_v43 = vmul.f32 %v22039_v4, %v29855_v41  ;;  %v22044_v40 = vmul.f32 %v22039_v4, %v29856_v56 }
 0xad8   :  { %v22045_v24 = vmul.f32 %v22039_v4, %v29857_v47  ;;  %v22046_v22 = vmul.f32 %v22039_v4, %v29858_v53  ;;  %v22047_v32 = vmul.f32 %v22039_v4, %v29859_v1  ;;  %v22048_v15 = vmul.f32 %v22039_v4, %v29860_v57 }
 0xad9   :  { %v22090_v51 = vmul.f32 %v22039_v4, %v28705_v17  ;;  %v22091_v2 = vmul.f32 %v22039_v4, %v28711_v52  ;;  %v22092_v8 = vmul.f32 %v22039_v4, %v28721_v20  ;;  %v22093_v29 = vmul.f32 %v22039_v4, %v28728_v9 }
 0xada   :  { %v22094_v41 = vmul.f32 %v22039_v4, %v28734_v18  ;;  %v22095_v56 = vmul.f32 %v22039_v4, %v28739_v16  ;;  %v22096_v47 = vmul.f32 %v22039_v4, %v28744_v46  ;;  %v22097_v53 = vmul.f32 %v22039_v4, %v28747_v55  ;;  %v22052_v62 = vpop.permute.xlu1 %22051 }
 0xadb   :  { %v22054_v42 = vadd.f32 %v22052_v62, %v22041_v6  ;;  %v22055_v26 = vadd.f32 %v22052_v62, %v22042_v58  ;;  %v22056_v31 = vadd.f32 %v22052_v62, %v22043_v43  ;;  %v22057_v1 = vadd.f32 %v22052_v62, %v22044_v40 }
 0xadc   :  { %v22058_v17 = vadd.f32 %v22052_v62, %v22045_v24  ;;  %v22059_v61 = vadd.f32 %v22052_v62, %v22046_v22  ;;  %v22060_v52 = vadd.f32 %v22052_v62, %v22047_v32  ;;  %v22061_v3 = vadd.f32 %v22052_v62, %v22048_v15 }
 0xadd   :  { %v22062_v20 = vmax.f32 %v22054_v42, 0.0  ;;  %v22063_v27 = vmax.f32 %v22055_v26, 0.0  ;;  %v22064_v9 = vmax.f32 %v22056_v31, 0.0  ;;  %v22065_v49 = vmax.f32 %v22057_v1, 0.0 }
 0xade   :  { %v22066_v18 = vmax.f32 %v22058_v17, 0.0  ;;  %v22067_v33 = vmax.f32 %v22059_v61, 0.0  ;;  %v22068_v16 = vmax.f32 %v22060_v52, 0.0  ;;  %v22069_v50 = vmax.f32 %v22061_v3, 0.0 }
 0xadf   :  { %v22078_v46 = vcombine.low %v22062_v20, %v22063_v27  ;;  %v22079_v57 = vcombine.low %v22064_v9, %v22065_v49  ;;  %v22098_v55 = vadd.f32 %v22090_v51, %v22052_v62  ;;  %v22099_v34 = vadd.f32 %v22091_v2, %v22052_v62 }
 0xae0   :  { %v22080_v38 = vcombine.low %v22066_v18, %v22067_v33  ;;  %v22081_v54 = vcombine.low %v22068_v16, %v22069_v50  ;;  %v22100_v37 = vadd.f32 %v22092_v8, %v22052_v62  ;;  %v22101_v60 = vadd.f32 %v22093_v29, %v22052_v62 }
 0xae1   :  { %22086 = vst [vmem:[%s28858_s8] sm:$0xff] %v22078_v46  ;;  %22087 = vst [vmem:[%s28858_s8 + $0x8] sm:$0xff] %v22079_v57  ;;  %v22102_v35 = vadd.f32 %v22094_v41, %v22052_v62  ;;  %v22103_v63 = vadd.f32 %v22095_v56, %v22052_v62  ;;  %v22104_v28 = vadd.f32 %v22096_v47, %v22052_v62  ;;  %v22106_v48 = vmax.f32 %v22098_v55, 0.0 }
 0xae2   :  { %v22105_v10 = vadd.f32 %v22097_v53, %v22052_v62  ;;  %22088 = vst [vmem:[%s28858_s8 + $0x10] sm:$0xff] %v22080_v38  ;;  %22089 = vst [vmem:[%s28858_s8 + $0x18] sm:$0xff] %v22081_v54  ;;  %v22107_v13 = vmax.f32 %v22099_v34, 0.0  ;;  %v22108_v5 = vmax.f32 %v22100_v37, 0.0  ;;  %v22109_v30 = vmax.f32 %v22101_v60, 0.0 }
 0xae3   :  { %v22110_v0 = vmax.f32 %v22102_v35, 0.0  ;;  %v22111_v36 = vmax.f32 %v22103_v63, 0.0  ;;  %v22112_v45 = vmax.f32 %v22104_v28, 0.0 }
 0xae4   :  { %v22113_v14 = vmax.f32 %v22105_v10, 0.0  ;;  %v22122_v19 = vcombine.low %v22106_v48, %v22107_v13  ;;  %v22123_v12 = vcombine.low %v22108_v5, %v22109_v30 }
 0xae5   :  { %v22124_v7 = vcombine.low %v22110_v0, %v22111_v36 }
 0xae6   :  { %v22125_v44 = vcombine.low %v22112_v45, %v22113_v14  ;;  %22877 = vst [vmem:[%s28858_s8 + $0x20] sm:$0xff] %v22122_v19  ;;  %22878 = vst [vmem:[%s28858_s8 + $0x28] sm:$0xff] %v22123_v12 }
 0xae7   :  { %22879 = vst [vmem:[%s28858_s8 + $0x30] sm:$0xff] %v22124_v7 }
 0xae8   :  { %22880 = vst [vmem:[%s28858_s8 + $0x38] sm:$0xff] %v22125_v44 }

</bundles_post_ra>
